<compile_context>
chip_gen: v6e
topology: v6e:2x2x1
jax: 0.10.0
libtpu: 0.0.40
codegen_flags: <defaults>
</compile_context>

<pallas_src>
import numpy as np
import jax
import jax.numpy as jnp
from jax import lax
from jax.experimental import pallas as pl
from jax.experimental.pallas import tpu as pltpu

C_IN = 3
C_OUT = 3
K = 3  # kernel size


def up_half_kernel(w_ref, b_ref, x_ref, out_ref):
    # w_ref: SMEM (27,) flat weights, layout ((ci*C_OUT + co)*K + kh)*K + kw
    # b_ref: SMEM (C_OUT,)
    # x_ref: VMEM (1, C_IN, H, W)
    # out_ref: VMEM (1, C_OUT, 2H, 2W)  -- final interleaved output, ReLU applied
    H, W = x_ref.shape[2], x_ref.shape[3]
    f32 = jnp.float32

    # 0/1 interleave ("expansion") matrices, built once per grid step (cheap VPU iota).
    # Column interleave: top = y_ee @ ew_e + y_eo @ ew_o  -> (H, 2W)
    rw = lax.broadcasted_iota(jnp.int32, (W, 2 * W), 0)
    cw = lax.broadcasted_iota(jnp.int32, (W, 2 * W), 1)
    ew_e = (cw == 2 * rw).astype(f32)         # ew_e[j, 2j]   = 1
    ew_o = (cw == 2 * rw + 1).astype(f32)     # ew_o[j, 2j+1] = 1
    # Row interleave: plane = eh_e @ top + eh_o @ bot     -> (2H, 2W)
    rh = lax.broadcasted_iota(jnp.int32, (2 * H, H), 0)
    ch = lax.broadcasted_iota(jnp.int32, (2 * H, H), 1)
    eh_e = (rh == 2 * ch).astype(f32)         # eh_e[2i, i]   = 1
    eh_o = (rh == 2 * ch + 1).astype(f32)     # eh_o[2i+1, i] = 1

    zero_col = jnp.zeros((H, 1), f32)
    zero_row = jnp.zeros((1, W), f32)

    def wgt(ci, co, kh, kw):
        return w_ref[((ci * C_OUT + co) * K + kh) * K + kw]

    # accs[co] = [y_ee, y_eo, y_oe, y_oo], each (H, W):
    #   y_ee -> out[2i, 2j], y_eo -> out[2i, 2j+1], y_oe -> out[2i+1, 2j], y_oo -> out[2i+1, 2j+1]
    accs = [None] * C_OUT
    for ci in range(C_IN):
        x00 = x_ref[0, ci]                                      # x[i,   j  ]
        x01 = jnp.concatenate([x00[:, 1:], zero_col], axis=1)   # x[i,   j+1] (0 at j=W-1)
        x10 = jnp.concatenate([x00[1:, :], zero_row], axis=0)   # x[i+1, j  ] (0 at i=H-1)
        x11 = jnp.concatenate([x10[:, 1:], zero_col], axis=1)   # x[i+1, j+1] (0 at border)
        for co in range(C_OUT):
            p_ee = x00 * wgt(ci, co, 1, 1)
            p_eo = x01 * wgt(ci, co, 1, 0) + x00 * wgt(ci, co, 1, 2)
            p_oe = x10 * wgt(ci, co, 0, 1) + x00 * wgt(ci, co, 2, 1)
            p_oo = (x11 * wgt(ci, co, 0, 0) + x10 * wgt(ci, co, 0, 2)
                    + x01 * wgt(ci, co, 2, 0) + x00 * wgt(ci, co, 2, 2))
            if ci == 0:
                accs[co] = [p_ee, p_eo, p_oe, p_oo]
            else:
                a = accs[co]
                accs[co] = [a[0] + p_ee, a[1] + p_eo, a[2] + p_oe, a[3] + p_oo]

    for co in range(C_OUT):
        y_ee, y_eo, y_oe, y_oo = accs[co]
        top = (jnp.dot(y_ee, ew_e, preferred_element_type=f32)
               + jnp.dot(y_eo, ew_o, preferred_element_type=f32))      # even output rows
        bot = (jnp.dot(y_oe, ew_e, preferred_element_type=f32)
               + jnp.dot(y_oo, ew_o, preferred_element_type=f32))      # odd output rows
        plane = (jnp.dot(eh_e, top, preferred_element_type=f32)
                 + jnp.dot(eh_o, bot, preferred_element_type=f32))     # (2H, 2W) interleaved
        out_ref[0, co] = jnp.maximum(plane + b_ref[co], 0.0)


def up_half_forward(x, w, b):
    """x: (N, 3, H, W); w: (3, 3, 3, 3) PyTorch layout [ci, co, kh, kw]; b: (3,)."""
    N, C, H, W = x.shape
    assert C == C_IN
    x = x.astype(jnp.float32)
    w_flat = jnp.asarray(w, jnp.float32).reshape(-1)
    b = jnp.asarray(b, jnp.float32)

    plane_bytes = H * W * 4
    est = (2 * C_IN * plane_bytes             # input block, double-buffered
           + 2 * C_OUT * 4 * plane_bytes      # output block, double-buffered
           + 16 * plane_bytes                 # accumulators + shifted views
           + 2 * (W * 2 * W + 2 * H * H) * 4)  # interleave matrices
    vmem_limit = int(min(60 * 2 ** 20, max(32 * 2 ** 20, 2 * est)))

    return pl.pallas_call(
        up_half_kernel,
        out_shape=jax.ShapeDtypeStruct((N, C_OUT, 2 * H, 2 * W), jnp.float32),
        grid=(N,),
        in_specs=[
            pl.BlockSpec(memory_space=pltpu.SMEM),                      # weights
            pl.BlockSpec(memory_space=pltpu.SMEM),                      # bias
            pl.BlockSpec((1, C_IN, H, W), lambda n: (n, 0, 0, 0)),
        ],
        out_specs=pl.BlockSpec((1, C_OUT, 2 * H, 2 * W), lambda n: (n, 0, 0, 0)),
        compiler_params=pltpu.CompilerParams(
            dimension_semantics=("parallel",),
            vmem_limit_bytes=vmem_limit,
        ),
    )(w_flat, b, x)


def ref_up_half(x, w, b):
    """Vectorized numpy reference of ConvTranspose2d(k=3, s=2, p=1, op=1) + ReLU."""
    x = np.asarray(x, np.float32)
    w = np.asarray(w, np.float32)
    b = np.asarray(b, np.float32)
    N, Cin, H, W = x.shape
    Cout = w.shape[1]
    canvas = np.zeros((N, Cout, 2 * H + 2, 2 * W + 2), np.float32)
    for kh in range(K):
        for kw in range(K):
            contrib = np.einsum("nchw,cd->ndhw", x, w[:, :, kh, kw])
            # output index oh = 2*ih - 1 + kh  ->  canvas index oh + 1 = 2*ih + kh
            canvas[:, :, kh:kh + 2 * H:2, kw:kw + 2 * W:2] += contrib
    out = canvas[:, :, 1:1 + 2 * H, 1:1 + 2 * W] + b[None, :, None, None]
    return np.maximum(out, 0.0)


if __name__ == "__main__":
    key = jax.random.PRNGKey(0)
    kx, kw, kb = jax.random.split(key, 3)

    N, H, W = 2, 64, 64  # 2H = 2W = 128 -> lane-dense output stores
    x = jax.random.normal(kx, (N, C_IN, H, W), dtype=jnp.float32)
    # ConvTranspose2d weight shape in PyTorch: (in_channels, out_channels, kH, kW)
    w = jax.random.normal(kw, (C_IN, C_OUT, K, K), dtype=jnp.float32) * 0.3
    b = jax.random.normal(kb, (C_OUT,), dtype=jnp.float32) * 0.1

    out = jax.block_until_ready(up_half_forward(x, w, b))

    ref = ref_up_half(x, w, b)
    if out.shape != (N, C_OUT, 2 * H, 2 * W):
        raise AssertionError(f"bad output shape {out.shape}")
    # Tolerance leaves headroom for possible reduced-precision MXU passes in the
    # 0/1 interleave matmuls (native f32 passes give ~1e-6 error); structural
    # bugs would produce O(0.1+) errors and still fail this check.
    if not np.allclose(np.asarray(out), ref, rtol=1e-2, atol=1e-3):
        max_err = float(np.max(np.abs(np.asarray(out) - ref)))
        raise AssertionError(f"Pallas result does not match reference (max err {max_err})")

    print("KERNEL_OK")
</pallas_src>

<mosaic_0001>
module attributes {stable_mosaic.version = 11 : i64} {
  func.func @up_half_kernel(%arg0: i32, %arg1: memref<81xf32, #tpu.memory_space<smem>>, %arg2: memref<3xf32, #tpu.memory_space<smem>>, %arg3: memref<1x3x64x64xf32, #tpu.memory_space<vmem>>, %arg4: memref<1x3x128x128xf32, #tpu.memory_space<vmem>>) attributes {dimension_semantics = [#tpu.dimension_semantics<parallel>], iteration_bounds = array<i64: 2>, scalar_prefetch = 0 : i64, scratch_operands = 0 : i64, tpu.core_type = #tpu.core_type<tc>, window_params = [{transform_indices = @transform_0, window_bounds = array<i64: 81>}, {transform_indices = @transform_1, window_bounds = array<i64: 3>}, {transform_indices = @transform_2, window_bounds = array<i64: 1, 3, 64, 64>}, {transform_indices = @transform_3, window_bounds = array<i64: 1, 3, 128, 128>}]} {
    %0 = tpu.iota {dimensions = array<i32: 0>} : vector<64x128xi32>
    %1 = tpu.iota {dimensions = array<i32: 1>} : vector<64x128xi32>
    %c2_i32 = arith.constant 2 : i32
    %2 = vector.broadcast %c2_i32 : i32 to vector<64x128xi32>
    %3 = arith.muli %2, %0 : vector<64x128xi32>
    %4 = arith.cmpi eq, %1, %3 : vector<64x128xi32>
    %5 = arith.extui %4 : vector<64x128xi1> to vector<64x128xi32>
    %6 = arith.sitofp %5 : vector<64x128xi32> to vector<64x128xf32>
    %c2_i32_0 = arith.constant 2 : i32
    %7 = vector.broadcast %c2_i32_0 : i32 to vector<64x128xi32>
    %8 = arith.muli %7, %0 : vector<64x128xi32>
    %c1_i32 = arith.constant 1 : i32
    %9 = vector.broadcast %c1_i32 : i32 to vector<64x128xi32>
    %10 = arith.addi %8, %9 : vector<64x128xi32>
    %11 = arith.cmpi eq, %1, %10 : vector<64x128xi32>
    %12 = arith.extui %11 : vector<64x128xi1> to vector<64x128xi32>
    %13 = arith.sitofp %12 : vector<64x128xi32> to vector<64x128xf32>
    %14 = tpu.iota {dimensions = array<i32: 0>} : vector<128x64xi32>
    %15 = tpu.iota {dimensions = array<i32: 1>} : vector<128x64xi32>
    %c2_i32_1 = arith.constant 2 : i32
    %16 = vector.broadcast %c2_i32_1 : i32 to vector<128x64xi32>
    %17 = arith.muli %16, %15 : vector<128x64xi32>
    %18 = arith.cmpi eq, %14, %17 : vector<128x64xi32>
    %19 = arith.extui %18 : vector<128x64xi1> to vector<128x64xi32>
    %20 = arith.sitofp %19 : vector<128x64xi32> to vector<128x64xf32>
    %c2_i32_2 = arith.constant 2 : i32
    %21 = vector.broadcast %c2_i32_2 : i32 to vector<128x64xi32>
    %22 = arith.muli %21, %15 : vector<128x64xi32>
    %c1_i32_3 = arith.constant 1 : i32
    %23 = vector.broadcast %c1_i32_3 : i32 to vector<128x64xi32>
    %24 = arith.addi %22, %23 : vector<128x64xi32>
    %25 = arith.cmpi eq, %14, %24 : vector<128x64xi32>
    %26 = arith.extui %25 : vector<128x64xi1> to vector<128x64xi32>
    %27 = arith.sitofp %26 : vector<128x64xi32> to vector<128x64xf32>
    %cst = arith.constant 0.000000e+00 : f32
    %28 = vector.broadcast %cst : f32 to vector<64x1xf32>
    %cst_4 = arith.constant 0.000000e+00 : f32
    %29 = vector.broadcast %cst_4 : f32 to vector<1x64xf32>
    %c0 = arith.constant 0 : index
    %c0_5 = arith.constant 0 : index
    %c0_6 = arith.constant 0 : index
    %c0_7 = arith.constant 0 : index
    %30 = vector.load %arg3[%c0, %c0_5, %c0_6, %c0_7] : memref<1x3x64x64xf32, #tpu.memory_space<vmem>>, vector<1x1x64x64xf32>
    %31 = vector.shape_cast %30 : vector<1x1x64x64xf32> to vector<64x64xf32>
    %32 = vector.extract_strided_slice %31 {offsets = [0, 1], sizes = [64, 63], strides = [1, 1]} : vector<64x64xf32> to vector<64x63xf32>
    %33 = tpu.concatenate %32, %28 in 1 : vector<64x63xf32>, vector<64x1xf32> -> vector<64x64xf32>
    %34 = vector.extract_strided_slice %31 {offsets = [1, 0], sizes = [63, 64], strides = [1, 1]} : vector<64x64xf32> to vector<63x64xf32>
    %35 = tpu.concatenate %34, %29 in 0 : vector<63x64xf32>, vector<1x64xf32> -> vector<64x64xf32>
    %36 = vector.extract_strided_slice %35 {offsets = [0, 1], sizes = [64, 63], strides = [1, 1]} : vector<64x64xf32> to vector<64x63xf32>
    %37 = tpu.concatenate %36, %28 in 1 : vector<64x63xf32>, vector<64x1xf32> -> vector<64x64xf32>
    %c4 = arith.constant 4 : index
    %38 = memref.load %arg1[%c4] : memref<81xf32, #tpu.memory_space<smem>>
    %39 = vector.broadcast %38 : f32 to vector<64x64xf32>
    %40 = arith.mulf %31, %39 : vector<64x64xf32>
    %c3 = arith.constant 3 : index
    %41 = memref.load %arg1[%c3] : memref<81xf32, #tpu.memory_space<smem>>
    %42 = vector.broadcast %41 : f32 to vector<64x64xf32>
    %43 = arith.mulf %33, %42 : vector<64x64xf32>
    %c5 = arith.constant 5 : index
    %44 = memref.load %arg1[%c5] : memref<81xf32, #tpu.memory_space<smem>>
    %45 = vector.broadcast %44 : f32 to vector<64x64xf32>
    %46 = arith.mulf %31, %45 : vector<64x64xf32>
    %47 = arith.addf %43, %46 : vector<64x64xf32>
    %c1 = arith.constant 1 : index
    %48 = memref.load %arg1[%c1] : memref<81xf32, #tpu.memory_space<smem>>
    %49 = vector.broadcast %48 : f32 to vector<64x64xf32>
    %50 = arith.mulf %35, %49 : vector<64x64xf32>
    %c7 = arith.constant 7 : index
    %51 = memref.load %arg1[%c7] : memref<81xf32, #tpu.memory_space<smem>>
    %52 = vector.broadcast %51 : f32 to vector<64x64xf32>
    %53 = arith.mulf %31, %52 : vector<64x64xf32>
    %54 = arith.addf %50, %53 : vector<64x64xf32>
    %c0_8 = arith.constant 0 : index
    %55 = memref.load %arg1[%c0_8] : memref<81xf32, #tpu.memory_space<smem>>
    %56 = vector.broadcast %55 : f32 to vector<64x64xf32>
    %57 = arith.mulf %37, %56 : vector<64x64xf32>
    %c2 = arith.constant 2 : index
    %58 = memref.load %arg1[%c2] : memref<81xf32, #tpu.memory_space<smem>>
    %59 = vector.broadcast %58 : f32 to vector<64x64xf32>
    %60 = arith.mulf %35, %59 : vector<64x64xf32>
    %61 = arith.addf %57, %60 : vector<64x64xf32>
    %c6 = arith.constant 6 : index
    %62 = memref.load %arg1[%c6] : memref<81xf32, #tpu.memory_space<smem>>
    %63 = vector.broadcast %62 : f32 to vector<64x64xf32>
    %64 = arith.mulf %33, %63 : vector<64x64xf32>
    %65 = arith.addf %61, %64 : vector<64x64xf32>
    %c8 = arith.constant 8 : index
    %66 = memref.load %arg1[%c8] : memref<81xf32, #tpu.memory_space<smem>>
    %67 = vector.broadcast %66 : f32 to vector<64x64xf32>
    %68 = arith.mulf %31, %67 : vector<64x64xf32>
    %69 = arith.addf %65, %68 : vector<64x64xf32>
    %c13 = arith.constant 13 : index
    %70 = memref.load %arg1[%c13] : memref<81xf32, #tpu.memory_space<smem>>
    %71 = vector.broadcast %70 : f32 to vector<64x64xf32>
    %72 = arith.mulf %31, %71 : vector<64x64xf32>
    %c12 = arith.constant 12 : index
    %73 = memref.load %arg1[%c12] : memref<81xf32, #tpu.memory_space<smem>>
    %74 = vector.broadcast %73 : f32 to vector<64x64xf32>
    %75 = arith.mulf %33, %74 : vector<64x64xf32>
    %c14 = arith.constant 14 : index
    %76 = memref.load %arg1[%c14] : memref<81xf32, #tpu.memory_space<smem>>
    %77 = vector.broadcast %76 : f32 to vector<64x64xf32>
    %78 = arith.mulf %31, %77 : vector<64x64xf32>
    %79 = arith.addf %75, %78 : vector<64x64xf32>
    %c10 = arith.constant 10 : index
    %80 = memref.load %arg1[%c10] : memref<81xf32, #tpu.memory_space<smem>>
    %81 = vector.broadcast %80 : f32 to vector<64x64xf32>
    %82 = arith.mulf %35, %81 : vector<64x64xf32>
    %c16 = arith.constant 16 : index
    %83 = memref.load %arg1[%c16] : memref<81xf32, #tpu.memory_space<smem>>
    %84 = vector.broadcast %83 : f32 to vector<64x64xf32>
    %85 = arith.mulf %31, %84 : vector<64x64xf32>
    %86 = arith.addf %82, %85 : vector<64x64xf32>
    %c9 = arith.constant 9 : index
    %87 = memref.load %arg1[%c9] : memref<81xf32, #tpu.memory_space<smem>>
    %88 = vector.broadcast %87 : f32 to vector<64x64xf32>
    %89 = arith.mulf %37, %88 : vector<64x64xf32>
    %c11 = arith.constant 11 : index
    %90 = memref.load %arg1[%c11] : memref<81xf32, #tpu.memory_space<smem>>
    %91 = vector.broadcast %90 : f32 to vector<64x64xf32>
    %92 = arith.mulf %35, %91 : vector<64x64xf32>
    %93 = arith.addf %89, %92 : vector<64x64xf32>
    %c15 = arith.constant 15 : index
    %94 = memref.load %arg1[%c15] : memref<81xf32, #tpu.memory_space<smem>>
    %95 = vector.broadcast %94 : f32 to vector<64x64xf32>
    %96 = arith.mulf %33, %95 : vector<64x64xf32>
    %97 = arith.addf %93, %96 : vector<64x64xf32>
    %c17 = arith.constant 17 : index
    %98 = memref.load %arg1[%c17] : memref<81xf32, #tpu.memory_space<smem>>
    %99 = vector.broadcast %98 : f32 to vector<64x64xf32>
    %100 = arith.mulf %31, %99 : vector<64x64xf32>
    %101 = arith.addf %97, %100 : vector<64x64xf32>
    %c22 = arith.constant 22 : index
    %102 = memref.load %arg1[%c22] : memref<81xf32, #tpu.memory_space<smem>>
    %103 = vector.broadcast %102 : f32 to vector<64x64xf32>
    %104 = arith.mulf %31, %103 : vector<64x64xf32>
    %c21 = arith.constant 21 : index
    %105 = memref.load %arg1[%c21] : memref<81xf32, #tpu.memory_space<smem>>
    %106 = vector.broadcast %105 : f32 to vector<64x64xf32>
    %107 = arith.mulf %33, %106 : vector<64x64xf32>
    %c23 = arith.constant 23 : index
    %108 = memref.load %arg1[%c23] : memref<81xf32, #tpu.memory_space<smem>>
    %109 = vector.broadcast %108 : f32 to vector<64x64xf32>
    %110 = arith.mulf %31, %109 : vector<64x64xf32>
    %111 = arith.addf %107, %110 : vector<64x64xf32>
    %c19 = arith.constant 19 : index
    %112 = memref.load %arg1[%c19] : memref<81xf32, #tpu.memory_space<smem>>
    %113 = vector.broadcast %112 : f32 to vector<64x64xf32>
    %114 = arith.mulf %35, %113 : vector<64x64xf32>
    %c25 = arith.constant 25 : index
    %115 = memref.load %arg1[%c25] : memref<81xf32, #tpu.memory_space<smem>>
    %116 = vector.broadcast %115 : f32 to vector<64x64xf32>
    %117 = arith.mulf %31, %116 : vector<64x64xf32>
    %118 = arith.addf %114, %117 : vector<64x64xf32>
    %c18 = arith.constant 18 : index
    %119 = memref.load %arg1[%c18] : memref<81xf32, #tpu.memory_space<smem>>
    %120 = vector.broadcast %119 : f32 to vector<64x64xf32>
    %121 = arith.mulf %37, %120 : vector<64x64xf32>
    %c20 = arith.constant 20 : index
    %122 = memref.load %arg1[%c20] : memref<81xf32, #tpu.memory_space<smem>>
    %123 = vector.broadcast %122 : f32 to vector<64x64xf32>
    %124 = arith.mulf %35, %123 : vector<64x64xf32>
    %125 = arith.addf %121, %124 : vector<64x64xf32>
    %c24 = arith.constant 24 : index
    %126 = memref.load %arg1[%c24] : memref<81xf32, #tpu.memory_space<smem>>
    %127 = vector.broadcast %126 : f32 to vector<64x64xf32>
    %128 = arith.mulf %33, %127 : vector<64x64xf32>
    %129 = arith.addf %125, %128 : vector<64x64xf32>
    %c26 = arith.constant 26 : index
    %130 = memref.load %arg1[%c26] : memref<81xf32, #tpu.memory_space<smem>>
    %131 = vector.broadcast %130 : f32 to vector<64x64xf32>
    %132 = arith.mulf %31, %131 : vector<64x64xf32>
    %133 = arith.addf %129, %132 : vector<64x64xf32>
    %c0_9 = arith.constant 0 : index
    %c1_10 = arith.constant 1 : index
    %c0_11 = arith.constant 0 : index
    %c0_12 = arith.constant 0 : index
    %134 = vector.load %arg3[%c0_9, %c1_10, %c0_11, %c0_12] : memref<1x3x64x64xf32, #tpu.memory_space<vmem>>, vector<1x1x64x64xf32>
    %135 = vector.shape_cast %134 : vector<1x1x64x64xf32> to vector<64x64xf32>
    %136 = vector.extract_strided_slice %135 {offsets = [0, 1], sizes = [64, 63], strides = [1, 1]} : vector<64x64xf32> to vector<64x63xf32>
    %137 = tpu.concatenate %136, %28 in 1 : vector<64x63xf32>, vector<64x1xf32> -> vector<64x64xf32>
    %138 = vector.extract_strided_slice %135 {offsets = [1, 0], sizes = [63, 64], strides = [1, 1]} : vector<64x64xf32> to vector<63x64xf32>
    %139 = tpu.concatenate %138, %29 in 0 : vector<63x64xf32>, vector<1x64xf32> -> vector<64x64xf32>
    %140 = vector.extract_strided_slice %139 {offsets = [0, 1], sizes = [64, 63], strides = [1, 1]} : vector<64x64xf32> to vector<64x63xf32>
    %141 = tpu.concatenate %140, %28 in 1 : vector<64x63xf32>, vector<64x1xf32> -> vector<64x64xf32>
    %c31 = arith.constant 31 : index
    %142 = memref.load %arg1[%c31] : memref<81xf32, #tpu.memory_space<smem>>
    %143 = vector.broadcast %142 : f32 to vector<64x64xf32>
    %144 = arith.mulf %135, %143 : vector<64x64xf32>
    %c30 = arith.constant 30 : index
    %145 = memref.load %arg1[%c30] : memref<81xf32, #tpu.memory_space<smem>>
    %146 = vector.broadcast %145 : f32 to vector<64x64xf32>
    %147 = arith.mulf %137, %146 : vector<64x64xf32>
    %c32 = arith.constant 32 : index
    %148 = memref.load %arg1[%c32] : memref<81xf32, #tpu.memory_space<smem>>
    %149 = vector.broadcast %148 : f32 to vector<64x64xf32>
    %150 = arith.mulf %135, %149 : vector<64x64xf32>
    %151 = arith.addf %147, %150 : vector<64x64xf32>
    %c28 = arith.constant 28 : index
    %152 = memref.load %arg1[%c28] : memref<81xf32, #tpu.memory_space<smem>>
    %153 = vector.broadcast %152 : f32 to vector<64x64xf32>
    %154 = arith.mulf %139, %153 : vector<64x64xf32>
    %c34 = arith.constant 34 : index
    %155 = memref.load %arg1[%c34] : memref<81xf32, #tpu.memory_space<smem>>
    %156 = vector.broadcast %155 : f32 to vector<64x64xf32>
    %157 = arith.mulf %135, %156 : vector<64x64xf32>
    %158 = arith.addf %154, %157 : vector<64x64xf32>
    %c27 = arith.constant 27 : index
    %159 = memref.load %arg1[%c27] : memref<81xf32, #tpu.memory_space<smem>>
    %160 = vector.broadcast %159 : f32 to vector<64x64xf32>
    %161 = arith.mulf %141, %160 : vector<64x64xf32>
    %c29 = arith.constant 29 : index
    %162 = memref.load %arg1[%c29] : memref<81xf32, #tpu.memory_space<smem>>
    %163 = vector.broadcast %162 : f32 to vector<64x64xf32>
    %164 = arith.mulf %139, %163 : vector<64x64xf32>
    %165 = arith.addf %161, %164 : vector<64x64xf32>
    %c33 = arith.constant 33 : index
    %166 = memref.load %arg1[%c33] : memref<81xf32, #tpu.memory_space<smem>>
    %167 = vector.broadcast %166 : f32 to vector<64x64xf32>
    %168 = arith.mulf %137, %167 : vector<64x64xf32>
    %169 = arith.addf %165, %168 : vector<64x64xf32>
    %c35 = arith.constant 35 : index
    %170 = memref.load %arg1[%c35] : memref<81xf32, #tpu.memory_space<smem>>
    %171 = vector.broadcast %170 : f32 to vector<64x64xf32>
    %172 = arith.mulf %135, %171 : vector<64x64xf32>
    %173 = arith.addf %169, %172 : vector<64x64xf32>
    %174 = arith.addf %40, %144 : vector<64x64xf32>
    %175 = arith.addf %47, %151 : vector<64x64xf32>
    %176 = arith.addf %54, %158 : vector<64x64xf32>
    %177 = arith.addf %69, %173 : vector<64x64xf32>
    %c40 = arith.constant 40 : index
    %178 = memref.load %arg1[%c40] : memref<81xf32, #tpu.memory_space<smem>>
    %179 = vector.broadcast %178 : f32 to vector<64x64xf32>
    %180 = arith.mulf %135, %179 : vector<64x64xf32>
    %c39 = arith.constant 39 : index
    %181 = memref.load %arg1[%c39] : memref<81xf32, #tpu.memory_space<smem>>
    %182 = vector.broadcast %181 : f32 to vector<64x64xf32>
    %183 = arith.mulf %137, %182 : vector<64x64xf32>
    %c41 = arith.constant 41 : index
    %184 = memref.load %arg1[%c41] : memref<81xf32, #tpu.memory_space<smem>>
    %185 = vector.broadcast %184 : f32 to vector<64x64xf32>
    %186 = arith.mulf %135, %185 : vector<64x64xf32>
    %187 = arith.addf %183, %186 : vector<64x64xf32>
    %c37 = arith.constant 37 : index
    %188 = memref.load %arg1[%c37] : memref<81xf32, #tpu.memory_space<smem>>
    %189 = vector.broadcast %188 : f32 to vector<64x64xf32>
    %190 = arith.mulf %139, %189 : vector<64x64xf32>
    %c43 = arith.constant 43 : index
    %191 = memref.load %arg1[%c43] : memref<81xf32, #tpu.memory_space<smem>>
    %192 = vector.broadcast %191 : f32 to vector<64x64xf32>
    %193 = arith.mulf %135, %192 : vector<64x64xf32>
    %194 = arith.addf %190, %193 : vector<64x64xf32>
    %c36 = arith.constant 36 : index
    %195 = memref.load %arg1[%c36] : memref<81xf32, #tpu.memory_space<smem>>
    %196 = vector.broadcast %195 : f32 to vector<64x64xf32>
    %197 = arith.mulf %141, %196 : vector<64x64xf32>
    %c38 = arith.constant 38 : index
    %198 = memref.load %arg1[%c38] : memref<81xf32, #tpu.memory_space<smem>>
    %199 = vector.broadcast %198 : f32 to vector<64x64xf32>
    %200 = arith.mulf %139, %199 : vector<64x64xf32>
    %201 = arith.addf %197, %200 : vector<64x64xf32>
    %c42 = arith.constant 42 : index
    %202 = memref.load %arg1[%c42] : memref<81xf32, #tpu.memory_space<smem>>
    %203 = vector.broadcast %202 : f32 to vector<64x64xf32>
    %204 = arith.mulf %137, %203 : vector<64x64xf32>
    %205 = arith.addf %201, %204 : vector<64x64xf32>
    %c44 = arith.constant 44 : index
    %206 = memref.load %arg1[%c44] : memref<81xf32, #tpu.memory_space<smem>>
    %207 = vector.broadcast %206 : f32 to vector<64x64xf32>
    %208 = arith.mulf %135, %207 : vector<64x64xf32>
    %209 = arith.addf %205, %208 : vector<64x64xf32>
    %210 = arith.addf %72, %180 : vector<64x64xf32>
    %211 = arith.addf %79, %187 : vector<64x64xf32>
    %212 = arith.addf %86, %194 : vector<64x64xf32>
    %213 = arith.addf %101, %209 : vector<64x64xf32>
    %c49 = arith.constant 49 : index
    %214 = memref.load %arg1[%c49] : memref<81xf32, #tpu.memory_space<smem>>
    %215 = vector.broadcast %214 : f32 to vector<64x64xf32>
    %216 = arith.mulf %135, %215 : vector<64x64xf32>
    %c48 = arith.constant 48 : index
    %217 = memref.load %arg1[%c48] : memref<81xf32, #tpu.memory_space<smem>>
    %218 = vector.broadcast %217 : f32 to vector<64x64xf32>
    %219 = arith.mulf %137, %218 : vector<64x64xf32>
    %c50 = arith.constant 50 : index
    %220 = memref.load %arg1[%c50] : memref<81xf32, #tpu.memory_space<smem>>
    %221 = vector.broadcast %220 : f32 to vector<64x64xf32>
    %222 = arith.mulf %135, %221 : vector<64x64xf32>
    %223 = arith.addf %219, %222 : vector<64x64xf32>
    %c46 = arith.constant 46 : index
    %224 = memref.load %arg1[%c46] : memref<81xf32, #tpu.memory_space<smem>>
    %225 = vector.broadcast %224 : f32 to vector<64x64xf32>
    %226 = arith.mulf %139, %225 : vector<64x64xf32>
    %c52 = arith.constant 52 : index
    %227 = memref.load %arg1[%c52] : memref<81xf32, #tpu.memory_space<smem>>
    %228 = vector.broadcast %227 : f32 to vector<64x64xf32>
    %229 = arith.mulf %135, %228 : vector<64x64xf32>
    %230 = arith.addf %226, %229 : vector<64x64xf32>
    %c45 = arith.constant 45 : index
    %231 = memref.load %arg1[%c45] : memref<81xf32, #tpu.memory_space<smem>>
    %232 = vector.broadcast %231 : f32 to vector<64x64xf32>
    %233 = arith.mulf %141, %232 : vector<64x64xf32>
    %c47 = arith.constant 47 : index
    %234 = memref.load %arg1[%c47] : memref<81xf32, #tpu.memory_space<smem>>
    %235 = vector.broadcast %234 : f32 to vector<64x64xf32>
    %236 = arith.mulf %139, %235 : vector<64x64xf32>
    %237 = arith.addf %233, %236 : vector<64x64xf32>
    %c51 = arith.constant 51 : index
    %238 = memref.load %arg1[%c51] : memref<81xf32, #tpu.memory_space<smem>>
    %239 = vector.broadcast %238 : f32 to vector<64x64xf32>
    %240 = arith.mulf %137, %239 : vector<64x64xf32>
    %241 = arith.addf %237, %240 : vector<64x64xf32>
    %c53 = arith.constant 53 : index
    %242 = memref.load %arg1[%c53] : memref<81xf32, #tpu.memory_space<smem>>
    %243 = vector.broadcast %242 : f32 to vector<64x64xf32>
    %244 = arith.mulf %135, %243 : vector<64x64xf32>
    %245 = arith.addf %241, %244 : vector<64x64xf32>
    %246 = arith.addf %104, %216 : vector<64x64xf32>
    %247 = arith.addf %111, %223 : vector<64x64xf32>
    %248 = arith.addf %118, %230 : vector<64x64xf32>
    %249 = arith.addf %133, %245 : vector<64x64xf32>
    %c0_13 = arith.constant 0 : index
    %c2_14 = arith.constant 2 : index
    %c0_15 = arith.constant 0 : index
    %c0_16 = arith.constant 0 : index
    %250 = vector.load %arg3[%c0_13, %c2_14, %c0_15, %c0_16] : memref<1x3x64x64xf32, #tpu.memory_space<vmem>>, vector<1x1x64x64xf32>
    %251 = vector.shape_cast %250 : vector<1x1x64x64xf32> to vector<64x64xf32>
    %252 = vector.extract_strided_slice %251 {offsets = [0, 1], sizes = [64, 63], strides = [1, 1]} : vector<64x64xf32> to vector<64x63xf32>
    %253 = tpu.concatenate %252, %28 in 1 : vector<64x63xf32>, vector<64x1xf32> -> vector<64x64xf32>
    %254 = vector.extract_strided_slice %251 {offsets = [1, 0], sizes = [63, 64], strides = [1, 1]} : vector<64x64xf32> to vector<63x64xf32>
    %255 = tpu.concatenate %254, %29 in 0 : vector<63x64xf32>, vector<1x64xf32> -> vector<64x64xf32>
    %256 = vector.extract_strided_slice %255 {offsets = [0, 1], sizes = [64, 63], strides = [1, 1]} : vector<64x64xf32> to vector<64x63xf32>
    %257 = tpu.concatenate %256, %28 in 1 : vector<64x63xf32>, vector<64x1xf32> -> vector<64x64xf32>
    %c58 = arith.constant 58 : index
    %258 = memref.load %arg1[%c58] : memref<81xf32, #tpu.memory_space<smem>>
    %259 = vector.broadcast %258 : f32 to vector<64x64xf32>
    %260 = arith.mulf %251, %259 : vector<64x64xf32>
    %c57 = arith.constant 57 : index
    %261 = memref.load %arg1[%c57] : memref<81xf32, #tpu.memory_space<smem>>
    %262 = vector.broadcast %261 : f32 to vector<64x64xf32>
    %263 = arith.mulf %253, %262 : vector<64x64xf32>
    %c59 = arith.constant 59 : index
    %264 = memref.load %arg1[%c59] : memref<81xf32, #tpu.memory_space<smem>>
    %265 = vector.broadcast %264 : f32 to vector<64x64xf32>
    %266 = arith.mulf %251, %265 : vector<64x64xf32>
    %267 = arith.addf %263, %266 : vector<64x64xf32>
    %c55 = arith.constant 55 : index
    %268 = memref.load %arg1[%c55] : memref<81xf32, #tpu.memory_space<smem>>
    %269 = vector.broadcast %268 : f32 to vector<64x64xf32>
    %270 = arith.mulf %255, %269 : vector<64x64xf32>
    %c61 = arith.constant 61 : index
    %271 = memref.load %arg1[%c61] : memref<81xf32, #tpu.memory_space<smem>>
    %272 = vector.broadcast %271 : f32 to vector<64x64xf32>
    %273 = arith.mulf %251, %272 : vector<64x64xf32>
    %274 = arith.addf %270, %273 : vector<64x64xf32>
    %c54 = arith.constant 54 : index
    %275 = memref.load %arg1[%c54] : memref<81xf32, #tpu.memory_space<smem>>
    %276 = vector.broadcast %275 : f32 to vector<64x64xf32>
    %277 = arith.mulf %257, %276 : vector<64x64xf32>
    %c56 = arith.constant 56 : index
    %278 = memref.load %arg1[%c56] : memref<81xf32, #tpu.memory_space<smem>>
    %279 = vector.broadcast %278 : f32 to vector<64x64xf32>
    %280 = arith.mulf %255, %279 : vector<64x64xf32>
    %281 = arith.addf %277, %280 : vector<64x64xf32>
    %c60 = arith.constant 60 : index
    %282 = memref.load %arg1[%c60] : memref<81xf32, #tpu.memory_space<smem>>
    %283 = vector.broadcast %282 : f32 to vector<64x64xf32>
    %284 = arith.mulf %253, %283 : vector<64x64xf32>
    %285 = arith.addf %281, %284 : vector<64x64xf32>
    %c62 = arith.constant 62 : index
    %286 = memref.load %arg1[%c62] : memref<81xf32, #tpu.memory_space<smem>>
    %287 = vector.broadcast %286 : f32 to vector<64x64xf32>
    %288 = arith.mulf %251, %287 : vector<64x64xf32>
    %289 = arith.addf %285, %288 : vector<64x64xf32>
    %290 = arith.addf %174, %260 : vector<64x64xf32>
    %291 = arith.addf %175, %267 : vector<64x64xf32>
    %292 = arith.addf %176, %274 : vector<64x64xf32>
    %293 = arith.addf %177, %289 : vector<64x64xf32>
    %c67 = arith.constant 67 : index
    %294 = memref.load %arg1[%c67] : memref<81xf32, #tpu.memory_space<smem>>
    %295 = vector.broadcast %294 : f32 to vector<64x64xf32>
    %296 = arith.mulf %251, %295 : vector<64x64xf32>
    %c66 = arith.constant 66 : index
    %297 = memref.load %arg1[%c66] : memref<81xf32, #tpu.memory_space<smem>>
    %298 = vector.broadcast %297 : f32 to vector<64x64xf32>
    %299 = arith.mulf %253, %298 : vector<64x64xf32>
    %c68 = arith.constant 68 : index
    %300 = memref.load %arg1[%c68] : memref<81xf32, #tpu.memory_space<smem>>
    %301 = vector.broadcast %300 : f32 to vector<64x64xf32>
    %302 = arith.mulf %251, %301 : vector<64x64xf32>
    %303 = arith.addf %299, %302 : vector<64x64xf32>
    %c64 = arith.constant 64 : index
    %304 = memref.load %arg1[%c64] : memref<81xf32, #tpu.memory_space<smem>>
    %305 = vector.broadcast %304 : f32 to vector<64x64xf32>
    %306 = arith.mulf %255, %305 : vector<64x64xf32>
    %c70 = arith.constant 70 : index
    %307 = memref.load %arg1[%c70] : memref<81xf32, #tpu.memory_space<smem>>
    %308 = vector.broadcast %307 : f32 to vector<64x64xf32>
    %309 = arith.mulf %251, %308 : vector<64x64xf32>
    %310 = arith.addf %306, %309 : vector<64x64xf32>
    %c63 = arith.constant 63 : index
    %311 = memref.load %arg1[%c63] : memref<81xf32, #tpu.memory_space<smem>>
    %312 = vector.broadcast %311 : f32 to vector<64x64xf32>
    %313 = arith.mulf %257, %312 : vector<64x64xf32>
    %c65 = arith.constant 65 : index
    %314 = memref.load %arg1[%c65] : memref<81xf32, #tpu.memory_space<smem>>
    %315 = vector.broadcast %314 : f32 to vector<64x64xf32>
    %316 = arith.mulf %255, %315 : vector<64x64xf32>
    %317 = arith.addf %313, %316 : vector<64x64xf32>
    %c69 = arith.constant 69 : index
    %318 = memref.load %arg1[%c69] : memref<81xf32, #tpu.memory_space<smem>>
    %319 = vector.broadcast %318 : f32 to vector<64x64xf32>
    %320 = arith.mulf %253, %319 : vector<64x64xf32>
    %321 = arith.addf %317, %320 : vector<64x64xf32>
    %c71 = arith.constant 71 : index
    %322 = memref.load %arg1[%c71] : memref<81xf32, #tpu.memory_space<smem>>
    %323 = vector.broadcast %322 : f32 to vector<64x64xf32>
    %324 = arith.mulf %251, %323 : vector<64x64xf32>
    %325 = arith.addf %321, %324 : vector<64x64xf32>
    %326 = arith.addf %210, %296 : vector<64x64xf32>
    %327 = arith.addf %211, %303 : vector<64x64xf32>
    %328 = arith.addf %212, %310 : vector<64x64xf32>
    %329 = arith.addf %213, %325 : vector<64x64xf32>
    %c76 = arith.constant 76 : index
    %330 = memref.load %arg1[%c76] : memref<81xf32, #tpu.memory_space<smem>>
    %331 = vector.broadcast %330 : f32 to vector<64x64xf32>
    %332 = arith.mulf %251, %331 : vector<64x64xf32>
    %c75 = arith.constant 75 : index
    %333 = memref.load %arg1[%c75] : memref<81xf32, #tpu.memory_space<smem>>
    %334 = vector.broadcast %333 : f32 to vector<64x64xf32>
    %335 = arith.mulf %253, %334 : vector<64x64xf32>
    %c77 = arith.constant 77 : index
    %336 = memref.load %arg1[%c77] : memref<81xf32, #tpu.memory_space<smem>>
    %337 = vector.broadcast %336 : f32 to vector<64x64xf32>
    %338 = arith.mulf %251, %337 : vector<64x64xf32>
    %339 = arith.addf %335, %338 : vector<64x64xf32>
    %c73 = arith.constant 73 : index
    %340 = memref.load %arg1[%c73] : memref<81xf32, #tpu.memory_space<smem>>
    %341 = vector.broadcast %340 : f32 to vector<64x64xf32>
    %342 = arith.mulf %255, %341 : vector<64x64xf32>
    %c79 = arith.constant 79 : index
    %343 = memref.load %arg1[%c79] : memref<81xf32, #tpu.memory_space<smem>>
    %344 = vector.broadcast %343 : f32 to vector<64x64xf32>
    %345 = arith.mulf %251, %344 : vector<64x64xf32>
    %346 = arith.addf %342, %345 : vector<64x64xf32>
    %c72 = arith.constant 72 : index
    %347 = memref.load %arg1[%c72] : memref<81xf32, #tpu.memory_space<smem>>
    %348 = vector.broadcast %347 : f32 to vector<64x64xf32>
    %349 = arith.mulf %257, %348 : vector<64x64xf32>
    %c74 = arith.constant 74 : index
    %350 = memref.load %arg1[%c74] : memref<81xf32, #tpu.memory_space<smem>>
    %351 = vector.broadcast %350 : f32 to vector<64x64xf32>
    %352 = arith.mulf %255, %351 : vector<64x64xf32>
    %353 = arith.addf %349, %352 : vector<64x64xf32>
    %c78 = arith.constant 78 : index
    %354 = memref.load %arg1[%c78] : memref<81xf32, #tpu.memory_space<smem>>
    %355 = vector.broadcast %354 : f32 to vector<64x64xf32>
    %356 = arith.mulf %253, %355 : vector<64x64xf32>
    %357 = arith.addf %353, %356 : vector<64x64xf32>
    %c80 = arith.constant 80 : index
    %358 = memref.load %arg1[%c80] : memref<81xf32, #tpu.memory_space<smem>>
    %359 = vector.broadcast %358 : f32 to vector<64x64xf32>
    %360 = arith.mulf %251, %359 : vector<64x64xf32>
    %361 = arith.addf %357, %360 : vector<64x64xf32>
    %362 = arith.addf %246, %332 : vector<64x64xf32>
    %363 = arith.addf %247, %339 : vector<64x64xf32>
    %364 = arith.addf %248, %346 : vector<64x64xf32>
    %365 = arith.addf %249, %361 : vector<64x64xf32>
    %cst_17 = arith.constant dense<0.000000e+00> : vector<64x128xf32>
    %366 = tpu.matmul %290, %6, %cst_17 {dimension_numbers = #tpu.dot_dimension_numbers<[1], [0], [0], [1], [0, 0, 1, 1], [], []>} : vector<64x64xf32>, vector<64x128xf32>, vector<64x128xf32> -> vector<64x128xf32>
    %cst_18 = arith.constant dense<0.000000e+00> : vector<64x128xf32>
    %367 = tpu.matmul %291, %13, %cst_18 {dimension_numbers = #tpu.dot_dimension_numbers<[1], [0], [0], [1], [0, 0, 1, 1], [], []>} : vector<64x64xf32>, vector<64x128xf32>, vector<64x128xf32> -> vector<64x128xf32>
    %368 = arith.addf %366, %367 : vector<64x128xf32>
    %cst_19 = arith.constant dense<0.000000e+00> : vector<64x128xf32>
    %369 = tpu.matmul %292, %6, %cst_19 {dimension_numbers = #tpu.dot_dimension_numbers<[1], [0], [0], [1], [0, 0, 1, 1], [], []>} : vector<64x64xf32>, vector<64x128xf32>, vector<64x128xf32> -> vector<64x128xf32>
    %cst_20 = arith.constant dense<0.000000e+00> : vector<64x128xf32>
    %370 = tpu.matmul %293, %13, %cst_20 {dimension_numbers = #tpu.dot_dimension_numbers<[1], [0], [0], [1], [0, 0, 1, 1], [], []>} : vector<64x64xf32>, vector<64x128xf32>, vector<64x128xf32> -> vector<64x128xf32>
    %371 = arith.addf %369, %370 : vector<64x128xf32>
    %cst_21 = arith.constant dense<0.000000e+00> : vector<128x128xf32>
    %372 = tpu.matmul %20, %368, %cst_21 {dimension_numbers = #tpu.dot_dimension_numbers<[1], [0], [0], [1], [0, 0, 1, 1], [], []>} : vector<128x64xf32>, vector<64x128xf32>, vector<128x128xf32> -> vector<128x128xf32>
    %cst_22 = arith.constant dense<0.000000e+00> : vector<128x128xf32>
    %373 = tpu.matmul %27, %371, %cst_22 {dimension_numbers = #tpu.dot_dimension_numbers<[1], [0], [0], [1], [0, 0, 1, 1], [], []>} : vector<128x64xf32>, vector<64x128xf32>, vector<128x128xf32> -> vector<128x128xf32>
    %374 = arith.addf %372, %373 : vector<128x128xf32>
    %c0_23 = arith.constant 0 : index
    %375 = memref.load %arg2[%c0_23] : memref<3xf32, #tpu.memory_space<smem>>
    %376 = vector.broadcast %375 : f32 to vector<128x128xf32>
    %377 = arith.addf %374, %376 : vector<128x128xf32>
    %cst_24 = arith.constant 0.000000e+00 : f32
    %378 = vector.broadcast %cst_24 : f32 to vector<128x128xf32>
    %379 = arith.maximumf %377, %378 : vector<128x128xf32>
    %c0_25 = arith.constant 0 : index
    %c0_26 = arith.constant 0 : index
    %c0_27 = arith.constant 0 : index
    %c0_28 = arith.constant 0 : index
    %380 = vector.load %arg4[%c0_25, %c0_26, %c0_27, %c0_28] : memref<1x3x128x128xf32, #tpu.memory_space<vmem>>, vector<1x1x128x128xf32>
    %381 = vector.shape_cast %380 : vector<1x1x128x128xf32> to vector<128x128xf32>
    %382 = vector.shape_cast %379 : vector<128x128xf32> to vector<1x1x128x128xf32>
    tpu.vector_store %arg4[%c0_25, %c0_26, %c0_27, %c0_28], %382 {strides = array<i32>} : memref<1x3x128x128xf32, #tpu.memory_space<vmem>>, vector<1x1x128x128xf32>,
    %cst_29 = arith.constant dense<0.000000e+00> : vector<64x128xf32>
    %383 = tpu.matmul %326, %6, %cst_29 {dimension_numbers = #tpu.dot_dimension_numbers<[1], [0], [0], [1], [0, 0, 1, 1], [], []>} : vector<64x64xf32>, vector<64x128xf32>, vector<64x128xf32> -> vector<64x128xf32>
    %cst_30 = arith.constant dense<0.000000e+00> : vector<64x128xf32>
    %384 = tpu.matmul %327, %13, %cst_30 {dimension_numbers = #tpu.dot_dimension_numbers<[1], [0], [0], [1], [0, 0, 1, 1], [], []>} : vector<64x64xf32>, vector<64x128xf32>, vector<64x128xf32> -> vector<64x128xf32>
    %385 = arith.addf %383, %384 : vector<64x128xf32>
    %cst_31 = arith.constant dense<0.000000e+00> : vector<64x128xf32>
    %386 = tpu.matmul %328, %6, %cst_31 {dimension_numbers = #tpu.dot_dimension_numbers<[1], [0], [0], [1], [0, 0, 1, 1], [], []>} : vector<64x64xf32>, vector<64x128xf32>, vector<64x128xf32> -> vector<64x128xf32>
    %cst_32 = arith.constant dense<0.000000e+00> : vector<64x128xf32>
    %387 = tpu.matmul %329, %13, %cst_32 {dimension_numbers = #tpu.dot_dimension_numbers<[1], [0], [0], [1], [0, 0, 1, 1], [], []>} : vector<64x64xf32>, vector<64x128xf32>, vector<64x128xf32> -> vector<64x128xf32>
    %388 = arith.addf %386, %387 : vector<64x128xf32>
    %cst_33 = arith.constant dense<0.000000e+00> : vector<128x128xf32>
    %389 = tpu.matmul %20, %385, %cst_33 {dimension_numbers = #tpu.dot_dimension_numbers<[1], [0], [0], [1], [0, 0, 1, 1], [], []>} : vector<128x64xf32>, vector<64x128xf32>, vector<128x128xf32> -> vector<128x128xf32>
    %cst_34 = arith.constant dense<0.000000e+00> : vector<128x128xf32>
    %390 = tpu.matmul %27, %388, %cst_34 {dimension_numbers = #tpu.dot_dimension_numbers<[1], [0], [0], [1], [0, 0, 1, 1], [], []>} : vector<128x64xf32>, vector<64x128xf32>, vector<128x128xf32> -> vector<128x128xf32>
    %391 = arith.addf %389, %390 : vector<128x128xf32>
    %c1_35 = arith.constant 1 : index
    %392 = memref.load %arg2[%c1_35] : memref<3xf32, #tpu.memory_space<smem>>
    %393 = vector.broadcast %392 : f32 to vector<128x128xf32>
    %394 = arith.addf %391, %393 : vector<128x128xf32>
    %cst_36 = arith.constant 0.000000e+00 : f32
    %395 = vector.broadcast %cst_36 : f32 to vector<128x128xf32>
    %396 = arith.maximumf %394, %395 : vector<128x128xf32>
    %c0_37 = arith.constant 0 : index
    %c1_38 = arith.constant 1 : index
    %c0_39 = arith.constant 0 : index
    %c0_40 = arith.constant 0 : index
    %397 = vector.load %arg4[%c0_37, %c1_38, %c0_39, %c0_40] : memref<1x3x128x128xf32, #tpu.memory_space<vmem>>, vector<1x1x128x128xf32>
    %398 = vector.shape_cast %397 : vector<1x1x128x128xf32> to vector<128x128xf32>
    %399 = vector.shape_cast %396 : vector<128x128xf32> to vector<1x1x128x128xf32>
    tpu.vector_store %arg4[%c0_37, %c1_38, %c0_39, %c0_40], %399 {strides = array<i32>} : memref<1x3x128x128xf32, #tpu.memory_space<vmem>>, vector<1x1x128x128xf32>,
    %cst_41 = arith.constant dense<0.000000e+00> : vector<64x128xf32>
    %400 = tpu.matmul %362, %6, %cst_41 {dimension_numbers = #tpu.dot_dimension_numbers<[1], [0], [0], [1], [0, 0, 1, 1], [], []>} : vector<64x64xf32>, vector<64x128xf32>, vector<64x128xf32> -> vector<64x128xf32>
    %cst_42 = arith.constant dense<0.000000e+00> : vector<64x128xf32>
    %401 = tpu.matmul %363, %13, %cst_42 {dimension_numbers = #tpu.dot_dimension_numbers<[1], [0], [0], [1], [0, 0, 1, 1], [], []>} : vector<64x64xf32>, vector<64x128xf32>, vector<64x128xf32> -> vector<64x128xf32>
    %402 = arith.addf %400, %401 : vector<64x128xf32>
    %cst_43 = arith.constant dense<0.000000e+00> : vector<64x128xf32>
    %403 = tpu.matmul %364, %6, %cst_43 {dimension_numbers = #tpu.dot_dimension_numbers<[1], [0], [0], [1], [0, 0, 1, 1], [], []>} : vector<64x64xf32>, vector<64x128xf32>, vector<64x128xf32> -> vector<64x128xf32>
    %cst_44 = arith.constant dense<0.000000e+00> : vector<64x128xf32>
    %404 = tpu.matmul %365, %13, %cst_44 {dimension_numbers = #tpu.dot_dimension_numbers<[1], [0], [0], [1], [0, 0, 1, 1], [], []>} : vector<64x64xf32>, vector<64x128xf32>, vector<64x128xf32> -> vector<64x128xf32>
    %405 = arith.addf %403, %404 : vector<64x128xf32>
    %cst_45 = arith.constant dense<0.000000e+00> : vector<128x128xf32>
    %406 = tpu.matmul %20, %402, %cst_45 {dimension_numbers = #tpu.dot_dimension_numbers<[1], [0], [0], [1], [0, 0, 1, 1], [], []>} : vector<128x64xf32>, vector<64x128xf32>, vector<128x128xf32> -> vector<128x128xf32>
    %cst_46 = arith.constant dense<0.000000e+00> : vector<128x128xf32>
    %407 = tpu.matmul %27, %405, %cst_46 {dimension_numbers = #tpu.dot_dimension_numbers<[1], [0], [0], [1], [0, 0, 1, 1], [], []>} : vector<128x64xf32>, vector<64x128xf32>, vector<128x128xf32> -> vector<128x128xf32>
    %408 = arith.addf %406, %407 : vector<128x128xf32>
    %c2_47 = arith.constant 2 : index
    %409 = memref.load %arg2[%c2_47] : memref<3xf32, #tpu.memory_space<smem>>
    %410 = vector.broadcast %409 : f32 to vector<128x128xf32>
    %411 = arith.addf %408, %410 : vector<128x128xf32>
    %cst_48 = arith.constant 0.000000e+00 : f32
    %412 = vector.broadcast %cst_48 : f32 to vector<128x128xf32>
    %413 = arith.maximumf %411, %412 : vector<128x128xf32>
    %c0_49 = arith.constant 0 : index
    %c2_50 = arith.constant 2 : index
    %c0_51 = arith.constant 0 : index
    %c0_52 = arith.constant 0 : index
    %414 = vector.load %arg4[%c0_49, %c2_50, %c0_51, %c0_52] : memref<1x3x128x128xf32, #tpu.memory_space<vmem>>, vector<1x1x128x128xf32>
    %415 = vector.shape_cast %414 : vector<1x1x128x128xf32> to vector<128x128xf32>
    %416 = vector.shape_cast %413 : vector<128x128xf32> to vector<1x1x128x128xf32>
    tpu.vector_store %arg4[%c0_49, %c2_50, %c0_51, %c0_52], %416 {strides = array<i32>} : memref<1x3x128x128xf32, #tpu.memory_space<vmem>>, vector<1x1x128x128xf32>,
    return
  }
  func.func @transform_0(%arg0: i32) -> i32 {
    %c0_i32 = arith.constant 0 : i32
    %c0_i32_0 = arith.constant 0 : i32
    return %c0_i32 : i32
  }
  func.func @transform_1(%arg0: i32) -> i32 {
    %c0_i32 = arith.constant 0 : i32
    %c0_i32_0 = arith.constant 0 : i32
    return %c0_i32 : i32
  }
  func.func @transform_2(%arg0: i32) -> (i32, i32, i32, i32) {
    %c0_i32 = arith.constant 0 : i32
    %c0_i32_0 = arith.constant 0 : i32
    %c0_i32_1 = arith.constant 0 : i32
    %c0_i32_2 = arith.constant 0 : i32
    return %arg0, %c0_i32, %c0_i32_0, %c0_i32_1 : i32, i32, i32, i32
  }
  func.func @transform_3(%arg0: i32) -> (i32, i32, i32, i32) {
    %c0_i32 = arith.constant 0 : i32
    %c0_i32_0 = arith.constant 0 : i32
    %c0_i32_1 = arith.constant 0 : i32
    %c0_i32_2 = arith.constant 0 : i32
    return %arg0, %c0_i32, %c0_i32_0, %c0_i32_1 : i32, i32, i32, i32
  }
}

</mosaic_0001>

<bundles_post_ra>
// kernel: tpu_custom_call.1
= control target key start
LH: loop header
LB: loop body
LE: loop exit
PB: predicated region body
PF: predicated region fallthrough
CT: control target
= control target key end

     0   :  { %s11177_s0 = inlined_call_operand.hbm [shape: f32[81], index: 0, kind: input, shape index: {}]   ;;  %s11178_s1 = inlined_call_operand.vmem [shape: f32[3], index: 1, kind: input, shape index: {}]   ;;  %s11179_s2 = inlined_call_operand.hbm [shape: f32[2,3,64,64], index: 2, kind: input, shape index: {}]   ;;  %s11180_s3 = inlined_call_operand.hbm [shape: f32[2,3,128,128], index: 3, kind: output, shape index: {}]  }
   0x1   :  { %11591 = sst [smem:[#allocation269_spill]] %s11177_s0 }
   0x2   :  { %11592 = sst [smem:[#allocation270_spill]] %s11178_s1 }
   0x3   :  { %11593 = sst [smem:[#allocation271_spill]] %s11179_s2 }
   0x4   :  { %8 = vsyncpa [#allocation5], 0 }
   0x5   :  { %9 = vsyncpa [#allocation6], 0 }
   0x6   :  { %10 = vsyncpa [#allocation3], 0 }
   0x7   :  { %12 = vsyncpa [#allocation3 + $0x1], 0 }
   0x8   :  { %13 = vsyncpa [#allocation4], 0 }
   0x9   :  { %15 = vsyncpa [#allocation4 + $0x1], 0  ;;  %s6547_s12 = smov 0   ;;  %s6549_s13 = smov 0  }
   0xa   :  { %s6551_s14 = smov 0   ;;  %s6553_s15 = smov 0  }
   0xb LB: > { %11594 = sst [smem:[#allocation14_spill]] %s6506_s13  ;;  %s6568_s16 = sadd.s32 4294967295, %s6514_s15   ;;  %s6514_s15 = sphi %s6553_s15, %s12809_s15   ;;  %s6510_s14 = sphi %s6551_s14, %s12812_s14   ;;  %s6506_s13 = sphi %s6549_s13, %s12811_s13   ;;  %s6502_s12 = sphi %s6547_s12, %s12810_s12  }
   0xc   : > { %11595 = sst [smem:[#allocation15_spill]] %s6510_s14  ;;  %s4854_s17 = sadd.s32 4294967294, %s6514_s15  }
   0xd   : > { %11596 = sst [smem:[#allocation16_spill]] %s6514_s15  ;;  %s6572_s18 = sadd.s32 1, %s6514_s15  }
   0xe   : > { %11597 = sst [smem:[#allocation17_spill]] %s6572_s18  ;;  %s70_s19 = sadd.s32 1, %s6510_s14 }
   0xf   : > { %s67_s20 = ssub.s32 %s6514_s15, %s6572_s18  ;;  %p77_p0 = scmp.ne.s32.totalorder %s6510_s14, %s6506_s13 }
  0x10   : > { %p68_p1 = scmp.eq.s32.totalorder %s67_s20, 0  ;;  %p78_p2 = scmp.eq.s32.totalorder %s6514_s15, 0 }
  0x11   : > { %p83_p3 = scmp.ne.s32.totalorder %s6506_s13, %s6502_s12  ;;  %p11181_p4 = scmp.eq.s32.totalorder %s6568_s16, 0 }
  0x12   : > { %s6584_s21 = scalar_select %p68_p1, %s6510_s14, %s70_s19  }
  0x13   : > { %p6586_p5 = por %p78_p2, %p77_p0  ;;  %p6592_p6 = por %p11181_p4, %p83_p3 }
  0x14   : > { %11598 = sst [smem:[#allocation18_spill]] %s6584_s21  ;;  %p107_p7 = scmp.eq.s32.totalorder %s6568_s16, 1 }
  0x15   : > { %s11600_s23 = scalar_select %p6592_p6, 1, 0 }
  0x16   : > { %p113_p8 = scmp.eq.s32.totalorder %s4854_s17, 1  ;;  %p4855_p9 = scmp.ge.s32.totalorder %s6514_s15, 1 }
  0x17   : > { %p120_p10 = scmp.lt.s32.totalorder %s6514_s15, 3  ;;  %p6599_p11 = por %p107_p7, %p77_p0 }
  0x18   : > { %p6603_p12 = por %p113_p8, %p83_p3  ;;  %p6278_p4 = scmp.lt.s32.totalorder %s6514_s15, 2 }
  0x19   : > { %s11601_s24 = scalar_select %p6599_p11, 1, 0 }
  0x1a   : > { %s11602_s25 = scalar_select %p6603_p12, 1, 0 }
  0x1b   : > { %p6607_p13 = pnand %p4855_p9, %p120_p10  ;;  %s11605_s1 = sld [smem:[#allocation270_spill]] }
  0x1c   : > { %11603 = sst [smem:[#allocation19_spill]] %s11602_s25  ;;  %p11606_p0 = scmp.eq.s32.totalorder %s6568_s16, 0 }
  0x1d   : > { %s11604_s26 = scalar_select %p6607_p13, 1, 0 }
  0x1e   : > { %p6261_p2 = pneg %p6607_p13  ;;  %p6626_p3 = pnand %p6278_p4, %p6586_p5 }
  0x1f   : > { %s153_s5 = sand.u32 1, %s6510_s14   ;;  %s6516_s6 = smov [#allocation2]  }
  0x20   : > { %p6620_p7 = pnand %p6261_p2, %p11606_p0  ;;  %s11609_s0 = sld [smem:[#allocation269_spill]] }
  0x21   : > { %s142_s29 = sshll.u32 %s11605_s1, 4  ;;  %s143_s29 = int_to_ptr.vmem [resolvable:$true] %s142_s29 }
  0x22   : > { %s6399_s9 = scalar_lea.vmem %s143_s29, 16  ;;  %p6401_p9 = pneg %p6620_p7 }
  0x23   : > { %p6400_p8 = scmp.ne.s32.totalorder %s143_s29, %s6399_s9  ;;  %p6407_p0 = scmp.lt.s32.totalorder %s143_s29, %s143_s29 }
  0x24   : > { %p6408_p1 = scmp.lt.s32.totalorder %s6399_s9, %s6399_s9 }
  0x25   : > { %p6402_p10 = pnand %p6401_p9, %p6400_p8 }
  0x26   : > { %6264 = dma.hbm_to_smem (!%p6620_p7), %s11609_s0, 16, %s6516_s6, [#allocation5]  }
  0x27   : > { %p6403_p2 = pneg %p6402_p10  ;;  %p6409_p4 = por %p6408_p1, %p6407_p0 }
  0x29   : > { %p6410_p5 = pnand %p6409_p4, %p6403_p2 }
  0x2b   : > { %6413 = shalt.err (!%p6410_p5)
}
  0x2c   : > { %s6517_s10 = smov [#allocation7]   ;;  %s6244_s11 = smul.u32 192, %s153_s5 }
  0x2d   : > { %6267 = dma.vmem_to_smem (!%p6620_p7), %s143_s29, 16, %s6517_s10, [#allocation6]  }
  0x2e   : > { %s6245_s17 = smul.u32 3072, %s6514_s15  ;;  %s11610_s2 = sld [smem:[#allocation271_spill]] }
  0x2f   : > { %s157_s27 = scalar_lea.vmem [#allocation8], %s6244_s11  ;;  %s6648_s6 = scalar_lea.sflag [#allocation3], %s153_s5 }
  0x30   : > { %s164_s28 = sshll.u32 %s157_s27, 4  ;;  %p6416_p7 = pneg %p6626_p3  ;;  %s6646_s28 = int_to_ptr.vmem [resolvable:$true] %s164_s28 }
  0x34   : > { %s6644_s22 = scalar_lea.hbm %s11610_s2, %s6245_s17  ;;  %s6419_s8 = scalar_lea.hbm %s11610_s2, 6144 }
  0x35   : > { %s6414_s30 = scalar_lea.hbm %s6644_s22, 3072  ;;  %p6420_p10 = scmp.lt.s32.totalorder %s6644_s22, %s11610_s2 }
  0x36   : > { %p6415_p1 = scmp.ne.s32.totalorder %s6644_s22, %s6414_s30  ;;  %p6421_p2 = scmp.lt.s32.totalorder %s6419_s8, %s6414_s30 }
  0x38   : > { %p6417_p8 = pnand %p6416_p7, %p6415_p1  ;;  %p6422_p0 = por %p6421_p2, %p6420_p10 }
  0x3a   : > { %p6418_p9 = pneg %p6417_p8 }
  0x3c   : > { %p6423_p4 = pnand %p6422_p0, %p6418_p9 }
  0x3e   : > { %6426 = shalt.err (!%p6423_p4)
}
  0x3f   : > { %s6427_s5 = scalar_lea.vmem %s6646_s28, 3072  ;;  %s6518_s11 = smov [#allocation8]  }
  0x40   : > { %p6428_p5 = scmp.ne.s32.totalorder %s6646_s28, %s6427_s5  ;;  %s6432_s17 = sshll.u32 %s6518_s11, 4  ;;  %s6433_s17 = int_to_ptr.vmem [resolvable:$false] %s6432_s17 }
  0x41   : > { %s6434_s19 = scalar_lea.vmem %s6433_s17, 6144  ;;  %p6435_p8 = scmp.lt.s32.totalorder %s6646_s28, %s6433_s17 }
  0x42   : > { %p6430_p12 = pnand %p6428_p5, %p6416_p7  ;;  %p6436_p11 = scmp.lt.s32.totalorder %s6434_s19, %s6427_s5 }
  0x44   : > { %p6431_p1 = pneg %p6430_p12  ;;  %p6437_p6 = por %p6436_p11, %p6435_p8 }
  0x46   : > { %p6438_p13 = pnand %p6437_p6, %p6431_p1 }
  0x48   : > { %6441 = shalt.err (!%p6438_p13)
}
  0x49   : > { %s6519_s20 = smov 128   ;;  %s6520_s27 = smov 8  }
  0x4a   : > { %6271 = dma.hbm_to_vmem [thread:$0]  (!%p6626_p3), %s6644_s22, 3072, %s6646_s28, %s6648_s6, %s6519_s20, %s6519_s20, %s6520_s27  }
  0x4b   : > { %p11611_p7 = scmp.ne.s32.totalorder %s11604_s26, 0 }
  0x4d   : > { %176 = sbr.rel (%p11611_p7) target bundleno = 1393 (0x571), region = 32 }
  0x52   : > { %p11612_p12 = scmp.eq.s32.totalorder %s6568_s16, 0 }
  0x54   : > { %6485 = dma.done.wait (%p11612_p12), [#allocation5], 16   ;;  %p11613_p9 = pmov %p11612_p12 }
  0x56   : > { %6487 = vsyncadd (%p11613_p9), [#allocation5], 4294967280  ;;  %p11614_p6 = pmov %p11613_p9 }
  0x58   : > { %6489 = dma.done.wait (%p11614_p6), [#allocation6], 16   ;;  %p11615_p11 = pmov %p11614_p6 }
  0x59   : > { %s6680_s30 = sand.u32 1, %s6506_s13   ;;  %p11616_p13 = scmp.ne.s32.totalorder %s11600_s23, 0 }
  0x5a   : > { %6491 = vsyncadd (%p11615_p11), [#allocation6], 4294967280  ;;  %s6246_s26 = smul.u32 192, %s6680_s30  ;;  %s187_s4 = scalar_lea.sflag [#allocation3], %s6680_s30 }
  0x5c   : > { %s6684_s22 = scalar_lea.vmem [#allocation8], %s6246_s26 }
  0x5d   : > { %6493 = dma.done.wait (%p11616_p13), %s187_s4, 3072  }
  0x5e   : > { %6495 = vsyncadd (%p11616_p13), %s187_s4, 4294964224 }
  0x5f   : > { %195 = sfence }
  0x60   : > { %v6691_v0 = vld [vmem:[%s6684_s22 + $0x8] sm:$0xff]  ;;  %v6694_v1 = vld [vmem:[%s6684_s22] sm:$0xff]  ;;  %s11203_s28 = smov 127   ;;  %v214_v6 = vlaneseq  ;;  %v6721_v7 = vld [vmem:[%s6684_s22 + $0x50] sm:$0xff]  ;;  %v11623_v23 = vmov 0  ;;  %v11192_v26 = vmov 1.0  }
  0x61   : > { %413 = vrot.lane.b32.xlu1 %v6691_v0, %s11203_s28  ;;  %411 = vrot.lane.b32.xlu0 %v6694_v1, %s11203_s28  ;;  %v6701_v2 = vld [vmem:[%s6684_s22 + $0x48] sm:$0xff]  ;;  %v6704_v3 = vld [vmem:[%s6684_s22 + $0x40] sm:$0xff]  ;;  %v11627_v27 = vmov 0  ;;  %v11631_v30 = vmov 0  ;;  %v11634_v32 = vmov 0  ;;  %v11637_v33 = vmov 0 }
  0x62   : > { %v6711_v4 = vld [vmem:[%s6684_s22 + $0x88] sm:$0xff]  ;;  %v6714_v5 = vld [vmem:[%s6684_s22 + $0x80] sm:$0xff]  ;;  %v6724_v8 = vld [vmem:[%s6684_s22 + $0x10] sm:$0xff]  ;;  %v6726_v9 = vshrl.u32 %v214_v6, 7  ;;  %v6741_v13 = vand.u32 127, %v214_v6  ;;  %v11641_v40 = vmov 0 }
  0x63   : > { %v6733_v10 = vld [vmem:[%s6684_s22 + $0x58] sm:$0xff]  ;;  %v6763_v21 = vld [vmem:[%s6684_s22 + $0x90] sm:$0xff]  ;;  %v6808_v34 = vld [vmem:[%s6684_s22 + $0x60] sm:$0xff]  ;;  %v11644_v41 = vmov 0  ;;  %vm11185_vm7 = vcmask 1046528   ;;  %s6851_s23 = sld [smem:[#allocation2 + $0x4]] }
  0x64   : > { %11617 = vst [vmem:[#allocation20_spill] sm:$0xff] %v6726_v9  ;;  %v6736_v11 = vld [vmem:[%s6684_s22 + $0x18] sm:$0xff]  ;;  %v6739_v12 = vadd.s32 56, %v6726_v9  ;;  %11619 = vst [vmem:[#allocation22_spill] sm:$0xff] %v6741_v13  ;;  %v6744_v14 = vadd.s32 48, %v6726_v9  ;;  %v6747_v15 = vadd.s32 40, %v6726_v9 }
  0x65   : > { %911 = vrot.lane.b32.xlu1 %v6701_v2, %s11203_s28  ;;  %909 = vrot.lane.b32.xlu0 %v6704_v3, %s11203_s28  ;;  %v6750_v16 = vadd.s32 32, %v6726_v9  ;;  %v6760_v20 = vld [vmem:[%s6684_s22 + $0x98] sm:$0xff]  ;;  %v6771_v25 = vadd.s32 24, %v6726_v9  ;;  %v6783_v29 = vadd.s32 16, %v6726_v9  ;;  %v6811_v35 = vld [vmem:[%s6684_s22 + $0x20] sm:$0xff]  ;;  %v6828_v39 = vadd.s32 8, %v6726_v9 }
  0x66   : > { %11618 = vst [vmem:[#allocation21_spill] sm:$0xff] %v6739_v12  ;;  %11620 = vst [vmem:[#allocation23_spill] sm:$0xff] %v6744_v14  ;;  %v232_v17 = vmul.u32 2, %v6739_v12  ;;  %v231_v18 = vmul.u32 2, %v6744_v14  ;;  %v6854_v44 = vld [vmem:[%s6684_s22 + $0x68] sm:$0xff]  ;;  %v445_v46 = vrot.slane %v6694_v1, 1 }
  0x67   : > { %11621 = vst [vmem:[#allocation24_spill] sm:$0xff] %v6747_v15  ;;  %11622 = vst [vmem:[#allocation25_spill] sm:$0xff] %v6750_v16  ;;  %v230_v19 = vmul.u32 2, %v6747_v15  ;;  %v229_v28 = vmul.u32 2, %v6750_v16  ;;  %v6857_v45 = vld [vmem:[%s6684_s22 + $0x28] sm:$0xff]  ;;  %v446_v47 = vrot.slane %v6691_v0, 1 }
  0x68   : > { %v264_v22 = vadd.s32 1, %v232_v17  ;;  %vm6766_vm0 = vcmp.eq.s32.totalorder %v6741_v13, %v232_v17  ;;  %v263_v24 = vadd.s32 1, %v231_v18  ;;  %11626 = vst [vmem:[#allocation27_spill] sm:$0xff] %v6771_v25  ;;  %vm6777_vm1 = vcmp.eq.s32.totalorder %v6741_v13, %v231_v18  ;;  %11630 = vst [vmem:[#allocation29_spill] sm:$0xff] %v6783_v29  ;;  %s6867_s6 = sld [smem:[#allocation2 + $0x1f]]  ;;  %v6909_v55 = vld [vmem:[%s6684_s22 + $0xa8] sm:$0xff] }
  0x69   : > { %1503 = vrot.lane.b32.xlu1 %v6711_v4, %s11203_s28  ;;  %1501 = vrot.lane.b32.xlu0 %v6714_v5, %s11203_s28  ;;  %v11624_v23 = vsel %vm6766_vm0, 4294967295, %v11623_v23  ;;  %v11628_v27 = vsel %vm6777_vm1, 4294967295, %v11627_v27  ;;  %v262_v31 = vadd.s32 1, %v230_v19  ;;  %vm6803_vm4 = vcmp.eq.s32.totalorder %v6741_v13, %v230_v19  ;;  %11640 = vst [vmem:[#allocation33_spill] sm:$0xff] %v6828_v39  ;;  %s6886_s29 = sld [smem:[#allocation2 + $0x3a]]  ;;  %v6912_v56 = vld [vmem:[%s6684_s22 + $0xa0] sm:$0xff] }
  0x6a   : > { %11625 = vst [vmem:[#allocation26_spill] sm:$0xff] %v11624_v23  ;;  %5696 = vmatprep.subr.msk.mxu1 %vm6766_vm0, %v11192_v26  ;;  %11629 = vst [vmem:[#allocation28_spill] sm:$0xff] %v11628_v27  ;;  %vm6786_vm2 = vcmp.eq.s32.totalorder %v6741_v13, %v264_v22  ;;  %vm6798_vm3 = vcmp.eq.s32.totalorder %v6741_v13, %v263_v24  ;;  %v11638_v33 = vsel %vm6803_vm4, 4294967295, %v11637_v33  ;;  %v228_v36 = vmul.u32 2, %v6771_v25  ;;  %s7087_s7 = sld [smem:[#allocation2 + $0x3]]  ;;  %s11689_s0 = smov 127  }
  0x6b   : > { %v11632_v30 = vsel %vm6786_vm2, 4294967295, %v11631_v30  ;;  %5697 = vmatpush3.msk.msra.mxu1 %vm6766_vm0, %v11192_v26  ;;  %v11635_v32 = vsel %vm6798_vm3, 4294967295, %v11634_v32  ;;  %11639 = vst [vmem:[#allocation32_spill] sm:$0xff] %v11638_v33  ;;  %5668 = vmatprep.subr.msk.mxu0 %vm6786_vm2, %v11192_v26  ;;  %v261_v37 = vadd.s32 1, %v229_v28  ;;  %v227_v38 = vmul.u32 2, %v6783_v29  ;;  %s7105_s8 = sld [smem:[#allocation2 + $0xc]] }
  0x6c   : > { %11633 = vst [vmem:[#allocation30_spill] sm:$0xff] %v11632_v30  ;;  %11636 = vst [vmem:[#allocation31_spill] sm:$0xff] %v11635_v32  ;;  %5698 = vmatprep.subr.msk.mxu1 %vm6777_vm1, %v11192_v26  ;;  %5669 = vmatpush3.msk.msra.mxu0 %vm6786_vm2, %v11192_v26  ;;  %vm6834_vm5 = vcmp.eq.s32.totalorder %v6741_v13, %v262_v31  ;;  %vm6842_vm6 = vcmp.eq.s32.totalorder %v6741_v13, %v229_v28  ;;  %v260_v42 = vadd.s32 1, %v228_v36  ;;  %v11647_v48 = vmov 0  ;;  %s7110_s9 = sld [smem:[#allocation2 + $0xe]]  ;;  %p12804_p10 = scmp.ne.s32.totalorder %s11601_s24, 0 }
  0x6d   : > { %913 = vrot.lane.b32.xlu1 %v6721_v7, %s11203_s28  ;;  %415 = vrot.lane.b32.xlu0 %v6724_v8, %s11203_s28  ;;  %v11642_v40 = vsel %vm6834_vm5, 4294967295, %v11641_v40  ;;  %v11645_v41 = vsel %vm6842_vm6, 4294967295, %v11644_v41  ;;  %v226_v43 = vmul.u32 2, %v6828_v39  ;;  %vm6873_vm8 = vcmp.eq.s32.totalorder %v6741_v13, %v261_v37  ;;  %s7115_s10 = sld [smem:[#allocation2 + $0x15]] }
  0x6e   : > { %5699 = vmatpush3.msk.msra.mxu1 %vm6777_vm1, %v11192_v26  ;;  %5670 = vmatprep.subr.msk.mxu0 %vm6798_vm3, %v11192_v26  ;;  %11643 = vst [vmem:[#allocation34_spill] sm:$0xff] %v11642_v40  ;;  %11646 = vst [vmem:[#allocation35_spill] sm:$0xff] %v11645_v41  ;;  %v11648_v48 = vsel %vm6873_vm8, 4294967295, %v11647_v48  ;;  %vm6881_vm9 = vcmp.eq.s32.totalorder %v6741_v13, %v228_v36  ;;  %v11650_v49 = vmov 0  ;;  %v259_v50 = vadd.s32 1, %v227_v38  ;;  %v6981_v36 = vld [vmem:[%s6684_s22 + $0x30] sm:$0xff] }
  0x6f   : > { %5700 = vmatprep.subr.msk.mxu1 %vm6803_vm4, %v11192_v26  ;;  %5671 = vmatpush3.msk.msra.mxu0 %vm6798_vm3, %v11192_v26  ;;  %11649 = vst [vmem:[#allocation36_spill] sm:$0xff] %v11648_v48  ;;  %v11651_v49 = vsel %vm6881_vm9, 4294967295, %v11650_v49  ;;  %v225_v51 = vmul.u32 2, %v6726_v9  ;;  %vm6899_vm10 = vcmp.eq.s32.totalorder %v6741_v13, %v260_v42  ;;  %v11653_v52 = vmov 0  ;;  %s7124_s5 = sld [smem:[#allocation2 + $0x17]] }
  0x70   : > { %5701 = vmatpush3.msk.msra.mxu1 %vm6803_vm4, %v11192_v26  ;;  %5672 = vmatprep.subr.msk.mxu0 %vm6834_vm5, %v11192_v26  ;;  %11652 = vst [vmem:[#allocation37_spill] sm:$0xff] %v11651_v49  ;;  %v11654_v52 = vsel %vm6899_vm10, 4294967295, %v11653_v52  ;;  %vm6904_vm11 = vcmp.eq.s32.totalorder %v6741_v13, %v227_v38  ;;  %v11656_v53 = vmov 0  ;;  %v258_v54 = vadd.s32 1, %v226_v43  ;;  %s7133_s11 = sld [smem:[#allocation2 + $0x1e]] }
  0x71   : > { %915 = vrot.lane.b32.xlu1 %v6733_v10, %s11203_s28  ;;  %417 = vrot.lane.b32.xlu0 %v6736_v11, %s11203_s28  ;;  %11655 = vst [vmem:[#allocation38_spill] sm:$0xff] %v11654_v52  ;;  %v11657_v53 = vsel %vm6904_vm11, 4294967295, %v11656_v53  ;;  %v6917_v57 = vsel %vm11185_vm7, %v445_v46, %v446_v47  ;;  %v941_v58 = vrot.slane %v6704_v3, 1  ;;  %v11188_v59 = vrot.slane %v6701_v2, 1  ;;  %s7139_s17 = sld [smem:[#allocation2 + $0x27]] }
  0x72   : > { %5702 = vmatprep.subr.msk.mxu1 %vm6842_vm6, %v11192_v26  ;;  %5673 = vmatpush3.msk.msra.mxu0 %vm6834_vm5, %v11192_v26  ;;  %11658 = vst [vmem:[#allocation39_spill] sm:$0xff] %v11657_v53  ;;  %11659 = vst [vmem:[#allocation40_spill] sm:$0xff] %v6917_v57  ;;  %vm6934_vm12 = vcmp.eq.s32.totalorder %v6741_v13, %v259_v50  ;;  %v11660_v60 = vmov 0  ;;  %vm6939_vm13 = vcmp.eq.s32.totalorder %v6741_v13, %v226_v43  ;;  %v11663_v61 = vmov 0  ;;  %s7145_s19 = sld [smem:[#allocation2 + $0x29]] }
  0x73   : > { %5703 = vmatpush3.msk.msra.mxu1 %vm6842_vm6, %v11192_v26  ;;  %5674 = vmatprep.subr.msk.mxu0 %vm6873_vm8, %v11192_v26  ;;  %v11661_v60 = vsel %vm6934_vm12, 4294967295, %v11660_v60  ;;  %v11664_v61 = vsel %vm6939_vm13, 4294967295, %v11663_v61  ;;  %v257_v62 = vadd.s32 1, %v225_v51  ;;  %v6944_v63 = vstv %s6851_s23  ;;  %s7154_s20 = sld [smem:[#allocation2 + $0x30]] }
  0x74   : > { %5704 = vmatprep.subr.msk.mxu1 %vm6881_vm9, %v11192_v26  ;;  %5675 = vmatpush3.msk.msra.mxu0 %vm6873_vm8, %v11192_v26  ;;  %11662 = vst [vmem:[#allocation41_spill] sm:$0xff] %v11661_v60  ;;  %11665 = vst [vmem:[#allocation42_spill] sm:$0xff] %v11664_v61  ;;  %vm6953_vm14 = vcmp.eq.s32.totalorder %v6741_v13, %v225_v51  ;;  %v11666_v6 = vmov 0  ;;  %v504_v17 = vmul.f32 %v6944_v63, %v6694_v1  ;;  %v6960_v18 = vstv %s6867_s6  ;;  %s7164_s27 = sld [smem:[#allocation2 + $0x32]] }
  0x75   : > { %1507 = vrot.lane.b32.xlu1 %v6760_v20, %s11203_s28  ;;  %1505 = vrot.lane.b32.xlu0 %v6763_v21, %s11203_s28  ;;  %v11667_v6 = vsel %vm6953_vm14, 4294967295, %v11666_v6  ;;  %v505_v19 = vmul.f32 %v6944_v63, %v6691_v0  ;;  %vm6969_vm15 = vcmp.eq.s32.totalorder %v6741_v13, %v258_v54  ;;  %v11669_v22 = vmov 0  ;;  %s7169_s26 = sld [smem:[#allocation2 + $0x39]] }
  0x76   : > { %5705 = vmatpush3.msk.msra.mxu1 %vm6881_vm9, %v11192_v26  ;;  %5676 = vmatprep.subr.msk.mxu0 %vm6899_vm10, %v11192_v26  ;;  %11668 = vst [vmem:[#allocation43_spill] sm:$0xff] %v11667_v6  ;;  %v11670_v22 = vsel %vm6969_vm15, 4294967295, %v11669_v22  ;;  %v1000_v24 = vmul.f32 %v6704_v3, %v6960_v18  ;;  %v6976_v28 = vstv %s6886_s29  ;;  %v1001_v31 = vmul.f32 %v6701_v2, %v6960_v18  ;;  %s7174_s4 = sld [smem:[#allocation2 + $0x42]] }
  0x77   : > { %5706 = vmatprep.subr.msk.mxu1 %vm6904_vm11, %v11192_v26  ;;  %11671 = vst [vmem:[#allocation44_spill] sm:$0xff] %v11670_v22  ;;  %5677 = vmatpush3.msk.msra.mxu0 %vm6899_vm10, %v11192_v26  ;;  %v1592_v37 = vmul.f32 %v6714_v5, %v6976_v28  ;;  %v1593_v38 = vmul.f32 %v6711_v4, %v6976_v28  ;;  %vm11200_vm10 = vcmask 523264   ;;  %v11681_v15 = vmov 1.0   ;;  %s7185_s23 = sld [smem:[#allocation2 + $0x44]] }
  0x78   : > { %5707 = vmatpush3.msk.msra.mxu1 %vm6904_vm11, %v11192_v26  ;;  %v506_v42 = vmul.f32 %v6944_v63, %v6724_v8  ;;  %5678 = vmatprep.subr.msk.mxu0 %vm6934_vm12, %v11192_v26  ;;  %v1128_v43 = vadd.f32 %v1000_v24, %v504_v17  ;;  %v1129_v46 = vadd.f32 %v1001_v31, %v505_v19  ;;  %v7026_v24 = vld [vmem:[%s6684_s22 + $0x70] sm:$0xff]  ;;  %v11191_v31 = vrot.slane %v6724_v8, 1  ;;  %s7197_s6 = sld [smem:[#allocation2 + $0x4b]] }
  0x79   : > { %917 = vrot.lane.b32.xlu1 %v6808_v34, %s11203_s28  ;;  %419 = vrot.lane.b32.xlu0 %v6811_v35, %s11203_s28  ;;  %v1002_v50 = vmul.f32 %v6721_v7, %v6960_v18  ;;  %v7006_v51 = vsel %vm11185_vm7, %v941_v58, %v11188_v59  ;;  %v1594_v54 = vmul.f32 %v6763_v21, %v6976_v28  ;;  %v11673_v58 = vmov 0  ;;  %s7202_s29 = sld [smem:[#allocation2 + $0x4d]] }
  0x7a   : > { %5708 = vmatprep.subr.msk.mxu1 %vm6939_vm13, %v11192_v26  ;;  %11672 = vst [vmem:[#allocation45_spill] sm:$0xff] %v7006_v51  ;;  %5679 = vmatpush3.msk.msra.mxu0 %vm6934_vm12, %v11192_v26  ;;  %vm7021_vm7 = vcmp.eq.s32.totalorder %v6741_v13, %v257_v62  ;;  %v1720_v17 = vadd.f32 %v1592_v37, %v1128_v43  ;;  %v1540_v33 = vrot.slane %v6912_v56, 1  ;;  %v454_v27 = vrot.slane %v6857_v45, 1  ;;  %s7225_s1 = sld [smem:[#allocation2 + $0x20]] }
  0x7b   : > { %5709 = vmatpush3.msk.msra.mxu1 %vm6939_vm13, %v11192_v26  ;;  %v11674_v58 = vsel %vm7021_vm7, 4294967295, %v11673_v58  ;;  %v1130_v19 = vadd.f32 %v1002_v50, %v506_v42  ;;  %5680 = vmatprep.subr.msk.mxu0 %vm6969_vm15, %v11192_v26  ;;  %v1721_v62 = vadd.f32 %v1593_v38, %v1129_v46  ;;  %v507_v59 = vmul.f32 %v6944_v63, %v6736_v11  ;;  %v7056_v46 = vld [vmem:[%s6684_s22 + $0x38] sm:$0xff]  ;;  %s7231_s2 = sld [smem:[#allocation2 + $0x3b]] }
  0x7c   : > { %11675 = vst [vmem:[#allocation46_spill] sm:$0xff] %v11674_v58  ;;  %5710 = vmatprep.subr.msk.mxu1 %vm6953_vm14, %v11192_v26  ;;  %v1003_v37 = vmul.f32 %v6733_v10, %v6960_v18  ;;  %5681 = vmatpush3.msk.msra.mxu0 %vm6969_vm15, %v11192_v26  ;;  %v1595_v43 = vmul.f32 %v6760_v20, %v6976_v28  ;;  %vm11676_vm15 = vcmask 1046528   ;;  %v950_v53 = vrot.slane %v6854_v44, 1  ;;  %s7237_s21 = sld [smem:[#allocation2]] }
  0x7d   : > { %919 = vrot.lane.b32.xlu1 %v6854_v44, %s11203_s28  ;;  %421 = vrot.lane.b32.xlu0 %v6857_v45, %s11203_s28  ;;  %v1722_v42 = vadd.f32 %v1594_v54, %v1130_v19  ;;  %v7063_v50 = vsel %vm11676_vm15, %v446_v47, %v11191_v31  ;;  %v944_v54 = vrot.slane %v6721_v7, 1  ;;  %v1004_v19 = vmul.f32 %v6808_v34, %v6960_v18  ;;  %s7249_s14 = sld [smem:[#allocation2 + $0x2]] }
  0x7e   : > { %5711 = vmatpush3.msk.msra.mxu1 %vm6953_vm14, %v11192_v26  ;;  %5682 = vmatprep.subr.msk.mxu0 %vm7021_vm7, %v11192_v26  ;;  %v1131_v38 = vadd.f32 %v1003_v37, %v507_v59  ;;  %11677 = vst [vmem:[#allocation47_spill] sm:$0xff] %v7063_v50  ;;  %v1596_v47 = vmul.f32 %v6912_v56, %v6976_v28  ;;  %v456_v23 = vrot.slane %v6981_v36, 1  ;;  %v952_v16 = vrot.slane %v7026_v24, 1  ;;  %s7263_s13 = sld [smem:[#allocation2 + $0x6]] }
  0x7f   : > { %5712 = vmatprep.mubr.msk.f32.mxu1 %vm11200_vm10, %v1720_v17  ;;  %5683 = vmatpush3.msk.msra.mxu0 %vm7021_vm7, %v11192_v26  ;;  %v508_v17 = vmul.f32 %v6944_v63, %v6811_v35  ;;  %v509_v37 = vmul.f32 %v6944_v63, %v6857_v45  ;;  %v1542_v25 = vrot.slane %v6909_v55, 1  ;;  %v1006_v29 = vmul.f32 %v7026_v24, %v6960_v18  ;;  %s7277_s18 = sld [smem:[#allocation2 + $0x8]] }
  0x80   : > { %5713 = vmatmul.mubr.msk.f32.vlgmr.msra.gmra.mxu1 %vm11200_vm10, %v1721_v62  ;;  %v1723_v59 = vadd.f32 %v1595_v43, %v1131_v38  ;;  %5724 = vmatprep.subr.msk.mxu0 %vm6786_vm2, %v11192_v26  ;;  %v7094_v43 = vld [vmem:[%s6684_s22 + $0x78] sm:$0xff]  ;;  %v11679_v38 = vrot.slane %v6701_v2, 1  ;;  %v458_v9 = vrot.slane %v7056_v46, 1  ;;  %s7291_s15 = sld [smem:[#allocation2 + $0x9]]  ;;  %v7329_v6 = vstv %s7115_s10 }
  0x81   : > { %1511 = vrot.lane.b32.xlu1 %v6909_v55, %s11203_s28  ;;  %1509 = vrot.lane.b32.xlu0 %v6912_v56, %s11203_s28  ;;  %v1132_v62 = vadd.f32 %v1004_v19, %v508_v17  ;;  %11678 = vst [vmem:[#allocation48_spill] sm:$0xff] %v7094_v43  ;;  %v1534_v17 = vrot.slane %v6711_v4, 1  ;;  %v1597_v19 = vmul.f32 %v6909_v55, %v6976_v28  ;;  %v954_v61 = vrot.slane %v7094_v43, 1  ;;  %s7305_s25 = sld [smem:[#allocation2 + $0xb]] }
  0x82   : > { %5715 = vmatprep.mubr.msk.f32.mxu1 %vm11200_vm10, %v1722_v42  ;;  %5752 = vmatprep.subr.msk.mxu1 %vm6766_vm0, %v11192_v26  ;;  %v1005_v42 = vmul.f32 %v6854_v44, %v6960_v18  ;;  %v7101_v31 = vsel %vm11676_vm15, %v11679_v38, %v944_v54  ;;  %v1533_v26 = vrot.slane %v6714_v5, 1  ;;  %v452_v38 = vrot.slane %v6811_v35, 1  ;;  %11721 = vst [vmem:[#allocation74_spill] sm:$0xff] %v7329_v6  ;;  %s7364_s10 = sld [smem:[#allocation2 + $0x1c]] }
  0x83   : > { %11680 = vst [vmem:[#allocation49_spill] sm:$0xff] %v7101_v31  ;;  %v1724_v14 = vadd.f32 %v1596_v47, %v1132_v62  ;;  %5753 = vmatpush3.msk.msra.mxu1 %vm6766_vm0, %v11681_v15  ;;  %v7127_v47 = vld [vmem:[%s6684_s22 + $0xb0] sm:$0xff]  ;;  %v7332_v40 = vstv %s7124_s5  ;;  %v511_v32 = vmul.f32 %v6944_v63, %v7056_v46  ;;  %v7358_v30 = vstv %s7185_s23  ;;  %s7384_s5 = sld [smem:[#allocation2 + $0x22]] }
  0x84   : > { %5716 = vmatmul.mubr.msk.f32.gmra.mxu1 %vm11200_vm10, %v1723_v59  ;;  %v1133_v12 = vadd.f32 %v1005_v42, %v509_v37  ;;  %5754 = vmatprep.subr.msk.mxu1 %vm6777_vm1, %v11681_v15  ;;  %v7130_v62 = vsel %vm11676_vm15, %v1533_v26, %v1534_v17  ;;  %v1536_v37 = vrot.slane %v6763_v21, 1  ;;  %v450_v26 = vrot.slane %v6736_v11, 1  ;;  %11722 = vst [vmem:[#allocation75_spill] sm:$0xff] %v7332_v40  ;;  %s7519_s23 = sld [smem:[#allocation2 + $0x23]] }
  0x85   : > { %423 = vrot.lane.b32.xlu0 %v6981_v36, %s11203_s28  ;;  %470 = vrot.lane.b32.xlu1 %v6917_v57, %s11203_s28  ;;  %11682 = vst [vmem:[#allocation50_spill] sm:$0xff] %v7130_v62  ;;  %v946_v42 = vrot.slane %v6733_v10, 1  ;;  %v1598_v39 = vmul.f32 %v7127_v47, %v6976_v28  ;;  %11729 = vst [vmem:[#allocation81_spill] sm:$0xff] %v7358_v30 }
  0x86   : > { %v1725_v59 = vadd.f32 %v1597_v19, %v1133_v12  ;;  %5718 = vmatprep.mubr.msk.f32.mxu1 %vm11200_vm10, %v1724_v14  ;;  %5755 = vmatpush3.msk.msra.mxu1 %vm6777_vm1, %v11681_v15  ;;  %v7157_v12 = vld [vmem:[%s6684_s22 + $0xb8] sm:$0xff]  ;;  %v7160_v14 = vsel %vm11676_vm15, %v1534_v17, %v1536_v37  ;;  %v948_v17 = vrot.slane %v6808_v34, 1  ;;  %v11685_v19 = vrot.slane %v6724_v8, 1 }
  0x87   : > { %5756 = vmatprep.subr.msk.mxu1 %vm6803_vm4, %v11681_v15  ;;  %11683 = vst [vmem:[#allocation51_spill] sm:$0xff] %v7157_v12  ;;  %11684 = vst [vmem:[#allocation52_spill] sm:$0xff] %v7160_v14  ;;  %v1546_v58 = vrot.slane %v7157_v12, 1 }
  0x88   : > { %5719 = vmatmul.mubr.msk.f32.gmra.mxu1 %vm11200_vm10, %v1725_v59  ;;  %v7190_v59 = vsel %vm11676_vm15, %v11685_v19, %v450_v26  ;;  %vm11687_vm10 = vmmov %vm11676_vm15  ;;  %v1538_v19 = vrot.slane %v6760_v20, 1 }
  0x89   : > { %921 = vrot.lane.b32.xlu0 %v7026_v24, %s11203_s28  ;;  %966 = vrot.lane.b32.xlu1 %v7006_v51, %s11203_s28  ;;  %11686 = vst [vmem:[#allocation53_spill] sm:$0xff] %v7190_v59  ;;  %v7195_v41 = vsel %vm11687_vm10, %v944_v54, %v946_v42  ;;  %v7218_v54 = vsel %vm11687_vm10, %v450_v26, %v452_v38  ;;  %vm11691_vm15 = vmmov %vm11687_vm10  ;;  %v1544_v26 = vrot.slane %v7127_v47, 1 }
  0x8a   : > { %5757 = vmatpush3.msk.msra.mxu1 %vm6803_vm4, %v11681_v15  ;;  %11688 = vst [vmem:[#allocation54_spill] sm:$0xff] %v7195_v41  ;;  %11690 = vst [vmem:[#allocation55_spill] sm:$0xff] %v7218_v54  ;;  %v7221_v49 = vsel %vm11691_vm15, %v946_v42, %v948_v17  ;;  %v510_v42 = vmul.f32 %v6944_v63, %v6981_v36  ;;  %v7259_v13 = vsel %vm11687_vm10, %v1536_v37, %v1538_v19 }
  0x8b   : > { %5758 = vmatprep.subr.msk.mxu1 %vm6842_vm6, %v11681_v15  ;;  %11692 = vst [vmem:[#allocation56_spill] sm:$0xff] %v7221_v49  ;;  %11693 = vst [vmem:[#allocation57_spill] sm:$0xff] %v7259_v13  ;;  %v7275_v37 = vsel %vm11687_vm10, %v454_v27, %v456_v23  ;;  %v7372_v63 = vmul.f32 %v7332_v40, %v6691_v0 }
  0x8c   : > { %5759 = vmatpush3.msk.msra.mxu1 %vm6842_vm6, %v11681_v15  ;;  %v1134_v22 = vadd.f32 %v1006_v29, %v510_v42  ;;  %vm11694_vm15 = vmmov %vm11687_vm10  ;;  %11700 = vst [vmem:[#allocation61_spill] sm:$0xff] %v7275_v37 }
  0x8d   : > { %425 = vrot.lane.b32.xlu0 %v7056_v46, %s11203_s28  ;;  %472 = vrot.lane.b32.xlu1 %v7063_v50, %s11203_s28  ;;  %v7266_v60 = vsel %vm11694_vm15, %v1538_v19, %v1540_v33  ;;  %11730 = vst [vmem:[#allocation82_spill] sm:$0xff] %v7372_v63  ;;  %v7406_v63 = vmul.f32 %v6711_v4, %v7358_v30 }
  0x8e   : > { %5760 = vmatprep.subr.msk.mxu1 %vm6881_vm9, %v11681_v15  ;;  %11695 = vst [vmem:[#allocation58_spill] sm:$0xff] %v7266_v60 }
  0x8f   : > { %5761 = vmatpush3.msk.msra.mxu1 %vm6881_vm9, %v11681_v15  ;;  %vm11701_vm9 = vmmov %vm11687_vm10  ;;  %11737 = vst [vmem:[#allocation89_spill] sm:$0xff] %v7406_v63 }
  0x90   : > { %5762 = vmatprep.subr.msk.mxu1 %vm6904_vm11, %v11681_v15  ;;  %v7283_v29 = vsel %vm11701_vm9, %v950_v53, %v952_v16  ;;  %vm11703_vm15 = vmmov %vm11701_vm9 }
  0x91   : > { %923 = vrot.lane.b32.xlu0 %v7094_v43, %s11203_s28  ;;  %968 = vrot.lane.b32.xlu1 %v7101_v31, %s11203_s28  ;;  %11702 = vst [vmem:[#allocation62_spill] sm:$0xff] %v7283_v29  ;;  %v7286_v19 = vsel %vm11703_vm15, %v1540_v33, %v1542_v25  ;;  %v7303_v33 = vstv %s7110_s9  ;;  %vm11714_vm15 = vmmov %vm11701_vm9  ;;  %s7338_s9 = sld [smem:[#allocation2 + $0x1]] }
  0x92   : > { %5763 = vmatpush3.msk.msra.mxu1 %vm6904_vm11, %v11681_v15  ;;  %vm11698_vm11 = vmmov %vm11687_vm10  ;;  %11704 = vst [vmem:[#allocation63_spill] sm:$0xff] %v7286_v19 }
  0x93   : > { %5764 = vmatprep.subr.msk.mxu1 %vm6939_vm13, %v11681_v15  ;;  %v7272_v48 = vsel %vm11698_vm11, %v948_v17, %v950_v53  ;;  %vm11707_vm11 = vmmov %vm11701_vm9  ;;  %v7300_v53 = vstv %s7087_s7  ;;  %11712 = vst [vmem:[#allocation68_spill] sm:$0xff] %v7303_v33  ;;  %s7323_s7 = sld [smem:[#allocation2 + $0xf]] }
  0x94   : > { %5765 = vmatpush3.msk.msra.mxu1 %vm6939_vm13, %v11681_v15  ;;  %vm11696_vm13 = vmmov %vm11687_vm10  ;;  %11699 = vst [vmem:[#allocation60_spill] sm:$0xff] %v7272_v48  ;;  %v7294_v17 = vsel %vm11707_vm11, %v456_v23, %v458_v9  ;;  %v7312_v23 = vsel %vm11701_vm9, %v952_v16, %v954_v61  ;;  %v7335_v16 = vstv %s7145_s19  ;;  %s7446_s19 = sld [smem:[#allocation2 + $0x14]] }
  0x95   : > { %1513 = vrot.lane.b32.xlu0 %v7127_v47, %s11203_s28  ;;  %1558 = vrot.lane.b32.xlu1 %v7130_v62, %s11203_s28  ;;  %v7269_v52 = vsel %vm11696_vm13, %v452_v38, %v454_v27  ;;  %vm11705_vm13 = vmmov %vm11701_vm9  ;;  %v1726_v27 = vadd.f32 %v1598_v39, %v1134_v22  ;;  %11708 = vst [vmem:[#allocation65_spill] sm:$0xff] %v7294_v17  ;;  %v7326_v22 = vstv %s7105_s8  ;;  %s7352_s8 = sld [smem:[#allocation2 + $0x7]] }
  0x96   : > { %5766 = vmatprep.subr.msk.mxu1 %vm6953_vm14, %v11681_v15  ;;  %11697 = vst [vmem:[#allocation59_spill] sm:$0xff] %v7269_v52  ;;  %v7289_v38 = vsel %vm11705_vm13, %v1542_v25, %v1544_v26  ;;  %vm11709_vm10 = vmmov %vm11701_vm9 }
  0x97   : > { %5767 = vmatpush3.msk.msra.mxu1 %vm6953_vm14, %v11681_v15  ;;  %11706 = vst [vmem:[#allocation64_spill] sm:$0xff] %v7289_v38  ;;  %v7297_v42 = vsel %vm11709_vm10, %v458_v9, 0.0  ;;  %11711 = vst [vmem:[#allocation67_spill] sm:$0xff] %v7300_v53  ;;  %v7315_v9 = vsel %vm11714_vm15, %v954_v61, 0.0  ;;  %vm11724_vm10 = vcmask 523264   ;;  %v7342_v61 = vmul.f32 %v7303_v33, %v6691_v0 }
  0x98   : > { %11710 = vst [vmem:[#allocation66_spill] sm:$0xff] %v7297_v42  ;;  %11713 = vst [vmem:[#allocation69_spill] sm:$0xff] %v7312_v23  ;;  %5721 = vmatprep.mubr.msk.f32.mxu1 %vm11724_vm10, %v1726_v27  ;;  %v7355_v27 = vstv %s7139_s17  ;;  %v1007_v15 = vmul.f32 %v7094_v43, %v6960_v18  ;;  %v1599_v33 = vmul.f32 %v7157_v12, %v6976_v28  ;;  %v7379_v53 = vstv %s7202_s29  ;;  %s7434_s17 = sld [smem:[#allocation2 + $0x12]] }
  0x99   : > { %1515 = vrot.lane.b32.xlu0 %v7157_v12, %s11203_s28  ;;  %1560 = vrot.lane.b32.xlu1 %v7160_v14, %s11203_s28  ;;  %s7208_s28 = sld [smem:[#allocation2 + $0x5]]  ;;  %11715 = vst [vmem:[#allocation70_spill] sm:$0xff] %v7315_v9  ;;  %vm11716_vm13 = vmmov %vm11701_vm9  ;;  %v7376_v18 = vmul.f32 %v6701_v2, %v7335_v16 }
  0x9a   : > { %v7318_v25 = vsel %vm11716_vm13, %v1544_v26, %v1546_v58  ;;  %vm11718_vm11 = vmmov %vm11701_vm9  ;;  %11720 = vst [vmem:[#allocation73_spill] sm:$0xff] %v7326_v22  ;;  %v7348_v26 = vstv %s7164_s27  ;;  %v1135_v40 = vadd.f32 %v1007_v15, %v511_v32  ;;  %s7480_s27 = sld [smem:[#allocation2 + $0x1b]] }
  0x9b   : > { %11717 = vst [vmem:[#allocation71_spill] sm:$0xff] %v7318_v25  ;;  %v7321_v39 = vsel %vm11718_vm11, %v1546_v58, 0.0  ;;  %11723 = vst [vmem:[#allocation76_spill] sm:$0xff] %v7335_v16  ;;  %v7345_v58 = vstv %s7133_s11  ;;  %s7396_s11 = sld [smem:[#allocation2 + $0x37]]  ;;  %v7399_v16 = vstv %s7169_s26  ;;  %vm435_vm11 = vcmask 515072  }
  0x9c   : > { %11719 = vst [vmem:[#allocation72_spill] sm:$0xff] %v7321_v39  ;;  %11725 = vst [vmem:[#allocation77_spill] sm:$0xff] %v7342_v61  ;;  %v7409_v61 = vstv %s7197_s6  ;;  %v1727_v32 = vadd.f32 %v1599_v33, %v1135_v40  ;;  %v7444_v33 = vstv %s7231_s2  ;;  %s7469_s2 = sld [smem:[#allocation2 + $0x1a]] }
  0x9d   : > { %474 = vrot.lane.b32.xlu0 %v7190_v59, %s11689_s0  ;;  %970 = vrot.lane.b32.xlu1 %v7195_v41, %s11689_s0  ;;  %11726 = vst [vmem:[#allocation78_spill] sm:$0xff] %v7345_v58  ;;  %11727 = vst [vmem:[#allocation79_spill] sm:$0xff] %v7348_v26  ;;  %v7387_v58 = vstv %s7154_s20  ;;  %s7460_s20 = sld [smem:[#allocation2 + $0x18]]  ;;  %v7503_v43 = vmul.f32 %v6714_v5, %v7444_v33  ;;  %v7507_v6 = vmul.f32 %v6711_v4, %v7444_v33 }
  0x9e   : > { %11728 = vst [vmem:[#allocation80_spill] sm:$0xff] %v7355_v27  ;;  %11731 = vst [vmem:[#allocation83_spill] sm:$0xff] %v7376_v18  ;;  %v7402_v18 = vstv %s7174_s4  ;;  %s7495_s26 = sld [smem:[#allocation2 + $0x1d]] }
  0x9f   : > { %11732 = vst [vmem:[#allocation84_spill] sm:$0xff] %v7379_v53  ;;  %v7382_v28 = vstv %s7208_s28  ;;  %11733 = vst [vmem:[#allocation85_spill] sm:$0xff] %v7387_v58  ;;  %s7411_s28 = sld [smem:[#allocation2 + $0x3d]] }
  0xa0   : > { %11735 = vst [vmem:[#allocation87_spill] sm:$0xff] %v7399_v16  ;;  %11736 = vst [vmem:[#allocation88_spill] sm:$0xff] %v7402_v18  ;;  %v7419_v15 = vmul.f32 %v7382_v28, %v6694_v1  ;;  %v7424_v18 = vstv %s7338_s9  ;;  %s7513_s4 = sld [smem:[#allocation2 + $0x21]] }
  0xa1   : > { %476 = vrot.lane.b32.xlu0 %v7218_v54, %s11689_s0  ;;  %972 = vrot.lane.b32.xlu1 %v7221_v49, %s11689_s0  ;;  %11738 = vst [vmem:[#allocation90_spill] sm:$0xff] %v7409_v61  ;;  %11741 = vst [vmem:[#allocation93_spill] sm:$0xff] %v7424_v18  ;;  %v542_v30 = vmul.f32 %v7424_v18, %v6917_v57  ;;  %v543_v40 = vmul.f32 %v7424_v18, %v7063_v50  ;;  %v7465_v61 = vstv %s7384_s5  ;;  %s7535_s6 = sld [smem:[#allocation2 + $0x24]] }
  0xa2   : > { %11740 = vst [vmem:[#allocation92_spill] sm:$0xff] %v7419_v15  ;;  %v7439_v15 = vstv %s7352_s8  ;;  %vm11744_vm9 = vmmov %vm11724_vm10  ;;  %v7474_v58 = vstv %s7396_s11  ;;  %s7547_s29 = sld [smem:[#allocation2 + $0x26]] }
  0xa3   : > { %11743 = vst [vmem:[#allocation95_spill] sm:$0xff] %v7439_v15  ;;  %5722 = vmatmul.mubr.msk.f32.gmra.mxu1 %vm11744_vm9, %v1727_v32  ;;  %11747 = vst [vmem:[#allocation98_spill] sm:$0xff] %v7465_v61  ;;  %s7745_s9 = sld [smem:[#allocation2 + $0x3c]] }
  0xa4   : > { %11748 = vst [vmem:[#allocation99_spill] sm:$0xff] %v7474_v58  ;;  %11751 = vst [vmem:[#allocation102_spill] sm:$0xff] %v7503_v43  ;;  %s7758_s8 = sld [smem:[#allocation2 + $0x3e]] }
  0xa5   : > { %1562 = vrot.lane.b32.xlu0 %v7259_v13, %s11689_s0  ;;  %1564 = vrot.lane.b32.xlu1 %v7266_v60, %s11689_s0  ;;  %v7485_v12 = vstv %s7411_s28  ;;  %11752 = vst [vmem:[#allocation103_spill] sm:$0xff] %v7507_v6  ;;  %vm11758_vm15 = vmmov %vm11744_vm9  ;;  %s7789_s5 = sld [smem:[#allocation2 + $0x41]] }
  0xa6   : > { %11749 = vst [vmem:[#allocation100_spill] sm:$0xff] %v7485_v12  ;;  %vm11762_vm13 = vmmov %vm11744_vm9  ;;  %s7799_s11 = sld [smem:[#allocation2 + $0x45]] }
  0xa7   : > { %s7809_s28 = sld [smem:[#allocation2 + $0x47]]  ;;  %vm11816_vm10 = vmmov %vm11744_vm9 }
  0xa9   : > { %478 = vrot.lane.b32.xlu0 %v7269_v52, %s11689_s0  ;;  %974 = vrot.lane.b32.xlu1 %v7272_v48, %s11689_s0  ;;  %v7391_v48 = vmul.f32 %v6701_v2, %v7348_v26  ;;  %v7394_v52 = vstv %s7225_s1  ;;  %v7415_v26 = vmul.f32 %v6711_v4, %v7379_v53  ;;  %s7421_s1 = sld [smem:[#allocation2 + $0x11]] }
  0xaa   : > { %v7432_v53 = vmul.f32 %v6704_v3, %v7394_v52 }
  0xab   : > { %11734 = vst [vmem:[#allocation86_spill] sm:$0xff] %v7391_v48  ;;  %11739 = vst [vmem:[#allocation91_spill] sm:$0xff] %v7415_v26  ;;  %v7458_v26 = vmul.f32 %v7382_v28, %v6691_v0  ;;  %v1048_v48 = vmul.f32 %v6704_v3, %v7465_v61 }
  0xac   : > { %11742 = vst [vmem:[#allocation94_spill] sm:$0xff] %v7432_v53  ;;  %v553_v53 = vmul.f32 %v7439_v15, %v6691_v0 }
  0xad   : > { %480 = vrot.lane.b32.xlu0 %v7275_v37, %s11689_s0  ;;  %976 = vrot.lane.b32.xlu1 %v7283_v29, %s11689_s0  ;;  %v552_v29 = vmul.f32 %v7439_v15, %v6694_v1  ;;  %v7452_v37 = vstv %s7364_s10  ;;  %11746 = vst [vmem:[#allocation97_spill] sm:$0xff] %v7458_v26  ;;  %v1630_v26 = vmul.f32 %v7474_v58, %v7130_v62  ;;  %s7775_s10 = sld [smem:[#allocation2 + $0x3f]] }
  0xae   : > { %11745 = vst [vmem:[#allocation96_spill] sm:$0xff] %v7452_v37  ;;  %v1038_v63 = vmul.f32 %v7452_v37, %v7006_v51  ;;  %v1039_v32 = vmul.f32 %v7452_v37, %v7101_v31  ;;  %v561_v27 = vadd.f32 %v553_v53, %v543_v40  ;;  %v7493_v53 = vmul.f32 %v6701_v2, %v7394_v52 }
  0xaf   : > { %v560_v16 = vadd.f32 %v552_v29, %v542_v30  ;;  %v1049_v30 = vmul.f32 %v6701_v2, %v7465_v61  ;;  %v1631_v29 = vmul.f32 %v7474_v58, %v7160_v14 }
  0xb0   : > { %11750 = vst [vmem:[#allocation101_spill] sm:$0xff] %v7493_v53  ;;  %v1056_v40 = vadd.f32 %v1048_v48, %v1038_v63  ;;  %v7511_v53 = vmul.f32 %v7382_v28, %v6724_v8  ;;  %v7517_v63 = vmul.f32 %v6721_v7, %v7394_v52 }
  0xb1   : > { %1566 = vrot.lane.b32.xlu0 %v7286_v19, %s11689_s0  ;;  %1568 = vrot.lane.b32.xlu1 %v7289_v38, %s11689_s0  ;;  %v1640_v38 = vmul.f32 %v6714_v5, %v7485_v12  ;;  %v1641_v19 = vmul.f32 %v6711_v4, %v7485_v12  ;;  %v1057_v48 = vadd.f32 %v1049_v30, %v1039_v32  ;;  %v7530_v30 = vstv %s7237_s21  ;;  %s7626_s21 = sld [smem:[#allocation2 + $0x2d]] }
  0xb2   : > { %11753 = vst [vmem:[#allocation104_spill] sm:$0xff] %v7517_v63  ;;  %v1144_v43 = vadd.f32 %v1056_v40, %v560_v16  ;;  %v7527_v32 = vmul.f32 %v6763_v21, %v7444_v33  ;;  %11754 = vst [vmem:[#allocation105_spill] sm:$0xff] %v7530_v30  ;;  %v7533_v63 = vstv %s7277_s18  ;;  %v7542_v16 = vstv %s7249_s14  ;;  %s7559_s18 = sld [smem:[#allocation2 + $0x2a]] }
  0xb3   : > { %v1648_v22 = vadd.f32 %v1640_v38, %v1630_v26  ;;  %v1649_v6 = vadd.f32 %v1641_v19, %v1631_v29  ;;  %v1145_v38 = vadd.f32 %v1057_v48, %v561_v27  ;;  %v7539_v19 = vmul.f32 %v7382_v28, %v6736_v11  ;;  %s7593_s14 = sld [smem:[#allocation2 + $0x2f]] }
  0xb4   : > { %v7545_v26 = vstv %s7305_s25  ;;  %v7551_v40 = vmul.f32 %v6733_v10, %v7394_v52  ;;  %v7554_v30 = vstv %s7263_s13  ;;  %v7563_v48 = vmul.f32 %v6760_v20, %v7444_v33  ;;  %s7575_s13 = sld [smem:[#allocation2 + $0x2c]] }
  0xb5   : > { %482 = vrot.lane.b32.xlu0 %v7294_v17, %s11689_s0  ;;  %978 = vrot.lane.b32.xlu1 %v7312_v23, %s11689_s0  ;;  %v1736_v29 = vadd.f32 %v1648_v22, %v1144_v43  ;;  %11755 = vst [vmem:[#allocation106_spill] sm:$0xff] %v7554_v30  ;;  %v7557_v23 = vstv %s7421_s1  ;;  %v1737_v27 = vadd.f32 %v1649_v6, %v1145_v38  ;;  %v7570_v43 = vstv %s7291_s15  ;;  %s7606_s15 = sld [smem:[#allocation2 + $0x35]] }
  0xb6   : > { %v7567_v17 = vmul.f32 %v7533_v63, %v6694_v1  ;;  %v7573_v22 = vstv %s7323_s7  ;;  %v7583_v6 = vstv %s7446_s19  ;;  %v7587_v38 = vmul.f32 %v7542_v16, %v6917_v57  ;;  %s7639_s25 = sld [smem:[#allocation2 + $0x33]] }
  0xb7   : > { %11757 = vst [vmem:[#allocation108_spill] sm:$0xff] %v7573_v22  ;;  %5768 = vmatprep.mubr.msk.f32.mxu1 %vm11758_vm15, %v1736_v29  ;;  %v7597_v29 = vmul.f32 %v7382_v28, %v6811_v35  ;;  %v7604_v30 = vstv %s7469_s2  ;;  %v7618_v35 = vstv %s7434_s17  ;;  %v7634_v22 = vmul.f32 %v7583_v6, %v6917_v57  ;;  %s7717_s7 = sld [smem:[#allocation2 + $0x38]]  ;;  %vm11905_vm15 = vmmov %vm11744_vm9 }
  0xb8   : > { %11756 = vst [vmem:[#allocation107_spill] sm:$0xff] %v7567_v17  ;;  %11759 = vst [vmem:[#allocation109_spill] sm:$0xff] %v7587_v38  ;;  %v7591_v17 = vmul.f32 %v7545_v26, %v6917_v57  ;;  %v7610_v38 = vmul.f32 %v6808_v34, %v7394_v52  ;;  %5769 = vmatmul.mubr.msk.f32.vlgmr.msra.gmra.mxu1 %vm11762_vm13, %v1737_v27  ;;  %v7630_v34 = vmul.f32 %v7382_v28, %v6857_v45  ;;  %s7819_s1 = sld [smem:[#allocation2 + $0x4a]] }
  0xb9   : > { %484 = vrot.lane.b32.xlu0 %v7297_v42, %s11689_s0  ;;  %980 = vrot.lane.b32.xlu1 %v7315_v9, %s11689_s0  ;;  %v7601_v9 = vmul.f32 %v7557_v23, %v6694_v1  ;;  %v7614_v42 = vmul.f32 %v6912_v56, %v7444_v33  ;;  %11763 = vst [vmem:[#allocation112_spill] sm:$0xff] %v7618_v35  ;;  %v7637_v56 = vstv %s7519_s23  ;;  %v7658_v57 = vstv %s7480_s27  ;;  %s7825_s17 = sld [smem:[#allocation2 + $0x48]]  ;;  %vm11908_vm13 = vmmov %vm11744_vm9 }
  0xba   : > { %11760 = vst [vmem:[#allocation110_spill] sm:$0xff] %v7591_v17  ;;  %v7621_v17 = vstv %s7460_s20  ;;  %11765 = vst [vmem:[#allocation114_spill] sm:$0xff] %v7637_v56  ;;  %v7643_v27 = vmul.f32 %v6854_v44, %v7394_v52  ;;  %v7655_v45 = vmul.f32 %v7604_v30, %v6694_v1  ;;  %v7662_v44 = vmul.f32 %v7542_v16, %v7063_v50  ;;  %s7837_s19 = sld [smem:[#allocation2 + $0x50]] }
  0xbb   : > { %11761 = vst [vmem:[#allocation111_spill] sm:$0xff] %v7601_v9  ;;  %11764 = vst [vmem:[#allocation113_spill] sm:$0xff] %v7621_v17  ;;  %v7624_v9 = vstv %s7495_s26  ;;  %v7647_v17 = vmul.f32 %v6909_v55, %v7444_v33  ;;  %v7666_v55 = vmul.f32 %v7533_v63, %v6691_v0  ;;  %v7677_v1 = vmul.f32 %v7545_v26, %v7063_v50  ;;  %s7854_s20 = sld [smem:[#allocation2 + $0x4e]] }
  0xbc   : > { %11766 = vst [vmem:[#allocation115_spill] sm:$0xff] %v7655_v45  ;;  %11767 = vst [vmem:[#allocation116_spill] sm:$0xff] %v7658_v57  ;;  %v7681_v45 = vmul.f32 %v7557_v23, %v6691_v0  ;;  %v7685_v57 = vmul.f32 %v6704_v3, %v7637_v56  ;;  %s4919_s2 = sld [smem:[#allocation2 + $0xd]] }
  0xbd   : > { %1570 = vrot.lane.b32.xlu0 %v7318_v25, %s11689_s0  ;;  %1572 = vrot.lane.b32.xlu1 %v7321_v39, %s11689_s0  ;;  %11768 = vst [vmem:[#allocation117_spill] sm:$0xff] %v7662_v44  ;;  %11769 = vst [vmem:[#allocation118_spill] sm:$0xff] %v7666_v55  ;;  %v7670_v25 = vmul.f32 %v7624_v9, %v7006_v51  ;;  %v7673_v39 = vstv %s7513_s4  ;;  %v7688_v55 = vstv %s7547_s29  ;;  %s7712_s0 = sld [smem:[#allocation2 + $0x36]] }
  0xbe   : > { %11771 = vst [vmem:[#allocation120_spill] sm:$0xff] %v7673_v39  ;;  %11772 = vst [vmem:[#allocation121_spill] sm:$0xff] %v7677_v1  ;;  %v7696_v44 = vmul.f32 %v7604_v30, %v6691_v0  ;;  %v7699_v1 = vstv %s7535_s6  ;;  %v7706_v39 = vmul.f32 %v7624_v9, %v7101_v31  ;;  %v7721_v0 = vmul.f32 %v7382_v28, %v6981_v36  ;;  %s4954_s27 = sld [smem:[#allocation2 + $0x28]] }
  0xbf   : > { %11770 = vst [vmem:[#allocation119_spill] sm:$0xff] %v7670_v25  ;;  %11773 = vst [vmem:[#allocation122_spill] sm:$0xff] %v7681_v45  ;;  %v7692_v25 = vmul.f32 %v7583_v6, %v7063_v50  ;;  %v7702_v45 = vstv %s7575_s13  ;;  %v7715_v50 = vstv %s7593_s14  ;;  %v7743_v36 = vmul.f32 %v7688_v55, %v7101_v31  ;;  %s4989_s26 = sld [smem:[#allocation2 + $0x43]] }
  0xc0   : > { %11774 = vst [vmem:[#allocation123_spill] sm:$0xff] %v7685_v57  ;;  %11775 = vst [vmem:[#allocation124_spill] sm:$0xff] %v7688_v55  ;;  %v7710_v57 = vmul.f32 %v6701_v2, %v7637_v56  ;;  %s9748_s4 = sld [smem:[#allocation2 + $0xa]] }
  0xc1   : > { %11776 = vst [vmem:[#allocation125_spill] sm:$0xff] %v7692_v25  ;;  %11777 = vst [vmem:[#allocation126_spill] sm:$0xff] %v7696_v44  ;;  %v7725_v44 = vmul.f32 %v7026_v24, %v7394_v52  ;;  %v7736_v25 = vstv %s7559_s18  ;;  %v7749_v24 = vmul.f32 %v6704_v3, %v7702_v45  ;;  %s9753_s23 = sld [smem:[#allocation2 + $0x10]] }
  0xc2   : > { %11778 = vst [vmem:[#allocation127_spill] sm:$0xff] %v7699_v1  ;;  %11779 = vst [vmem:[#allocation128_spill] sm:$0xff] %v7702_v45  ;;  %v7739_v1 = vstv %s7606_s15  ;;  %s9760_s6 = sld [smem:[#allocation2 + $0x25]]  ;;  %s6247_s15 = smul.u32 384, %s6680_s30 }
  0xc3   : > { %11780 = vst [vmem:[#allocation129_spill] sm:$0xff] %v7706_v39  ;;  %11781 = vst [vmem:[#allocation130_spill] sm:$0xff] %v7710_v57  ;;  %v7729_v39 = vmul.f32 %v7382_v28, %v7056_v46  ;;  %v7733_v57 = vmul.f32 %v7688_v55, %v7006_v51  ;;  %v7752_v46 = vstv %s7626_s21  ;;  %v7756_v28 = vmul.f32 %v6701_v2, %v7702_v45  ;;  %s9781_s29 = sld [smem:[#allocation2 + $0x2b]] }
  0xc4   : > { %11782 = vst [vmem:[#allocation131_spill] sm:$0xff] %v7715_v50  ;;  %11783 = vst [vmem:[#allocation132_spill] sm:$0xff] %v7721_v0  ;;  %v7766_v0 = vmul.f32 %v7715_v50, %v7006_v51  ;;  %v7787_v51 = vmul.f32 %v6701_v2, %v7739_v1  ;;  %v1040_v2 = vmul.f32 %v7452_v37, %v7195_v41  ;;  %s9804_s18 = sld [smem:[#allocation2 + $0x40]]  ;;  %s10317_s21 = scalar_lea.vmem [#allocation9], %s6247_s15 }
  0xc5   : > { %11784 = vst [vmem:[#allocation133_spill] sm:$0xff] %v7725_v44  ;;  %11785 = vst [vmem:[#allocation134_spill] sm:$0xff] %v7729_v39  ;;  %v7762_v39 = vmul.f32 %v7127_v47, %v7444_v33  ;;  %v7769_v44 = vstv %s7639_s25  ;;  %v7783_v47 = vmul.f32 %v6704_v3, %v7739_v1  ;;  %v544_v3 = vmul.f32 %v7424_v18, %v7190_v59  ;;  %s9816_s13 = sld [smem:[#allocation2 + $0x46]] }
  0xc6   : > { %11786 = vst [vmem:[#allocation135_spill] sm:$0xff] %v7733_v57  ;;  %11787 = vst [vmem:[#allocation136_spill] sm:$0xff] %v7736_v25  ;;  %v1041_v57 = vmul.f32 %v7452_v37, %v7221_v49  ;;  %s2979_s14 = sld [smem:[#allocation7]] }
  0xc7   : > { %11788 = vst [vmem:[#allocation137_spill] sm:$0xff] %v7739_v1  ;;  %11789 = vst [vmem:[#allocation138_spill] sm:$0xff] %v7743_v36  ;;  %s10412_s25 = sld [smem:[#allocation2 + $0x16]] }
  0xc8   : > { %11790 = vst [vmem:[#allocation139_spill] sm:$0xff] %v7749_v24  ;;  %11791 = vst [vmem:[#allocation140_spill] sm:$0xff] %v7752_v46  ;;  %v7773_v24 = vmul.f32 %v7715_v50, %v7101_v31  ;;  %v7793_v31 = vmul.f32 %v7533_v63, %v6724_v8 }
  0xc9   : > { %11792 = vst [vmem:[#allocation141_spill] sm:$0xff] %v7756_v28  ;;  %11793 = vst [vmem:[#allocation142_spill] sm:$0xff] %v7762_v39  ;;  %v7779_v28 = vmul.f32 %v7542_v16, %v7190_v59  ;;  %v7797_v39 = vmul.f32 %v7545_v26, %v7190_v59 }
  0xca   : > { %11794 = vst [vmem:[#allocation143_spill] sm:$0xff] %v7766_v0  ;;  %11795 = vst [vmem:[#allocation144_spill] sm:$0xff] %v7769_v44  ;;  %v1051_v44 = vmul.f32 %v6733_v10, %v7465_v61 }
  0xcb   : > { %11796 = vst [vmem:[#allocation145_spill] sm:$0xff] %v7773_v24  ;;  %11797 = vst [vmem:[#allocation146_spill] sm:$0xff] %v7779_v28  ;;  %v1050_v28 = vmul.f32 %v6721_v7, %v7465_v61  ;;  %v555_v24 = vmul.f32 %v7439_v15, %v6736_v11  ;;  %v7899_v61 = vmul.f32 %v7715_v50, %v7195_v41 }
  0xcc   : > { %11798 = vst [vmem:[#allocation147_spill] sm:$0xff] %v7783_v47  ;;  %11799 = vst [vmem:[#allocation148_spill] sm:$0xff] %v7787_v51  ;;  %v554_v47 = vmul.f32 %v7439_v15, %v6724_v8  ;;  %v545_v51 = vmul.f32 %v7424_v18, %v7218_v54  ;;  %v1633_v18 = vmul.f32 %v7474_v58, %v7266_v60 }
  0xcd   : > { %11800 = vst [vmem:[#allocation149_spill] sm:$0xff] %v7793_v31  ;;  %11801 = vst [vmem:[#allocation150_spill] sm:$0xff] %v7797_v39  ;;  %v1632_v31 = vmul.f32 %v7474_v58, %v7259_v13  ;;  %v1642_v39 = vmul.f32 %v6763_v21, %v7485_v12  ;;  %v1058_v0 = vadd.f32 %v1050_v28, %v1040_v2  ;;  %v7832_v28 = vstv %s7712_s0  ;;  %s10421_s0 = sld [smem:[#allocation2 + $0x31]] }
  0xce   : > { %v562_v36 = vadd.f32 %v554_v47, %v544_v3  ;;  %v563_v46 = vadd.f32 %v555_v24, %v545_v51  ;;  %v1643_v15 = vmul.f32 %v6760_v20, %v7485_v12  ;;  %11802 = vst [vmem:[#allocation151_spill] sm:$0xff] %v7832_v28  ;;  %v7835_v47 = vstv %s7717_s7  ;;  %11820 = vst [vmem:[#allocation168_spill] sm:$0xff] %v7899_v61  ;;  %v11875_v28 = vld [vmem:[#allocation90_spill] sm:$0xff]  ;;  %s10438_s7 = sld [smem:[#allocation2 + $0x4c]] }
  0xcf   : > { %v1650_v25 = vadd.f32 %v1642_v39, %v1632_v31  ;;  %11803 = vst [vmem:[#allocation152_spill] sm:$0xff] %v7835_v47  ;;  %v1059_v2 = vadd.f32 %v1051_v44, %v1041_v57  ;;  %v7841_v31 = vmul.f32 %v7557_v23, %v6724_v8  ;;  %v7845_v51 = vmul.f32 %v7583_v6, %v7190_v59 }
  0xd0   : > { %v1146_v3 = vadd.f32 %v1058_v0, %v562_v36  ;;  %v7849_v20 = vmul.f32 %v7604_v30, %v6724_v8  ;;  %v1651_v39 = vadd.f32 %v1643_v15, %v1633_v18  ;;  %v7852_v24 = vstv %s7758_s8  ;;  %s10543_s8 = sld [smem:[#allocation2 + $0x19]] }
  0xd1   : > { %11804 = vst [vmem:[#allocation153_spill] sm:$0xff] %v7841_v31  ;;  %11805 = vst [vmem:[#allocation154_spill] sm:$0xff] %v7845_v51  ;;  %v7858_v57 = vmul.f32 %v7624_v9, %v7195_v41  ;;  %v1147_v0 = vadd.f32 %v1059_v2, %v563_v46  ;;  %v7862_v36 = vmul.f32 %v7835_v47, %v7130_v62  ;;  %v7865_v8 = vstv %s7745_s9  ;;  %v11867_v51 = vld [vmem:[#allocation78_spill] sm:$0xff]  ;;  %s10521_s9 = sld [smem:[#allocation2 + $0x13]] }
  0xd2   : > { %11806 = vst [vmem:[#allocation155_spill] sm:$0xff] %v7849_v20  ;;  %11807 = vst [vmem:[#allocation156_spill] sm:$0xff] %v7852_v24  ;;  %v1738_v44 = vadd.f32 %v1650_v25, %v1146_v3  ;;  %v7868_v18 = vstv %s7789_s5  ;;  %v7872_v15 = vmul.f32 %v7835_v47, %v7160_v14  ;;  %v7876_v59 = vmul.f32 %v6721_v7, %v7637_v56  ;;  %s10575_s5 = sld [smem:[#allocation2 + $0x34]] }
  0xd3   : > { %11808 = vst [vmem:[#allocation157_spill] sm:$0xff] %v7858_v57  ;;  %11809 = vst [vmem:[#allocation158_spill] sm:$0xff] %v7862_v36  ;;  %v7880_v25 = vmul.f32 %v7688_v55, %v7195_v41  ;;  %v7884_v46 = vmul.f32 %v6721_v7, %v7702_v45  ;;  %v1739_v3 = vadd.f32 %v1651_v39, %v1147_v0  ;;  %v7892_v12 = vstv %s7775_s10  ;;  %v414_v57 = vpop.permute.xlu1 %413  ;;  %s10563_s10 = sld [smem:[#allocation2 + $0x2e]] }
  0xd4   : > { %11810 = vst [vmem:[#allocation159_spill] sm:$0xff] %v7865_v8  ;;  %11811 = vst [vmem:[#allocation160_spill] sm:$0xff] %v7868_v18  ;;  %5771 = vmatprep.mubr.msk.f32.mxu1 %vm11816_vm10, %v1738_v44  ;;  %v7889_v2 = vmul.f32 %v6714_v5, %v7852_v24  ;;  %v7895_v58 = vstv %s7809_s28  ;;  %v7903_v37 = vmul.f32 %v7868_v18, %v7130_v62  ;;  %v7906_v44 = vstv %s7819_s1  ;;  %v11882_v8 = vld [vmem:[#allocation91_spill] sm:$0xff]  ;;  %s10647_s28 = sld [smem:[#allocation2 + $0x4f]] }
  0xd5   : > { %11812 = vst [vmem:[#allocation161_spill] sm:$0xff] %v7872_v15  ;;  %11813 = vst [vmem:[#allocation162_spill] sm:$0xff] %v7876_v59  ;;  %v7910_v39 = vmul.f32 %v6711_v4, %v7852_v24  ;;  %v7914_v0 = vmul.f32 %v6721_v7, %v7739_v1  ;;  %5772 = vmatmul.mubr.msk.f32.gmra.mxu1 %vm11744_vm9, %v1739_v3  ;;  %v7922_v41 = vmul.f32 %v7868_v18, %v7160_v14  ;;  %v11870_v15 = vld [vmem:[#allocation67_spill] sm:$0xff]  ;;  %s5312_s1 = sld [smem:[#allocation7 + $0x2]] }
  0xd6   : > { %11814 = vst [vmem:[#allocation163_spill] sm:$0xff] %v7880_v25  ;;  %11815 = vst [vmem:[#allocation164_spill] sm:$0xff] %v7884_v46  ;;  %v7918_v46 = vstv %s7799_s11  ;;  %v7926_v20 = vmul.f32 %v7542_v16, %v7218_v54  ;;  %v7930_v31 = vmul.f32 %v7533_v63, %v6736_v11  ;;  %v7934_v7 = vmul.f32 %v6714_v5, %v7895_v58  ;;  %v6324_v25 = vld [vmem:[%s6684_s22 + $0x58] sm:$0xff]  ;;  %s10628_s11 = sld [smem:[#allocation2 + $0x49]] }
  0xd7   : > { %11817 = vst [vmem:[#allocation165_spill] sm:$0xff] %v7889_v2  ;;  %11818 = vst [vmem:[#allocation166_spill] sm:$0xff] %v7892_v12  ;;  %v7937_v3 = vstv %s7825_s17  ;;  %v7944_v59 = vmul.f32 %v6711_v4, %v7895_v58  ;;  %v412_v2 = vpop.permute.xlu0 %411  ;;  %v7960_v61 = vmul.f32 %v7583_v6, %v7218_v54  ;;  %v7963_v4 = vsel %vm435_vm11, %v414_v57, 0.0  ;;  %s6248_s17 = smul.u32 6144, %s6568_s16  ;;  %s4744_s16 = scalar_lea.sflag [#allocation4], %s6680_s30 }
  0xd8   : > { %11819 = vst [vmem:[#allocation167_spill] sm:$0xff] %v7895_v58  ;;  %11821 = vst [vmem:[#allocation169_spill] sm:$0xff] %v7903_v37  ;;  %v7966_v36 = vstv %s7854_s20  ;;  %v7986_v57 = vmul.f32 %v6733_v10, %v7637_v56  ;;  %v6326_v37 = vld [vmem:[%s6684_s22] sm:$0xff] }
  0xd9   : > { %11822 = vst [vmem:[#allocation170_spill] sm:$0xff] %v7906_v44  ;;  %11823 = vst [vmem:[#allocation171_spill] sm:$0xff] %v7910_v39  ;;  %v912_v39 = vpop.permute.xlu1 %911 }
  0xda   : > { %11824 = vst [vmem:[#allocation172_spill] sm:$0xff] %v7914_v0  ;;  %11825 = vst [vmem:[#allocation173_spill] sm:$0xff] %v7918_v46  ;;  %v7940_v0 = vstv %s7837_s19  ;;  %s4757_s19 = sshll.u32 %s10317_s21, 4  ;;  %s11133_s19 = int_to_ptr.vmem [resolvable:$true] %s4757_s19 }
  0xdb   : > { %11826 = vst [vmem:[#allocation174_spill] sm:$0xff] %v7922_v41  ;;  %11827 = vst [vmem:[#allocation175_spill] sm:$0xff] %v7926_v20  ;;  %v7948_v20 = vmul.f32 %v7906_v44, %v7130_v62  ;;  %v7970_v62 = vmul.f32 %v7906_v44, %v7160_v14  ;;  %v7990_v14 = vmul.f32 %v7688_v55, %v7221_v49 }
  0xdc   : > { %11828 = vst [vmem:[#allocation176_spill] sm:$0xff] %v7930_v31  ;;  %11829 = vst [vmem:[#allocation177_spill] sm:$0xff] %v7934_v7  ;;  %v7952_v31 = vmul.f32 %v7545_v26, %v7218_v54  ;;  %v7956_v7 = vmul.f32 %v7557_v23, %v6736_v11  ;;  %v7982_v54 = vmul.f32 %v7624_v9, %v7221_v49 }
  0xdd   : > { %11830 = vst [vmem:[#allocation178_spill] sm:$0xff] %v7937_v3  ;;  %11831 = vst [vmem:[#allocation179_spill] sm:$0xff] %v7940_v0  ;;  %v11877_v3 = vld [vmem:[#allocation68_spill] sm:$0xff] }
  0xde   : > { %11832 = vst [vmem:[#allocation180_spill] sm:$0xff] %v7944_v59  ;;  %11833 = vst [vmem:[#allocation181_spill] sm:$0xff] %v7948_v20 }
  0xdf   : > { %11834 = vst [vmem:[#allocation182_spill] sm:$0xff] %v7952_v31  ;;  %11835 = vst [vmem:[#allocation183_spill] sm:$0xff] %v7956_v7  ;;  %v7974_v31 = vmul.f32 %v7604_v30, %v6736_v11  ;;  %v7978_v7 = vmul.f32 %v6714_v5, %v7940_v0  ;;  %v8000_v5 = vmul.f32 %v6733_v10, %v7702_v45  ;;  %v11852_v10 = vld [vmem:[#allocation51_spill] sm:$0xff] }
  0xe0   : > { %11836 = vst [vmem:[#allocation184_spill] sm:$0xff] %v7960_v61  ;;  %11837 = vst [vmem:[#allocation185_spill] sm:$0xff] %v7966_v36  ;;  %v11844_v61 = vld [vmem:[#allocation73_spill] sm:$0xff] }
  0xe1   : > { %11838 = vst [vmem:[#allocation186_spill] sm:$0xff] %v7970_v62  ;;  %11839 = vst [vmem:[#allocation187_spill] sm:$0xff] %v7974_v31  ;;  %v645_v11 = vmul.f32 %v11844_v61, %v7963_v4  ;;  %v6323_v31 = vld [vmem:[%s6684_s22 + $0x88] sm:$0xff]  ;;  %v8010_v61 = vmul.f32 %v6324_v25, %v7739_v1  ;;  %v8033_v25 = vmul.f32 %v7868_v18, %v7259_v13 }
  0xe2   : > { %11840 = vst [vmem:[#allocation188_spill] sm:$0xff] %v7978_v7  ;;  %11841 = vst [vmem:[#allocation189_spill] sm:$0xff] %v7982_v54  ;;  %v7996_v59 = vmul.f32 %v6323_v31, %v7940_v0  ;;  %v8004_v7 = vmul.f32 %v7715_v50, %v7221_v49  ;;  %v11850_v31 = vld [vmem:[#allocation48_spill] sm:$0xff]  ;;  %v8021_v49 = vsel %vm435_vm11, %v912_v39, 0.0  ;;  %v11880_v36 = vld [vmem:[#allocation101_spill] sm:$0xff] }
  0xe3   : > { %11842 = vst [vmem:[#allocation190_spill] sm:$0xff] %v7986_v57  ;;  %11843 = vst [vmem:[#allocation191_spill] sm:$0xff] %v7990_v14  ;;  %v11848_v57 = vld [vmem:[#allocation74_spill] sm:$0xff]  ;;  %v910_v14 = vpop.permute.xlu0 %909  ;;  %v1011_v62 = vmul.f32 %v11867_v51, %v8021_v49 }
  0xe4   : > { %11845 = vst [vmem:[#allocation192_spill] sm:$0xff] %v7996_v59  ;;  %11846 = vst [vmem:[#allocation193_spill] sm:$0xff] %v8000_v5  ;;  %v775_v54 = vmul.f32 %v11848_v57, %v7963_v4  ;;  %v8014_v59 = vmul.f32 %v11850_v31, %v7394_v52  ;;  %v8018_v5 = vmul.f32 %v11852_v10, %v7444_v33  ;;  %v11858_v52 = vld [vmem:[#allocation80_spill] sm:$0xff]  ;;  %v11859_v33 = vld [vmem:[#allocation85_spill] sm:$0xff]  ;;  %v8040_v39 = vsel %vm435_vm11, %v910_v14, 0.0 }
  0xe5   : > { %11847 = vst [vmem:[#allocation194_spill] sm:$0xff] %v8004_v7  ;;  %11849 = vst [vmem:[#allocation195_spill] sm:$0xff] %v8010_v61  ;;  %v8025_v57 = vmul.f32 %v7835_v47, %v7259_v13  ;;  %v8029_v7 = vmul.f32 %v6763_v21, %v7852_v24  ;;  %v1173_v31 = vmul.f32 %v11858_v52, %v8021_v49  ;;  %v6325_v52 = vld [vmem:[%s6684_s22 + $0x90] sm:$0xff] }
  0xe6   : > { %11851 = vst [vmem:[#allocation48_spill] sm:$0xff] %v8014_v59  ;;  %11853 = vst [vmem:[#allocation51_spill] sm:$0xff] %v8018_v5  ;;  %v1335_v10 = vmul.f32 %v11859_v33, %v8021_v49  ;;  %v8044_v61 = vmul.f32 %v6763_v21, %v7895_v58  ;;  %v8056_v59 = vmul.f32 %v6325_v52, %v7940_v0  ;;  %v11866_v33 = vld [vmem:[#allocation82_spill] sm:$0xff]  ;;  %v11868_v21 = vld [vmem:[#allocation83_spill] sm:$0xff] }
  0xe7   : > { %11854 = vst [vmem:[#allocation196_spill] sm:$0xff] %v8021_v49  ;;  %11855 = vst [vmem:[#allocation197_spill] sm:$0xff] %v8025_v57  ;;  %v11862_v57 = vld [vmem:[#allocation77_spill] sm:$0xff]  ;;  %v793_v14 = vadd.f32 %v11866_v33, %v775_v54  ;;  %v1502_v41 = vpop.permute.xlu0 %1501  ;;  %v1010_v54 = vmul.f32 %v11867_v51, %v8040_v39 }
  0xe8   : > { %11856 = vst [vmem:[#allocation198_spill] sm:$0xff] %v8029_v7  ;;  %11857 = vst [vmem:[#allocation199_spill] sm:$0xff] %v8033_v25  ;;  %v663_v5 = vadd.f32 %v11862_v57, %v645_v11  ;;  %v8048_v7 = vsel %vm435_vm11, %v412_v2, 0.0  ;;  %v8052_v25 = vmul.f32 %v7906_v44, %v7259_v13  ;;  %v11869_v57 = vld [vmem:[#allocation86_spill] sm:$0xff]  ;;  %v1504_v2 = vpop.permute.xlu1 %1503  ;;  %v515_v13 = vmul.f32 %v11870_v15, %v7963_v4 }
  0xe9   : > { %11860 = vst [vmem:[#allocation200_spill] sm:$0xff] %v8040_v39  ;;  %11861 = vst [vmem:[#allocation201_spill] sm:$0xff] %v8044_v61  ;;  %v1191_v61 = vadd.f32 %v11868_v21, %v1173_v31  ;;  %v1353_v11 = vadd.f32 %v11869_v57, %v1335_v10  ;;  %v8069_v52 = vsel %vm435_vm11, %v1502_v41, 0.0  ;;  %v11873_v31 = vld [vmem:[#allocation87_spill] sm:$0xff]  ;;  %v11874_v21 = vld [vmem:[#allocation88_spill] sm:$0xff]  ;;  %v8083_v41 = vmul.f32 %v7835_v47, %v7266_v60 }
  0xea   : > { %11863 = vst [vmem:[#allocation77_spill] sm:$0xff] %v8048_v7  ;;  %11864 = vst [vmem:[#allocation202_spill] sm:$0xff] %v8052_v25  ;;  %v8066_v25 = vsel %vm435_vm11, %v1504_v2, 0.0  ;;  %v514_v2 = vmul.f32 %v11870_v15, %v8048_v7  ;;  %v11888_v39 = vld [vmem:[#allocation103_spill] sm:$0xff] }
  0xeb   : > { %11865 = vst [vmem:[#allocation203_spill] sm:$0xff] %v8056_v59  ;;  %11871 = vst [vmem:[#allocation82_spill] sm:$0xff] %v8066_v25  ;;  %v1299_v33 = vadd.f32 %v1191_v61, %v663_v5  ;;  %v1461_v59 = vadd.f32 %v1353_v11, %v793_v14  ;;  %v1603_v10 = vmul.f32 %v11873_v31, %v8066_v25  ;;  %v11879_v5 = vld [vmem:[#allocation89_spill] sm:$0xff]  ;;  %v416_v12 = vpop.permute.xlu0 %415 }
  0xec   : > { %11872 = vst [vmem:[#allocation78_spill] sm:$0xff] %v8069_v52  ;;  %v1765_v57 = vmul.f32 %v11874_v21, %v8066_v25  ;;  %v1927_v20 = vmul.f32 %v11875_v28, %v8066_v25  ;;  %11876 = vst [vmem:[#allocation83_spill] sm:$0xff] %v8083_v41  ;;  %v8087_v61 = vmul.f32 %v6326_v37, %v11877_v3  ;;  %v914_v11 = vpop.permute.xlu1 %913  ;;  %v6327_v25 = vld [vmem:[%s6684_s22 + $0x98] sm:$0xff]  ;;  %v8102_v37 = vsel %vm435_vm11, %v416_v12, 0.0 }
  0xed   : > { %v1602_v21 = vmul.f32 %v11873_v31, %v8069_v52  ;;  %v1029_v28 = vadd.f32 %v11880_v36, %v1011_v62  ;;  %v8095_v46 = vmul.f32 %v6327_v25, %v7852_v24  ;;  %v8099_v41 = vsel %vm435_vm11, %v914_v11, 0.0  ;;  %11884 = vst [vmem:[#allocation89_spill] sm:$0xff] %v8102_v37  ;;  %vm11937_vm10 = vmmov %vm11744_vm9 }
  0xee   : > { %11878 = vst [vmem:[#allocation86_spill] sm:$0xff] %v8087_v61  ;;  %v1783_v14 = vadd.f32 %v11879_v5, %v1765_v57  ;;  %v1945_v49 = vadd.f32 %v11882_v8, %v1927_v20  ;;  %11883 = vst [vmem:[#allocation87_spill] sm:$0xff] %v8099_v41  ;;  %v11885_v57 = vld [vmem:[#allocation94_spill] sm:$0xff]  ;;  %v11887_v61 = vld [vmem:[#allocation97_spill] sm:$0xff]  ;;  %v1621_v62 = vadd.f32 %v11888_v39, %v1603_v10 }
  0xef   : > { %11881 = vst [vmem:[#allocation67_spill] sm:$0xff] %v8095_v46  ;;  %v1028_v5 = vadd.f32 %v11885_v57, %v1010_v54  ;;  %v533_v52 = vadd.f32 %v11887_v61, %v515_v13  ;;  %v8111_v36 = vmul.f32 %v7868_v18, %v7266_v60  ;;  %v11891_v20 = vld [vmem:[#allocation92_spill] sm:$0xff]  ;;  %v8117_v11 = vmul.f32 %v6327_v25, %v7895_v58 }
  0xf0   : > { %v8105_v3 = vadd.f32 %v1783_v14, %v1299_v33  ;;  %v8113_v46 = vadd.f32 %v1945_v49, %v1461_v59  ;;  %v532_v8 = vadd.f32 %v11891_v20, %v514_v2  ;;  %v8121_v12 = vmul.f32 %v7906_v44, %v7266_v60  ;;  %v916_v54 = vpop.permute.xlu1 %915  ;;  %v418_v33 = vpop.permute.xlu0 %417  ;;  %v11894_v49 = vld [vmem:[#allocation102_spill] sm:$0xff]  ;;  %v11897_v60 = vld [vmem:[#allocation59_spill] sm:$0xff] }
  0xf1   : > { %11889 = vst [vmem:[#allocation91_spill] sm:$0xff] %v8111_v36  ;;  %11892 = vst [vmem:[#allocation97_spill] sm:$0xff] %v8117_v11  ;;  %v1012_v13 = vmul.f32 %v11867_v51, %v8099_v41  ;;  %v516_v39 = vmul.f32 %v11870_v15, %v8102_v37  ;;  %v1620_v59 = vadd.f32 %v11894_v49, %v1602_v21  ;;  %v8129_v2 = vsel %vm435_vm11, %v916_v54, 0.0  ;;  %v6328_v21 = vld [vmem:[%s6684_s22 + $0x20] sm:$0xff] }
  0xf2   : > { %11886 = vst [vmem:[#allocation101_spill] sm:$0xff] %v8105_v3  ;;  %11890 = vst [vmem:[#allocation94_spill] sm:$0xff] %v8113_v46  ;;  %v1137_v10 = vadd.f32 %v1029_v28, %v533_v52  ;;  %v8132_v61 = vsel %vm435_vm11, %v418_v33, 0.0  ;;  %v1136_v14 = vadd.f32 %v1028_v5, %v532_v8  ;;  %v8135_v57 = vmul.f32 %v6327_v25, %v7940_v0  ;;  %v11902_v49 = vld [vmem:[#allocation104_spill] sm:$0xff] }
  0xf3   : > { %11893 = vst [vmem:[#allocation103_spill] sm:$0xff] %v8121_v12  ;;  %11895 = vst [vmem:[#allocation92_spill] sm:$0xff] %v8132_v61  ;;  %v1013_v20 = vmul.f32 %v11867_v51, %v8129_v2  ;;  %v517_v46 = vmul.f32 %v11870_v15, %v8132_v61  ;;  %v8143_v28 = vmul.f32 %v7542_v16, %v11897_v60 }
  0xf4   : > { %11896 = vst [vmem:[#allocation102_spill] sm:$0xff] %v8135_v57  ;;  %v1729_v3 = vadd.f32 %v1621_v62, %v1137_v10  ;;  %v1728_v52 = vadd.f32 %v1620_v59, %v1136_v14  ;;  %v8147_v54 = vmul.f32 %v6328_v21, %v7533_v63  ;;  %v8151_v25 = vmul.f32 %v7545_v26, %v11897_v60  ;;  %v1508_v8 = vpop.permute.xlu1 %1507  ;;  %v1506_v33 = vpop.permute.xlu0 %1505 }
  0xf5   : > { %11898 = vst [vmem:[#allocation204_spill] sm:$0xff] %v8143_v28  ;;  %v8154_v5 = vmul.f32 %v6328_v21, %v7557_v23  ;;  %v534_v62 = vadd.f32 %v7511_v53, %v516_v39  ;;  %v1030_v10 = vadd.f32 %v11902_v49, %v1012_v13  ;;  %v8160_v59 = vmul.f32 %v7583_v6, %v11897_v60 }
  0xf6   : > { %11899 = vst [vmem:[#allocation205_spill] sm:$0xff] %v8147_v54  ;;  %11900 = vst [vmem:[#allocation206_spill] sm:$0xff] %v8151_v25  ;;  %v8163_v14 = vmul.f32 %v6328_v21, %v7604_v30  ;;  %5684 = vmatprep.mubr.msk.f32.mxu0 %vm11905_vm15, %v1728_v52  ;;  %v8167_v54 = vsel %vm435_vm11, %v1508_v8, 0.0  ;;  %v535_v57 = vadd.f32 %v7539_v19, %v517_v46  ;;  %v11909_v52 = vld [vmem:[#allocation60_spill] sm:$0xff]  ;;  %v11912_v19 = vmov 1.0  }
  0xf7   : > { %11901 = vst [vmem:[#allocation207_spill] sm:$0xff] %v8154_v5  ;;  %11903 = vst [vmem:[#allocation104_spill] sm:$0xff] %v8160_v59  ;;  %v8170_v5 = vsel %vm435_vm11, %v1506_v33, 0.0  ;;  %v1031_v53 = vadd.f32 %v7551_v40, %v1013_v20  ;;  %5685 = vmatmul.mubr.msk.f32.vlgmr.msra.gmra.mxu0 %vm11908_vm13, %v1729_v3  ;;  %v1605_v13 = vmul.f32 %v11873_v31, %v8167_v54  ;;  %v6329_v8 = vld [vmem:[%s6684_s22 + $0x60] sm:$0xff]  ;;  %v12014_v59 = vld [vmem:[#allocation125_spill] sm:$0xff] }
  0xf8   : > { %11904 = vst [vmem:[#allocation208_spill] sm:$0xff] %v8163_v14  ;;  %11906 = vst [vmem:[#allocation209_spill] sm:$0xff] %v8167_v54  ;;  %v1604_v39 = vmul.f32 %v11873_v31, %v8170_v5  ;;  %v8181_v21 = vmul.f32 %v7624_v9, %v11909_v52  ;;  %v8185_v33 = vmul.f32 %v6329_v8, %v7637_v56  ;;  %5725 = vmatpush3.msk.msra.mxu0 %vm6786_vm2, %v11912_v19  ;;  %v918_v14 = vpop.permute.xlu1 %917  ;;  %v420_v60 = vpop.permute.xlu0 %419  ;;  %v12018_v54 = vld [vmem:[#allocation138_spill] sm:$0xff] }
  0xf9   : > { %11907 = vst [vmem:[#allocation210_spill] sm:$0xff] %v8170_v5  ;;  %v8192_v40 = vmul.f32 %v7688_v55, %v11909_v52  ;;  %v8195_v3 = vmul.f32 %v6329_v8, %v7702_v45  ;;  %v8199_v20 = vmul.f32 %v7715_v50, %v11909_v52  ;;  %v8202_v49 = vmul.f32 %v6329_v8, %v7739_v1  ;;  %v12019_v5 = vld [vmem:[#allocation145_spill] sm:$0xff] }
  0xfa   : > { %11910 = vst [vmem:[#allocation211_spill] sm:$0xff] %v8181_v21  ;;  %11911 = vst [vmem:[#allocation212_spill] sm:$0xff] %v8185_v33  ;;  %v1622_v33 = vadd.f32 %v7527_v32, %v1604_v39  ;;  %v1623_v46 = vadd.f32 %v7563_v48, %v1605_v13  ;;  %5726 = vmatprep.subr.msk.mxu0 %vm6798_vm3, %v11912_v19  ;;  %v6330_v21 = vld [vmem:[%s6684_s22 + $0x28] sm:$0xff]  ;;  %v8218_v8 = vsel %vm435_vm11, %v918_v14, 0.0  ;;  %v8221_v32 = vsel %vm435_vm11, %v420_v60, 0.0 }
  0xfb   : > { %11914 = vst [vmem:[#allocation213_spill] sm:$0xff] %v8192_v40  ;;  %11915 = vst [vmem:[#allocation214_spill] sm:$0xff] %v8195_v3  ;;  %v11919_v40 = vld [vmem:[#allocation61_spill] sm:$0xff]  ;;  %v8215_v52 = vmul.f32 %v6330_v21, %v7533_v63  ;;  %v1138_v48 = vadd.f32 %v1030_v10, %v534_v62  ;;  %v1139_v13 = vadd.f32 %v1031_v53, %v535_v57  ;;  %5727 = vmatpush3.msk.msra.mxu0 %vm6798_vm3, %v11912_v19  ;;  %v11929_v53 = vld [vmem:[#allocation62_spill] sm:$0xff] }
  0xfc   : > { %11916 = vst [vmem:[#allocation215_spill] sm:$0xff] %v8199_v20  ;;  %11917 = vst [vmem:[#allocation216_spill] sm:$0xff] %v8202_v49  ;;  %v8211_v3 = vmul.f32 %v7542_v16, %v11919_v40  ;;  %5728 = vmatprep.subr.msk.mxu0 %vm6834_vm5, %v11912_v19  ;;  %v8231_v49 = vmul.f32 %v7545_v26, %v11919_v40  ;;  %v8234_v14 = vmul.f32 %v6330_v21, %v7557_v23 }
  0xfd   : > { %11921 = vst [vmem:[#allocation218_spill] sm:$0xff] %v8215_v52  ;;  %11922 = vst [vmem:[#allocation219_spill] sm:$0xff] %v8218_v8  ;;  %v8238_v60 = vmul.f32 %v7583_v6, %v11919_v40  ;;  %v8241_v57 = vmul.f32 %v6330_v21, %v7604_v30  ;;  %v1730_v62 = vadd.f32 %v1622_v33, %v1138_v48  ;;  %5729 = vmatpush3.msk.msra.mxu0 %vm6834_vm5, %v11912_v19  ;;  %v6331_v52 = vld [vmem:[%s6684_s22 + $0x68] sm:$0xff]  ;;  %v920_v33 = vpop.permute.xlu1 %919 }
  0xfe   : > { %11920 = vst [vmem:[#allocation217_spill] sm:$0xff] %v8211_v3  ;;  %11923 = vst [vmem:[#allocation220_spill] sm:$0xff] %v8221_v32  ;;  %v1731_v10 = vadd.f32 %v1623_v46, %v1139_v13  ;;  %v8248_v11 = vmul.f32 %v7624_v9, %v11929_v53  ;;  %v1014_v40 = vmul.f32 %v11867_v51, %v8218_v8  ;;  %v422_v46 = vpop.permute.xlu0 %421  ;;  %5730 = vmatprep.subr.msk.mxu0 %vm6873_vm8, %v11912_v19 }
  0xff   : > { %11925 = vst [vmem:[#allocation221_spill] sm:$0xff] %v8231_v49  ;;  %11926 = vst [vmem:[#allocation222_spill] sm:$0xff] %v8234_v14  ;;  %v8252_v14 = vmul.f32 %v6331_v52, %v7637_v56  ;;  %v518_v21 = vmul.f32 %v11870_v15, %v8221_v32  ;;  %v8263_v13 = vmul.f32 %v7688_v55, %v11929_v53  ;;  %5687 = vmatprep.mubr.msk.f32.mxu0 %vm11937_vm10, %v1730_v62  ;;  %v11940_v62 = vld [vmem:[#allocation63_spill] sm:$0xff] }
 0x100   : > { %11927 = vst [vmem:[#allocation223_spill] sm:$0xff] %v8238_v60  ;;  %11928 = vst [vmem:[#allocation224_spill] sm:$0xff] %v8241_v57  ;;  %v8266_v39 = vmul.f32 %v6331_v52, %v7702_v45  ;;  %v8269_v57 = vsel %vm435_vm11, %v920_v33, 0.0  ;;  %5731 = vmatpush3.msk.msra.mxu0 %vm6873_vm8, %v11912_v19  ;;  %v8292_v48 = vmul.f32 %v7835_v47, %v11940_v62  ;;  %v12012_v60 = vld [vmem:[#allocation117_spill] sm:$0xff] }
 0x101   : > { %11930 = vst [vmem:[#allocation225_spill] sm:$0xff] %v8248_v11  ;;  %11931 = vst [vmem:[#allocation226_spill] sm:$0xff] %v8252_v14  ;;  %v8272_v14 = vsel %vm435_vm11, %v422_v46, 0.0  ;;  %v8280_v11 = vmul.f32 %v7715_v50, %v11929_v53  ;;  %v1015_v33 = vmul.f32 %v11867_v51, %v8269_v57  ;;  %5688 = vmatmul.mubr.msk.f32.gmra.mxu0 %vm11744_vm9, %v1731_v10 }
 0x102   : > { %11933 = vst [vmem:[#allocation227_spill] sm:$0xff] %v8263_v13  ;;  %11934 = vst [vmem:[#allocation228_spill] sm:$0xff] %v8266_v39  ;;  %v8283_v13 = vmul.f32 %v6331_v52, %v7739_v1  ;;  %v519_v46 = vmul.f32 %v11870_v15, %v8272_v14  ;;  %v8295_v39 = vld [vmem:[%s6684_s22 + $0xa0] sm:$0xff]  ;;  %v11944_v52 = vld [vmem:[#allocation38_spill] sm:$0xff]  ;;  %v536_v3 = vadd.f32 %v7597_v29, %v518_v21 }
 0x103   : > { %11935 = vst [vmem:[#allocation229_spill] sm:$0xff] %v8269_v57  ;;  %11936 = vst [vmem:[#allocation230_spill] sm:$0xff] %v8272_v14  ;;  %v8299_v53 = vmul.f32 %v8295_v39, %v7852_v24  ;;  %vm11945_vm15 = vnez %v11944_v52  ;;  %v8310_v10 = vmul.f32 %v8295_v39, %v7895_v58  ;;  %v1510_v57 = vpop.permute.xlu0 %1509  ;;  %v1032_v20 = vadd.f32 %v7610_v38, %v1014_v40  ;;  %v12013_v14 = vld [vmem:[#allocation121_spill] sm:$0xff] }
 0x104   : > { %11938 = vst [vmem:[#allocation231_spill] sm:$0xff] %v8280_v11  ;;  %11939 = vst [vmem:[#allocation232_spill] sm:$0xff] %v8283_v13  ;;  %5732 = vmatprep.subr.msk.mxu0 %vm11945_vm15, %v11912_v19  ;;  %v8306_v13 = vmul.f32 %v7868_v18, %v11940_v62  ;;  %v8314_v11 = vmul.f32 %v7906_v44, %v11940_v62  ;;  %v8330_v62 = vld [vmem:[%s6684_s22 + $0xa8] sm:$0xff]  ;;  %v8340_v38 = vsel %vm435_vm11, %v1510_v57, 0.0 }
 0x105   : > { %11941 = vst [vmem:[#allocation233_spill] sm:$0xff] %v8292_v48  ;;  %11942 = vst [vmem:[#allocation234_spill] sm:$0xff] %v8295_v39  ;;  %v8318_v48 = vmul.f32 %v8295_v39, %v7940_v0  ;;  %5733 = vmatpush3.msk.msra.mxu0 %vm11945_vm15, %v11912_v19  ;;  %v537_v29 = vadd.f32 %v7630_v34, %v519_v46  ;;  %v1033_v40 = vadd.f32 %v7643_v27, %v1015_v33  ;;  %v11959_v27 = vld [vmem:[#allocation44_spill] sm:$0xff]  ;;  %v11963_v46 = vld [vmem:[#allocation65_spill] sm:$0xff] }
 0x106   : > { %11943 = vst [vmem:[#allocation235_spill] sm:$0xff] %v8299_v53  ;;  %11946 = vst [vmem:[#allocation236_spill] sm:$0xff] %v8306_v13  ;;  %v1512_v53 = vpop.permute.xlu1 %1511  ;;  %v11950_v13 = vld [vmem:[#allocation64_spill] sm:$0xff]  ;;  %5734 = vmatprep.subr.msk.mxu0 %vm6934_vm12, %v11912_v19  ;;  %v8360_v34 = vmul.f32 %v8330_v62, %v7895_v58  ;;  %vm11960_vm13 = vnez %v11959_v27  ;;  %v8371_v33 = vmul.f32 %v8330_v62, %v7940_v0 }
 0x107   : > { %11947 = vst [vmem:[#allocation237_spill] sm:$0xff] %v8310_v10  ;;  %11948 = vst [vmem:[#allocation238_spill] sm:$0xff] %v8314_v11  ;;  %v8327_v10 = vmul.f32 %v7835_v47, %v11950_v13  ;;  %v8337_v39 = vsel %vm435_vm11, %v1512_v53, 0.0  ;;  %5735 = vmatpush3.msk.msra.mxu0 %vm6934_vm12, %v11912_v19  ;;  %v8356_v57 = vmul.f32 %v7868_v18, %v11950_v13  ;;  %v8378_v18 = vld [vmem:[%s6684_s22 + $0x30] sm:$0xff]  ;;  %v12004_v11 = vld [vmem:[#allocation196_spill] sm:$0xff] }
 0x108   : > { %11949 = vst [vmem:[#allocation239_spill] sm:$0xff] %v8318_v48  ;;  %11952 = vst [vmem:[#allocation241_spill] sm:$0xff] %v8330_v62  ;;  %v8334_v48 = vmul.f32 %v8330_v62, %v7852_v24  ;;  %v1607_v52 = vmul.f32 %v11873_v31, %v8337_v39  ;;  %v1606_v24 = vmul.f32 %v11873_v31, %v8340_v38  ;;  %5736 = vmatprep.subr.msk.mxu0 %vm11960_vm13, %v11912_v19 }
 0x109   : > { %11951 = vst [vmem:[#allocation240_spill] sm:$0xff] %v8327_v10  ;;  %11954 = vst [vmem:[#allocation243_spill] sm:$0xff] %v8337_v39  ;;  %v8367_v53 = vmul.f32 %v7906_v44, %v11950_v13  ;;  %v8375_v21 = vmul.f32 %v7542_v16, %v11963_v46  ;;  %v8382_v58 = vmul.f32 %v8378_v18, %v7533_v63  ;;  %5737 = vmatpush3.msk.msra.mxu0 %vm11960_vm13, %v11912_v19 }
 0x10a   : > { %11953 = vst [vmem:[#allocation242_spill] sm:$0xff] %v8334_v48  ;;  %11955 = vst [vmem:[#allocation244_spill] sm:$0xff] %v8340_v38  ;;  %v471_v48 = vpop.permute.xlu1 %470  ;;  %v1624_v44 = vadd.f32 %v7614_v42, %v1606_v24  ;;  %v1625_v13 = vadd.f32 %v7647_v17, %v1607_v52  ;;  %v8397_v0 = vmul.f32 %v8378_v18, %v7557_v23  ;;  %5738 = vmatprep.subr.msk.mxu0 %vm7021_vm7, %v11912_v19 }
 0x10b   : > { %11957 = vst [vmem:[#allocation245_spill] sm:$0xff] %v8356_v57  ;;  %11958 = vst [vmem:[#allocation246_spill] sm:$0xff] %v8360_v34  ;;  %v8384_v34 = vpop.permute.xlu0 %423  ;;  %v8400_v62 = vsel %vm435_vm11, %v471_v48, 0.0  ;;  %v1141_v47 = vadd.f32 %v1033_v40, %v537_v29  ;;  %v8407_v17 = vmul.f32 %v7583_v6, %v11963_v46  ;;  %5739 = vmatpush3.msk.msra.mxu0 %vm7021_vm7, %v11912_v19  ;;  %v11972_v48 = vld [vmem:[#allocation69_spill] sm:$0xff]  ;;  %v12002_v57 = vld [vmem:[#allocation143_spill] sm:$0xff] }
 0x10c   : > { %11961 = vst [vmem:[#allocation247_spill] sm:$0xff] %v8367_v53  ;;  %11962 = vst [vmem:[#allocation248_spill] sm:$0xff] %v8371_v33  ;;  %v8393_v33 = vmul.f32 %v7545_v26, %v11963_v46  ;;  %v8414_v24 = vmul.f32 %v8378_v18, %v7604_v30  ;;  %v8429_v29 = vmul.f32 %v7688_v55, %v11972_v48 }
 0x10d   : > { %11964 = vst [vmem:[#allocation249_spill] sm:$0xff] %v8375_v21  ;;  %11965 = vst [vmem:[#allocation250_spill] sm:$0xff] %v8378_v18  ;;  %v700_v40 = vmul.f32 %v7570_v43, %v8400_v62  ;;  %v830_v42 = vmul.f32 %v7618_v35, %v8400_v62  ;;  %v1733_v19 = vadd.f32 %v1625_v13, %v1141_v47 }
 0x10e   : > { %11966 = vst [vmem:[#allocation251_spill] sm:$0xff] %v8382_v58  ;;  %11967 = vst [vmem:[#allocation252_spill] sm:$0xff] %v8393_v33  ;;  %v1140_v58 = vadd.f32 %v1032_v20, %v536_v3  ;;  %v8418_v3 = vmul.f32 %v7624_v9, %v11972_v48  ;;  %v8421_v20 = vld [vmem:[%s6684_s22 + $0x70] sm:$0xff]  ;;  %v967_v18 = vpop.permute.xlu1 %966 }
 0x10f   : > { %11968 = vst [vmem:[#allocation253_spill] sm:$0xff] %v8397_v0  ;;  %11970 = vst [vmem:[#allocation254_spill] sm:$0xff] %v8407_v17  ;;  %v8425_v52 = vmul.f32 %v8421_v20, %v7637_v56  ;;  %v922_v17 = vpop.permute.xlu0 %921  ;;  %v8439_v46 = vmul.f32 %v8421_v20, %v7702_v45  ;;  %v848_v33 = vadd.f32 %v7634_v22, %v830_v42  ;;  %v8454_v53 = vsel %vm435_vm11, %v967_v18, 0.0  ;;  %v12030_v45 = vld [vmem:[#allocation169_spill] sm:$0xff] }
 0x110   : > { %11971 = vst [vmem:[#allocation255_spill] sm:$0xff] %v8414_v24  ;;  %11973 = vst [vmem:[#allocation256_spill] sm:$0xff] %v8418_v3  ;;  %v1732_v27 = vadd.f32 %v1624_v44, %v1140_v58  ;;  %v11977_v24 = vld [vmem:[#allocation108_spill] sm:$0xff]  ;;  %v11981_v58 = vld [vmem:[#allocation113_spill] sm:$0xff] }
 0x111   : > { %11974 = vst [vmem:[#allocation257_spill] sm:$0xff] %v8421_v20  ;;  %11975 = vst [vmem:[#allocation258_spill] sm:$0xff] %v8425_v52  ;;  %v728_v0 = vmul.f32 %v11977_v24, %v8048_v7  ;;  %v8443_v52 = vmul.f32 %v7715_v50, %v11972_v48  ;;  %v858_v47 = vmul.f32 %v11981_v58, %v8048_v7  ;;  %v11982_v44 = vld [vmem:[#allocation110_spill] sm:$0xff]  ;;  %v12000_v48 = vld [vmem:[#allocation144_spill] sm:$0xff] }
 0x112   : > { %11976 = vst [vmem:[#allocation259_spill] sm:$0xff] %v8429_v29  ;;  %11978 = vst [vmem:[#allocation260_spill] sm:$0xff] %v8439_v46  ;;  %v8447_v29 = vmul.f32 %v8421_v20, %v7739_v1  ;;  %v718_v13 = vadd.f32 %v11982_v44, %v700_v40  ;;  %v11984_v46 = vld [vmem:[#allocation66_spill] sm:$0xff]  ;;  %v8463_v20 = vld [vmem:[%s6684_s22 + $0x38] sm:$0xff]  ;;  %v729_v10 = vmul.f32 %v11977_v24, %v7963_v4 }
 0x113   : > { %11979 = vst [vmem:[#allocation261_spill] sm:$0xff] %v8443_v52  ;;  %vm11983_vm10 = vmmov %vm11744_vm9  ;;  %v8460_v52 = vmul.f32 %v7542_v16, %v11984_v46  ;;  %v8471_v22 = vmul.f32 %v7545_v26, %v11984_v46  ;;  %v8475_v18 = vmul.f32 %v8463_v20, %v7557_v23  ;;  %v11992_v16 = vld [vmem:[#allocation127_spill] sm:$0xff]  ;;  %v8485_v40 = vmul.f32 %v7583_v6, %v11984_v46  ;;  %v11995_v26 = vld [vmem:[#allocation140_spill] sm:$0xff]  ;;  %v8493_v23 = vpop.permute.xlu0 %425 }
 0x114   : > { %11980 = vst [vmem:[#allocation262_spill] sm:$0xff] %v8447_v29  ;;  %5690 = vmatprep.mubr.msk.f32.mxu0 %vm11983_vm10, %v1732_v27  ;;  %11986 = vst [vmem:[#allocation263_spill] sm:$0xff] %v8463_v20  ;;  %v8467_v29 = vmul.f32 %v8463_v20, %v7533_v63  ;;  %v8477_v27 = vadd.f32 %v728_v0, %v718_v13  ;;  %v1228_v42 = vmul.f32 %v11992_v16, %v8454_v53  ;;  %v11994_v63 = vld [vmem:[#allocation106_spill] sm:$0xff]  ;;  %v11997_v13 = vld [vmem:[#allocation200_spill] sm:$0xff] }
 0x115   : > { %5691 = vmatmul.mubr.msk.f32.gmra.mxu0 %vm11744_vm9, %v1733_v19  ;;  %11985 = vst [vmem:[#allocation110_spill] sm:$0xff] %v8460_v52  ;;  %11988 = vst [vmem:[#allocation265_spill] sm:$0xff] %v8471_v22  ;;  %v8479_v19 = vadd.f32 %v858_v47, %v848_v33  ;;  %v8489_v44 = vmul.f32 %v11994_v63, %v8048_v7  ;;  %v1390_v22 = vmul.f32 %v11995_v26, %v8454_v53  ;;  %v473_v33 = vpop.permute.xlu1 %472  ;;  %v11998_v6 = vld [vmem:[#allocation120_spill] sm:$0xff]  ;;  %v12001_v52 = vld [vmem:[#allocation135_spill] sm:$0xff] }
 0x116   : > { %11987 = vst [vmem:[#allocation264_spill] sm:$0xff] %v8467_v29  ;;  %11989 = vst [vmem:[#allocation266_spill] sm:$0xff] %v8475_v18  ;;  %v599_v0 = vmul.f32 %v11994_v63, %v7963_v4  ;;  %v8499_v47 = vmul.f32 %v8463_v20, %v7604_v30  ;;  %v8503_v18 = vmul.f32 %v11998_v6, %v11997_v13  ;;  %v12026_v1 = vld [vmem:[#allocation130_spill] sm:$0xff] }
 0x117   : > { %11990 = vst [vmem:[#allocation267_spill] sm:$0xff] %v8477_v27  ;;  %11991 = vst [vmem:[#allocation268_spill] sm:$0xff] %v8479_v19  ;;  %v1418_v29 = vmul.f32 %v12000_v48, %v11997_v13  ;;  %v1246_v3 = vadd.f32 %v12001_v52, %v1228_v42  ;;  %v1408_v21 = vadd.f32 %v12002_v57, %v1390_v22  ;;  %v12006_v22 = vld [vmem:[#allocation105_spill] sm:$0xff] }
 0x118   : > { %11993 = vst [vmem:[#allocation127_spill] sm:$0xff] %v8485_v40  ;;  %11996 = vst [vmem:[#allocation140_spill] sm:$0xff] %v8499_v47  ;;  %v11999_v40 = vld [vmem:[#allocation136_spill] sm:$0xff]  ;;  %v859_v30 = vmul.f32 %v11981_v58, %v7963_v4  ;;  %v495_v47 = vsel %vm435_vm11, %v473_v33, 0.0  ;;  %v1095_v39 = vmul.f32 %v11998_v6, %v12004_v11  ;;  %v1419_v52 = vmul.f32 %v12000_v48, %v12004_v11  ;;  %v8528_v4 = vpop.permute.xlu0 %923  ;;  %v12009_v19 = vld [vmem:[#allocation173_spill] sm:$0xff] }
 0x119   : > { %v1256_v46 = vmul.f32 %v11999_v40, %v11997_v13  ;;  %v1257_v38 = vmul.f32 %v11999_v40, %v12004_v11  ;;  %v8524_v57 = vadd.f32 %v1418_v29, %v1408_v21  ;;  %v571_v42 = vmul.f32 %v12006_v22, %v495_v47  ;;  %v969_v33 = vpop.permute.xlu1 %968  ;;  %v12010_v11 = vld [vmem:[#allocation185_spill] sm:$0xff]  ;;  %v12011_v29 = vld [vmem:[#allocation82_spill] sm:$0xff]  ;;  %vm12057_vm10 = vmmov %vm11744_vm9 }
 0x11a   : > { %v701_v8 = vmul.f32 %v7570_v43, %v495_v47  ;;  %v8547_v63 = vmul.f32 %v12009_v19, %v12011_v29  ;;  %v991_v32 = vsel %vm435_vm11, %v969_v33, 0.0 }
 0x11b   : > { %v8516_v20 = vadd.f32 %v1256_v46, %v1246_v3  ;;  %12005 = vst [vmem:[#allocation135_spill] sm:$0xff] %v8524_v57  ;;  %v12007_v46 = vld [vmem:[#allocation78_spill] sm:$0xff]  ;;  %v12008_v3 = vld [vmem:[#allocation159_spill] sm:$0xff]  ;;  %v589_v49 = vadd.f32 %v12012_v60, %v571_v42  ;;  %v8561_v60 = vmul.f32 %v11981_v58, %v8102_v37  ;;  %v1391_v12 = vmul.f32 %v11995_v26, %v991_v32 }
 0x11c   : > { %v8532_v28 = vmul.f32 %v12008_v3, %v12007_v46  ;;  %v1848_v27 = vmul.f32 %v12009_v19, %v12007_v46  ;;  %v2010_v21 = vmul.f32 %v12010_v11, %v12007_v46  ;;  %v8541_v57 = vmul.f32 %v12008_v3, %v12011_v29  ;;  %v1514_v13 = vpop.permute.xlu0 %1513 }
 0x11d   : > { %12003 = vst [vmem:[#allocation144_spill] sm:$0xff] %v8516_v20  ;;  %v831_v20 = vmul.f32 %v7618_v35, %v495_v47  ;;  %v719_v6 = vadd.f32 %v12013_v14, %v701_v8  ;;  %v8551_v47 = vmul.f32 %v12010_v11, %v12011_v29  ;;  %v8557_v3 = vmul.f32 %v11977_v24, %v8102_v37  ;;  %v12015_v14 = vld [vmem:[#allocation116_spill] sm:$0xff]  ;;  %v1559_v29 = vpop.permute.xlu1 %1558 }
 0x11e   : > { %v1067_v42 = vmul.f32 %v12015_v14, %v991_v32  ;;  %v1229_v46 = vmul.f32 %v11992_v16, %v991_v32  ;;  %v8575_v37 = vmul.f32 %v12000_v48, %v8099_v41  ;;  %v1582_v19 = vsel %vm435_vm11, %v1559_v29, 0.0  ;;  %v12022_v29 = vld [vmem:[#allocation166_spill] sm:$0xff] }
 0x11f   : > { %v849_v25 = vadd.f32 %v12014_v59, %v831_v20  ;;  %v737_v8 = vadd.f32 %v729_v10, %v719_v6  ;;  %v8567_v59 = vmul.f32 %v11999_v40, %v8099_v41  ;;  %v8570_v20 = vsel %vm435_vm11, %v922_v17, 0.0  ;;  %v12017_v6 = vld [vmem:[#allocation129_spill] sm:$0xff] }
 0x120   : > { %12016 = vst [vmem:[#allocation143_spill] sm:$0xff] %v8570_v20  ;;  %v607_v10 = vadd.f32 %v599_v0, %v589_v49  ;;  %v1085_v36 = vadd.f32 %v12017_v6, %v1067_v42  ;;  %v1247_v11 = vadd.f32 %v12018_v54, %v1229_v46  ;;  %v1409_v7 = vadd.f32 %v12019_v5, %v1391_v12  ;;  %v8599_v0 = vpop.permute.xlu0 %1515 }
 0x121   : > { %v867_v33 = vadd.f32 %v859_v30, %v849_v25  ;;  %v8583_v17 = vmul.f32 %v11977_v24, %v8132_v61  ;;  %v8587_v25 = vmul.f32 %v11981_v58, %v8132_v61  ;;  %v8591_v32 = vmul.f32 %v11999_v40, %v8129_v2  ;;  %v1561_v30 = vpop.permute.xlu1 %1560  ;;  %v12023_v40 = vld [vmem:[#allocation178_spill] sm:$0xff] }
 0x122   : > { %v8595_v49 = vsel %vm435_vm11, %v8384_v34, 0.0  ;;  %v570_v54 = vmul.f32 %v12006_v22, %v8400_v62  ;;  %v1103_v12 = vadd.f32 %v1095_v39, %v1085_v36  ;;  %v1265_v5 = vadd.f32 %v1257_v38, %v1247_v11  ;;  %v12024_v61 = vld [vmem:[#allocation118_spill] sm:$0xff]  ;;  %v12027_v62 = vld [vmem:[#allocation141_spill] sm:$0xff]  ;;  %v12029_v11 = vld [vmem:[#allocation148_spill] sm:$0xff] }
 0x123   : > { %12020 = vst [vmem:[#allocation196_spill] sm:$0xff] %v8591_v32  ;;  %12021 = vst [vmem:[#allocation82_spill] sm:$0xff] %v8595_v49  ;;  %v1016_v46 = vmul.f32 %v11867_v51, %v8570_v20  ;;  %v1427_v42 = vadd.f32 %v1419_v52, %v1409_v7  ;;  %v1820_v6 = vmul.f32 %v12022_v29, %v1582_v19  ;;  %v12025_v34 = vld [vmem:[#allocation122_spill] sm:$0xff]  ;;  %v12031_v20 = vld [vmem:[#allocation181_spill] sm:$0xff] }
 0x124   : > { %v1982_v58 = vmul.f32 %v12023_v40, %v1582_v19  ;;  %v625_v24 = vadd.f32 %v12024_v61, %v607_v10  ;;  %v755_v41 = vadd.f32 %v12025_v34, %v737_v8  ;;  %v1121_v50 = vadd.f32 %v12026_v1, %v1103_v12  ;;  %v12028_v39 = vld [vmem:[#allocation126_spill] sm:$0xff]  ;;  %v475_v61 = vpop.permute.xlu0 %474 }
 0x125   : > { %v1283_v36 = vadd.f32 %v12027_v62, %v1265_v5  ;;  %v885_v38 = vadd.f32 %v12028_v39, %v867_v33  ;;  %v1445_v22 = vadd.f32 %v12029_v11, %v1427_v42  ;;  %v1838_v55 = vadd.f32 %v12030_v45, %v1820_v6  ;;  %v971_v10 = vpop.permute.xlu1 %970  ;;  %v12036_v6 = vld [vmem:[#allocation161_spill] sm:$0xff]  ;;  %v12037_v62 = vld [vmem:[#allocation174_spill] sm:$0xff] }
 0x126   : > { %v2000_v7 = vadd.f32 %v12031_v20, %v1982_v58  ;;  %v1066_v52 = vmul.f32 %v12015_v14, %v8454_v53  ;;  %v1153_v56 = vadd.f32 %v1121_v50, %v625_v24  ;;  %v8617_v1 = vmul.f32 %v12000_v48, %v8129_v2  ;;  %v12032_v20 = vld [vmem:[#allocation151_spill] sm:$0xff]  ;;  %v12033_v24 = vld [vmem:[#allocation109_spill] sm:$0xff]  ;;  %v12038_v39 = vld [vmem:[#allocation186_spill] sm:$0xff] }
 0x127   : > { %v1315_v32 = vadd.f32 %v1283_v36, %v755_v41  ;;  %v1477_v8 = vadd.f32 %v1445_v22, %v885_v38  ;;  %v8619_v12 = vadd.f32 %v1848_v27, %v1838_v55  ;;  %v1583_v45 = vsel %vm435_vm11, %v1561_v30, 0.0  ;;  %v12034_v27 = vld [vmem:[#allocation133_spill] sm:$0xff] }
 0x128   : > { %v8621_v33 = vadd.f32 %v2010_v21, %v2000_v7  ;;  %v520_v58 = vmul.f32 %v11870_v15, %v8595_v49  ;;  %v1659_v53 = vmul.f32 %v12032_v20, %v1583_v45  ;;  %v1821_v50 = vmul.f32 %v12022_v29, %v1583_v45  ;;  %v12035_v21 = vld [vmem:[#allocation119_spill] sm:$0xff] }
 0x129   : > { %v1983_v41 = vmul.f32 %v12023_v40, %v1583_v45  ;;  %v588_v5 = vadd.f32 %v12033_v24, %v570_v54  ;;  %v8631_v42 = vsel %vm435_vm11, %v475_v61, 0.0  ;;  %v8634_v55 = vsel %vm435_vm11, %v971_v10, 0.0 }
 0x12a   : > { %v1034_v22 = vadd.f32 %v12034_v27, %v1016_v46  ;;  %v1084_v30 = vadd.f32 %v12035_v21, %v1066_v52  ;;  %v1677_v34 = vadd.f32 %v12036_v6, %v1659_v53  ;;  %v1839_v36 = vadd.f32 %v12037_v62, %v1821_v50  ;;  %v12041_v53 = vld [vmem:[#allocation150_spill] sm:$0xff]  ;;  %v12043_v27 = vld [vmem:[#allocation163_spill] sm:$0xff] }
 0x12b   : > { %v2001_v38 = vadd.f32 %v12038_v39, %v1983_v41  ;;  %v8642_v11 = vsel %vm435_vm11, %v1514_v13, 0.0  ;;  %v702_v54 = vmul.f32 %v7570_v43, %v8631_v42  ;;  %v832_v7 = vmul.f32 %v7618_v35, %v8631_v42  ;;  %v12042_v41 = vld [vmem:[#allocation154_spill] sm:$0xff]  ;;  %v12044_v62 = vld [vmem:[#allocation171_spill] sm:$0xff]  ;;  %v12045_v39 = vld [vmem:[#allocation180_spill] sm:$0xff] }
 0x12c   : > { %12039 = vst [vmem:[#allocation117_spill] sm:$0xff] %v8642_v11  ;;  %v1230_v46 = vmul.f32 %v11992_v16, %v8634_v55  ;;  %v8652_v52 = vsel %vm435_vm11, %v8493_v23, 0.0  ;;  %v1695_v61 = vadd.f32 %v8541_v57, %v1677_v34  ;;  %v1857_v10 = vadd.f32 %v8547_v63, %v1839_v36  ;;  %v12046_v57 = vld [vmem:[#allocation192_spill] sm:$0xff] }
 0x12d   : > { %12040 = vst [vmem:[#allocation121_spill] sm:$0xff] %v8652_v52  ;;  %v2019_v13 = vadd.f32 %v8551_v47, %v2001_v38  ;;  %v1658_v45 = vmul.f32 %v12032_v20, %v1582_v19  ;;  %v720_v50 = vadd.f32 %v12041_v53, %v702_v54  ;;  %v850_v24 = vadd.f32 %v12042_v41, %v832_v7  ;;  %v12047_v36 = vld [vmem:[#allocation132_spill] sm:$0xff]  ;;  %v477_v54 = vpop.permute.xlu0 %476  ;;  %v973_v7 = vpop.permute.xlu1 %972  ;;  %v12052_v41 = vld [vmem:[#allocation142_spill] sm:$0xff] }
 0x12e   : > { %v1248_v21 = vadd.f32 %v12043_v27, %v1230_v46  ;;  %v1608_v6 = vmul.f32 %v11873_v31, %v8642_v11  ;;  %v1713_v23 = vadd.f32 %v12044_v62, %v1695_v61  ;;  %v1875_v49 = vadd.f32 %v12045_v39, %v1857_v10  ;;  %v12056_v62 = vld [vmem:[#allocation184_spill] sm:$0xff]  ;;  %v12134_v11 = vld [vmem:[#allocation189_spill] sm:$0xff] }
 0x12f   : > { %v2037_v34 = vadd.f32 %v12046_v57, %v2019_v13  ;;  %v8667_v63 = vadd.f32 %v8557_v3, %v720_v50  ;;  %v8670_v19 = vadd.f32 %v8561_v60, %v850_v24  ;;  %v538_v38 = vadd.f32 %v12047_v36, %v520_v58  ;;  %v12051_v13 = vld [vmem:[#allocation158_spill] sm:$0xff] }
 0x130   : > { %v8673_v47 = vadd.f32 %v8567_v59, %v1248_v21  ;;  %v8678_v46 = vsel %vm435_vm11, %v8528_v4, 0.0  ;;  %v8680_v61 = vadd.f32 %v1713_v23, %v1153_v56  ;;  %v8682_v10 = vadd.f32 %v1875_v49, %v1315_v32  ;;  %v12055_v21 = vld [vmem:[#allocation182_spill] sm:$0xff] }
 0x131   : > { %12048 = vst [vmem:[#allocation125_spill] sm:$0xff] %v8678_v46  ;;  %v8684_v3 = vadd.f32 %v2037_v34, %v1477_v8  ;;  %v1102_v60 = vadd.f32 %v8503_v18, %v1084_v30  ;;  %v521_v59 = vmul.f32 %v11870_v15, %v8652_v52  ;;  %v1676_v53 = vadd.f32 %v12051_v13, %v1658_v45  ;;  %v12058_v34 = vld [vmem:[#allocation191_spill] sm:$0xff] }
 0x132   : > { %12049 = vst [vmem:[#allocation116_spill] sm:$0xff] %v8682_v10  ;;  %v1142_v58 = vadd.f32 %v1034_v22, %v538_v38  ;;  %v1392_v50 = vmul.f32 %v11995_v26, %v8634_v55  ;;  %v1626_v4 = vadd.f32 %v12052_v41, %v1608_v6  ;;  %v8694_v56 = vsel %vm435_vm11, %v477_v54, 0.0  ;;  %v12054_v22 = vld [vmem:[#allocation168_spill] sm:$0xff]  ;;  %v12059_v38 = vld [vmem:[#allocation194_spill] sm:$0xff]  ;;  %v12091_v10 = vld [vmem:[#allocation103_spill] sm:$0xff] }
 0x133   : > { %12050 = vst [vmem:[#allocation129_spill] sm:$0xff] %v8684_v3  ;;  %v8697_v32 = vsel %vm435_vm11, %v973_v7, 0.0  ;;  %v1017_v18 = vmul.f32 %v11867_v51, %v8678_v46  ;;  %v8703_v15 = vsel %vm435_vm11, %v8599_v0, 0.0  ;;  %v703_v49 = vmul.f32 %v7570_v43, %v8694_v56  ;;  %v12064_v41 = vld [vmem:[#allocation134_spill] sm:$0xff] }
 0x134   : > { %12053 = vst [vmem:[#allocation138_spill] sm:$0xff] %v8703_v15  ;;  %v833_v8 = vmul.f32 %v7618_v35, %v8694_v56  ;;  %v1410_v30 = vadd.f32 %v12054_v22, %v1392_v50  ;;  %v1734_v45 = vadd.f32 %v1626_v4, %v1142_v58  ;;  %v1231_v24 = vmul.f32 %v11992_v16, %v8697_v32 }
 0x135   : > { %v1393_v27 = vmul.f32 %v11995_v26, %v8697_v32  ;;  %v606_v51 = vadd.f32 %v8489_v44, %v588_v5  ;;  %v1694_v0 = vadd.f32 %v8532_v28, %v1676_v53  ;;  %v721_v6 = vadd.f32 %v12055_v21, %v703_v49  ;;  %v1563_v44 = vpop.permute.xlu0 %1562  ;;  %v12060_v5 = vld [vmem:[#allocation123_spill] sm:$0xff]  ;;  %v12063_v53 = vld [vmem:[#allocation196_spill] sm:$0xff] }
 0x136   : > { %v851_v23 = vadd.f32 %v12056_v62, %v833_v8  ;;  %v1609_v39 = vmul.f32 %v11873_v31, %v8703_v15  ;;  %v8721_v57 = vadd.f32 %v8575_v37, %v1410_v30  ;;  %5693 = vmatprep.mubr.msk.f32.mxu0 %vm12057_vm10, %v1734_v45  ;;  %v1249_v36 = vadd.f32 %v12058_v34, %v1231_v24  ;;  %v12061_v31 = vld [vmem:[#allocation70_spill] sm:$0xff]  ;;  %v12065_v49 = vld [vmem:[#allocation48_spill] sm:$0xff]  ;;  %v1565_v8 = vpop.permute.xlu1 %1564  ;;  %v12067_v30 = vld [vmem:[#allocation165_spill] sm:$0xff] }
 0x137   : > { %v1411_v54 = vadd.f32 %v12059_v38, %v1393_v27  ;;  %v1120_v28 = vadd.f32 %v12060_v5, %v1102_v60  ;;  %v8728_v7 = vadd.f32 %v8583_v17, %v721_v6  ;;  %v8735_v37 = vmul.f32 %v7624_v9, %v12061_v31  ;;  %v12066_v17 = vld [vmem:[#allocation107_spill] sm:$0xff]  ;;  %v12069_v24 = vld [vmem:[#allocation114_spill] sm:$0xff]  ;;  %v12071_v27 = vld [vmem:[#allocation124_spill] sm:$0xff] }
 0x138   : > { %v8731_v13 = vadd.f32 %v8587_v25, %v851_v23  ;;  %v8738_v58 = vadd.f32 %v12063_v53, %v1249_v36  ;;  %v539_v4 = vadd.f32 %v12064_v41, %v521_v59  ;;  %v1035_v60 = vadd.f32 %v12065_v49, %v1017_v18  ;;  %v8748_v45 = vld [vmem:[%s6684_s22 + $0x78] sm:$0xff]  ;;  %v12074_v62 = vld [vmem:[#allocation128_spill] sm:$0xff]  ;;  %v12078_v38 = vld [vmem:[#allocation137_spill] sm:$0xff] }
 0x139   : > { %12062 = vst [vmem:[#allocation145_spill] sm:$0xff] %v8735_v37  ;;  %v8741_v50 = vadd.f32 %v8617_v1, %v1411_v54  ;;  %v624_v22 = vadd.f32 %v12066_v17, %v606_v51  ;;  %v1712_v25 = vadd.f32 %v12067_v30, %v1694_v0  ;;  %12068 = vst [vmem:[#allocation166_spill] sm:$0xff] %v8748_v45  ;;  %v12073_v6 = vld [vmem:[#allocation51_spill] sm:$0xff]  ;;  %v1584_v34 = vsel %vm435_vm11, %v1563_v44, 0.0  ;;  %v12080_v5 = vld [vmem:[#allocation77_spill] sm:$0xff] }
 0x13a   : > { %v8752_v9 = vmul.f32 %v8748_v45, %v12069_v24  ;;  %v8756_v21 = vmul.f32 %v12071_v27, %v12061_v31  ;;  %v1143_v1 = vadd.f32 %v1035_v60, %v539_v4  ;;  %v1627_v59 = vadd.f32 %v12073_v6, %v1609_v39  ;;  %v12076_v51 = vld [vmem:[#allocation131_spill] sm:$0xff]  ;;  %v12081_v39 = vld [vmem:[#allocation73_spill] sm:$0xff]  ;;  %v479_v60 = vpop.permute.xlu0 %478  ;;  %v12083_v17 = vld [vmem:[#allocation210_spill] sm:$0xff] }
 0x13b   : > { %v8761_v18 = vmul.f32 %v8748_v45, %v12074_v62  ;;  %v8765_v0 = vmul.f32 %v12076_v51, %v12061_v31  ;;  %v1152_v23 = vadd.f32 %v1120_v28, %v624_v22  ;;  %v8769_v36 = vsel %vm435_vm11, %v1565_v8, 0.0  ;;  %v12084_v44 = vld [vmem:[#allocation173_spill] sm:$0xff]  ;;  %vm12089_vm10 = vmmov %vm11744_vm9  ;;  %v12122_v31 = vld [vmem:[#allocation104_spill] sm:$0xff] }
 0x13c   : > { %12070 = vst [vmem:[#allocation118_spill] sm:$0xff] %v8752_v9  ;;  %12072 = vst [vmem:[#allocation122_spill] sm:$0xff] %v8756_v21  ;;  %v8773_v54 = vmul.f32 %v8748_v45, %v12078_v38  ;;  %v8777_v53 = vmul.f32 %v12081_v39, %v12080_v5  ;;  %v1735_v41 = vadd.f32 %v1627_v59, %v1143_v1  ;;  %v12085_v24 = vld [vmem:[#allocation185_spill] sm:$0xff]  ;;  %v12086_v1 = vld [vmem:[#allocation199_spill] sm:$0xff] }
 0x13d   : > { %12075 = vst [vmem:[#allocation130_spill] sm:$0xff] %v8761_v18  ;;  %12077 = vst [vmem:[#allocation141_spill] sm:$0xff] %v8765_v0  ;;  %v1822_v4 = vmul.f32 %v12022_v29, %v1584_v34  ;;  %v1984_v49 = vmul.f32 %v12023_v40, %v1584_v34  ;;  %v1744_v28 = vadd.f32 %v1712_v25, %v1152_v23  ;;  %v12087_v59 = vld [vmem:[#allocation202_spill] sm:$0xff]  ;;  %v12088_v51 = vld [vmem:[#allocation209_spill] sm:$0xff] }
 0x13e   : > { %12079 = vst [vmem:[#allocation126_spill] sm:$0xff] %v8773_v54  ;;  %12082 = vst [vmem:[#allocation148_spill] sm:$0xff] %v8777_v53  ;;  %v1850_v22 = vmul.f32 %v12084_v44, %v12083_v17  ;;  %v1823_v8 = vmul.f32 %v12022_v29, %v8769_v36  ;;  %v1985_v30 = vmul.f32 %v12023_v40, %v8769_v36  ;;  %5694 = vmatmul.mubr.msk.f32.gmra.mxu0 %vm11744_vm9, %v1735_v41  ;;  %v12090_v38 = vld [vmem:[#allocation91_spill] sm:$0xff]  ;;  %v12092_v0 = vld [vmem:[#allocation74_spill] sm:$0xff]  ;;  %v481_v53 = vpop.permute.xlu0 %480 }
 0x13f   : > { %v2012_v27 = vmul.f32 %v12085_v24, %v12083_v17  ;;  %v1840_v6 = vadd.f32 %v12086_v1, %v1822_v4  ;;  %v2002_v62 = vadd.f32 %v12087_v59, %v1984_v49  ;;  %v1851_v25 = vmul.f32 %v12084_v44, %v12088_v51  ;;  %5740 = vmatprep.mubr.msk.f32.mxu0 %vm12089_vm10, %v1744_v28  ;;  %v12094_v49 = vld [vmem:[#allocation200_spill] sm:$0xff]  ;;  %v12097_v21 = vld [vmem:[#allocation85_spill] sm:$0xff]  ;;  %v12133_v9 = vld [vmem:[#allocation175_spill] sm:$0xff] }
 0x140   : > { %v2013_v23 = vmul.f32 %v12085_v24, %v12088_v51  ;;  %v1841_v3 = vadd.f32 %v12090_v38, %v1823_v8  ;;  %v2003_v54 = vadd.f32 %v12091_v10, %v1985_v30  ;;  %v8800_v41 = vsel %vm435_vm11, %v479_v60, 0.0  ;;  %v12095_v1 = vld [vmem:[#allocation80_spill] sm:$0xff]  ;;  %v12099_v30 = vld [vmem:[#allocation78_spill] sm:$0xff]  ;;  %v12136_v37 = vld [vmem:[#allocation159_spill] sm:$0xff] }
 0x141   : > { %v8804_v4 = vmul.f32 %v12092_v0, %v12080_v5  ;;  %v8808_v59 = vmul.f32 %v12095_v1, %v12094_v49  ;;  %v8810_v18 = vadd.f32 %v1850_v22, %v1840_v6  ;;  %v8812_v28 = vadd.f32 %v2012_v27, %v2002_v62  ;;  %v12100_v38 = vld [vmem:[#allocation88_spill] sm:$0xff]  ;;  %v12102_v22 = vld [vmem:[#allocation90_spill] sm:$0xff]  ;;  %v12104_v27 = vld [vmem:[#allocation87_spill] sm:$0xff] }
 0x142   : > { %v8816_v8 = vmul.f32 %v12097_v21, %v12094_v49  ;;  %v8818_v10 = vadd.f32 %v1851_v25, %v1841_v3  ;;  %v8820_v60 = vadd.f32 %v2013_v23, %v2003_v54  ;;  %v704_v5 = vmul.f32 %v7570_v43, %v8800_v41  ;;  %v12106_v3 = vld [vmem:[#allocation105_spill] sm:$0xff]  ;;  %5741 = vmatmul.mubr.msk.f32.vlgmr.msra.gmra.mxu0 %vm11744_vm9, %v8680_v61  ;;  %v12108_v49 = vld [vmem:[#allocation220_spill] sm:$0xff]  ;;  %vm12190_vm10 = vmmov %vm11744_vm9 }
 0x143   : > { %12093 = vst [vmem:[#allocation169_spill] sm:$0xff] %v8804_v4  ;;  %12096 = vst [vmem:[#allocation181_spill] sm:$0xff] %v8808_v59  ;;  %v8826_v4 = vmul.f32 %v12100_v38, %v12099_v30  ;;  %v8830_v6 = vmul.f32 %v12102_v22, %v12099_v30  ;;  %v8834_v62 = vmul.f32 %v12095_v1, %v12104_v27  ;;  %v12109_v30 = vld [vmem:[#allocation108_spill] sm:$0xff]  ;;  %v12111_v59 = vld [vmem:[#allocation89_spill] sm:$0xff] }
 0x144   : > { %12098 = vst [vmem:[#allocation151_spill] sm:$0xff] %v8816_v8  ;;  %v572_v25 = vmul.f32 %v12106_v3, %v8631_v42  ;;  %v8842_v54 = vmul.f32 %v12097_v21, %v12104_v27  ;;  %v1068_v23 = vmul.f32 %v12015_v14, %v8634_v55  ;;  %v12110_v8 = vld [vmem:[#allocation206_spill] sm:$0xff]  ;;  %v8855_v42 = vmul.f32 %v12092_v0, %v12111_v59 }
 0x145   : > { %12101 = vst [vmem:[#allocation109_spill] sm:$0xff] %v8826_v4  ;;  %12103 = vst [vmem:[#allocation133_spill] sm:$0xff] %v8830_v6  ;;  %v732_v6 = vmul.f32 %v12109_v30, %v12108_v49  ;;  %v722_v4 = vadd.f32 %v12110_v8, %v704_v5  ;;  %v8859_v61 = vmul.f32 %v12095_v1, %v8129_v2  ;;  %v12116_v8 = vld [vmem:[#allocation92_spill] sm:$0xff] }
 0x146   : > { %12105 = vst [vmem:[#allocation119_spill] sm:$0xff] %v8834_v62  ;;  %12107 = vst [vmem:[#allocation161_spill] sm:$0xff] %v8842_v54  ;;  %v8851_v62 = vmul.f32 %v12081_v39, %v12111_v59  ;;  %v834_v55 = vmul.f32 %v7618_v35, %v8800_v41  ;;  %v8865_v54 = vmul.f32 %v12097_v21, %v8129_v2  ;;  %v12121_v21 = vld [vmem:[#allocation113_spill] sm:$0xff] }
 0x147   : > { %12113 = vst [vmem:[#allocation186_spill] sm:$0xff] %v8855_v42  ;;  %12114 = vst [vmem:[#allocation150_spill] sm:$0xff] %v8859_v61  ;;  %v8869_v5 = vmul.f32 %v12081_v39, %v12116_v8  ;;  %v8875_v42 = vadd.f32 %v732_v6, %v722_v4  ;;  %v8879_v1 = vmul.f32 %v12100_v38, %v12088_v51  ;;  %v12120_v61 = vld [vmem:[#allocation146_spill] sm:$0xff]  ;;  %v12125_v6 = vld [vmem:[#allocation157_spill] sm:$0xff] }
 0x148   : > { %12112 = vst [vmem:[#allocation174_spill] sm:$0xff] %v8851_v62  ;;  %12115 = vst [vmem:[#allocation154_spill] sm:$0xff] %v8865_v54  ;;  %v8873_v62 = vmul.f32 %v12092_v0, %v12116_v8  ;;  %v590_v45 = vadd.f32 %v12120_v61, %v572_v25  ;;  %v862_v54 = vmul.f32 %v12121_v21, %v12108_v49  ;;  %v12124_v0 = vld [vmem:[#allocation106_spill] sm:$0xff] }
 0x149   : > { %12117 = vst [vmem:[#allocation163_spill] sm:$0xff] %v8869_v5  ;;  %12119 = vst [vmem:[#allocation180_spill] sm:$0xff] %v8879_v1  ;;  %v852_v15 = vadd.f32 %v12122_v31, %v834_v55  ;;  %v8887_v39 = vmul.f32 %v12102_v22, %v12088_v51  ;;  %v600_v4 = vmul.f32 %v12124_v0, %v12111_v59  ;;  %v499_v31 = vsel %vm435_vm11, %v481_v53, 0.0 }
 0x14a   : > { %12118 = vst [vmem:[#allocation171_spill] sm:$0xff] %v8873_v62  ;;  %v1086_v62 = vadd.f32 %v12125_v6, %v1068_v23  ;;  %v573_v5 = vmul.f32 %v12106_v3, %v8694_v56  ;;  %v1069_v25 = vmul.f32 %v12015_v14, %v8697_v32  ;;  %v1660_v61 = vmul.f32 %v12032_v20, %v1584_v34  ;;  %v12129_v32 = vld [vmem:[#allocation120_spill] sm:$0xff] }
 0x14b   : > { %12123 = vst [vmem:[#allocation192_spill] sm:$0xff] %v8887_v39  ;;  %v8897_v1 = vadd.f32 %v862_v54, %v852_v15  ;;  %v8902_v55 = vmul.f32 %v12100_v38, %v12083_v17  ;;  %v8906_v59 = vmul.f32 %v12102_v22, %v12083_v17  ;;  %v705_v23 = vmul.f32 %v7570_v43, %v499_v31  ;;  %v975_v54 = vpop.permute.xlu1 %974  ;;  %v12130_v38 = vld [vmem:[#allocation230_spill] sm:$0xff]  ;;  %v12131_v39 = vld [vmem:[#allocation221_spill] sm:$0xff] }
 0x14c   : > { %v835_v56 = vmul.f32 %v7618_v35, %v499_v31  ;;  %v608_v6 = vadd.f32 %v600_v4, %v590_v45  ;;  %v1096_v34 = vmul.f32 %v12129_v32, %v12104_v27  ;;  %v601_v15 = vmul.f32 %v12124_v0, %v12116_v8  ;;  %v12135_v8 = vld [vmem:[#allocation197_spill] sm:$0xff] }
 0x14d   : > { %12126 = vst [vmem:[#allocation132_spill] sm:$0xff] %v8897_v1  ;;  %12127 = vst [vmem:[#allocation158_spill] sm:$0xff] %v8902_v55  ;;  %v1661_v53 = vmul.f32 %v12032_v20, %v8769_v36  ;;  %v733_v1 = vmul.f32 %v12109_v30, %v12130_v38  ;;  %v863_v22 = vmul.f32 %v12121_v21, %v12130_v38  ;;  %v12132_v55 = vld [vmem:[#allocation223_spill] sm:$0xff] }
 0x14e   : > { %12128 = vst [vmem:[#allocation142_spill] sm:$0xff] %v8906_v59  ;;  %v723_v59 = vadd.f32 %v12131_v39, %v705_v23  ;;  %v853_v45 = vadd.f32 %v12132_v55, %v835_v56  ;;  %v1104_v4 = vadd.f32 %v1096_v34, %v1086_v62  ;;  %v591_v27 = vadd.f32 %v12133_v9, %v573_v5  ;;  %v12138_v39 = vld [vmem:[#allocation267_spill] sm:$0xff]  ;;  %v12146_v56 = vld [vmem:[#allocation162_spill] sm:$0xff] }
 0x14f   : > { %v1087_v46 = vadd.f32 %v12134_v11, %v1069_v25  ;;  %v1678_v35 = vadd.f32 %v12135_v8, %v1660_v61  ;;  %v1097_v36 = vmul.f32 %v12129_v32, %v8129_v2  ;;  %v1688_v52 = vmul.f32 %v12136_v37, %v12083_v17  ;;  %v12139_v23 = vld [vmem:[#allocation111_spill] sm:$0xff]  ;;  %v12142_v2 = vld [vmem:[#allocation268_spill] sm:$0xff]  ;;  %v12145_v17 = vld [vmem:[#allocation149_spill] sm:$0xff] }
 0x150   : > { %v8929_v30 = vadd.f32 %v733_v1, %v723_v59  ;;  %v8931_v21 = vadd.f32 %v863_v22, %v853_v45  ;;  %v8935_v55 = vadd.f32 %v12139_v23, %v12138_v39  ;;  %v1689_v9 = vmul.f32 %v12136_v37, %v12088_v51  ;;  %v12141_v11 = vld [vmem:[#allocation83_spill] sm:$0xff]  ;;  %v12147_v39 = vld [vmem:[#allocation144_spill] sm:$0xff] }
 0x151   : > { %v1679_v62 = vadd.f32 %v12141_v11, %v1661_v53  ;;  %v602_v5 = vmul.f32 %v12124_v0, %v12108_v49  ;;  %v12143_v25 = vld [vmem:[#allocation115_spill] sm:$0xff]  ;;  %v626_v1 = vadd.f32 %v12145_v17, %v608_v6  ;;  %v574_v22 = vmul.f32 %v12106_v3, %v8800_v41  ;;  %v977_v53 = vpop.permute.xlu1 %976  ;;  %v12153_v6 = vld [vmem:[#allocation177_spill] sm:$0xff]  ;;  %v12155_v41 = vld [vmem:[#allocation188_spill] sm:$0xff] }
 0x152   : > { %12137 = vst [vmem:[#allocation168_spill] sm:$0xff] %v8931_v21  ;;  %12140 = vst [vmem:[#allocation182_spill] sm:$0xff] %v8935_v55  ;;  %v8944_v61 = vadd.f32 %v12143_v25, %v12142_v2  ;;  %v994_v59 = vsel %vm435_vm11, %v975_v54, 0.0  ;;  %v1122_v34 = vadd.f32 %v12146_v56, %v1104_v4  ;;  %v609_v45 = vadd.f32 %v601_v15, %v591_v27  ;;  %v12148_v23 = vld [vmem:[#allocation139_spill] sm:$0xff] }
 0x153   : > { %v1105_v51 = vadd.f32 %v1097_v36, %v1087_v46  ;;  %v1696_v8 = vadd.f32 %v1688_v52, %v1678_v35  ;;  %v8953_v11 = vadd.f32 %v12148_v23, %v12147_v39  ;;  %v12150_v49 = vld [vmem:[#allocation135_spill] sm:$0xff]  ;;  %v8961_v17 = vadd.f32 %v12153_v6, %v8619_v12  ;;  %v12157_v46 = vld [vmem:[#allocation153_spill] sm:$0xff]  ;;  %v12161_v12 = vld [vmem:[#allocation164_spill] sm:$0xff] }
 0x154   : > { %12144 = vst [vmem:[#allocation184_spill] sm:$0xff] %v8944_v61  ;;  %v12151_v2 = vld [vmem:[#allocation147_spill] sm:$0xff]  ;;  %v8965_v54 = vadd.f32 %v12155_v41, %v8621_v33  ;;  %v8969_v35 = vadd.f32 %v12157_v46, %v8667_v63  ;;  %v1697_v52 = vadd.f32 %v1689_v9, %v1679_v62  ;;  %v1070_v15 = vmul.f32 %v12015_v14, %v994_v59  ;;  %v12163_v33 = vld [vmem:[#allocation172_spill] sm:$0xff]  ;;  %v12167_v62 = vld [vmem:[#allocation190_spill] sm:$0xff]  ;;  %v1567_v46 = vpop.permute.xlu0 %1566 }
 0x155   : > { %12149 = vst [vmem:[#allocation191_spill] sm:$0xff] %v8953_v11  ;;  %v8957_v25 = vadd.f32 %v12151_v2, %v12150_v49  ;;  %12154 = vst [vmem:[#allocation123_spill] sm:$0xff] %v8961_v17  ;;  %v1232_v4 = vmul.f32 %v11992_v16, %v994_v59  ;;  %v12159_v49 = vld [vmem:[#allocation155_spill] sm:$0xff]  ;;  %v8979_v36 = vadd.f32 %v12161_v12, %v8673_v47  ;;  %v12165_v39 = vld [vmem:[#allocation204_spill] sm:$0xff] }
 0x156   : > { %12156 = vst [vmem:[#allocation196_spill] sm:$0xff] %v8965_v54  ;;  %12158 = vst [vmem:[#allocation134_spill] sm:$0xff] %v8969_v35  ;;  %v8975_v27 = vadd.f32 %v12159_v49, %v8670_v19  ;;  %v8983_v56 = vadd.f32 %v12163_v33, %v8721_v57  ;;  %v592_v63 = vadd.f32 %v12165_v39, %v574_v22  ;;  %v12166_v23 = vld [vmem:[#allocation176_spill] sm:$0xff]  ;;  %v12168_v6 = vld [vmem:[#allocation198_spill] sm:$0xff] }
 0x157   : > { %12152 = vst [vmem:[#allocation194_spill] sm:$0xff] %v8957_v25  ;;  %12162 = vst [vmem:[#allocation107_spill] sm:$0xff] %v8979_v36  ;;  %v627_v9 = vadd.f32 %v12166_v23, %v609_v45  ;;  %v1123_v2 = vadd.f32 %v12167_v62, %v1105_v51  ;;  %v1714_v41 = vadd.f32 %v12168_v6, %v1696_v8  ;;  %v12169_v19 = vld [vmem:[#allocation183_spill] sm:$0xff]  ;;  %v12173_v45 = vld [vmem:[#allocation193_spill] sm:$0xff] }
 0x158   : > { %12160 = vst [vmem:[#allocation48_spill] sm:$0xff] %v8975_v27  ;;  %12164 = vst [vmem:[#allocation165_spill] sm:$0xff] %v8983_v56  ;;  %v1154_v54 = vadd.f32 %v1122_v34, %v626_v1  ;;  %v8991_v49 = vadd.f32 %v12169_v19, %v8728_v7  ;;  %v12171_v47 = vld [vmem:[#allocation187_spill] sm:$0xff]  ;;  %v1394_v57 = vmul.f32 %v11995_v26, %v994_v59  ;;  %v12177_v34 = vld [vmem:[#allocation213_spill] sm:$0xff]  ;;  %v1569_v7 = vpop.permute.xlu1 %1568 }
 0x159   : > { %v8995_v12 = vadd.f32 %v12171_v47, %v8731_v13  ;;  %v575_v22 = vmul.f32 %v12106_v3, %v499_v31  ;;  %v9001_v33 = vadd.f32 %v12173_v45, %v8738_v58  ;;  %v12175_v51 = vld [vmem:[#allocation67_spill] sm:$0xff]  ;;  %v1250_v23 = vadd.f32 %v12177_v34, %v1232_v4  ;;  %v12180_v13 = vld [vmem:[#allocation201_spill] sm:$0xff]  ;;  %v12183_v47 = vld [vmem:[#allocation136_spill] sm:$0xff] }
 0x15a   : > { %12170 = vst [vmem:[#allocation114_spill] sm:$0xff] %v8991_v49  ;;  %v1715_v8 = vadd.f32 %v12175_v51, %v1697_v52  ;;  %v12176_v39 = vld [vmem:[#allocation211_spill] sm:$0xff]  ;;  %v9012_v59 = vadd.f32 %v12180_v13, %v8810_v18  ;;  %v610_v31 = vadd.f32 %v602_v5, %v592_v63  ;;  %v1746_v45 = vadd.f32 %v1714_v41, %v1154_v54  ;;  %v12188_v63 = vld [vmem:[#allocation97_spill] sm:$0xff]  ;;  %v483_v54 = vpop.permute.xlu0 %482  ;;  %v12259_v17 = vld [vmem:[#allocation96_spill] sm:$0xff] }
 0x15b   : > { %12172 = vst [vmem:[#allocation124_spill] sm:$0xff] %v8995_v12  ;;  %12174 = vst [vmem:[#allocation51_spill] sm:$0xff] %v9001_v33  ;;  %v1088_v1 = vadd.f32 %v12176_v39, %v1070_v15  ;;  %v12178_v62 = vld [vmem:[#allocation195_spill] sm:$0xff]  ;;  %v995_v15 = vsel %vm435_vm11, %v977_v53, 0.0  ;;  %v1155_v4 = vadd.f32 %v1123_v2, %v627_v9  ;;  %v1586_v5 = vsel %vm435_vm11, %v1567_v46, 0.0  ;;  %v12191_v9 = vld [vmem:[#allocation102_spill] sm:$0xff] }
 0x15c   : > { %v9008_v6 = vadd.f32 %v12178_v62, %v8741_v50  ;;  %12181 = vst [vmem:[#allocation131_spill] sm:$0xff] %v9012_v59  ;;  %v12182_v19 = vld [vmem:[#allocation219_spill] sm:$0xff]  ;;  %v12187_v62 = vld [vmem:[#allocation217_spill] sm:$0xff]  ;;  %v9028_v13 = vadd.f32 %v12188_v63, %v8818_v10  ;;  %5743 = vmatprep.mubr.msk.f32.mxu0 %vm12190_vm10, %v1746_v45  ;;  %v603_v41 = vmul.f32 %v12124_v0, %v12130_v38  ;;  %v500_v38 = vsel %vm435_vm11, %v483_v54, 0.0  ;;  %v9231_v59 = vld [vmem:[%s6684_s22 + $0x20] sm:$0xff] }
 0x15d   : > { %v1098_v58 = vmul.f32 %v12129_v32, %v12182_v19  ;;  %v1260_v52 = vmul.f32 %v12183_v47, %v12182_v19  ;;  %v12184_v51 = vld [vmem:[#allocation203_spill] sm:$0xff]  ;;  %v593_v18 = vadd.f32 %v12187_v62, %v575_v22  ;;  %v1747_v53 = vadd.f32 %v1715_v8, %v1155_v4  ;;  %v12193_v10 = vld [vmem:[#allocation205_spill] sm:$0xff]  ;;  %12256 = vst [vmem:[#allocation146_spill] sm:$0xff] %v9231_v59  ;;  %v12264_v33 = vld [vmem:[#allocation100_spill] sm:$0xff] }
 0x15e   : > { %12179 = vst [vmem:[#allocation128_spill] sm:$0xff] %v9008_v6  ;;  %v9021_v39 = vadd.f32 %v12184_v51, %v8812_v28  ;;  %v12186_v50 = vld [vmem:[#allocation215_spill] sm:$0xff]  ;;  %12189 = vst [vmem:[#allocation77_spill] sm:$0xff] %v9028_v13  ;;  %v9033_v28 = vadd.f32 %v12191_v9, %v8820_v60  ;;  %v1422_v2 = vmul.f32 %v12000_v48, %v12182_v19  ;;  %v12197_v45 = vld [vmem:[#allocation229_spill] sm:$0xff]  ;;  %v485_v19 = vpop.permute.xlu0 %484 }
 0x15f   : > { %v1412_v34 = vadd.f32 %v12186_v50, %v1394_v57  ;;  %v1106_v6 = vadd.f32 %v1098_v58, %v1088_v1  ;;  %v1268_v12 = vadd.f32 %v1260_v52, %v1250_v23  ;;  %v1071_v46 = vmul.f32 %v12015_v14, %v995_v15  ;;  %v12194_v22 = vld [vmem:[#allocation207_spill] sm:$0xff]  ;;  %5744 = vmatmul.mubr.msk.f32.gmra.mxu0 %vm11744_vm9, %v1747_v53  ;;  %v979_v23 = vpop.permute.xlu1 %978  ;;  %v12198_v51 = vld [vmem:[#allocation212_spill] sm:$0xff]  ;;  %v12265_v49 = vld [vmem:[#allocation234_spill] sm:$0xff] }
 0x160   : > { %12185 = vst [vmem:[#allocation137_spill] sm:$0xff] %v9021_v39  ;;  %12192 = vst [vmem:[#allocation210_spill] sm:$0xff] %v9033_v28  ;;  %v9041_v57 = vadd.f32 %v12193_v10, %v610_v31  ;;  %v9045_v1 = vadd.f32 %v12194_v22, %v8875_v42  ;;  %v1233_v8 = vmul.f32 %v11992_v16, %v995_v15  ;;  %v12199_v42 = vld [vmem:[#allocation214_spill] sm:$0xff]  ;;  %v1587_v10 = vsel %vm435_vm11, %v1569_v7, 0.0  ;;  %v12210_v39 = vld [vmem:[#allocation231_spill] sm:$0xff] }
 0x161   : > { %v1662_v60 = vmul.f32 %v12032_v20, %v1586_v5  ;;  %v9050_v58 = vadd.f32 %v1422_v2, %v1412_v34  ;;  %v611_v52 = vadd.f32 %v603_v41, %v593_v18  ;;  %v1099_v4 = vmul.f32 %v12129_v32, %v12197_v45  ;;  %v12201_v34 = vld [vmem:[#allocation225_spill] sm:$0xff]  ;;  %v12202_v2 = vld [vmem:[#allocation244_spill] sm:$0xff]  ;;  %v12205_v28 = vld [vmem:[#allocation218_spill] sm:$0xff] }
 0x162   : > { %12195 = vst [vmem:[#allocation173_spill] sm:$0xff] %v9045_v1  ;;  %v1824_v31 = vmul.f32 %v12022_v29, %v1586_v5  ;;  %v9056_v50 = vadd.f32 %v12198_v51, %v1106_v6  ;;  %v9059_v62 = vadd.f32 %v12199_v42, %v1268_v12  ;;  %v1261_v63 = vmul.f32 %v12183_v47, %v12197_v45  ;;  %v12203_v6 = vld [vmem:[#allocation227_spill] sm:$0xff]  ;;  %v12204_v51 = vld [vmem:[#allocation233_spill] sm:$0xff]  ;;  %vm12270_vm10 = vmmov %vm11744_vm9 }
 0x163   : > { %12196 = vst [vmem:[#allocation199_spill] sm:$0xff] %v9050_v58  ;;  %v1423_v53 = vmul.f32 %v12000_v48, %v12197_v45  ;;  %v1089_v9 = vadd.f32 %v12201_v34, %v1071_v46  ;;  %v1395_v18 = vmul.f32 %v11995_v26, %v995_v15  ;;  %v1690_v41 = vmul.f32 %v12136_v37, %v12202_v2  ;;  %v12206_v34 = vld [vmem:[#allocation236_spill] sm:$0xff] }
 0x164   : > { %12200 = vst [vmem:[#allocation202_spill] sm:$0xff] %v9059_v62  ;;  %v1251_v22 = vadd.f32 %v12203_v6, %v1233_v8  ;;  %v1680_v12 = vadd.f32 %v12204_v51, %v1662_v60  ;;  %v1986_v42 = vmul.f32 %v12023_v40, %v1586_v5  ;;  %v9075_v45 = vadd.f32 %v12205_v28, %v611_v52  ;;  %v12207_v8 = vld [vmem:[#allocation222_spill] sm:$0xff]  ;;  %v12209_v60 = vld [vmem:[#allocation243_spill] sm:$0xff]  ;;  %v981_v52 = vpop.permute.xlu1 %980 }
 0x165   : > { %v1852_v15 = vmul.f32 %v12084_v44, %v12202_v2  ;;  %v2014_v46 = vmul.f32 %v12085_v24, %v12202_v2  ;;  %v1842_v7 = vadd.f32 %v12206_v34, %v1824_v31  ;;  %v9084_v6 = vadd.f32 %v12207_v8, %v8929_v30  ;;  %v12211_v8 = vld [vmem:[#allocation238_spill] sm:$0xff]  ;;  %v9225_v62 = vld [vmem:[%s6684_s22 + $0xb8] sm:$0xff] }
 0x166   : > { %v1691_v5 = vmul.f32 %v12136_v37, %v12209_v60  ;;  %v1663_v54 = vmul.f32 %v12032_v20, %v1587_v10  ;;  %v9090_v28 = vsel %vm435_vm11, %v979_v23, 0.0  ;;  %v1107_v51 = vadd.f32 %v1099_v4, %v1089_v9 }
 0x167   : > { %12208 = vst [vmem:[#allocation209_spill] sm:$0xff] %v9084_v6  ;;  %v1413_v56 = vadd.f32 %v12210_v39, %v1395_v18  ;;  %v576_v2 = vmul.f32 %v12106_v3, %v500_v38  ;;  %v9095_v31 = vsel %vm435_vm11, %v485_v19, 0.0  ;;  %v1269_v34 = vadd.f32 %v1261_v63, %v1251_v22  ;;  %v12214_v63 = vld [vmem:[#allocation240_spill] sm:$0xff]  ;;  %v12215_v22 = vld [vmem:[#allocation226_spill] sm:$0xff] }
 0x168   : > { %v1698_v30 = vadd.f32 %v1690_v41, %v1680_v12  ;;  %v2004_v27 = vadd.f32 %v12211_v8, %v1986_v42  ;;  %v1853_v25 = vmul.f32 %v12084_v44, %v12209_v60  ;;  %v1860_v61 = vadd.f32 %v1852_v15, %v1842_v7  ;;  %v12217_v15 = vld [vmem:[#allocation249_spill] sm:$0xff]  ;;  %v12218_v8 = vld [vmem:[#allocation228_spill] sm:$0xff]  ;;  %v1573_v6 = vpop.permute.xlu1 %1572 }
 0x169   : > { %v1825_v23 = vmul.f32 %v12022_v29, %v1587_v10  ;;  %v1072_v4 = vmul.f32 %v12015_v14, %v9090_v28  ;;  %v9104_v39 = vsel %vm435_vm11, %v981_v52, 0.0  ;;  %v9108_v19 = vmul.f32 %v12085_v24, %v12209_v60  ;;  %v12220_v60 = vld [vmem:[#allocation235_spill] sm:$0xff] }
 0x16a   : > { %12212 = vst [vmem:[#allocation91_spill] sm:$0xff] %v9104_v39  ;;  %v1681_v9 = vadd.f32 %v12214_v63, %v1663_v54  ;;  %v1987_v18 = vmul.f32 %v12023_v40, %v1587_v10  ;;  %v577_v41 = vmul.f32 %v12106_v3, %v9095_v31  ;;  %v9115_v12 = vadd.f32 %v12215_v22, %v1107_v51  ;;  %v12222_v3 = vld [vmem:[#allocation237_spill] sm:$0xff]  ;;  %v12226_v22 = vld [vmem:[#allocation256_spill] sm:$0xff] }
 0x16b   : > { %12213 = vst [vmem:[#allocation103_spill] sm:$0xff] %v9108_v19  ;;  %v9117_v42 = vadd.f32 %v1423_v53, %v1413_v56  ;;  %v594_v7 = vadd.f32 %v12217_v15, %v576_v2  ;;  %v706_v52 = vmul.f32 %v7570_v43, %v500_v38  ;;  %v9122_v21 = vadd.f32 %v12218_v8, %v1269_v34  ;;  %v12224_v51 = vld [vmem:[#allocation245_spill] sm:$0xff]  ;;  %v12225_v53 = vld [vmem:[#allocation82_spill] sm:$0xff]  ;;  %v12227_v8 = vld [vmem:[#allocation247_spill] sm:$0xff] }
 0x16c   : > { %v1716_v58 = vadd.f32 %v12220_v60, %v1698_v30  ;;  %v9125_v54 = vadd.f32 %v2014_v46, %v2004_v27  ;;  %v1073_v10 = vmul.f32 %v12015_v14, %v9104_v39  ;;  %v9130_v63 = vadd.f32 %v12222_v3, %v1860_v61  ;;  %v12229_v27 = vld [vmem:[#allocation108_spill] sm:$0xff]  ;;  %v12230_v60 = vld [vmem:[#allocation110_spill] sm:$0xff] }
 0x16d   : > { %12216 = vst [vmem:[#allocation200_spill] sm:$0xff] %v9117_v42  ;;  %12219 = vst [vmem:[#allocation78_spill] sm:$0xff] %v9122_v21  ;;  %v1843_v56 = vadd.f32 %v12224_v51, %v1825_v23  ;;  %v604_v2 = vmul.f32 %v12124_v0, %v12225_v53  ;;  %v1090_v15 = vadd.f32 %v12226_v22, %v1072_v4  ;;  %v1571_v42 = vpop.permute.xlu0 %1570  ;;  %v12231_v61 = vld [vmem:[#allocation252_spill] sm:$0xff]  ;;  %v12233_v51 = vld [vmem:[#allocation121_spill] sm:$0xff] }
 0x16e   : > { %12221 = vst [vmem:[#allocation87_spill] sm:$0xff] %v9125_v54  ;;  %12223 = vst [vmem:[#allocation105_spill] sm:$0xff] %v9130_v63  ;;  %v1699_v34 = vadd.f32 %v1691_v5, %v1681_v9  ;;  %v9137_v19 = vadd.f32 %v12227_v8, %v1987_v18  ;;  %v734_v46 = vmul.f32 %v12229_v27, %v12225_v53  ;;  %v12232_v54 = vld [vmem:[#allocation143_spill] sm:$0xff]  ;;  %v12234_v4 = vld [vmem:[#allocation145_spill] sm:$0xff] }
 0x16f   : > { %v595_v14 = vadd.f32 %v12230_v60, %v577_v41  ;;  %v612_v30 = vadd.f32 %v604_v2, %v594_v7  ;;  %v724_v3 = vadd.f32 %v12231_v61, %v706_v52  ;;  %v1100_v23 = vmul.f32 %v12129_v32, %v12232_v54  ;;  %v12235_v18 = vld [vmem:[#allocation71_spill] sm:$0xff]  ;;  %v12236_v22 = vld [vmem:[#allocation152_spill] sm:$0xff]  ;;  %v12238_v7 = vld [vmem:[#allocation113_spill] sm:$0xff] }
 0x170   : > { %12228 = vst [vmem:[#allocation206_spill] sm:$0xff] %v9137_v19  ;;  %v605_v24 = vmul.f32 %v12124_v0, %v12233_v51  ;;  %v1234_v5 = vmul.f32 %v11992_v16, %v9090_v28  ;;  %v1091_v9 = vadd.f32 %v12234_v4, %v1073_v10  ;;  %v1674_v8 = vmul.f32 %v12236_v22, %v12235_v18  ;;  %v12240_v60 = vld [vmem:[#allocation242_spill] sm:$0xff]  ;;  %v12241_v63 = vld [vmem:[#allocation112_spill] sm:$0xff]  ;;  %v12242_v21 = vld [vmem:[#allocation125_spill] sm:$0xff] }
 0x171   : > { %v9153_v19 = vsel %vm435_vm11, %v1571_v42, 0.0  ;;  %v9155_v41 = vadd.f32 %v1853_v25, %v1843_v56  ;;  %v9159_v52 = vmul.f32 %v12238_v7, %v12225_v53  ;;  %v1108_v2 = vadd.f32 %v1100_v23, %v1090_v15  ;;  %v12243_v25 = vld [vmem:[#allocation251_spill] sm:$0xff]  ;;  %v12245_v23 = vld [vmem:[#allocation72_spill] sm:$0xff] }
 0x172   : > { %12237 = vst [vmem:[#allocation89_spill] sm:$0xff] %v9153_v19  ;;  %v1664_v0 = vmul.f32 %v12032_v20, %v9153_v19  ;;  %v1717_v61 = vadd.f32 %v12240_v60, %v1699_v34  ;;  %v9165_v10 = vmul.f32 %v12241_v63, %v500_v38  ;;  %v613_v4 = vadd.f32 %v605_v24, %v595_v14  ;;  %v12244_v38 = vld [vmem:[#allocation259_spill] sm:$0xff]  ;;  %v12246_v60 = vld [vmem:[#allocation258_spill] sm:$0xff] }
 0x173   : > { %12239 = vst [vmem:[#allocation92_spill] sm:$0xff] %v9159_v52  ;;  %v1101_v42 = vmul.f32 %v12129_v32, %v12242_v21  ;;  %v9170_v56 = vadd.f32 %v12243_v25, %v612_v30  ;;  %v9172_v53 = vadd.f32 %v734_v46, %v724_v3  ;;  %v9176_v15 = vmul.f32 %v12183_v47, %v12232_v54 }
 0x174   : > { %v9180_v34 = vmul.f32 %v12229_v27, %v12233_v51  ;;  %v9183_v24 = vadd.f32 %v12244_v38, %v1234_v5  ;;  %v1682_v32 = vadd.f32 %v1674_v8, %v1664_v0  ;;  %v1675_v30 = vmul.f32 %v12236_v22, %v12245_v23  ;;  %v12247_v5 = vld [vmem:[#allocation264_spill] sm:$0xff]  ;;  %v12248_v8 = vld [vmem:[#allocation117_spill] sm:$0xff]  ;;  %v12251_v38 = vld [vmem:[#allocation59_spill] sm:$0xff] }
 0x175   : > { %v1109_v14 = vadd.f32 %v1101_v42, %v1091_v9  ;;  %v9188_v25 = vadd.f32 %v12246_v60, %v1108_v2  ;;  %v9192_v46 = vmul.f32 %v7570_v43, %v9095_v31  ;;  %v9195_v3 = vsel %vm435_vm11, %v1573_v6, 0.0  ;;  %v9211_v6 = vld [vmem:[%s6684_s22 + $0xb0] sm:$0xff]  ;;  %v12249_v0 = vld [vmem:[#allocation156_spill] sm:$0xff]  ;;  %vm12255_vm11 = vmmov %vm11744_vm9 }
 0x176   : > { %v1156_v27 = vadd.f32 %v9056_v50, %v9041_v57  ;;  %v9200_v9 = vadd.f32 %v12247_v5, %v613_v4  ;;  %v9204_v22 = vmul.f32 %v11992_v16, %v9104_v39  ;;  %v1692_v2 = vmul.f32 %v12136_v37, %v12248_v8  ;;  %v12250_v50 = vld [vmem:[#allocation160_spill] sm:$0xff]  ;;  %v12252_v16 = vld [vmem:[#allocation93_spill] sm:$0xff]  ;;  %v12253_v5 = vld [vmem:[#allocation118_spill] sm:$0xff] }
 0x177   : > { %v1665_v43 = vmul.f32 %v12032_v20, %v9195_v3  ;;  %v1710_v57 = vmul.f32 %v9211_v6, %v12249_v0  ;;  %v9217_v4 = vmul.f32 %v12250_v50, %v12235_v18  ;;  %v546_v60 = vmul.f32 %v12252_v16, %v12251_v38  ;;  %v12254_v51 = vld [vmem:[#allocation138_spill] sm:$0xff]  ;;  %v12258_v38 = vld [vmem:[#allocation60_spill] sm:$0xff]  ;;  %v9263_v39 = vld [vmem:[%s6684_s22 + $0x28] sm:$0xff] }
 0x178   : > { %v1748_v42 = vadd.f32 %v1716_v58, %v1156_v27  ;;  %v1127_v52 = vadd.f32 %v12253_v5, %v1109_v14  ;;  %v1700_v7 = vadd.f32 %v1692_v2, %v1682_v32  ;;  %v1693_v20 = vmul.f32 %v12136_v37, %v12254_v51  ;;  %v12257_v58 = vld [vmem:[#allocation95_spill] sm:$0xff]  ;;  %v9238_v32 = vld [vmem:[%s6684_s22 + $0x60] sm:$0xff]  ;;  %v12261_v2 = vld [vmem:[#allocation98_spill] sm:$0xff] }
 0x179   : > { %v1683_v13 = vadd.f32 %v1675_v30, %v1665_v43  ;;  %v1711_v1 = vmul.f32 %v9225_v62, %v12249_v0  ;;  %v556_v27 = vmul.f32 %v9231_v59, %v12257_v58  ;;  %v1042_v14 = vmul.f32 %v12259_v17, %v12258_v38  ;;  %12260 = vst [vmem:[#allocation104_spill] sm:$0xff] %v9238_v32  ;;  %v12262_v0 = vld [vmem:[#allocation63_spill] sm:$0xff] }
 0x17a   : > { %5746 = vmatprep.mubr.msk.f32.mxu0 %vm12255_vm11, %v1748_v42  ;;  %v1052_v37 = vmul.f32 %v9238_v32, %v12261_v2  ;;  %v9244_v30 = vmul.f32 %v12022_v29, %v9153_v19  ;;  %v12263_v42 = vld [vmem:[#allocation99_spill] sm:$0xff]  ;;  %v1644_v59 = vmul.f32 %v12265_v49, %v12264_v33  ;;  %v9252_v38 = vmul.f32 %v12250_v50, %v12245_v23  ;;  %vm12281_vm11 = vmmov %vm11744_vm9 }
 0x17b   : > { %v1701_v43 = vadd.f32 %v1693_v20, %v1683_v13  ;;  %v1634_v5 = vmul.f32 %v12263_v42, %v12262_v0  ;;  %v564_v40 = vadd.f32 %v556_v27, %v546_v60  ;;  %v1157_v32 = vadd.f32 %v9115_v12, %v9075_v45  ;;  %v12266_v0 = vld [vmem:[#allocation61_spill] sm:$0xff]  ;;  %v12267_v60 = vld [vmem:[#allocation62_spill] sm:$0xff] }
 0x17c   : > { %v1060_v36 = vadd.f32 %v1052_v37, %v1042_v14  ;;  %v1718_v35 = vadd.f32 %v1710_v57, %v1700_v7  ;;  %v9258_v13 = vmul.f32 %v12022_v29, %v9195_v3  ;;  %v547_v19 = vmul.f32 %v12252_v16, %v12266_v0  ;;  %v9270_v12 = vld [vmem:[%s6684_s22 + $0x68] sm:$0xff]  ;;  %v12272_v14 = vld [vmem:[#allocation250_spill] sm:$0xff] }
 0x17d   : > { %v1652_v20 = vadd.f32 %v1644_v59, %v1634_v5  ;;  %v1719_v11 = vadd.f32 %v1711_v1, %v1701_v43  ;;  %v1749_v55 = vadd.f32 %v1717_v61, %v1157_v32  ;;  %v557_v50 = vmul.f32 %v9263_v39, %v12257_v58  ;;  %v12268_v59 = vld [vmem:[#allocation64_spill] sm:$0xff]  ;;  %v12269_v1 = vld [vmem:[#allocation241_spill] sm:$0xff] }
 0x17e   : > { %v1148_v49 = vadd.f32 %v1060_v36, %v564_v40  ;;  %v1043_v45 = vmul.f32 %v12259_v17, %v12267_v60  ;;  %v1053_v29 = vmul.f32 %v9270_v12, %v12261_v2  ;;  %v1635_v7 = vmul.f32 %v12263_v42, %v12268_v59  ;;  %v12271_v57 = vld [vmem:[#allocation65_spill] sm:$0xff] }
 0x17f   : > { %v1645_v40 = vmul.f32 %v12269_v1, %v12264_v33  ;;  %5747 = vmatmul.mubr.msk.f32.gmra.mxu0 %vm12270_vm10, %v1749_v55  ;;  %v565_v61 = vadd.f32 %v557_v50, %v547_v19  ;;  %v548_v27 = vmul.f32 %v12252_v16, %v12271_v57  ;;  %v558_v32 = vmul.f32 %v12272_v14, %v12257_v58  ;;  %v12273_v5 = vld [vmem:[#allocation69_spill] sm:$0xff]  ;;  %vm12285_vm10 = vmmov %vm11744_vm9 }
 0x180   : > { %v1740_v36 = vadd.f32 %v1652_v20, %v1148_v49  ;;  %v1061_v37 = vadd.f32 %v1053_v29, %v1043_v45  ;;  %v1044_v60 = vmul.f32 %v12259_v17, %v12273_v5  ;;  %v12274_v59 = vld [vmem:[#allocation257_spill] sm:$0xff]  ;;  %v1636_v55 = vmul.f32 %v12263_v42, %v12235_v18  ;;  %v12275_v49 = vld [vmem:[#allocation66_spill] sm:$0xff] }
 0x181   : > { %v1653_v43 = vadd.f32 %v1645_v40, %v1635_v7  ;;  %v1054_v0 = vmul.f32 %v12274_v59, %v12261_v2  ;;  %v566_v20 = vadd.f32 %v558_v32, %v548_v27  ;;  %v1646_v19 = vmul.f32 %v9211_v6, %v12264_v33  ;;  %v12276_v7 = vld [vmem:[#allocation263_spill] sm:$0xff]  ;;  %v12277_v40 = vld [vmem:[#allocation70_spill] sm:$0xff] }
 0x182   : > { %5774 = vmatprep.mubr.msk.f32.mxu1 %vm11744_vm9, %v1740_v36  ;;  %v549_v50 = vmul.f32 %v12252_v16, %v12275_v49  ;;  %v1149_v45 = vadd.f32 %v1061_v37, %v565_v61  ;;  %v559_v1 = vmul.f32 %v12276_v7, %v12257_v58  ;;  %v1045_v59 = vmul.f32 %v12259_v17, %v12277_v40  ;;  %v12278_v27 = vld [vmem:[#allocation166_spill] sm:$0xff]  ;;  %v12466_v40 = vld [vmem:[#allocation53_spill] sm:$0xff] }
 0x183   : > { %v1062_v29 = vadd.f32 %v1054_v0, %v1044_v60  ;;  %v1654_v36 = vadd.f32 %v1646_v19, %v1636_v55  ;;  %v1055_v14 = vmul.f32 %v12278_v27, %v12261_v2  ;;  %v1637_v32 = vmul.f32 %v12263_v42, %v12245_v23  ;;  %v12279_v2 = vld [vmem:[#allocation148_spill] sm:$0xff]  ;;  %v12280_v19 = vld [vmem:[#allocation86_spill] sm:$0xff]  ;;  %v12286_v27 = vld [vmem:[#allocation181_spill] sm:$0xff] }
 0x184   : > { %v1647_v16 = vmul.f32 %v9225_v62, %v12264_v33  ;;  %v1741_v61 = vadd.f32 %v1653_v43, %v1149_v45  ;;  %v567_v60 = vadd.f32 %v559_v1, %v549_v50  ;;  %v1158_v58 = vadd.f32 %v9188_v25, %v9170_v56  ;;  %v9311_v43 = vld [vmem:[%s6684_s22 + $0x40] sm:$0xff]  ;;  %v12283_v56 = vld [vmem:[#allocation81_spill] sm:$0xff] }
 0x185   : > { %v1150_v0 = vadd.f32 %v1062_v29, %v566_v20  ;;  %v1063_v17 = vadd.f32 %v1055_v14, %v1045_v59  ;;  %v1159_v55 = vadd.f32 %v1127_v52, %v9200_v9  ;;  %v662_v7 = vadd.f32 %v12280_v19, %v12279_v2  ;;  %v12282_v20 = vld [vmem:[#allocation76_spill] sm:$0xff]  ;;  %v9321_v9 = vld [vmem:[%s6684_s22 + $0x10] sm:$0xff]  ;;  %v9343_v2 = vld [vmem:[%s6684_s22 + $0x18] sm:$0xff] }
 0x186   : > { %v1655_v37 = vadd.f32 %v1647_v16, %v1637_v32  ;;  %5775 = vmatmul.mubr.msk.f32.gmra.mxu1 %vm12281_vm11, %v1741_v61  ;;  %v1750_v33 = vadd.f32 %v1718_v35, %v1158_v58  ;;  %v1182_v50 = vmul.f32 %v9311_v43, %v12282_v20  ;;  %v9316_v45 = vld [vmem:[%s6684_s22 + $0x80] sm:$0xff]  ;;  %v12287_v32 = vld [vmem:[#allocation109_spill] sm:$0xff]  ;;  %v9335_v16 = vld [vmem:[%s6684_s22 + $0x90] sm:$0xff] }
 0x187   : > { %v1742_v42 = vadd.f32 %v1654_v36, %v1150_v0  ;;  %v1774_v25 = vmul.f32 %v9316_v45, %v12283_v56  ;;  %v1151_v29 = vadd.f32 %v1063_v17, %v567_v60  ;;  %v1751_v52 = vadd.f32 %v1719_v11, %v1159_v55  ;;  %v12284_v1 = vld [vmem:[#allocation68_spill] sm:$0xff]  ;;  %v9326_v36 = vld [vmem:[%s6684_s22 + $0x50] sm:$0xff]  ;;  %vm12288_vm11 = vmmov %vm11744_vm9 }
 0x188   : > { %v656_v59 = vmul.f32 %v9321_v9, %v12284_v1  ;;  %v1184_v35 = vmul.f32 %v9326_v36, %v12282_v20  ;;  %5749 = vmatprep.mubr.msk.f32.mxu0 %vm11744_vm9, %v1750_v33  ;;  %v1190_v14 = vadd.f32 %v1182_v50, %v12286_v27  ;;  %v1776_v61 = vmul.f32 %v9335_v16, %v12283_v56  ;;  %v12289_v60 = vld [vmem:[#allocation174_spill] sm:$0xff]  ;;  %v12290_v17 = vld [vmem:[#allocation119_spill] sm:$0xff] }
 0x189   : > { %5777 = vmatprep.mubr.msk.f32.mxu1 %vm12285_vm10, %v1742_v42  ;;  %v1782_v11 = vadd.f32 %v1774_v25, %v12287_v32  ;;  %v1743_v0 = vadd.f32 %v1655_v37, %v1151_v29  ;;  %5750 = vmatmul.mubr.msk.f32.gmra.mxu0 %vm12288_vm11, %v1751_v52  ;;  %v657_v19 = vmul.f32 %v9343_v2, %v12284_v1  ;;  %v12291_v33 = vld [vmem:[#allocation158_spill] sm:$0xff]  ;;  %v9349_v25 = vld [vmem:[%s6684_s22 + $0x58] sm:$0xff]  ;;  %v12292_v52 = vld [vmem:[#allocation265_spill] sm:$0xff] }
 0x18a   : > { %v664_v58 = vadd.f32 %v656_v59, %v12289_v60  ;;  %v1192_v55 = vadd.f32 %v1184_v35, %v12290_v17  ;;  %v1298_v42 = vadd.f32 %v1190_v14, %v662_v7  ;;  %v1784_v50 = vadd.f32 %v1776_v61, %v12291_v33  ;;  %v9354_v37 = vld [vmem:[%s6684_s22 + $0x98] sm:$0xff]  ;;  %v12293_v35 = vld [vmem:[#allocation122_spill] sm:$0xff]  ;;  %vm12294_vm10 = vmmov %vm11744_vm9 }
 0x18b   : > { %v1185_v27 = vmul.f32 %v9349_v25, %v12282_v20  ;;  %v1777_v29 = vmul.f32 %v9354_v37, %v12283_v56  ;;  %v725_v59 = vadd.f32 %v12292_v52, %v9192_v46  ;;  %v1253_v32 = vadd.f32 %v12293_v35, %v9204_v22  ;;  %5778 = vmatmul.mubr.msk.f32.gmra.mxu1 %vm12294_vm10, %v1743_v0  ;;  %v12295_v14 = vld [vmem:[#allocation163_spill] sm:$0xff]  ;;  %v12297_v33 = vld [vmem:[#allocation150_spill] sm:$0xff]  ;;  %v12298_v1 = vld [vmem:[#allocation180_spill] sm:$0xff] }
 0x18c   : > { %v1300_v7 = vadd.f32 %v1192_v55, %v664_v58  ;;  %v665_v61 = vadd.f32 %v657_v19, %v12295_v14  ;;  %v1844_v60 = vadd.f32 %v9217_v4, %v9244_v30  ;;  %v9366_v17 = vadd.f32 %v1782_v11, %v1298_v42  ;;  %v12306_v52 = vld [vmem:[#allocation261_spill] sm:$0xff]  ;;  %vm12392_vm11 = vmmov %vm12294_vm10 }
 0x18d   : > { %v1193_v20 = vadd.f32 %v1185_v27, %v12297_v33  ;;  %v1785_v56 = vadd.f32 %v1777_v29, %v12298_v1  ;;  %v1396_v46 = vmul.f32 %v11995_v26, %v9090_v28  ;;  %v1263_v22 = vmul.f32 %v12183_v47, %v12242_v21  ;;  %v12300_v28 = vld [vmem:[#allocation246_spill] sm:$0xff]  ;;  %v12312_v33 = vld [vmem:[#allocation191_spill] sm:$0xff] }
 0x18e   : > { %12296 = vst [vmem:[#allocation106_spill] sm:$0xff] %v9366_v17  ;;  %v1845_v0 = vadd.f32 %v9252_v38, %v9258_v13  ;;  %v9376_v58 = vadd.f32 %v1784_v50, %v1300_v7  ;;  %v1270_v4 = vadd.f32 %v9176_v15, %v9183_v24  ;;  %v837_v30 = vmul.f32 %v12241_v63, %v9095_v31  ;;  %v12301_v13 = vld [vmem:[#allocation254_spill] sm:$0xff]  ;;  %v12302_v15 = vld [vmem:[#allocation167_spill] sm:$0xff] }
 0x18f   : > { %v1854_v1 = vmul.f32 %v12084_v44, %v12248_v8  ;;  %v1301_v11 = vadd.f32 %v1193_v20, %v665_v61  ;;  %v1879_v55 = vadd.f32 %v12300_v28, %v9155_v41  ;;  %v743_v47 = vadd.f32 %v9180_v34, %v725_v59  ;;  %v12304_v20 = vld [vmem:[#allocation253_spill] sm:$0xff]  ;;  %v12307_v59 = vld [vmem:[#allocation127_spill] sm:$0xff]  ;;  %v12309_v7 = vld [vmem:[#allocation266_spill] sm:$0xff] }
 0x190   : > { %12299 = vst [vmem:[#allocation157_spill] sm:$0xff] %v9376_v58  ;;  %v1271_v19 = vadd.f32 %v1263_v22, %v1253_v32  ;;  %v1855_v38 = vmul.f32 %v12084_v44, %v12254_v51  ;;  %v854_v42 = vadd.f32 %v12301_v13, %v9165_v10  ;;  %v1872_v24 = vmul.f32 %v9211_v6, %v12302_v15  ;;  %v12305_v44 = vld [vmem:[#allocation260_spill] sm:$0xff]  ;;  %v12308_v32 = vld [vmem:[#allocation91_spill] sm:$0xff]  ;;  %v12310_v61 = vld [vmem:[#allocation130_spill] sm:$0xff] }
 0x191   : > { %v1862_v31 = vadd.f32 %v1854_v1, %v1844_v60  ;;  %v9393_v63 = vadd.f32 %v1785_v56, %v1301_v11  ;;  %v760_v50 = vadd.f32 %v12304_v20, %v9172_v53  ;;  %v1424_v41 = vmul.f32 %v12000_v48, %v12232_v54  ;;  %v12311_v60 = vld [vmem:[#allocation182_spill] sm:$0xff]  ;;  %v12314_v11 = vld [vmem:[#allocation107_spill] sm:$0xff] }
 0x192   : > { %v1873_v34 = vmul.f32 %v9225_v62, %v12302_v15  ;;  %v1863_v27 = vadd.f32 %v1855_v38, %v1845_v0  ;;  %v1288_v29 = vadd.f32 %v12305_v44, %v1270_v4  ;;  %v1414_v10 = vadd.f32 %v12306_v52, %v1396_v46  ;;  %v12313_v1 = vld [vmem:[#allocation134_spill] sm:$0xff]  ;;  %v12316_v38 = vld [vmem:[#allocation89_spill] sm:$0xff]  ;;  %v12320_v44 = vld [vmem:[#allocation123_spill] sm:$0xff] }
 0x193   : > { %12303 = vst [vmem:[#allocation120_spill] sm:$0xff] %v9393_v63  ;;  %v855_v35 = vadd.f32 %v12307_v59, %v837_v30  ;;  %v1397_v56 = vmul.f32 %v11995_v26, %v12308_v32  ;;  %v761_v14 = vadd.f32 %v12309_v7, %v743_v47  ;;  %v1289_v53 = vadd.f32 %v12310_v61, %v1271_v19  ;;  %v12315_v4 = vld [vmem:[#allocation170_spill] sm:$0xff]  ;;  %v12319_v26 = vld [vmem:[#allocation51_spill] sm:$0xff]  ;;  %v12324_v32 = vld [vmem:[#allocation173_spill] sm:$0xff] }
 0x194   : > { %v1314_v22 = vadd.f32 %v12312_v33, %v12311_v60  ;;  %v1316_v0 = vadd.f32 %v12314_v11, %v12313_v1  ;;  %v1998_v28 = vmul.f32 %v12315_v4, %v12235_v18  ;;  %v1880_v46 = vadd.f32 %v1872_v24, %v1862_v31  ;;  %v12317_v30 = vld [vmem:[#allocation178_spill] sm:$0xff]  ;;  %v12322_v52 = vld [vmem:[#allocation131_spill] sm:$0xff]  ;;  %v12326_v24 = vld [vmem:[#allocation77_spill] sm:$0xff] }
 0x195   : > { %v1988_v13 = vmul.f32 %v12317_v30, %v12316_v38  ;;  %v12318_v15 = vld [vmem:[#allocation114_spill] sm:$0xff]  ;;  %v1881_v47 = vadd.f32 %v1873_v34, %v1863_v27  ;;  %v1999_v60 = vmul.f32 %v12315_v4, %v12245_v23  ;;  %v12328_v33 = vld [vmem:[#allocation209_spill] sm:$0xff]  ;;  %v1320_v38 = vadd.f32 %v1288_v29, %v760_v50  ;;  %v12336_v50 = vld [vmem:[#allocation84_spill] sm:$0xff] }
 0x196   : > { %v1317_v20 = vadd.f32 %v12319_v26, %v12318_v15  ;;  %v9419_v19 = vadd.f32 %v12320_v44, %v1314_v22  ;;  %v9422_v59 = vadd.f32 %v12322_v52, %v1316_v0  ;;  %v12325_v7 = vld [vmem:[#allocation202_spill] sm:$0xff]  ;;  %v12330_v34 = vld [vmem:[#allocation105_spill] sm:$0xff]  ;;  %v1321_v22 = vadd.f32 %v1289_v53, %v761_v14  ;;  %v9437_v15 = vld [vmem:[%s6684_s22] sm:$0xff] }
 0x197   : > { %v1318_v61 = vadd.f32 %v12325_v7, %v12324_v32  ;;  %v12329_v1 = vld [vmem:[#allocation78_spill] sm:$0xff]  ;;  %v12332_v0 = vld [vmem:[#allocation75_spill] sm:$0xff]  ;;  %v1989_v4 = vmul.f32 %v12317_v30, %v9195_v3  ;;  %v9447_v32 = vadd.f32 %v1880_v46, %v1320_v38  ;;  %v1936_v29 = vmul.f32 %v9316_v45, %v12336_v50  ;;  %v12338_v14 = vld [vmem:[#allocation169_spill] sm:$0xff] }
 0x198   : > { %12321 = vst [vmem:[#allocation221_spill] sm:$0xff] %v9419_v19  ;;  %12323 = vst [vmem:[#allocation223_spill] sm:$0xff] %v9422_v59  ;;  %v9429_v31 = vadd.f32 %v12326_v24, %v1317_v20  ;;  %v1319_v11 = vadd.f32 %v12329_v1, %v12328_v33  ;;  %v784_v26 = vmul.f32 %v9437_v15, %v12332_v0  ;;  %v12333_v44 = vld [vmem:[#allocation79_spill] sm:$0xff]  ;;  %v12340_v1 = vld [vmem:[#allocation133_spill] sm:$0xff]  ;;  %v9894_v18 = vstv %s9816_s13 }
 0x199   : > { %v9434_v27 = vadd.f32 %v12330_v34, %v1318_v61  ;;  %v1344_v52 = vmul.f32 %v9311_v43, %v12333_v44  ;;  %12335 = vst [vmem:[#allocation159_spill] sm:$0xff] %v9447_v32  ;;  %v9451_v7 = vadd.f32 %v1881_v47, %v1321_v22  ;;  %v12339_v61 = vld [vmem:[#allocation151_spill] sm:$0xff]  ;;  %v786_v33 = vmul.f32 %v9321_v9, %v12332_v0  ;;  %v12341_v47 = vld [vmem:[#allocation186_spill] sm:$0xff] }
 0x19a   : > { %12327 = vst [vmem:[#allocation175_spill] sm:$0xff] %v9429_v31  ;;  %v9445_v20 = vadd.f32 %v1879_v55, %v1319_v11  ;;  %v792_v53 = vadd.f32 %v784_v26, %v12338_v14  ;;  %v1944_v34 = vadd.f32 %v1936_v29, %v12340_v1  ;;  %v1346_v3 = vmul.f32 %v9326_v36, %v12333_v44  ;;  %v12342_v26 = vld [vmem:[#allocation141_spill] sm:$0xff] }
 0x19b   : > { %12331 = vst [vmem:[#allocation189_spill] sm:$0xff] %v9434_v27  ;;  %12337 = vst [vmem:[#allocation267_spill] sm:$0xff] %v9451_v7  ;;  %v1352_v24 = vadd.f32 %v1344_v52, %v12339_v61  ;;  %v1938_v55 = vmul.f32 %v9335_v16, %v12336_v50  ;;  %v787_v46 = vmul.f32 %v9343_v2, %v12332_v0  ;;  %v12343_v29 = vld [vmem:[#allocation161_spill] sm:$0xff]  ;;  %v12344_v61 = vld [vmem:[#allocation142_spill] sm:$0xff] }
 0x19c   : > { %12334 = vst [vmem:[#allocation197_spill] sm:$0xff] %v9445_v20  ;;  %v794_v11 = vadd.f32 %v786_v33, %v12341_v47  ;;  %v1347_v38 = vmul.f32 %v9349_v25, %v12333_v44  ;;  %v1939_v22 = vmul.f32 %v9354_v37, %v12336_v50  ;;  %v1415_v52 = vadd.f32 %v12342_v26, %v1397_v56  ;;  %v12345_v7 = vld [vmem:[#allocation171_spill] sm:$0xff]  ;;  %v12348_v33 = vld [vmem:[#allocation192_spill] sm:$0xff]  ;;  %v12349_v0 = vld [vmem:[#allocation121_spill] sm:$0xff] }
 0x19d   : > { %v1460_v30 = vadd.f32 %v1352_v24, %v792_v53  ;;  %v1354_v14 = vadd.f32 %v1346_v3, %v12343_v29  ;;  %v1946_v1 = vadd.f32 %v1938_v55, %v12344_v61  ;;  %v795_v32 = vadd.f32 %v787_v46, %v12345_v7  ;;  %v12347_v53 = vld [vmem:[#allocation154_spill] sm:$0xff]  ;;  %v12350_v44 = vld [vmem:[#allocation113_spill] sm:$0xff]  ;;  %v12351_v3 = vld [vmem:[#allocation92_spill] sm:$0xff] }
 0x19e   : > { %v2006_v20 = vadd.f32 %v1998_v28, %v1988_v13  ;;  %v1355_v24 = vadd.f32 %v1347_v38, %v12347_v53  ;;  %v1947_v47 = vadd.f32 %v1939_v22, %v12348_v33  ;;  %v865_v31 = vmul.f32 %v12350_v44, %v12349_v0  ;;  %v12352_v7 = vld [vmem:[#allocation185_spill] sm:$0xff]  ;;  %v12354_v44 = vld [vmem:[#allocation206_spill] sm:$0xff]  ;;  %v12355_v22 = vld [vmem:[#allocation103_spill] sm:$0xff] }
 0x19f   : > { %v9473_v27 = vadd.f32 %v1944_v34, %v1460_v30  ;;  %v1425_v50 = vmul.f32 %v12000_v48, %v12242_v21  ;;  %v2007_v56 = vadd.f32 %v1999_v60, %v1989_v4  ;;  %v1462_v26 = vadd.f32 %v1354_v14, %v794_v11  ;;  %v12356_v48 = vld [vmem:[#allocation179_spill] sm:$0xff]  ;;  %v12362_v14 = vld [vmem:[#allocation168_spill] sm:$0xff] }
 0x1a0   : > { %v872_v29 = vadd.f32 %v12351_v3, %v854_v42  ;;  %v1432_v55 = vadd.f32 %v1424_v41, %v1414_v10  ;;  %v2016_v28 = vmul.f32 %v12352_v7, %v12248_v8  ;;  %v1463_v13 = vadd.f32 %v1355_v24, %v795_v32  ;;  %v12358_v41 = vld [vmem:[#allocation132_spill] sm:$0xff]  ;;  %v12360_v32 = vld [vmem:[#allocation199_spill] sm:$0xff] }
 0x1a1   : > { %12346 = vst [vmem:[#allocation111_spill] sm:$0xff] %v9473_v27  ;;  %v873_v34 = vadd.f32 %v865_v31, %v855_v35  ;;  %v1433_v46 = vadd.f32 %v1425_v50, %v1415_v52  ;;  %v2017_v30 = vmul.f32 %v12352_v7, %v12254_v51  ;;  %v9486_v38 = vadd.f32 %v1946_v1, %v1462_v26  ;;  %v12359_v10 = vld [vmem:[#allocation208_spill] sm:$0xff]  ;;  %v12366_v3 = vld [vmem:[#allocation255_spill] sm:$0xff] }
 0x1a2   : > { %v2023_v61 = vadd.f32 %v12355_v22, %v12354_v44  ;;  %v2034_v60 = vmul.f32 %v9211_v6, %v12356_v48  ;;  %v2024_v4 = vadd.f32 %v2016_v28, %v2006_v20  ;;  %v9492_v42 = vadd.f32 %v1947_v47, %v1463_v13  ;;  %v12361_v35 = vld [vmem:[#allocation216_spill] sm:$0xff]  ;;  %v12367_v47 = vld [vmem:[#allocation262_spill] sm:$0xff]  ;;  %v12368_v28 = vld [vmem:[#allocation87_spill] sm:$0xff] }
 0x1a3   : > { %12353 = vst [vmem:[#allocation83_spill] sm:$0xff] %v9486_v38  ;;  %v888_v11 = vadd.f32 %v12359_v10, %v12358_v41  ;;  %v1448_v31 = vadd.f32 %v12361_v35, %v12360_v32  ;;  %v2035_v50 = vmul.f32 %v9225_v62, %v12356_v48  ;;  %v2025_v52 = vadd.f32 %v2017_v30, %v2007_v56  ;;  %v12363_v1 = vld [vmem:[#allocation224_spill] sm:$0xff]  ;;  %v12369_v13 = vld [vmem:[#allocation239_spill] sm:$0xff]  ;;  %v12371_v10 = vld [vmem:[#allocation126_spill] sm:$0xff] }
 0x1a4   : > { %12357 = vst [vmem:[#allocation268_spill] sm:$0xff] %v9492_v42  ;;  %v889_v53 = vadd.f32 %v12363_v1, %v12362_v14  ;;  %v12364_v24 = vld [vmem:[#allocation200_spill] sm:$0xff]  ;;  %v890_v20 = vadd.f32 %v12366_v3, %v872_v29  ;;  %v1450_v7 = vadd.f32 %v12367_v47, %v1432_v55  ;;  %v2040_v44 = vadd.f32 %v12369_v13, %v12368_v28  ;;  %v12373_v48 = vld [vmem:[#allocation194_spill] sm:$0xff]  ;;  %v12376_v38 = vld [vmem:[#allocation165_spill] sm:$0xff] }
 0x1a5   : > { %v12365_v33 = vld [vmem:[#allocation232_spill] sm:$0xff]  ;;  %v1451_v32 = vadd.f32 %v12371_v10, %v1433_v46  ;;  %v2042_v14 = vadd.f32 %v2034_v60, %v2024_v4  ;;  %v1480_v13 = vadd.f32 %v1448_v31, %v888_v11 }
 0x1a6   : > { %v1449_v26 = vadd.f32 %v12365_v33, %v12364_v24  ;;  %v12370_v22 = vld [vmem:[#allocation140_spill] sm:$0xff]  ;;  %v2043_v33 = vadd.f32 %v2035_v50, %v2025_v52  ;;  %v1482_v10 = vadd.f32 %v1450_v7, %v890_v20  ;;  %v12389_v52 = vld [vmem:[#allocation22_spill] sm:$0xff] }
 0x1a7   : > { %v891_v41 = vadd.f32 %v12370_v22, %v873_v34  ;;  %v12372_v35 = vld [vmem:[#allocation184_spill] sm:$0xff]  ;;  %v12381_v34 = vld [vmem:[#allocation137_spill] sm:$0xff] }
 0x1a8   : > { %v1476_v56 = vadd.f32 %v12373_v48, %v12372_v35  ;;  %v12374_v30 = vld [vmem:[#allocation248_spill] sm:$0xff]  ;;  %v1481_v46 = vadd.f32 %v1449_v26, %v889_v53  ;;  %v12383_v35 = vld [vmem:[#allocation210_spill] sm:$0xff]  ;;  %v9530_v4 = vadd.f32 %v2042_v14, %v1482_v10  ;;  %v11505_v53 = vmov 0.0   ;;  %v12401_v14 = vld [vmem:[#allocation25_spill] sm:$0xff]  ;;  %v9596_v10 = vpop.f32.mrf.mxu1 }
 0x1a9   : > { %v2041_v42 = vadd.f32 %v12374_v30, %v2023_v61  ;;  %v12375_v1 = vld [vmem:[#allocation48_spill] sm:$0xff]  ;;  %v9526_v61 = vadd.f32 %v2040_v44, %v1480_v13  ;;  %v1483_v60 = vadd.f32 %v1451_v32, %v891_v41  ;;  %v12396_v44 = vld [vmem:[#allocation29_spill] sm:$0xff]  ;;  %v12399_v32 = vld [vmem:[#allocation27_spill] sm:$0xff] }
 0x1aa   : > { %v1478_v24 = vadd.f32 %v12376_v38, %v12375_v1  ;;  %v12377_v29 = vld [vmem:[#allocation196_spill] sm:$0xff]  ;;  %12387 = vst [vmem:[#allocation135_spill] sm:$0xff] %v9530_v4 }
 0x1ab   : > { %v9516_v3 = vadd.f32 %v12377_v29, %v1476_v56  ;;  %v12379_v55 = vld [vmem:[#allocation124_spill] sm:$0xff]  ;;  %12385 = vst [vmem:[#allocation144_spill] sm:$0xff] %v9526_v61  ;;  %v9528_v38 = vadd.f32 %v2041_v42, %v1481_v46  ;;  %v9532_v50 = vadd.f32 %v2043_v33, %v1483_v60  ;;  %v9535_v56 = vmul.u32 2, %v12389_v52  ;;  %v12393_v42 = vld [vmem:[#allocation33_spill] sm:$0xff] }
 0x1ac   : > { %v12380_v47 = vld [vmem:[#allocation128_spill] sm:$0xff]  ;;  %v9521_v22 = vadd.f32 %v12381_v34, %v1478_v24  ;;  %v12405_v29 = vld [vmem:[#allocation21_spill] sm:$0xff] }
 0x1ad   : > { %12378 = vst [vmem:[#allocation115_spill] sm:$0xff] %v9516_v3  ;;  %v1479_v28 = vadd.f32 %v12380_v47, %v12379_v55  ;;  %12386 = vst [vmem:[#allocation139_spill] sm:$0xff] %v9528_v38  ;;  %v12390_v11 = vld [vmem:[#allocation20_spill] sm:$0xff]  ;;  %v9540_v31 = vadd.s32 1, %v9535_v56  ;;  %v12406_v55 = vld [vmem:[#allocation23_spill] sm:$0xff] }
 0x1ae   : > { %12382 = vst [vmem:[#allocation149_spill] sm:$0xff] %v9521_v22  ;;  %12388 = vst [vmem:[#allocation147_spill] sm:$0xff] %v9532_v50  ;;  %vm298_vm9 = vcmp.eq.s32.totalorder %v12390_v11, %v9535_v56  ;;  %v12403_v24 = vld [vmem:[#allocation24_spill] sm:$0xff]  ;;  %v289_v34 = vadd.s32 64, %v12390_v11  ;;  %v290_v46 = vadd.s32 72, %v12390_v11  ;;  %v291_v50 = vadd.s32 80, %v12390_v11 }
 0x1af   : > { %v9524_v48 = vadd.f32 %v12383_v35, %v1479_v28  ;;  %v9543_v26 = vsel %vm298_vm9, 1.0, %v11505_v53  ;;  %vm347_vm10 = vcmp.eq.s32.totalorder %v12390_v11, %v9540_v31  ;;  %vm348_vm7 = vcmp.eq.s32.totalorder %v12393_v42, %v9540_v31  ;;  %vm12397_vm9 = vmmov %vm12392_vm11 }
 0x1b0   : > { %12391 = vst [vmem:[#allocation177_spill] sm:$0xff] %v9543_v26  ;;  %5836 = vmatprep.mubr.msk.f32.mxu1 %vm12392_vm11, %v9543_v26  ;;  %v9552_v20 = vsel %vm347_vm10, 1.0, %v11505_v53  ;;  %v9555_v7 = vsel %vm348_vm7, 1.0, %v11505_v53  ;;  %vm349_vm13 = vcmp.eq.s32.totalorder %v12396_v44, %v9540_v31  ;;  %vm350_vm11 = vcmp.eq.s32.totalorder %v12399_v32, %v9540_v31 }
 0x1b1   : > { %12384 = vst [vmem:[#allocation162_spill] sm:$0xff] %v9524_v48  ;;  %12394 = vst [vmem:[#allocation188_spill] sm:$0xff] %v9552_v20  ;;  %5796 = vmatprep.mubr.msk.f32.mxu0 %vm12397_vm9, %v9552_v20  ;;  %v9562_v41 = vsel %vm349_vm13, 1.0, %v11505_v53  ;;  %v9567_v30 = vsel %vm350_vm11, 1.0, %v11505_v53  ;;  %vm351_vm10 = vcmp.eq.s32.totalorder %v12401_v14, %v9540_v31  ;;  %vm352_vm7 = vcmp.eq.s32.totalorder %v12403_v24, %v9540_v31 }
 0x1b2   : > { %12395 = vst [vmem:[#allocation153_spill] sm:$0xff] %v9555_v7  ;;  %12398 = vst [vmem:[#allocation155_spill] sm:$0xff] %v9562_v41  ;;  %v9572_v1 = vsel %vm351_vm10, 1.0, %v11505_v53  ;;  %v9577_v33 = vsel %vm352_vm7, 1.0, %v11505_v53  ;;  %vm305_vm13 = vcmp.eq.s32.totalorder %v12405_v29, %v9535_v56  ;;  %vm353_vm9 = vcmp.eq.s32.totalorder %v12406_v55, %v9540_v31  ;;  %v9849_v41 = vld [vmem:[%s6684_s22 + $0xa0] sm:$0xff] }
 0x1b3   : > { %12400 = vst [vmem:[#allocation164_spill] sm:$0xff] %v9567_v30  ;;  %12402 = vst [vmem:[#allocation172_spill] sm:$0xff] %v9572_v1  ;;  %v9584_v47 = vsel %vm305_vm13, 1.0, %v11505_v53  ;;  %v9587_v28 = vsel %vm353_vm9, 1.0, %v11505_v53  ;;  %vm354_vm11 = vcmp.eq.s32.totalorder %v12405_v29, %v9540_v31  ;;  %vm306_vm10 = vcmp.eq.s32.totalorder %v289_v34, %v9535_v56 }
 0x1b4   : > { %12404 = vst [vmem:[#allocation204_spill] sm:$0xff] %v9577_v33  ;;  %12407 = vst [vmem:[#allocation176_spill] sm:$0xff] %v9584_v47  ;;  %v9592_v13 = vsel %vm354_vm11, 1.0, %v11505_v53  ;;  %vm307_vm7 = vcmp.eq.s32.totalorder %v290_v46, %v9535_v56  ;;  %vm355_vm13 = vcmp.eq.s32.totalorder %v289_v34, %v9540_v31  ;;  %vm356_vm9 = vcmp.eq.s32.totalorder %v290_v46, %v9540_v31  ;;  %v9616_v34 = vpop.f32.mrf.mxu1 }
 0x1b5   : > { %12408 = vst [vmem:[#allocation190_spill] sm:$0xff] %v9587_v28  ;;  %12409 = vst [vmem:[#allocation198_spill] sm:$0xff] %v9592_v13  ;;  %v9603_v35 = vsel %vm306_vm10, 1.0, %v11505_v53  ;;  %v9606_v60 = vsel %vm307_vm7, 1.0, %v11505_v53  ;;  %v9609_v52 = vsel %vm355_vm13, 1.0, %v11505_v53  ;;  %v9612_v29 = vsel %vm356_vm9, 1.0, %v11505_v53 }
 0x1b6   : > { %12410 = vst [vmem:[#allocation183_spill] sm:$0xff] %v9603_v35  ;;  %12411 = vst [vmem:[#allocation187_spill] sm:$0xff] %v9606_v60  ;;  %v292_v4 = vadd.s32 88, %v12390_v11  ;;  %vm308_vm11 = vcmp.eq.s32.totalorder %v291_v50, %v9535_v56  ;;  %vm357_vm7 = vcmp.eq.s32.totalorder %v291_v50, %v9540_v31  ;;  %v5717_v3 = vpop.f32.mrf.mxu1  ;;  %v293_v27 = vadd.s32 96, %v12390_v11 }
 0x1b7   : > { %12412 = vst [vmem:[#allocation193_spill] sm:$0xff] %v9609_v52  ;;  %12413 = vst [vmem:[#allocation67_spill] sm:$0xff] %v9612_v29  ;;  %v5686_v38 = vpop.f32.mrf.mxu0  ;;  %v9623_v46 = vsel %vm308_vm11, 1.0, %v11505_v53  ;;  %v9629_v48 = vsel %vm357_vm7, 1.0, %v11505_v53  ;;  %v294_v20 = vadd.s32 104, %v12390_v11  ;;  %v295_v0 = vadd.s32 112, %v12390_v11 }
 0x1b8   : > { %vm309_vm10 = vcmp.eq.s32.totalorder %v292_v4, %v9535_v56  ;;  %vm358_vm12 = vcmp.eq.s32.totalorder %v292_v4, %v9540_v31  ;;  %12414 = vst [vmem:[#allocation211_spill] sm:$0xff] %v9623_v46  ;;  %12416 = vst [vmem:[#allocation195_spill] sm:$0xff] %v9629_v48  ;;  %vm310_vm13 = vcmp.eq.s32.totalorder %v293_v27, %v9535_v56  ;;  %v2306_v58 = vpop.f32.mrf.mxu1  ;;  %v9844_v33 = vstv %s9781_s29 }
 0x1b9   : > { %v9626_v61 = vsel %vm309_vm10, 1.0, %v11505_v53  ;;  %v9632_v22 = vsel %vm358_vm12, 1.0, %v11505_v53  ;;  %v2167_v50 = vpop.f32.mrf.mxu0  ;;  %vm311_vm9 = vcmp.eq.s32.totalorder %v294_v20, %v9535_v56  ;;  %vm359_vm11 = vcmp.eq.s32.totalorder %v293_v27, %v9540_v31 }
 0x1ba   : > { %12415 = vst [vmem:[#allocation213_spill] sm:$0xff] %v9626_v61  ;;  %12417 = vst [vmem:[#allocation201_spill] sm:$0xff] %v9632_v22  ;;  %vm360_vm10 = vcmp.eq.s32.totalorder %v294_v20, %v9540_v31  ;;  %v9641_v4 = vsel %vm310_vm13, 1.0, %v11505_v53  ;;  %v9644_v59 = vsel %vm311_vm9, 1.0, %v11505_v53  ;;  %v9647_v19 = vsel %vm359_vm11, 1.0, %v11505_v53  ;;  %v5720_v21 = vpop.f32.mrf.mxu1 }
 0x1bb   : > { %12418 = vst [vmem:[#allocation136_spill] sm:$0xff] %v9641_v4  ;;  %12419 = vst [vmem:[#allocation203_spill] sm:$0xff] %v9644_v59  ;;  %v9650_v63 = vsel %vm360_vm10, 1.0, %v11505_v53  ;;  %v296_v27 = vadd.s32 120, %v12390_v11  ;;  %vm312_vm12 = vcmp.eq.s32.totalorder %v295_v0, %v9535_v56  ;;  %vm361_vm13 = vcmp.eq.s32.totalorder %v295_v0, %v9540_v31 }
 0x1bc   : > { %12420 = vst [vmem:[#allocation215_spill] sm:$0xff] %v9647_v19  ;;  %12421 = vst [vmem:[#allocation217_spill] sm:$0xff] %v9650_v63  ;;  %v9659_v20 = vsel %vm312_vm12, 1.0, %v11505_v53  ;;  %v9665_v17 = vsel %vm361_vm13, 1.0, %v11505_v53  ;;  %v2316_v19 = vpop.f32.mrf.mxu1  ;;  %vm299_vm11 = vcmp.eq.s32.totalorder %v12393_v42, %v9535_v56  ;;  %vm300_vm10 = vcmp.eq.s32.totalorder %v12396_v44, %v9535_v56  ;;  %v12443_v42 = vld [vmem:[#allocation37_spill] sm:$0xff] }
 0x1bd   : > { %vm313_vm7 = vcmp.eq.s32.totalorder %v296_v27, %v9535_v56  ;;  %vm362_vm9 = vcmp.eq.s32.totalorder %v296_v27, %v9540_v31  ;;  %12422 = vst [vmem:[#allocation97_spill] sm:$0xff] %v9659_v20  ;;  %12424 = vst [vmem:[#allocation205_spill] sm:$0xff] %v9665_v17  ;;  %v2302_v17 = vadd.f32 %v9596_v10, %v5686_v38  ;;  %vm12429_vm13 = vcmask 523264   ;;  %v9772_v10 = vld [vmem:[%s6684_s22 + $0x8] sm:$0xff] }
 0x1be   : > { %v9662_v8 = vsel %vm313_vm7, 1.0, %v11505_v53  ;;  %v9668_v11 = vsel %vm362_vm9, 1.0, %v11505_v53  ;;  %v5723_v22 = vpop.f32.mrf.mxu1  ;;  %vm301_vm12 = vcmp.eq.s32.totalorder %v12399_v32, %v9535_v56  ;;  %vm302_vm7 = vcmp.eq.s32.totalorder %v12401_v14, %v9535_v56  ;;  %vm12432_vm9 = vmmov %vm12429_vm13  ;;  %v12446_v14 = vld [vmem:[#allocation39_spill] sm:$0xff] }
 0x1bf   : > { %12423 = vst [vmem:[#allocation102_spill] sm:$0xff] %v9662_v8  ;;  %12425 = vst [vmem:[#allocation207_spill] sm:$0xff] %v9668_v11  ;;  %v9739_v44 = vstv %s4919_s2  ;;  %v9746_v32 = vstv %s4954_s27  ;;  %v1210_v23 = vmul.f32 %v9311_v43, %v9844_v33  ;;  %s11130_s27 = scalar_lea.hbm %s11180_s3, %s6248_s17 }
 0x1c0   : > { %v2326_v29 = vpop.f32.mrf.mxu1 }
 0x1c1   : > { %v5689_v51 = vpop.f32.mrf.mxu0 }
 0x1c2   : > { %v2312_v53 = vadd.f32 %v5717_v3, %v5689_v51  ;;  %v12426_v51 = vmov 0.0  }
 0x1c3   : > { %v2177_v54 = vpop.f32.mrf.mxu0 }
 0x1c4   : > { %v2307_v11 = vadd.f32 %v2306_v58, %v2177_v54  ;;  %v9680_v54 = vsel %vm300_vm10, 1.0, %v12426_v51  ;;  %v12430_v58 = vmov 1.0   ;;  %vm304_vm10 = vcmp.eq.s32.totalorder %v12406_v55, %v9535_v56  ;;  %v12449_v55 = vld [vmem:[#allocation42_spill] sm:$0xff] }
 0x1c5   : > { %12428 = vst [vmem:[#allocation214_spill] sm:$0xff] %v9680_v54 }
 0x1d5   : > { %v5692_v63 = vpop.f32.mrf.mxu0 }
 0x1d6   : > { %v2322_v13 = vadd.f32 %v5720_v21, %v5692_v63  ;;  %v2297_v21 = vadd.f32 %v9616_v34, %v2167_v50  ;;  %v9677_v63 = vsel %vm299_vm11, 1.0, %v12426_v51  ;;  %vm303_vm11 = vcmp.eq.s32.totalorder %v12403_v24, %v9535_v56 }
 0x1d7   : > { %v2187_v48 = vpop.f32.mrf.mxu0  ;;  %12427 = vst [vmem:[#allocation212_spill] sm:$0xff] %v9677_v63  ;;  %v9720_v38 = vsel %vm303_vm11, 1.0, %v12426_v51  ;;  %v9726_v56 = vsel %vm304_vm10, 1.0, %v12426_v51  ;;  %vm12447_vm10 = vnez %v12446_v14  ;;  %v634_v24 = vmul.f32 %v9437_v15, %v9739_v44  ;;  %v12469_v14 = vld [vmem:[#allocation50_spill] sm:$0xff] }
 0x1d8   : > { %v2317_v28 = vadd.f32 %v2316_v19, %v2187_v48  ;;  %12439 = vst [vmem:[#allocation233_spill] sm:$0xff] %v9720_v38  ;;  %12440 = vst [vmem:[#allocation218_spill] sm:$0xff] %v9726_v56  ;;  %v636_v50 = vmul.f32 %v9321_v9, %v9739_v44 }
 0x1fe   : > { %v5695_v0 = vpop.f32.mrf.mxu0 }
 0x1ff   : > { %v2332_v31 = vadd.f32 %v5723_v22, %v5695_v0  ;;  %v9703_v22 = vsel %vm302_vm7, 1.0, %v12426_v51  ;;  %vm12438_vm7 = vmmov %vm12432_vm9  ;;  %v9881_v0 = vld [vmem:[%s6684_s22 + $0x38] sm:$0xff] }
 0x200   : > { %v2197_v27 = vpop.f32.mrf.mxu0  ;;  %12435 = vst [vmem:[#allocation227_spill] sm:$0xff] %v9703_v22  ;;  %vm12445_vm11 = vmmov %vm12438_vm7 }
 0x201   : > { %v2327_v52 = vadd.f32 %v2326_v29, %v2197_v27  ;;  %5820 = vmatprep.subr.mxu1 %v2332_v31  ;;  %v9777_v29 = vld [vmem:[%s6684_s22 + $0x48] sm:$0xff]  ;;  %v1165_v27 = vmul.f32 %v9349_v25, %v9746_v32  ;;  %12462 = vst [vmem:[#allocation231_spill] sm:$0xff] %v9881_v0 }
 0x202   : > { %5821 = vmatpush3.msra.mxu1 %v2332_v31  ;;  %v1163_v34 = vmul.f32 %v9777_v29, %v9746_v32  ;;  %v637_v31 = vmul.f32 %v9343_v2, %v9739_v44  ;;  %v1211_v49 = vmul.f32 %v9777_v29, %v9844_v33 }
 0x203   : > { %5822 = vmatprep.subr.mxu1 %v2327_v52 }
 0x204   : > { %5823 = vmatpush3.msra.mxu1 %v2327_v52  ;;  %v635_v52 = vmul.f32 %v9772_v10, %v9739_v44 }
 0x205   : > { %5824 = vmatprep.subr.mxu1 %v2322_v13 }
 0x206   : > { %5825 = vmatpush3.msra.mxu1 %v2322_v13  ;;  %v9769_v13 = vstv %s4989_s26  ;;  %s6442_s26 = scalar_lea.vmem %s11133_s19, 6144 }
 0x207   : > { %5826 = vmatprep.subr.mxu1 %v2317_v28  ;;  %v1758_v7 = vmul.f32 %v9849_v41, %v9769_v13  ;;  %v1760_v29 = vmul.f32 %v9211_v6, %v9769_v13  ;;  %p6443_p3 = scmp.ne.s32.totalorder %s11133_s19, %s6442_s26 }
 0x208   : > { %5827 = vmatpush3.msra.mxu1 %v2317_v28  ;;  %v1162_v28 = vmul.f32 %v9311_v43, %v9746_v32  ;;  %v12465_v43 = vld [vmem:[#allocation47_spill] sm:$0xff] }
 0x209   : > { %5828 = vmatprep.subr.mxu1 %v2312_v53  ;;  %p6444_p2 = pnand %p6443_p3, %p12804_p10 }
 0x20a   : > { %5829 = vmatpush3.msra.mxu1 %v2312_v53  ;;  %v12441_v53 = vld [vmem:[#allocation35_spill] sm:$0xff] }
 0x20b   : > { %5830 = vmatprep.subr.mxu1 %v2307_v11  ;;  %p6445_p0 = pneg %p6444_p2 }
 0x20c   : > { %5831 = vmatpush3.msra.mxu1 %v2307_v11  ;;  %v1164_v11 = vmul.f32 %v9326_v36, %v9746_v32 }
 0x20d   : > { %5832 = vmatprep.subr.mxu1 %v2302_v17 }
 0x20e   : > { %5833 = vmatpush3.msra.mxu1 %v2302_v17  ;;  %v9697_v17 = vsel %vm301_vm12, 1.0, %v12426_v51  ;;  %vm12436_vm12 = vmmov %vm12432_vm9  ;;  %v1290_v51 = vadd.f32 %v1162_v28, %v634_v24  ;;  %v1756_v24 = vmul.f32 %v9335_v16, %v9769_v13  ;;  %v12454_v28 = vld [vmem:[#allocation146_spill] sm:$0xff] }
 0x20f   : > { %5834 = vmatprep.subr.mxu1 %v2297_v21  ;;  %12433 = vst [vmem:[#allocation225_spill] sm:$0xff] %v9697_v17 }
 0x210   : > { %5835 = vmatpush3.msra.mxu1 %v2297_v21  ;;  %v1754_v21 = vmul.f32 %v9316_v45, %v9769_v13 }
 0x211   : > { %5837 = vmatmul.mubr.msk.f32.vlgmr.msra.gmra.mxu1 %vm12429_vm13, %v9677_v63  ;;  %5888 = vmatprep.subr.msk.mxu1 %vm6766_vm0, %v12430_v58  ;;  %vm12442_vm13 = vmmov %vm12438_vm7 }
 0x212   : > { %5839 = vmatprep.mubr.msk.f32.mxu1 %vm12432_vm9, %v9680_v54  ;;  %5889 = vmatpush3.msk.msra.mxu1 %vm6766_vm0, %v12430_v58  ;;  %vm12444_vm9 = vnez %v12443_v42  ;;  %v639_v54 = vmul.f32 %v9263_v39, %v9739_v44  ;;  %v1882_v63 = vadd.f32 %v1754_v21, %v1290_v51  ;;  %v9861_v21 = vld [vmem:[%s6684_s22 + $0x30] sm:$0xff] }
 0x213   : > { %5890 = vmatprep.subr.msk.mxu1 %vm6777_vm1, %v12430_v58 }
 0x214   : > { %5891 = vmatpush3.msk.msra.mxu1 %vm6777_vm1, %v12430_v58 }
 0x215   : > { %5840 = vmatmul.mubr.msk.f32.gmra.mxu1 %vm12436_vm12, %v9697_v17  ;;  %5892 = vmatprep.subr.msk.mxu1 %vm6803_vm4, %v12430_v58  ;;  %vm12448_vm12 = vmmov %vm12438_vm7  ;;  %v1757_v17 = vmul.f32 %v9354_v37, %v9769_v13 }
 0x216   : > { %5842 = vmatprep.mubr.msk.f32.mxu1 %vm12438_vm7, %v9703_v22  ;;  %5893 = vmatpush3.msk.msra.mxu1 %vm6803_vm4, %v12430_v58  ;;  %vm12450_vm7 = vnez %v12449_v55  ;;  %v1293_v22 = vadd.f32 %v1165_v27, %v637_v31  ;;  %v9841_v27 = vstv %s9760_s6 }
 0x217   : > { %5894 = vmatprep.subr.msk.mxu1 %vm6842_vm6, %v12430_v58 }
 0x218   : > { %5895 = vmatpush3.msk.msra.mxu1 %vm6842_vm6, %v12430_v58 }
 0x219   : > { %5843 = vmatmul.mubr.msk.f32.gmra.mxu1 %vm12442_vm13, %v9720_v38  ;;  %5896 = vmatprep.subr.msk.mxu1 %vm12444_vm9, %v12430_v58  ;;  %vm12451_vm13 = vmmov %vm12445_vm11 }
 0x21a   : > { %5845 = vmatprep.mubr.msk.f32.mxu1 %vm12445_vm11, %v9726_v56  ;;  %5897 = vmatpush3.msk.msra.mxu1 %vm12444_vm9, %v12430_v58 }
 0x21b   : > { %5898 = vmatprep.subr.msk.mxu1 %vm12447_vm10, %v12430_v58 }
 0x21c   : > { %5899 = vmatpush3.msk.msra.mxu1 %vm12447_vm10, %v12430_v58 }
 0x21d   : > { %5846 = vmatmul.mubr.msk.f32.gmra.mxu1 %vm12448_vm12, %v9584_v47  ;;  %5900 = vmatprep.subr.msk.mxu1 %vm12450_vm7, %v12430_v58  ;;  %v9809_v47 = vld [vmem:[%s6684_s22 + $0x88] sm:$0xff]  ;;  %vm12453_vm12 = vmmov %vm12445_vm11 }
 0x21e   : > { %5848 = vmatprep.mubr.msk.f32.mxu1 %vm12451_vm13, %v9603_v35  ;;  %5901 = vmatpush3.msk.msra.mxu1 %vm12450_vm7, %v12430_v58  ;;  %v1291_v35 = vadd.f32 %v1163_v34, %v635_v52  ;;  %v1755_v56 = vmul.f32 %v9809_v47, %v9769_v13  ;;  %v638_v52 = vmul.f32 %v12454_v28, %v9739_v44  ;;  %v12455_v34 = vld [vmem:[#allocation104_spill] sm:$0xff]  ;;  %vm12456_vm13 = vmmov %vm12445_vm11 }
 0x21f   : > { %5902 = vmatprep.subr.msk.mxu1 %vm6953_vm14, %v12430_v58  ;;  %v1166_v38 = vmul.f32 %v12455_v34, %v9746_v32 }
 0x220   : > { %5903 = vmatpush3.msk.msra.mxu1 %vm6953_vm14, %v12430_v58  ;;  %v1883_v31 = vadd.f32 %v1755_v56, %v1291_v35  ;;  %v9858_v56 = vadd.f32 %v1757_v17, %v1293_v22  ;;  %v12460_v17 = vld [vmem:[#allocation45_spill] sm:$0xff] }
 0x221   : > { %5849 = vmatmul.mubr.msk.f32.gmra.mxu1 %vm12445_vm11, %v9606_v60  ;;  %5944 = vmatprep.subr.msk.mxu1 %vm6766_vm0, %v12430_v58  ;;  %v1292_v60 = vadd.f32 %v1164_v11, %v636_v50  ;;  %v1167_v50 = vmul.f32 %v9270_v12, %v9746_v32  ;;  %v9833_v11 = vstv %s9748_s4  ;;  %v1294_v30 = vadd.f32 %v1166_v38, %v638_v52  ;;  %v12458_v38 = vld [vmem:[#allocation40_spill] sm:$0xff]  ;;  %s6524_s4 = smov [#allocation9]  }
 0x222   : > { %5851 = vmatprep.mubr.msk.f32.mxu1 %vm12453_vm12, %v9623_v46  ;;  %v9836_v46 = vstv %s9753_s23  ;;  %v672_v51 = vmul.f32 %v9833_v11, %v12458_v38  ;;  %v1200_v22 = vmul.f32 %v9841_v27, %v12460_v17  ;;  %vm12461_vm12 = vmmov %vm12445_vm11  ;;  %v9891_v38 = vstv %s9804_s18  ;;  %s6446_s23 = sshll.u32 %s6524_s4, 4  ;;  %s6447_s23 = int_to_ptr.vmem [resolvable:$false] %s6446_s23 }
 0x223   : > { %v1884_v1 = vadd.f32 %v1756_v24, %v1292_v60  ;;  %v640_v60 = vmul.f32 %v9861_v21, %v9739_v44  ;;  %v682_v24 = vmul.f32 %v9437_v15, %v9836_v46  ;;  %v1295_v52 = vadd.f32 %v1167_v50, %v639_v54  ;;  %v9886_v54 = vld [vmem:[%s6684_s22 + $0x78] sm:$0xff]  ;;  %s6448_s6 = scalar_lea.vmem %s6447_s23, 12288  ;;  %p6449_p4 = scmp.lt.s32.totalorder %s11133_s19, %s6447_s23 }
 0x224   : > { %v641_v15 = vmul.f32 %v9881_v0, %v9739_v44  ;;  %12463 = vst [vmem:[#allocation238_spill] sm:$0xff] %v9886_v54  ;;  %v1169_v50 = vmul.f32 %v9886_v54, %v9746_v32  ;;  %v673_v17 = vmul.f32 %v9833_v11, %v12465_v43  ;;  %v674_v44 = vmul.f32 %v9833_v11, %v12466_v40  ;;  %v12467_v54 = vld [vmem:[#allocation49_spill] sm:$0xff]  ;;  %p6450_p5 = scmp.lt.s32.totalorder %s6448_s6, %s6442_s26 }
 0x225   : > { %5852 = vmatmul.mubr.msk.f32.gmra.mxu1 %vm12456_vm13, %v9626_v61  ;;  %v9854_v61 = vld [vmem:[%s6684_s22 + $0xa8] sm:$0xff]  ;;  %vm12464_vm13 = vmmov %vm12445_vm11  ;;  %v684_v0 = vmul.f32 %v9321_v9, %v9836_v46  ;;  %v1201_v55 = vmul.f32 %v9841_v27, %v12467_v54  ;;  %v1218_v43 = vadd.f32 %v1210_v23, %v1200_v22  ;;  %v1802_v40 = vmul.f32 %v9316_v45, %v9894_v18  ;;  %v12471_v45 = vld [vmem:[#allocation52_spill] sm:$0xff] }
 0x226   : > { %5854 = vmatprep.mubr.msk.f32.mxu1 %vm12445_vm11, %v9641_v4  ;;  %12457 = vst [vmem:[#allocation236_spill] sm:$0xff] %v9854_v61  ;;  %v1759_v35 = vmul.f32 %v9854_v61, %v9769_v13  ;;  %v9870_v4 = vld [vmem:[%s6684_s22 + $0x70] sm:$0xff]  ;;  %v1212_v9 = vmul.f32 %v9326_v36, %v9844_v33  ;;  %v1761_v23 = vmul.f32 %v9225_v62, %v9769_v13  ;;  %p6451_p1 = por %p6450_p5, %p6449_p4 }
 0x227   : > { %12459 = vst [vmem:[#allocation222_spill] sm:$0xff] %v9870_v4  ;;  %v1168_v26 = vmul.f32 %v9870_v4, %v9746_v32  ;;  %v690_v32 = vadd.f32 %v682_v24, %v672_v51  ;;  %v1886_v51 = vadd.f32 %v1758_v7, %v1294_v30  ;;  %v1793_v54 = vmul.f32 %v9891_v38, %v12471_v45 }
 0x228   : > { %v1887_v22 = vadd.f32 %v1759_v35, %v1295_v52  ;;  %v1219_v36 = vadd.f32 %v1211_v49, %v1201_v55  ;;  %v692_v7 = vadd.f32 %v684_v0, %v674_v44  ;;  %v1804_v62 = vmul.f32 %v9335_v16, %v9894_v18  ;;  %v12476_v16 = vld [vmem:[#allocation59_spill] sm:$0xff]  ;;  %v12477_v52 = vld [vmem:[#allocation60_spill] sm:$0xff]  ;;  %p6452_p8 = pnand %p6451_p1, %p6445_p0 }
 0x229   : > { %5855 = vmatmul.mubr.msk.f32.gmra.mxu1 %vm12461_vm12, %v9644_v59  ;;  %v683_v59 = vmul.f32 %v9772_v10, %v9836_v46  ;;  %v1792_v10 = vmul.f32 %v9891_v38, %v12469_v14  ;;  %v1296_v24 = vadd.f32 %v1168_v26, %v640_v60  ;;  %vm12470_vm12 = vmmov %vm12445_vm11  ;;  %v12472_v26 = vld [vmem:[#allocation57_spill] sm:$0xff]  ;;  %v1306_v6 = vadd.f32 %v1218_v43, %v690_v32  ;;  %v9971_v43 = vpop.f32.mrf.mxu1 }
 0x22a   : > { %5857 = vmatprep.mubr.msk.f32.mxu1 %vm12464_vm13, %v9659_v20  ;;  %v12468_v20 = vld [vmem:[#allocation54_spill] sm:$0xff]  ;;  %v1794_v30 = vmul.f32 %v9891_v38, %v12472_v26  ;;  %vm12473_vm13 = vmmov %vm12445_vm11  ;;  %v685_v49 = vmul.f32 %v9343_v2, %v9836_v46  ;;  %v686_v0 = vmul.f32 %v12454_v28, %v9836_v46 }
 0x22b   : > { %v1202_v61 = vmul.f32 %v9841_v27, %v12468_v20  ;;  %v1297_v20 = vadd.f32 %v1169_v50, %v641_v15  ;;  %v691_v14 = vadd.f32 %v683_v59, %v673_v17  ;;  %v1810_v60 = vadd.f32 %v1802_v40, %v1792_v10 }
 0x22c   : > { %v1888_v59 = vadd.f32 %v1760_v29, %v1296_v24  ;;  %v1213_v40 = vmul.f32 %v9349_v25, %v9844_v33  ;;  %v1214_v25 = vmul.f32 %v12455_v34, %v9844_v33  ;;  %v1812_v50 = vadd.f32 %v1804_v62, %v1794_v30  ;;  %v12483_v29 = vld [vmem:[#allocation62_spill] sm:$0xff] }
 0x22d   : > { %5858 = vmatmul.mubr.msk.f32.gmra.mxu1 %vm12445_vm11, %v9662_v8  ;;  %v1803_v8 = vmul.f32 %v9809_v47, %v9894_v18  ;;  %v1220_v4 = vadd.f32 %v1212_v9, %v1202_v61  ;;  %v12475_v47 = vld [vmem:[#allocation56_spill] sm:$0xff]  ;;  %v676_v61 = vmul.f32 %v9833_v11, %v12476_v16  ;;  %v1889_v2 = vadd.f32 %v1761_v23, %v1297_v20  ;;  %v12479_v20 = vld [vmem:[#allocation58_spill] sm:$0xff]  ;;  %v12482_v9 = vld [vmem:[#allocation61_spill] sm:$0xff] }
 0x22e   : > { %5904 = vmatprep.mubr.msk.f32.mxu1 %vm12470_vm12, %v1882_v63  ;;  %v12474_v63 = vld [vmem:[#allocation55_spill] sm:$0xff]  ;;  %v1203_v55 = vmul.f32 %v9841_v27, %v12475_v47  ;;  %v1898_v17 = vadd.f32 %v1810_v60, %v1306_v6  ;;  %v1307_v28 = vadd.f32 %v1219_v36, %v691_v14  ;;  %vm12478_vm12 = vmmov %vm12445_vm11  ;;  %v1805_v34 = vmul.f32 %v9354_v37, %v9894_v18 }
 0x22f   : > { %v675_v13 = vmul.f32 %v9833_v11, %v12474_v63  ;;  %v1811_v35 = vadd.f32 %v1803_v8, %v1793_v54  ;;  %v1308_v15 = vadd.f32 %v1220_v4, %v692_v7  ;;  %v1795_v54 = vmul.f32 %v9891_v38, %v12479_v20  ;;  %v12553_v47 = vld [vmem:[#allocation207_spill] sm:$0xff]  ;;  %v10184_v63 = vld [vmem:[%s6684_s22 + $0x28] sm:$0xff] }
 0x230   : > { %v1221_v4 = vadd.f32 %v1213_v40, %v1203_v55  ;;  %v694_v14 = vadd.f32 %v686_v0, %v676_v61  ;;  %v1806_v10 = vmul.f32 %v9849_v41, %v9894_v18  ;;  %v677_v24 = vmul.f32 %v9833_v11, %v12482_v9 }
 0x231   : > { %5905 = vmatmul.mubr.msk.f32.vlgmr.msra.gmra.mxu1 %vm12473_vm13, %v1883_v31  ;;  %v9950_v31 = vpop.f32.mrf.mxu0  ;;  %v693_v8 = vadd.f32 %v685_v49, %v675_v13  ;;  %vm12480_vm13 = vmmov %vm12445_vm11  ;;  %v1205_v23 = vmul.f32 %v9841_v27, %v12483_v29  ;;  %v1215_v36 = vmul.f32 %v9270_v12, %v9844_v33  ;;  %v678_v7 = vmul.f32 %v9833_v11, %v12271_v57  ;;  %v10007_v13 = vpop.f32.mrf.mxu1 }
 0x232   : > { %5945 = vmatpush3.msk.msra.mxu1 %vm6766_vm0, %v12430_v58  ;;  %5907 = vmatprep.mubr.msk.f32.mxu1 %vm12445_vm11, %v1884_v1  ;;  %v1204_v1 = vmul.f32 %v9841_v27, %v12477_v52  ;;  %v688_v30 = vmul.f32 %v9861_v21, %v9836_v46  ;;  %v1900_v60 = vadd.f32 %v1812_v50, %v1308_v15  ;;  %v12488_v15 = vld [vmem:[#allocation236_spill] sm:$0xff]  ;;  %v12552_v52 = vld [vmem:[#allocation230_spill] sm:$0xff] }
 0x233   : > { %5946 = vmatprep.subr.msk.mxu1 %vm6777_vm1, %v12430_v58  ;;  %v9979_v32 = vpop.f32.mrf.mxu0  ;;  %v1813_v62 = vadd.f32 %v1805_v34, %v1795_v54  ;;  %v1309_v12 = vadd.f32 %v1221_v4, %v693_v8  ;;  %v1206_v49 = vmul.f32 %v9841_v27, %v12273_v5  ;;  %v1807_v50 = vmul.f32 %v12488_v15, %v9894_v18  ;;  %v12489_v54 = vld [vmem:[#allocation66_spill] sm:$0xff]  ;;  %v10062_v5 = vld [vmem:[%s6684_s22 + $0xb8] sm:$0xff] }
 0x234   : > { %5947 = vmatpush3.msk.msra.mxu1 %vm6777_vm1, %v12430_v58  ;;  %v1222_v37 = vadd.f32 %v1214_v25, %v1204_v1  ;;  %v12487_v1 = vld [vmem:[#allocation64_spill] sm:$0xff]  ;;  %v696_v8 = vadd.f32 %v688_v30, %v678_v7  ;;  %v679_v34 = vmul.f32 %v9833_v11, %v12489_v54  ;;  %v10048_v7 = vld [vmem:[%s6684_s22 + $0xb0] sm:$0xff]  ;;  %v1809_v57 = vmul.f32 %v10062_v5, %v9894_v18 }
 0x235   : > { %5908 = vmatmul.mubr.msk.f32.gmra.mxu1 %vm12478_vm12, %v9858_v56  ;;  %5948 = vmatprep.subr.msk.mxu1 %vm6803_vm4, %v12430_v58  ;;  %v12481_v56 = vld [vmem:[#allocation63_spill] sm:$0xff]  ;;  %v10001_v6 = vpop.f32.mrf.mxu0  ;;  %vm12484_vm12 = vmmov %vm12445_vm11  ;;  %v1797_v25 = vmul.f32 %v9891_v38, %v12487_v1  ;;  %12496 = vst [vmem:[#allocation240_spill] sm:$0xff] %v10048_v7  ;;  %v12499_v54 = vld [vmem:[#allocation72_spill] sm:$0xff] }
 0x236   : > { %5949 = vmatpush3.msk.msra.mxu1 %vm6803_vm4, %v12430_v58  ;;  %5910 = vmatprep.mubr.msk.f32.mxu1 %vm12480_vm13, %v1886_v51  ;;  %v1796_v44 = vmul.f32 %v9891_v38, %v12481_v56  ;;  %v687_v51 = vmul.f32 %v9263_v39, %v9836_v46  ;;  %v1899_v39 = vadd.f32 %v1811_v35, %v1307_v28  ;;  %v10022_v28 = vpop.f32.mrf.mxu1  ;;  %vm12490_vm13 = vmmov %vm12445_vm11 }
 0x237   : > { %5950 = vmatprep.subr.msk.mxu1 %vm6842_vm6, %v12430_v58  ;;  %v1310_v61 = vadd.f32 %v1222_v37, %v694_v14  ;;  %v2435_v4 = vpop.f32.mrf.mxu0  ;;  %v1799_v1 = vmul.f32 %v9891_v38, %v12499_v54  ;;  %v12551_v54 = vld [vmem:[#allocation229_spill] sm:$0xff] }
 0x238   : > { %5951 = vmatpush3.msk.msra.mxu1 %vm6842_vm6, %v12430_v58  ;;  %v1814_v0 = vadd.f32 %v1806_v10, %v1796_v44  ;;  %v695_v35 = vadd.f32 %v687_v51, %v677_v24  ;;  %v12492_v44 = vld [vmem:[#allocation231_spill] sm:$0xff]  ;;  %v12493_v10 = vld [vmem:[#allocation70_spill] sm:$0xff] }
 0x239   : > { %5911 = vmatmul.mubr.msk.f32.gmra.mxu1 %vm12445_vm11, %v1887_v22  ;;  %5952 = vmatprep.subr.msk.mxu1 %vm12444_vm9, %v12430_v58  ;;  %v12485_v22 = vld [vmem:[#allocation222_spill] sm:$0xff]  ;;  %v689_v37 = vmul.f32 %v12492_v44, %v9836_v46  ;;  %v1207_v24 = vmul.f32 %v9841_v27, %v12493_v10  ;;  %v1808_v46 = vmul.f32 %v10048_v7, %v9894_v18 }
 0x23a   : > { %5953 = vmatpush3.msk.msra.mxu1 %vm12444_vm9, %v12430_v58  ;;  %5913 = vmatprep.mubr.msk.f32.mxu1 %vm12484_vm12, %v1888_v59  ;;  %v1216_v55 = vmul.f32 %v12485_v22, %v9844_v33  ;;  %v1223_v59 = vadd.f32 %v1215_v36, %v1205_v23  ;;  %v12494_v51 = vld [vmem:[#allocation238_spill] sm:$0xff]  ;;  %vm12498_vm12 = vmmov %vm12445_vm11  ;;  %v1902_v9 = vadd.f32 %v1814_v0, %v1310_v61 }
 0x23b   : > { %5954 = vmatprep.subr.msk.mxu1 %vm12447_vm10, %v12430_v58  ;;  %v1217_v23 = vmul.f32 %v12494_v51, %v9844_v33  ;;  %v2564_v33 = vpop.f32.mrf.mxu1 }
 0x23c   : > { %5955 = vmatpush3.msk.msra.mxu1 %vm12447_vm10, %v12430_v58  ;;  %v1224_v11 = vadd.f32 %v1216_v55, %v1206_v49  ;;  %v1311_v49 = vadd.f32 %v1223_v59, %v695_v35  ;;  %v1815_v55 = vadd.f32 %v1807_v50, %v1797_v25  ;;  %v1817_v50 = vadd.f32 %v1809_v57, %v1799_v1 }
 0x23d   : > { %5914 = vmatmul.mubr.msk.f32.gmra.mxu1 %vm12490_vm13, %v1889_v2  ;;  %5956 = vmatprep.subr.msk.mxu1 %vm12450_vm7, %v12430_v58  ;;  %v12495_v2 = vld [vmem:[#allocation71_spill] sm:$0xff]  ;;  %v1225_v10 = vadd.f32 %v1217_v23, %v1207_v24  ;;  %vm12500_vm13 = vmmov %vm12445_vm11  ;;  %v2565_v1 = vadd.f32 %v2564_v33, %v2435_v4  ;;  %v12517_v23 = vld [vmem:[#allocation204_spill] sm:$0xff] }
 0x23e   : > { %5957 = vmatpush3.msk.msra.mxu1 %vm12450_vm7, %v12430_v58  ;;  %5960 = vmatprep.mubr.msk.f32.mxu1 %vm12445_vm11, %v1898_v17  ;;  %v1798_v36 = vmul.f32 %v9891_v38, %v12495_v2  ;;  %v1901_v17 = vadd.f32 %v1813_v62, %v1309_v12  ;;  %v697_v2 = vadd.f32 %v689_v37, %v679_v34  ;;  %v12527_v33 = vld [vmem:[#allocation193_spill] sm:$0xff] }
 0x23f   : > { %v5748_v27 = vpop.f32.mrf.mxu0  ;;  %5958 = vmatprep.subr.msk.mxu1 %vm6953_vm14, %v12430_v58  ;;  %v1312_v56 = vadd.f32 %v1224_v11, %v696_v8  ;;  %v2555_v8 = vadd.f32 %v10007_v13, %v9979_v32  ;;  %v12512_v32 = vld [vmem:[#allocation164_spill] sm:$0xff] }
 0x240   : > { %5959 = vmatpush3.msk.msra.mxu1 %vm6953_vm14, %v12430_v58  ;;  %v1816_v62 = vadd.f32 %v1808_v46, %v1798_v36  ;;  %v1313_v59 = vadd.f32 %v1225_v10, %v697_v2  ;;  %vm12502_vm14 = vmmov %vm12445_vm11  ;;  %v12506_v10 = vld [vmem:[#allocation153_spill] sm:$0xff]  ;;  %v12520_v2 = vld [vmem:[#allocation190_spill] sm:$0xff] }
 0x241   : > { %5961 = vmatmul.mubr.msk.f32.vlgmr.msra.gmra.mxu1 %vm12498_vm12, %v1899_v39  ;;  %v2445_v12 = vpop.f32.mrf.mxu0  ;;  %v1903_v39 = vadd.f32 %v1815_v55, %v1311_v49  ;;  %vm12501_vm12 = vmmov %vm12445_vm11  ;;  %v12522_v36 = vld [vmem:[#allocation41_spill] sm:$0xff]  ;;  %v12524_v46 = vld [vmem:[#allocation198_spill] sm:$0xff] }
 0x242   : > { %5963 = vmatprep.mubr.msk.f32.mxu1 %vm12500_vm13, %v1900_v60  ;;  %v1904_v38 = vadd.f32 %v1816_v62, %v1312_v56  ;;  %v1905_v60 = vadd.f32 %v1817_v50, %v1313_v59  ;;  %vm12503_vm13 = vmmov %vm12445_vm11  ;;  %v12504_v56 = vld [vmem:[#allocation177_spill] sm:$0xff]  ;;  %v12531_v49 = vld [vmem:[#allocation67_spill] sm:$0xff] }
 0x243   : > { %v12532_v55 = vld [vmem:[#allocation195_spill] sm:$0xff]  ;;  %v12534_v62 = vld [vmem:[#allocation201_spill] sm:$0xff]  ;;  %v12542_v50 = vld [vmem:[#allocation220_spill] sm:$0xff] }
 0x245   : > { %5964 = vmatmul.mubr.msk.f32.gmra.mxu1 %vm12445_vm11, %v1901_v17  ;;  %v12529_v17 = vld [vmem:[#allocation46_spill] sm:$0xff] }
 0x246   : > { %v5776_v29 = vpop.f32.mrf.mxu1  ;;  %5966 = vmatprep.mubr.msk.f32.mxu1 %vm12501_vm12, %v1902_v9  ;;  %vm12505_vm12 = vmmov %vm12445_vm11  ;;  %v2570_v9 = vadd.f32 %v10022_v28, %v10001_v6  ;;  %v12514_v28 = vld [vmem:[#allocation172_spill] sm:$0xff]  ;;  %vm12530_vm7 = vnez %v12529_v17 }
 0x247   : > { %v2580_v0 = vadd.f32 %v5776_v29, %v5748_v27  ;;  %v2560_v29 = vadd.f32 %v9971_v43, %v9950_v31  ;;  %v12509_v31 = vld [vmem:[#allocation155_spill] sm:$0xff]  ;;  %v12525_v27 = vld [vmem:[#allocation44_spill] sm:$0xff] }
 0x248   : > { %v2574_v35 = vpop.f32.mrf.mxu1 }
 0x249   : > { %v5751_v25 = vpop.f32.mrf.mxu0  ;;  %5967 = vmatmul.mubr.msk.f32.gmra.mxu1 %vm12502_vm14, %v1903_v39  ;;  %v2575_v57 = vadd.f32 %v2574_v35, %v2445_v12  ;;  %vm12507_vm14 = vmmov %vm12445_vm11  ;;  %v12536_v12 = vld [vmem:[#allocation215_spill] sm:$0xff]  ;;  %v12538_v35 = vld [vmem:[#allocation217_spill] sm:$0xff] }
 0x24a   : > { %5969 = vmatprep.mubr.msk.f32.mxu1 %vm12503_vm13, %v1904_v38  ;;  %vm12510_vm13 = vmmov %vm12445_vm11  ;;  %v12541_v39 = vld [vmem:[#allocation80_spill] sm:$0xff]  ;;  %v12543_v38 = vld [vmem:[#allocation73_spill] sm:$0xff] }
 0x24b   : > { %v5779_v34 = vpop.f32.mrf.mxu1  ;;  %v2455_v37 = vpop.f32.mrf.mxu0  ;;  %v1177_v20 = vmul.f32 %v12541_v39, %v12551_v54  ;;  %v649_v16 = vmul.f32 %v12543_v38, %v12552_v52 }
 0x24c   : > { %v2590_v18 = vadd.f32 %v5779_v34, %v5751_v25  ;;  %v12540_v25 = vld [vmem:[#allocation219_spill] sm:$0xff]  ;;  %v648_v34 = vmul.f32 %v12543_v38, %v12542_v50 }
 0x24d   : > { %v2584_v24 = vpop.f32.mrf.mxu1  ;;  %5970 = vmatmul.mubr.msk.f32.gmra.mxu1 %vm12445_vm11, %v1905_v60  ;;  %v1176_v59 = vmul.f32 %v12541_v39, %v12540_v25 }
 0x24e   : > { %v2585_v61 = vadd.f32 %v2584_v24, %v2455_v37  ;;  %5780 = vmatprep.subr.mxu0 %v2590_v18  ;;  %6028 = vmatprep.mubr.msk.f32.mxu1 %vm12505_vm12, %v12504_v56  ;;  %vm12515_vm12 = vmmov %vm12445_vm11  ;;  %v12544_v37 = vld [vmem:[#allocation205_spill] sm:$0xff]  ;;  %v12546_v24 = vld [vmem:[#allocation68_spill] sm:$0xff] }
 0x24f   : > { %5781 = vmatpush3.msra.mxu0 %v2590_v18  ;;  %vm12535_vm10 = vmmov %vm12515_vm12  ;;  %v10164_v18 = vld [vmem:[%s6684_s22 + $0x20] sm:$0xff]  ;;  %v659_v26 = vmul.f32 %v10184_v63, %v12546_v24 }
 0x250   : > { %5782 = vmatprep.subr.mxu0 %v2585_v61  ;;  %vm12537_vm9 = vmmov %vm12535_vm10  ;;  %v658_v60 = vmul.f32 %v10164_v18, %v12546_v24 }
 0x251   : > { %5783 = vmatpush3.msra.mxu0 %v2585_v61  ;;  %vm12539_vm6 = vmmov %vm12537_vm9  ;;  %v10169_v61 = vld [vmem:[%s6684_s22 + $0x60] sm:$0xff] }
 0x252   : > { %5784 = vmatprep.subr.mxu0 %v2580_v0  ;;  %v666_v30 = vadd.f32 %v658_v60, %v648_v34  ;;  %v12560_v34 = vld [vmem:[#allocation125_spill] sm:$0xff] }
 0x253   : > { %5785 = vmatpush3.msra.mxu0 %v2580_v0  ;;  %v12547_v0 = vld [vmem:[#allocation76_spill] sm:$0xff]  ;;  %v1179_v60 = vmul.f32 %v12541_v39, %v12560_v34  ;;  %v12566_v34 = vld [vmem:[#allocation138_spill] sm:$0xff] }
 0x254   : > { %5786 = vmatprep.subr.mxu0 %v2575_v57 }
 0x255   : > { %5787 = vmatpush3.msra.mxu0 %v2575_v57  ;;  %v1186_v57 = vmul.f32 %v10169_v61, %v12547_v0 }
 0x256   : > { %5788 = vmatprep.subr.mxu0 %v2570_v9 }
 0x257   : > { %5789 = vmatpush3.msra.mxu0 %v2570_v9  ;;  %v12548_v9 = vld [vmem:[#allocation244_spill] sm:$0xff] }
 0x258   : > { %5790 = vmatprep.subr.mxu0 %v2565_v1 }
 0x259   : > { %5791 = vmatpush3.msra.mxu0 %v2565_v1  ;;  %v12549_v1 = vld [vmem:[#allocation88_spill] sm:$0xff] }
 0x25a   : > { %5792 = vmatprep.subr.mxu0 %v2560_v29 }
 0x25b   : > { %5793 = vmatpush3.msra.mxu0 %v2560_v29  ;;  %v1768_v29 = vmul.f32 %v12549_v1, %v12548_v9 }
 0x25c   : > { %5794 = vmatprep.subr.mxu0 %v2555_v8 }
 0x25d   : > { %5795 = vmatpush3.msra.mxu0 %v2555_v8  ;;  %v12550_v8 = vld [vmem:[#allocation81_spill] sm:$0xff] }
 0x25e   : > { %5797 = vmatmul.mubr.msk.f32.vlgmr.msra.gmra.mxu0 %vm12507_vm14, %v12506_v10  ;;  %5860 = vmatprep.subr.msk.mxu0 %vm6786_vm2, %v12430_v58  ;;  %vm12518_vm14 = vmmov %vm12445_vm11  ;;  %v1778_v56 = vmul.f32 %v9849_v41, %v12550_v8  ;;  %v1779_v40 = vmul.f32 %v12488_v15, %v12550_v8 }
 0x25f   : > { %5861 = vmatpush3.msk.msra.mxu0 %vm6786_vm2, %v12430_v58  ;;  %5799 = vmatprep.mubr.msk.f32.mxu0 %vm12510_vm13, %v12509_v31  ;;  %vm12521_vm13 = vmmov %vm12445_vm11  ;;  %v1189_v31 = vmul.f32 %v12494_v51, %v12547_v0 }
 0x260   : > { %5862 = vmatprep.subr.msk.mxu0 %vm6798_vm3, %v12430_v58 }
 0x261   : > { %5863 = vmatpush3.msk.msra.mxu0 %vm6798_vm3, %v12430_v58 }
 0x262   : > { %5800 = vmatmul.mubr.msk.f32.gmra.mxu0 %vm12445_vm11, %v12512_v32  ;;  %5864 = vmatprep.subr.msk.mxu0 %vm6834_vm5, %v12430_v58  ;;  %vm12523_vm11 = vnez %v12522_v36  ;;  %v667_v32 = vadd.f32 %v659_v26, %v649_v16  ;;  %v661_v26 = vmul.f32 %v12492_v44, %v12546_v24  ;;  %v1781_v16 = vmul.f32 %v10062_v5, %v12550_v8  ;;  %v12658_v36 = vld [vmem:[#allocation45_spill] sm:$0xff] }
 0x263   : > { %5802 = vmatprep.mubr.msk.f32.mxu0 %vm12515_vm12, %v12514_v28  ;;  %5865 = vmatpush3.msk.msra.mxu0 %vm6834_vm5, %v12430_v58  ;;  %v1786_v28 = vadd.f32 %v1778_v56, %v1768_v29  ;;  %v12564_v29 = vld [vmem:[#allocation157_spill] sm:$0xff] }
 0x264   : > { %5866 = vmatprep.subr.msk.mxu0 %vm6873_vm8, %v12430_v58 }
 0x265   : > { %5867 = vmatpush3.msk.msra.mxu0 %vm6873_vm8, %v12430_v58 }
 0x266   : > { %5803 = vmatmul.mubr.msk.f32.gmra.mxu0 %vm12518_vm14, %v12517_v23  ;;  %5868 = vmatprep.subr.msk.mxu0 %vm11945_vm15, %v12430_v58  ;;  %vm12526_vm14 = vnez %v12525_v27 }
 0x267   : > { %5805 = vmatprep.mubr.msk.f32.mxu0 %vm12521_vm13, %v12520_v2  ;;  %5869 = vmatpush3.msk.msra.mxu0 %vm11945_vm15, %v12430_v58  ;;  %vm12528_vm13 = vmmov %vm12515_vm12  ;;  %v12559_v2 = vld [vmem:[#allocation117_spill] sm:$0xff] }
 0x268   : > { %5870 = vmatprep.subr.msk.mxu0 %vm12523_vm11, %v12430_v58  ;;  %v1770_v23 = vmul.f32 %v12549_v1, %v12559_v2 }
 0x269   : > { %5871 = vmatpush3.msk.msra.mxu0 %vm12523_vm11, %v12430_v58 }
 0x26a   : > { %5806 = vmatmul.mubr.msk.f32.gmra.mxu0 %vm12515_vm12, %v12524_v46  ;;  %5872 = vmatprep.subr.msk.mxu0 %vm12526_vm14, %v12430_v58 }
 0x26b   : > { %5808 = vmatprep.mubr.msk.f32.mxu0 %vm12528_vm13, %v12527_v33  ;;  %5873 = vmatpush3.msk.msra.mxu0 %vm12526_vm14, %v12430_v58  ;;  %vm12533_vm13 = vmmov %vm12515_vm12  ;;  %v12558_v33 = vld [vmem:[#allocation82_spill] sm:$0xff] }
 0x26c   : > { %5874 = vmatprep.subr.msk.mxu0 %vm12530_vm7, %v12430_v58  ;;  %v650_v46 = vmul.f32 %v12543_v38, %v12558_v33 }
 0x26d   : > { %5875 = vmatpush3.msk.msra.mxu0 %vm12530_vm7, %v12430_v58 }
 0x26e   : > { %5809 = vmatmul.mubr.msk.f32.gmra.mxu0 %vm12515_vm12, %v12531_v49  ;;  %5916 = vmatprep.subr.msk.mxu0 %vm6786_vm2, %v12430_v58  ;;  %vm12545_vm12 = vmmov %vm12539_vm6  ;;  %v12557_v49 = vld [vmem:[#allocation243_spill] sm:$0xff] }
 0x26f   : > { %5811 = vmatprep.mubr.msk.f32.mxu0 %vm12533_vm13, %v12532_v55  ;;  %v1194_v55 = vadd.f32 %v1186_v57, %v1176_v59  ;;  %v1769_v14 = vmul.f32 %v12549_v1, %v12557_v49  ;;  %v1780_v59 = vmul.f32 %v10048_v7, %v12550_v8  ;;  %v12561_v57 = vld [vmem:[#allocation101_spill] sm:$0xff]  ;;  %vm12565_vm13 = vmmov %vm12539_vm6  ;;  %v12583_v8 = vld [vmem:[#allocation159_spill] sm:$0xff] }
 0x271   : > { %v1302_v7 = vadd.f32 %v1194_v55, %v666_v30  ;;  %v1788_v51 = vadd.f32 %v1780_v59, %v1770_v23  ;;  %v12567_v30 = vld [vmem:[#allocation120_spill] sm:$0xff] }
 0x272   : > { %5812 = vmatmul.mubr.msk.f32.gmra.mxu0 %vm12535_vm10, %v12534_v62  ;;  %v12555_v62 = vld [vmem:[#allocation106_spill] sm:$0xff]  ;;  %vm12562_vm10 = vmmov %vm12539_vm6  ;;  %v12587_v59 = vld [vmem:[#allocation188_spill] sm:$0xff] }
 0x273   : > { %5814 = vmatprep.mubr.msk.f32.mxu0 %vm12537_vm9, %v12536_v12  ;;  %vm12556_vm9 = vmmov %vm12539_vm6 }
 0x276   : > { %5815 = vmatmul.mubr.msk.f32.gmra.mxu0 %vm12539_vm6, %v12538_v35  ;;  %v12554_v35 = vld [vmem:[#allocation143_spill] sm:$0xff] }
 0x277   : > { %5817 = vmatprep.mubr.msk.f32.mxu0 %vm12545_vm12, %v12544_v37  ;;  %v10189_v37 = vld [vmem:[%s6684_s22 + $0x68] sm:$0xff]  ;;  %v1178_v12 = vmul.f32 %v12541_v39, %v12554_v35  ;;  %vm12568_vm12 = vmmov %vm12539_vm6 }
 0x278   : > { %v1187_v45 = vmul.f32 %v10189_v37, %v12547_v0 }
 0x27a   : > { %5818 = vmatmul.mubr.msk.f32.gmra.mxu0 %vm12539_vm6, %v12553_v47  ;;  %v1188_v47 = vmul.f32 %v12485_v22, %v12547_v0  ;;  %v1195_v42 = vadd.f32 %v1187_v45, %v1177_v20  ;;  %v12563_v22 = vld [vmem:[#allocation121_spill] sm:$0xff]  ;;  %v1787_v45 = vadd.f32 %v1779_v40, %v1769_v14  ;;  %v1894_v20 = vadd.f32 %v1786_v28, %v1302_v7 }
 0x27b   : > { %5876 = vmatprep.mubr.msk.f32.mxu0 %vm12556_vm9, %v12555_v62  ;;  %v660_v62 = vmul.f32 %v9861_v21, %v12546_v24  ;;  %v651_v56 = vmul.f32 %v12543_v38, %v12563_v22  ;;  %v1197_v14 = vadd.f32 %v1189_v31, %v1179_v60  ;;  %vm12569_vm9 = vmmov %vm12539_vm6  ;;  %v12575_v38 = vld [vmem:[#allocation223_spill] sm:$0xff]  ;;  %v12579_v0 = vld [vmem:[#allocation189_spill] sm:$0xff] }
 0x27c   : > { %v1196_v39 = vadd.f32 %v1188_v47, %v1178_v12  ;;  %v1303_v40 = vadd.f32 %v1195_v42, %v667_v32  ;;  %v12574_v12 = vld [vmem:[#allocation116_spill] sm:$0xff]  ;;  %v12577_v24 = vld [vmem:[#allocation175_spill] sm:$0xff] }
 0x27d   : > { %v668_v47 = vadd.f32 %v660_v62, %v650_v46  ;;  %v669_v28 = vadd.f32 %v661_v26, %v651_v56  ;;  %v12572_v46 = vld [vmem:[#allocation221_spill] sm:$0xff]  ;;  %v12585_v62 = vld [vmem:[#allocation267_spill] sm:$0xff] }
 0x27e   : > { %5877 = vmatmul.mubr.msk.f32.vlgmr.msra.gmra.mxu0 %vm12562_vm10, %v12561_v57  ;;  %v1771_v57 = vmul.f32 %v12549_v1, %v12566_v34  ;;  %v1895_v7 = vadd.f32 %v1787_v45, %v1303_v40  ;;  %vm12570_vm10 = vmmov %vm12539_vm6  ;;  %v12581_v1 = vld [vmem:[#allocation197_spill] sm:$0xff] }
 0x27f   : > { %5879 = vmatprep.mubr.msk.f32.mxu0 %vm12565_vm13, %v12564_v29  ;;  %5917 = vmatpush3.msk.msra.mxu0 %vm6786_vm2, %v12430_v58  ;;  %v1304_v55 = vadd.f32 %v1196_v39, %v668_v47  ;;  %v1305_v31 = vadd.f32 %v1197_v14, %v669_v28  ;;  %vm12571_vm13 = vmmov %vm12539_vm6 }
 0x280   : > { %5918 = vmatprep.subr.msk.mxu0 %vm6798_vm3, %v12430_v58  ;;  %v1789_v23 = vadd.f32 %v1781_v16, %v1771_v57 }
 0x281   : > { %5919 = vmatpush3.msk.msra.mxu0 %vm6798_vm3, %v12430_v58  ;;  %v1896_v42 = vadd.f32 %v1788_v51, %v1304_v55 }
 0x282   : > { %5880 = vmatmul.mubr.msk.f32.gmra.mxu0 %vm12568_vm12, %v12567_v30  ;;  %5920 = vmatprep.subr.msk.mxu0 %vm6834_vm5, %v12430_v58  ;;  %v1897_v32 = vadd.f32 %v1789_v23, %v1305_v31  ;;  %vm12573_vm12 = vmmov %vm12539_vm6  ;;  %v10309_v23 = vstv %s2979_s14 }
 0x283   : > { %5882 = vmatprep.mubr.msk.f32.mxu0 %vm12539_vm6, %v1894_v20  ;;  %5921 = vmatpush3.msk.msra.mxu0 %vm6834_vm5, %v12430_v58 }
 0x284   : > { %5922 = vmatprep.subr.msk.mxu0 %vm6873_vm8, %v12430_v58 }
 0x285   : > { %5923 = vmatpush3.msk.msra.mxu0 %vm6873_vm8, %v12430_v58 }
 0x286   : > { %5883 = vmatmul.mubr.msk.f32.gmra.mxu0 %vm12569_vm9, %v1895_v7  ;;  %5924 = vmatprep.subr.msk.mxu0 %vm11945_vm15, %v12430_v58  ;;  %vm12576_vm9 = vmmov %vm12539_vm6 }
 0x287   : > { %5885 = vmatprep.mubr.msk.f32.mxu0 %vm12570_vm10, %v1896_v42  ;;  %5925 = vmatpush3.msk.msra.mxu0 %vm11945_vm15, %v12430_v58  ;;  %vm12578_vm10 = vmmov %vm12539_vm6 }
 0x288   : > { %5926 = vmatprep.subr.msk.mxu0 %vm12523_vm11, %v12430_v58 }
 0x289   : > { %5927 = vmatpush3.msk.msra.mxu0 %vm12523_vm11, %v12430_v58 }
 0x28a   : > { %5886 = vmatmul.mubr.msk.f32.gmra.mxu0 %vm12571_vm13, %v1897_v32  ;;  %5928 = vmatprep.subr.msk.mxu0 %vm12526_vm14, %v12430_v58  ;;  %vm12580_vm13 = vmmov %vm12539_vm6 }
 0x28b   : > { %5929 = vmatpush3.msk.msra.mxu0 %vm12526_vm14, %v12430_v58  ;;  %5932 = vmatprep.mubr.msk.f32.mxu0 %vm12573_vm12, %v12572_v46  ;;  %vm12582_vm12 = vmmov %vm12539_vm6 }
 0x28c   : > { %5930 = vmatprep.subr.msk.mxu0 %vm12530_vm7, %v12430_v58  ;;  %vm12584_vm14 = vmmov %vm12539_vm6 }
 0x28d   : > { %5931 = vmatpush3.msk.msra.mxu0 %vm12530_vm7, %v12430_v58  ;;  %vm12586_vm7 = vmmov %vm12539_vm6 }
 0x28e   : > { %5933 = vmatmul.mubr.msk.f32.vlgmr.msra.gmra.mxu0 %vm12539_vm6, %v12574_v12 }
 0x28f   : > { %5935 = vmatprep.mubr.msk.f32.mxu0 %vm12576_vm9, %v12575_v38  ;;  %vm12593_vm9 = vmmov %vm12539_vm6 }
 0x292   : > { %5936 = vmatmul.mubr.msk.f32.gmra.mxu0 %vm12578_vm10, %v12577_v24  ;;  %vm12595_vm10 = vmmov %vm12539_vm6 }
 0x293   : > { %5938 = vmatprep.mubr.msk.f32.mxu0 %vm12580_vm13, %v12579_v0  ;;  %vm12599_vm13 = vmmov %vm12539_vm6 }
 0x296   : > { %5939 = vmatmul.mubr.msk.f32.gmra.mxu0 %vm12582_vm12, %v12581_v1  ;;  %vm12604_vm12 = vmmov %vm12539_vm6 }
 0x297   : > { %5941 = vmatprep.mubr.msk.f32.mxu0 %vm12584_vm14, %v12583_v8  ;;  %vm12591_vm14 = vmmov %vm12539_vm6 }
 0x29a   : > { %5942 = vmatmul.mubr.msk.f32.gmra.mxu0 %vm12586_vm7, %v12585_v62  ;;  %vm12589_vm7 = vmmov %vm12539_vm6 }
 0x29b   : > { %5988 = vmatprep.mubr.msk.f32.mxu0 %vm12539_vm6, %v12587_v59 }
 0x2d1   : > { %v5838_v60 = vpop.f32.mrf.mxu1 }
 0x2d3   : > { %v2900_v56 = vpop.f32.mrf.mxu1 }
 0x2d5   : > { %v5841_v29 = vpop.f32.mrf.mxu1 }
 0x2d7   : > { %v2910_v39 = vpop.f32.mrf.mxu1 }
 0x2d9   : > { %v5844_v57 = vpop.f32.mrf.mxu1 }
 0x2db   : > { %v2920_v45 = vpop.f32.mrf.mxu1 }
 0x2dd   : > { %v5847_v26 = vpop.f32.mrf.mxu1 }
 0x2df   : > { %v2930_v16 = vpop.f32.mrf.mxu1 }
 0x2e1   : > { %v5850_v20 = vpop.f32.mrf.mxu1 }
 0x2e3   : > { %v2940_v47 = vpop.f32.mrf.mxu1 }
 0x2e5   : > { %v10296_v51 = vpop.f32.mrf.mxu1 }
 0x2e7   : > { %v10298_v30 = vpop.f32.mrf.mxu1 }
 0x2e9   : > { %v10300_v40 = vpop.f32.mrf.mxu1 }
 0x2eb   : > { %v10302_v14 = vpop.f32.mrf.mxu1 }
 0x2ed   : > { %v10304_v55 = vpop.f32.mrf.mxu1 }
 0x2ef   : > { %v10306_v7 = vpop.f32.mrf.mxu1 }
 0x2f1   : > { %v10311_v32 = vpop.f32.mrf.mxu1 }
 0x2f3   : > { %v10315_v62 = vpop.f32.mrf.mxu1 }
 0x31e   : > { %v5798_v28 = vpop.f32.mrf.mxu0 }
 0x31f   : > { %v2906_v42 = vadd.f32 %v5838_v60, %v5798_v28 }
 0x320   : > { %v2707_v31 = vpop.f32.mrf.mxu0 }
 0x321   : > { %v2982_v46 = vadd.f32 %v10309_v23, %v2906_v42  ;;  %v2901_v12 = vadd.f32 %v2900_v56, %v2707_v31 }
 0x322   : > { %v5801_v38 = vpop.f32.mrf.mxu0 }
 0x323   : > { %v2998_v24 = vmax.f32 %v2982_v46, 0.0  ;;  %v2981_v0 = vadd.f32 %v10309_v23, %v2901_v12  ;;  %v2916_v1 = vadd.f32 %v5841_v29, %v5801_v38  ;;  %v10323_v38 = vpop.f32.mrf.mxu1 }
 0x324   : > { %v2717_v8 = vpop.f32.mrf.mxu0 }
 0x325   : > { %3014 = vst [vmem:[%s10317_s21 + $0x8] sm:$0xff] %v2998_v24  ;;  %v2997_v60 = vmax.f32 %v2981_v0, 0.0  ;;  %v2984_v28 = vadd.f32 %v10309_v23, %v2916_v1  ;;  %v2911_v42 = vadd.f32 %v2910_v39, %v2717_v8 }
 0x326   : > { %v5804_v56 = vpop.f32.mrf.mxu0 }
 0x327   : > { %3013 = vst [vmem:[%s10317_s21] sm:$0xff] %v2997_v60  ;;  %v3000_v31 = vmax.f32 %v2984_v28, 0.0  ;;  %v2983_v29 = vadd.f32 %v10309_v23, %v2911_v42  ;;  %v2926_v46 = vadd.f32 %v5844_v57, %v5804_v56  ;;  %v10329_v28 = vpop.f32.mrf.mxu1 }
 0x328   : > { %v2727_v12 = vpop.f32.mrf.mxu0 }
 0x329   : > { %3016 = vst [vmem:[%s10317_s21 + $0x18] sm:$0xff] %v3000_v31  ;;  %v2999_v59 = vmax.f32 %v2983_v29, 0.0  ;;  %v2986_v24 = vadd.f32 %v10309_v23, %v2926_v46  ;;  %v2921_v17 = vadd.f32 %v2920_v45, %v2727_v12  ;;  %v5912_v12 = vpop.f32.mrf.mxu1 }
 0x32a   : > { %v5807_v0 = vpop.f32.mrf.mxu0 }
 0x32b   : > { %3015 = vst [vmem:[%s10317_s21 + $0x10] sm:$0xff] %v2999_v59  ;;  %v3002_v1 = vmax.f32 %v2986_v24, 0.0  ;;  %v2985_v39 = vadd.f32 %v10309_v23, %v2921_v17  ;;  %v2936_v8 = vadd.f32 %v5847_v26, %v5807_v0 }
 0x32c   : > { %v2737_v60 = vpop.f32.mrf.mxu0 }
 0x32d   : > { %3018 = vst [vmem:[%s10317_s21 + $0x28] sm:$0xff] %v3002_v1  ;;  %v3001_v57 = vmax.f32 %v2985_v39, 0.0  ;;  %v2988_v42 = vadd.f32 %v10309_v23, %v2936_v8  ;;  %v2931_v56 = vadd.f32 %v2930_v16, %v2737_v60  ;;  %v3268_v60 = vpop.f32.mrf.mxu1 }
 0x32e   : > { %v5810_v31 = vpop.f32.mrf.mxu0 }
 0x32f   : > { %3017 = vst [vmem:[%s10317_s21 + $0x20] sm:$0xff] %v3001_v57  ;;  %v3004_v29 = vmax.f32 %v2988_v42, 0.0  ;;  %v2987_v59 = vadd.f32 %v10309_v23, %v2931_v56  ;;  %v2946_v45 = vadd.f32 %v5850_v20, %v5810_v31 }
 0x330   : > { %v2747_v46 = vpop.f32.mrf.mxu0 }
 0x331   : > { %3020 = vst [vmem:[%s10317_s21 + $0x38] sm:$0xff] %v3004_v29  ;;  %v3003_v17 = vmax.f32 %v2987_v59, 0.0  ;;  %v2990_v26 = vadd.f32 %v10309_v23, %v2946_v45  ;;  %v2941_v24 = vadd.f32 %v2940_v47, %v2747_v46  ;;  %v5915_v45 = vpop.f32.mrf.mxu1 }
 0x332   : > { %v5813_v0 = vpop.f32.mrf.mxu0 }
 0x333   : > { %3019 = vst [vmem:[%s10317_s21 + $0x30] sm:$0xff] %v3003_v17  ;;  %v3006_v1 = vmax.f32 %v2990_v26, 0.0  ;;  %v2989_v16 = vadd.f32 %v10309_v23, %v2941_v24  ;;  %v2956_v39 = vadd.f32 %v10296_v51, %v5813_v0 }
 0x334   : > { %v2757_v8 = vpop.f32.mrf.mxu0 }
 0x335   : > { %3022 = vst [vmem:[%s10317_s21 + $0x48] sm:$0xff] %v3006_v1  ;;  %v3005_v20 = vmax.f32 %v2989_v16, 0.0  ;;  %v2992_v57 = vadd.f32 %v10309_v23, %v2956_v39  ;;  %v2951_v42 = vadd.f32 %v10298_v30, %v2757_v8 }
 0x336   : > { %v5816_v56 = vpop.f32.mrf.mxu0 }
 0x337   : > { %3021 = vst [vmem:[%s10317_s21 + $0x40] sm:$0xff] %v3005_v20  ;;  %v3008_v47 = vmax.f32 %v2992_v57, 0.0  ;;  %v2991_v31 = vadd.f32 %v10309_v23, %v2951_v42  ;;  %v2966_v29 = vadd.f32 %v10300_v40, %v5816_v56  ;;  %v3278_v40 = vpop.f32.mrf.mxu1 }
 0x338   : > { %v2767_v59 = vpop.f32.mrf.mxu0 }
 0x339   : > { %3024 = vst [vmem:[%s10317_s21 + $0x58] sm:$0xff] %v3008_v47  ;;  %v3007_v51 = vmax.f32 %v2991_v31, 0.0  ;;  %v2994_v46 = vadd.f32 %v10309_v23, %v2966_v29  ;;  %v2961_v17 = vadd.f32 %v10302_v14, %v2767_v59  ;;  %v10357_v56 = vpop.f32.mrf.mxu1 }
 0x33a   : > { %v5819_v26 = vpop.f32.mrf.mxu0 }
 0x33b   : > { %3023 = vst [vmem:[%s10317_s21 + $0x50] sm:$0xff] %v3007_v51  ;;  %v3010_v30 = vmax.f32 %v2994_v46, 0.0  ;;  %v2993_v24 = vadd.f32 %v10309_v23, %v2961_v17  ;;  %v2976_v0 = vadd.f32 %v10304_v55, %v5819_v26  ;;  %v10361_v29 = vpop.f32.mrf.mxu1 }
 0x33c   : > { %v2777_v1 = vpop.f32.mrf.mxu0 }
 0x33d   : > { %3026 = vst [vmem:[%s10317_s21 + $0x68] sm:$0xff] %v3010_v30  ;;  %v3009_v16 = vmax.f32 %v2993_v24, 0.0  ;;  %v2996_v39 = vadd.f32 %v10309_v23, %v2976_v0  ;;  %v2971_v8 = vadd.f32 %v10306_v7, %v2777_v1  ;;  %v5965_v46 = vpop.f32.mrf.mxu1 }
 0x33e   : > { %v5878_v20 = vpop.f32.mrf.mxu0 }
 0x33f   : > { %3025 = vst [vmem:[%s10317_s21 + $0x60] sm:$0xff] %v3009_v16  ;;  %v3012_v14 = vmax.f32 %v2996_v39, 0.0  ;;  %v2995_v57 = vadd.f32 %v10309_v23, %v2971_v8  ;;  %v3516_v30 = vpop.f32.mrf.mxu1 }
 0x340   : > { %v3119_v42 = vpop.f32.mrf.mxu0 }
 0x341   : > { %3028 = vst [vmem:[%s10317_s21 + $0x78] sm:$0xff] %v3012_v14  ;;  %v3011_v47 = vmax.f32 %v2995_v57, 0.0  ;;  %v5968_v16 = vpop.f32.mrf.mxu1 }
 0x342   : > { %v5881_v55 = vpop.f32.mrf.mxu0 }
 0x343   : > { %3027 = vst [vmem:[%s10317_s21 + $0x70] sm:$0xff] %v3011_v47  ;;  %v3264_v14 = vadd.f32 %v10323_v38, %v5881_v55 }
 0x344   : > { %v3129_v31 = vpop.f32.mrf.mxu0 }
 0x345   : > { %v3259_v57 = vadd.f32 %v10329_v28, %v3129_v31  ;;  %v12588_v31 = vld [vmem:[#allocation212_spill] sm:$0xff] }
 0x346   : > { %v5884_v59 = vpop.f32.mrf.mxu0 }
 0x347   : > { %v3274_v0 = vadd.f32 %v5912_v12, %v5884_v59  ;;  %v3254_v12 = vadd.f32 %v10311_v32, %v5878_v20 }
 0x348   : > { %v3139_v51 = vpop.f32.mrf.mxu0 }
 0x349   : > { %v3269_v39 = vadd.f32 %v3268_v60, %v3139_v51  ;;  %v3249_v60 = vadd.f32 %v10315_v62, %v3119_v42  ;;  %v12590_v62 = vld [vmem:[#allocation214_spill] sm:$0xff]  ;;  %v12592_v42 = vld [vmem:[#allocation225_spill] sm:$0xff] }
 0x34a   : > { %v5887_v17 = vpop.f32.mrf.mxu0 }
 0x34b   : > { %v3284_v7 = vadd.f32 %v5915_v45, %v5887_v17 }
 0x34c   : > { %v3149_v26 = vpop.f32.mrf.mxu0 }
 0x34d   : > { %v3279_v24 = vadd.f32 %v3278_v40, %v3149_v26  ;;  %6012 = vmatprep.subr.mxu1 %v3284_v7  ;;  %v3526_v40 = vpop.f32.mrf.mxu1 }
 0x34e   : > { %v10363_v23 = vpop.f32.mrf.mxu0  ;;  %6013 = vmatpush3.msra.mxu1 %v3284_v7 }
 0x34f   : > { %6014 = vmatprep.subr.mxu1 %v3279_v24  ;;  %v5971_v17 = vpop.f32.mrf.mxu1 }
 0x350   : > { %v10365_v1 = vpop.f32.mrf.mxu0  ;;  %6015 = vmatpush3.msra.mxu1 %v3279_v24  ;;  %v12594_v24 = vld [vmem:[#allocation227_spill] sm:$0xff] }
 0x351   : > { %6016 = vmatprep.subr.mxu1 %v3274_v0  ;;  %v3536_v55 = vpop.f32.mrf.mxu1 }
 0x352   : > { %v5937_v8 = vpop.f32.mrf.mxu0  ;;  %6017 = vmatpush3.msra.mxu1 %v3274_v0  ;;  %v12596_v0 = vld [vmem:[#allocation85_spill] sm:$0xff] }
 0x353   : > { %6018 = vmatprep.subr.mxu1 %v3269_v39  ;;  %v3522_v26 = vadd.f32 %v5965_v46, %v5937_v8  ;;  %v1339_v46 = vmul.f32 %v12596_v0, %v12551_v54  ;;  %v12600_v8 = vld [vmem:[#allocation75_spill] sm:$0xff]  ;;  %v12605_v54 = vld [vmem:[#allocation84_spill] sm:$0xff] }
 0x354   : > { %v3387_v45 = vpop.f32.mrf.mxu0  ;;  %6019 = vmatpush3.msra.mxu1 %v3269_v39  ;;  %v12597_v39 = vld [vmem:[#allocation74_spill] sm:$0xff] }
 0x355   : > { %6020 = vmatprep.subr.mxu1 %v3264_v14 }
 0x356   : > { %v5940_v47 = vpop.f32.mrf.mxu0  ;;  %6021 = vmatpush3.msra.mxu1 %v3264_v14  ;;  %v778_v14 = vmul.f32 %v12597_v39, %v12542_v50  ;;  %v12602_v50 = vld [vmem:[#allocation90_spill] sm:$0xff] }
 0x357   : > { %6022 = vmatprep.subr.mxu1 %v3259_v57  ;;  %v3532_v32 = vadd.f32 %v5968_v16, %v5940_v47  ;;  %v1338_v16 = vmul.f32 %v12596_v0, %v12540_v25  ;;  %v788_v47 = vmul.f32 %v10164_v18, %v12600_v8  ;;  %v12601_v25 = vld [vmem:[#allocation79_spill] sm:$0xff] }
 0x358   : > { %v3397_v59 = vpop.f32.mrf.mxu0  ;;  %6023 = vmatpush3.msra.mxu1 %v3259_v57  ;;  %v12598_v57 = vld [vmem:[#allocation233_spill] sm:$0xff] }
 0x359   : > { %6024 = vmatprep.subr.mxu1 %v3254_v12  ;;  %v3527_v20 = vadd.f32 %v3526_v40, %v3397_v59  ;;  %v3517_v40 = vadd.f32 %v3516_v30, %v3387_v45  ;;  %v1930_v30 = vmul.f32 %v12602_v50, %v12548_v9  ;;  %v3512_v45 = vadd.f32 %v10357_v56, %v10363_v23  ;;  %v12603_v59 = vld [vmem:[#allocation218_spill] sm:$0xff] }
 0x35a   : > { %v5943_v51 = vpop.f32.mrf.mxu0  ;;  %6025 = vmatpush3.msra.mxu1 %v3254_v12  ;;  %v1348_v12 = vmul.f32 %v10169_v61, %v12601_v25  ;;  %v789_v9 = vmul.f32 %v10184_v63, %v12600_v8  ;;  %v1349_v56 = vmul.f32 %v10189_v37, %v12601_v25  ;;  %v1931_v23 = vmul.f32 %v12602_v50, %v12557_v49 }
 0x35b   : > { %v3542_v38 = vadd.f32 %v5971_v17, %v5943_v51  ;;  %6026 = vmatprep.subr.mxu1 %v3249_v60  ;;  %v1940_v17 = vmul.f32 %v9849_v41, %v12605_v54  ;;  %v3507_v41 = vadd.f32 %v10361_v29, %v10365_v1  ;;  %v780_v51 = vmul.f32 %v12597_v39, %v12558_v33  ;;  %v12608_v29 = vld [vmem:[#allocation183_spill] sm:$0xff] }
 0x35c   : > { %v3407_v7 = vpop.f32.mrf.mxu0  ;;  %6027 = vmatpush3.msra.mxu1 %v3249_v60  ;;  %v779_v60 = vmul.f32 %v12597_v39, %v12552_v52  ;;  %v12606_v52 = vld [vmem:[#allocation176_spill] sm:$0xff]  ;;  %v1340_v49 = vmul.f32 %v12596_v0, %v12554_v35  ;;  %v1941_v33 = vmul.f32 %v12488_v15, %v12605_v54  ;;  %v781_v35 = vmul.f32 %v12597_v39, %v12563_v22  ;;  %v12611_v15 = vld [vmem:[#allocation222_spill] sm:$0xff] }
 0x35d   : > { %v3537_v28 = vadd.f32 %v3536_v55, %v3407_v7  ;;  %5972 = vmatprep.subr.mxu0 %v3542_v38  ;;  %6029 = vmatmul.mubr.msk.f32.vlgmr.msra.gmra.mxu1 %vm12589_vm7, %v12588_v31  ;;  %vm12607_vm7 = vnez %v12441_v53  ;;  %v1356_v55 = vadd.f32 %v1348_v12, %v1338_v16  ;;  %v1948_v1 = vadd.f32 %v1940_v17, %v1930_v30  ;;  %v12652_v31 = vld [vmem:[#allocation102_spill] sm:$0xff] }
 0x35e   : > { %5973 = vmatpush3.msra.mxu0 %v3542_v38  ;;  %6080 = vmatprep.subr.msk.mxu1 %vm6766_vm0, %v12430_v58  ;;  %v796_v38 = vadd.f32 %v788_v47, %v778_v14  ;;  %v797_v7 = vadd.f32 %v789_v9, %v779_v60  ;;  %v791_v39 = vmul.f32 %v12492_v44, %v12600_v8  ;;  %v12615_v14 = vld [vmem:[#allocation125_spill] sm:$0xff]  ;;  %v12616_v47 = vld [vmem:[#allocation187_spill] sm:$0xff]  ;;  %v10483_v12 = vstv %s10412_s25 }
 0x35f   : > { %5974 = vmatprep.subr.mxu0 %v3537_v28  ;;  %6031 = vmatprep.mubr.msk.f32.mxu1 %vm12591_vm14, %v12590_v62  ;;  %vm12609_vm14 = vmmov %vm12539_vm6  ;;  %v1949_v30 = vadd.f32 %v1941_v33, %v1931_v23  ;;  %v12618_v44 = vld [vmem:[#allocation37_spill] sm:$0xff]  ;;  %v10502_v60 = vld [vmem:[%s6684_s22 + $0x78] sm:$0xff]  ;;  %v10677_v62 = vstv %s10543_s8 }
 0x360   : > { %5975 = vmatpush3.msra.mxu0 %v3537_v28  ;;  %6081 = vmatpush3.msk.msra.mxu1 %vm6766_vm0, %v12430_v58  ;;  %v1357_v28 = vadd.f32 %v1349_v56, %v1339_v46  ;;  %v1464_v22 = vadd.f32 %v1356_v55, %v796_v38  ;;  %v10475_v46 = vmul.f32 %v12602_v50, %v12566_v34  ;;  %v10492_v34 = vstv %s10421_s0  ;;  %v12622_v23 = vld [vmem:[#allocation172_spill] sm:$0xff] }
 0x361   : > { %5976 = vmatprep.subr.mxu0 %v3532_v32  ;;  %6032 = vmatmul.mubr.msk.f32.gmra.mxu1 %vm12593_vm9, %v12592_v42  ;;  %vm12610_vm9 = vmmov %vm12539_vm6  ;;  %12621 = vst [vmem:[#allocation226_spill] sm:$0xff] %v10502_v60  ;;  %v1351_v9 = vmul.f32 %v10502_v60, %v12601_v25  ;;  %v1943_v56 = vmul.f32 %v10062_v5, %v12605_v54  ;;  %v10519_v38 = vstv %s10438_s7  ;;  %v12624_v5 = vld [vmem:[#allocation211_spill] sm:$0xff] }
 0x362   : > { %5977 = vmatpush3.msra.mxu0 %v3532_v32  ;;  %6082 = vmatprep.subr.msk.mxu1 %vm6777_vm1, %v12430_v58  ;;  %v790_v32 = vmul.f32 %v9861_v21, %v12600_v8  ;;  %v12612_v21 = vld [vmem:[#allocation155_spill] sm:$0xff]  ;;  %v1465_v8 = vadd.f32 %v1357_v28, %v797_v7  ;;  %v799_v55 = vadd.f32 %v791_v39, %v781_v35  ;;  %v10539_v7 = vld [vmem:[%s6684_s22 + $0x48] sm:$0xff] }
 0x363   : > { %5978 = vmatprep.subr.mxu0 %v3527_v20  ;;  %6034 = vmatprep.mubr.msk.f32.mxu1 %vm12595_vm10, %v12594_v24  ;;  %vm12613_vm10 = vmmov %vm12539_vm6  ;;  %v1325_v28 = vmul.f32 %v10539_v7, %v10492_v34  ;;  %v10664_v24 = vstv %s10521_s9  ;;  %v817_v13 = vmul.f32 %v10184_v63, %v10677_v62 }
 0x364   : > { %5979 = vmatpush3.msra.mxu0 %v3527_v20  ;;  %6083 = vmatpush3.msk.msra.mxu1 %vm6777_vm1, %v12430_v58  ;;  %v1932_v20 = vmul.f32 %v12602_v50, %v12559_v2  ;;  %v12614_v2 = vld [vmem:[#allocation240_spill] sm:$0xff]  ;;  %v798_v50 = vadd.f32 %v790_v32, %v780_v51  ;;  %v10552_v32 = vld [vmem:[%s6684_s22 + $0x10] sm:$0xff] }
 0x365   : > { %5980 = vmatprep.subr.mxu0 %v3522_v26  ;;  %6035 = vmatmul.mubr.msk.f32.gmra.mxu1 %vm12599_vm13, %v12598_v57  ;;  %v1942_v16 = vmul.f32 %v12614_v2, %v12605_v54  ;;  %vm12617_vm13 = vmmov %vm12539_vm6  ;;  %v10529_v54 = vld [vmem:[%s6684_s22 + $0x40] sm:$0xff]  ;;  %v766_v35 = vmul.f32 %v10552_v32, %v10483_v12 }
 0x366   : > { %5981 = vmatpush3.msra.mxu0 %v3522_v26  ;;  %6084 = vmatprep.subr.msk.mxu1 %vm6803_vm4, %v12430_v58  ;;  %v1350_v26 = vmul.f32 %v12611_v15, %v12601_v25 }
 0x367   : > { %5982 = vmatprep.subr.mxu0 %v3517_v40  ;;  %6037 = vmatprep.mubr.msk.f32.mxu1 %vm12604_vm12, %v12603_v59  ;;  %vm12619_vm12 = vnez %v12618_v44  ;;  %v1950_v25 = vadd.f32 %v1942_v16, %v1932_v20  ;;  %v10557_v20 = vld [vmem:[%s6684_s22 + $0x50] sm:$0xff]  ;;  %v10571_v16 = vld [vmem:[%s6684_s22 + $0x80] sm:$0xff] }
 0x368   : > { %5983 = vmatpush3.msra.mxu0 %v3517_v40  ;;  %6085 = vmatpush3.msk.msra.mxu1 %vm6803_vm4, %v12430_v58  ;;  %v1341_v40 = vmul.f32 %v12596_v0, %v12615_v14  ;;  %v10494_v0 = vadd.f32 %v1948_v1, %v1464_v22  ;;  %v1358_v17 = vadd.f32 %v1350_v26, %v1340_v49  ;;  %v10534_v1 = vld [vmem:[%s6684_s22 + $0x8] sm:$0xff]  ;;  %v12626_v22 = vld [vmem:[#allocation204_spill] sm:$0xff] }
 0x369   : > { %5984 = vmatprep.subr.mxu0 %v3512_v45  ;;  %6038 = vmatmul.mubr.msk.f32.gmra.mxu1 %vm12539_vm6, %v12606_v52  ;;  %v1324_v49 = vmul.f32 %v10529_v54, %v10492_v34  ;;  %v765_v33 = vmul.f32 %v10534_v1, %v10483_v12  ;;  %v1326_v15 = vmul.f32 %v10557_v20, %v10492_v34 }
 0x36a   : > { %5985 = vmatpush3.msra.mxu0 %v3512_v45  ;;  %6086 = vmatprep.subr.msk.mxu1 %vm12607_vm7, %v12430_v58  ;;  %v12620_v45 = vld [vmem:[#allocation164_spill] sm:$0xff]  ;;  %v10561_v26 = vadd.f32 %v1949_v30, %v1465_v8  ;;  %v1916_v39 = vmul.f32 %v10571_v16, %v10519_v38  ;;  %v1466_v14 = vadd.f32 %v1358_v17, %v798_v50  ;;  %v12628_v30 = vld [vmem:[#allocation190_spill] sm:$0xff]  ;;  %v10583_v8 = vld [vmem:[%s6684_s22 + $0x88] sm:$0xff] }
 0x36b   : > { %5986 = vmatprep.subr.mxu0 %v3507_v41  ;;  %6040 = vmatprep.mubr.msk.f32.mxu1 %vm12609_vm14, %v12608_v29  ;;  %vm12623_vm14 = vmmov %vm12539_vm6  ;;  %v12633_v29 = vld [vmem:[#allocation136_spill] sm:$0xff]  ;;  %v768_v52 = vmul.f32 %v10164_v18, %v10483_v12 }
 0x36c   : > { %5987 = vmatpush3.msra.mxu0 %v3507_v41  ;;  %6087 = vmatpush3.msk.msra.mxu1 %vm12607_vm7, %v12430_v58  ;;  %v10514_v41 = vld [vmem:[%s6684_s22] sm:$0xff] }
 0x36d   : > { %5989 = vmatmul.mubr.msk.f32.vlgmr.msra.gmra.mxu0 %vm12610_vm9, %v12506_v10  ;;  %6052 = vmatprep.subr.msk.mxu0 %vm6786_vm2, %v12430_v58  ;;  %v764_v51 = vmul.f32 %v10514_v41, %v10483_v12  ;;  %vm12625_vm9 = vmmov %vm12539_vm6 }
 0x36e   : > { %6053 = vmatpush3.msk.msra.mxu0 %vm6786_vm2, %v12430_v58  ;;  %5991 = vmatprep.mubr.msk.f32.mxu0 %vm12613_vm10, %v12612_v21  ;;  %vm12627_vm10 = vmmov %vm12539_vm6  ;;  %v1453_v21 = vadd.f32 %v1325_v28, %v765_v33  ;;  %v10621_v33 = vadd.f32 %v1950_v25, %v1466_v14  ;;  %v10641_v25 = vld [vmem:[%s6684_s22 + $0xa0] sm:$0xff]  ;;  %v769_v14 = vmul.f32 %v10184_v63, %v10483_v12 }
 0x36f   : > { %6054 = vmatprep.subr.msk.mxu0 %vm6798_vm3, %v12430_v58  ;;  %6041 = vmatmul.mubr.msk.f32.gmra.mxu1 %vm12617_vm13, %v12616_v47  ;;  %vm12629_vm13 = vmmov %vm12539_vm6  ;;  %v12631_v47 = vld [vmem:[#allocation39_spill] sm:$0xff] }
 0x370   : > { %6055 = vmatpush3.msk.msra.mxu0 %vm6798_vm3, %v12430_v58  ;;  %6088 = vmatprep.subr.msk.mxu1 %vm12619_vm12, %v12430_v58  ;;  %12637 = vst [vmem:[#allocation249_spill] sm:$0xff] %v10621_v33  ;;  %v12661_v33 = vld [vmem:[#allocation215_spill] sm:$0xff] }
 0x371   : > { %5992 = vmatmul.mubr.msk.f32.gmra.mxu0 %vm12539_vm6, %v12620_v45  ;;  %6056 = vmatprep.subr.msk.mxu0 %vm6834_vm5, %v12430_v58  ;;  %v10588_v45 = vld [vmem:[%s6684_s22 + $0x18] sm:$0xff] }
 0x372   : > { %5994 = vmatprep.mubr.msk.f32.mxu0 %vm12623_vm14, %v12622_v23  ;;  %6057 = vmatpush3.msk.msra.mxu0 %vm6834_vm5, %v12430_v58  ;;  %v1359_v23 = vadd.f32 %v1351_v9, %v1341_v40  ;;  %v767_v50 = vmul.f32 %v10588_v45, %v10483_v12  ;;  %v10593_v40 = vld [vmem:[%s6684_s22 + $0x58] sm:$0xff]  ;;  %v12630_v9 = vld [vmem:[#allocation213_spill] sm:$0xff]  ;;  %vm12632_vm14 = vnez %v12631_v47 }
 0x373   : > { %6058 = vmatprep.subr.msk.mxu0 %vm6873_vm8, %v12430_v58  ;;  %6043 = vmatprep.mubr.msk.f32.mxu1 %vm12625_vm9, %v12624_v5  ;;  %v1327_v17 = vmul.f32 %v10593_v40, %v10492_v34  ;;  %v10603_v5 = vld [vmem:[%s6684_s22 + $0x90] sm:$0xff]  ;;  %vm12634_vm9 = vmmov %vm12539_vm6  ;;  %v12699_v47 = vld [vmem:[#allocation65_spill] sm:$0xff] }
 0x374   : > { %6059 = vmatpush3.msk.msra.mxu0 %vm6873_vm8, %v12430_v58  ;;  %6089 = vmatpush3.msk.msra.mxu1 %vm12619_vm12, %v12430_v58  ;;  %v1918_v10 = vmul.f32 %v10603_v5, %v10519_v38  ;;  %v10623_v28 = vadd.f32 %v1359_v23, %v799_v55 }
 0x375   : > { %5995 = vmatmul.mubr.msk.f32.gmra.mxu0 %vm12627_vm10, %v12626_v22  ;;  %6060 = vmatprep.subr.msk.mxu0 %vm11945_vm15, %v12430_v58  ;;  %v1917_v22 = vmul.f32 %v10583_v8, %v10519_v38  ;;  %vm12636_vm10 = vmmov %vm12539_vm6 }
 0x376   : > { %5997 = vmatprep.mubr.msk.f32.mxu0 %vm12629_vm13, %v12628_v30  ;;  %6061 = vmatpush3.msk.msra.mxu0 %vm11945_vm15, %v12430_v58  ;;  %v1452_v30 = vadd.f32 %v1324_v49, %v764_v51  ;;  %v1328_v51 = vmul.f32 %v10169_v61, %v10492_v34  ;;  %v12635_v49 = vld [vmem:[#allocation198_spill] sm:$0xff]  ;;  %vm12639_vm13 = vmmov %vm12539_vm6 }
 0x377   : > { %6044 = vmatmul.mubr.msk.f32.gmra.mxu1 %vm12539_vm6, %v12630_v9  ;;  %6062 = vmatprep.subr.msk.mxu0 %vm12523_vm11, %v12430_v58  ;;  %v1454_v9 = vadd.f32 %v1326_v15, %v766_v35  ;;  %v12638_v35 = vld [vmem:[#allocation193_spill] sm:$0xff]  ;;  %v1455_v15 = vadd.f32 %v1327_v17, %v767_v50  ;;  %v1329_v50 = vmul.f32 %v10189_v37, %v10492_v34  ;;  %v12642_v17 = vld [vmem:[#allocation42_spill] sm:$0xff] }
 0x378   : > { %6090 = vmatprep.subr.msk.mxu1 %vm12632_vm14, %v12430_v58  ;;  %6046 = vmatprep.mubr.msk.f32.mxu1 %vm12634_vm9, %v12633_v29  ;;  %v10626_v29 = vadd.f32 %v1943_v56, %v10475_v46  ;;  %v10645_v46 = vmul.f32 %v10641_v25, %v10519_v38  ;;  %v12640_v56 = vld [vmem:[#allocation203_spill] sm:$0xff]  ;;  %vm12641_vm9 = vnez %v12525_v27  ;;  %v2044_v55 = vadd.f32 %v1916_v39, %v1452_v30  ;;  %v10672_v30 = vld [vmem:[%s6684_s22 + $0xa8] sm:$0xff]  ;;  %v12655_v27 = vld [vmem:[#allocation40_spill] sm:$0xff] }
 0x379   : > { %5998 = vmatmul.mubr.msk.f32.gmra.mxu0 %vm12636_vm10, %v12635_v49  ;;  %6091 = vmatpush3.msk.msra.mxu1 %vm12632_vm14, %v12430_v58  ;;  %v10636_v49 = vld [vmem:[%s6684_s22 + $0x98] sm:$0xff]  ;;  %vm12643_vm10 = vnez %v12642_v17  ;;  %v2046_v59 = vadd.f32 %v1918_v10, %v1454_v9  ;;  %v1456_v57 = vadd.f32 %v1328_v51, %v768_v52  ;;  %12647 = vst [vmem:[#allocation228_spill] sm:$0xff] %v10672_v30  ;;  %v10683_v10 = vstv %s10575_s5  ;;  %v10691_v9 = vld [vmem:[%s6684_s22 + $0x30] sm:$0xff] }
 0x37a   : > { %6000 = vmatprep.mubr.msk.f32.mxu0 %vm12639_vm13, %v12638_v35  ;;  %6063 = vmatpush3.msk.msra.mxu0 %vm12523_vm11, %v12430_v58  ;;  %v1919_v23 = vmul.f32 %v10636_v49, %v10519_v38  ;;  %v12644_v35 = vld [vmem:[#allocation97_spill] sm:$0xff]  ;;  %vm12645_vm13 = vmmov %vm12539_vm6  ;;  %v12646_v39 = vld [vmem:[#allocation67_spill] sm:$0xff]  ;;  %v1921_v42 = vmul.f32 %v10672_v30, %v10519_v38  ;;  %12650 = vst [vmem:[#allocation235_spill] sm:$0xff] %v10691_v9 }
 0x37b   : > { %6047 = vmatmul.mubr.msk.f32.gmra.mxu1 %vm12539_vm6, %v12640_v56  ;;  %6064 = vmatprep.subr.msk.mxu0 %vm12641_vm9, %v12430_v58  ;;  %v2045_v56 = vadd.f32 %v1917_v22, %v1453_v21  ;;  %v10680_v21 = vstv %s10563_s10  ;;  %v12648_v52 = vld [vmem:[#allocation195_spill] sm:$0xff]  ;;  %v770_v51 = vmul.f32 %v10691_v9, %v10483_v12  ;;  %v802_v30 = vmul.f32 %v10664_v24, %v12655_v27  ;;  %v12663_v9 = vld [vmem:[#allocation49_spill] sm:$0xff] }
 0x37c   : > { %6092 = vmatprep.subr.msk.mxu1 %vm12643_vm10, %v12430_v58  ;;  %6049 = vmatprep.mubr.msk.f32.mxu1 %vm12645_vm13, %v12644_v35  ;;  %vm12649_vm13 = vmmov %vm12539_vm6  ;;  %v2047_v22 = vadd.f32 %v1919_v23, %v1455_v15  ;;  %v1457_v15 = vadd.f32 %v1329_v50, %v769_v14  ;;  %v1922_v23 = vmul.f32 %v12614_v2, %v10519_v38  ;;  %v12656_v17 = vld [vmem:[#allocation43_spill] sm:$0xff]  ;;  %v12659_v50 = vld [vmem:[#allocation201_spill] sm:$0xff] }
 0x37d   : > { %6001 = vmatmul.mubr.msk.f32.gmra.mxu0 %vm12539_vm6, %v12646_v39  ;;  %6093 = vmatpush3.msk.msra.mxu1 %vm12643_vm10, %v12430_v58  ;;  %v10696_v39 = vld [vmem:[%s6684_s22 + $0x70] sm:$0xff]  ;;  %v1362_v14 = vmul.f32 %v10680_v21, %v12658_v36  ;;  %v1372_v2 = vmul.f32 %v10529_v54, %v10683_v10  ;;  %v10727_v27 = vld [vmem:[%s6684_s22 + $0x38] sm:$0xff]  ;;  %v1375_v53 = vmul.f32 %v10593_v40, %v10683_v10 }
 0x37e   : > { %6003 = vmatprep.mubr.msk.f32.mxu0 %vm12649_vm13, %v12648_v52  ;;  %6065 = vmatpush3.msk.msra.mxu0 %vm12641_vm9, %v12430_v58  ;;  %12651 = vst [vmem:[#allocation237_spill] sm:$0xff] %v10696_v39  ;;  %v1330_v35 = vmul.f32 %v10696_v39, %v10492_v34  ;;  %v12653_v52 = vld [vmem:[#allocation46_spill] sm:$0xff]  ;;  %vm12657_vm9 = vnez %v12656_v17  ;;  %v10734_v39 = vstv %s10628_s11  ;;  %v12660_v36 = vld [vmem:[#allocation47_spill] sm:$0xff]  ;;  %v813_v17 = vmul.f32 %v10534_v1, %v10677_v62 }
 0x37f   : > { %6050 = vmatmul.mubr.msk.f32.gmra.mxu1 %vm12539_vm6, %v12652_v31  ;;  %vm12654_vm13 = vnez %v12653_v52  ;;  %6094 = vmatprep.subr.msk.mxu1 %vm12657_vm9, %v12430_v58  ;;  %v812_v31 = vmul.f32 %v10514_v41, %v10677_v62  ;;  %v771_v52 = vmul.f32 %v10727_v27, %v10483_v12  ;;  %v1331_v41 = vmul.f32 %v10502_v60, %v10492_v34  ;;  %v12687_v40 = vld [vmem:[#allocation83_spill] sm:$0xff] }
 0x380   : > { %6066 = vmatprep.subr.msk.mxu0 %vm12654_vm13, %v12430_v58  ;;  %6095 = vmatpush3.msk.msra.mxu1 %vm12657_vm9, %v12430_v58  ;;  %v803_v54 = vmul.f32 %v10664_v24, %v12660_v36  ;;  %v1363_v12 = vmul.f32 %v10680_v21, %v12663_v9  ;;  %v1373_v34 = vmul.f32 %v10539_v7, %v10683_v10  ;;  %vm12664_vm9 = vmmov %vm12539_vm6  ;;  %v12667_v9 = vld [vmem:[#allocation217_spill] sm:$0xff] }
 0x381   : > { %6067 = vmatpush3.msk.msra.mxu0 %vm12654_vm13, %v12430_v58  ;;  %vm12662_vm13 = vmmov %vm12539_vm6  ;;  %6096 = vmatprep.mubr.msk.f32.mxu1 %vm12539_vm6, %v2044_v55  ;;  %v1458_v36 = vadd.f32 %v1330_v35, %v770_v51  ;;  %v814_v60 = vmul.f32 %v10552_v32, %v10677_v62  ;;  %v820_v1 = vadd.f32 %v812_v31, %v802_v30  ;;  %v12669_v32 = vld [vmem:[#allocation52_spill] sm:$0xff]  ;;  %v12670_v30 = vld [vmem:[#allocation205_spill] sm:$0xff] }
 0x382   : > { %6004 = vmatmul.mubr.msk.f32.gmra.mxu0 %vm12539_vm6, %v12659_v50  ;;  %v10742_v50 = vstv %s10647_s28  ;;  %6136 = vmatprep.subr.msk.mxu1 %vm6766_vm0, %v12430_v58  ;;  %v1380_v7 = vadd.f32 %v1372_v2, %v1362_v14  ;;  %v2048_v51 = vadd.f32 %v10645_v46, %v1456_v57  ;;  %v821_v14 = vadd.f32 %v813_v17, %v803_v54  ;;  %v12675_v46 = vld [vmem:[#allocation207_spill] sm:$0xff] }
 0x383   : > { %6006 = vmatprep.mubr.msk.f32.mxu0 %vm12662_vm13, %v12661_v33  ;;  %6097 = vmatmul.mubr.msk.f32.vlgmr.msra.gmra.mxu1 %vm12664_vm9, %v2045_v56  ;;  %v12665_v33 = vld [vmem:[#allocation53_spill] sm:$0xff]  ;;  %v12666_v56 = vld [vmem:[#allocation50_spill] sm:$0xff]  ;;  %vm12668_vm9 = vmmov %vm12539_vm6  ;;  %v1964_v19 = vmul.f32 %v10571_v16, %v10742_v50  ;;  %v1965_v31 = vmul.f32 %v10583_v8, %v10742_v50  ;;  %v1381_v2 = vadd.f32 %v1373_v34, %v1363_v12 }
 0x384   : > { %v804_v55 = vmul.f32 %v10664_v24, %v12665_v33  ;;  %6137 = vmatpush3.msk.msra.mxu1 %vm6766_vm0, %v12430_v58  ;;  %6108 = vmatprep.subr.msk.mxu0 %vm6786_vm2, %v12430_v58  ;;  %v1954_v35 = vmul.f32 %v10734_v39, %v12666_v56  ;;  %v1955_v33 = vmul.f32 %v10734_v39, %v12669_v32  ;;  %vm12671_vm0 = vmmov %vm12539_vm6  ;;  %v10785_v56 = vld [vmem:[%s6684_s22 + $0xb8] sm:$0xff]  ;;  %v12673_v8 = vld [vmem:[#allocation54_spill] sm:$0xff] }
 0x385   : > { %6138 = vmatprep.subr.msk.mxu1 %vm6777_vm1, %v12430_v58  ;;  %vm12672_vm13 = vmmov %vm12671_vm0  ;;  %v2049_v16 = vadd.f32 %v1921_v42, %v1457_v15  ;;  %v1923_v32 = vmul.f32 %v10785_v56, %v10519_v38  ;;  %v2050_v3 = vadd.f32 %v1922_v23, %v1458_v36  ;;  %v1459_v57 = vadd.f32 %v1331_v41, %v771_v52  ;;  %v12679_v52 = vld [vmem:[#allocation57_spill] sm:$0xff]  ;;  %v12683_v36 = vld [vmem:[#allocation59_spill] sm:$0xff] }
 0x386   : > { %6007 = vmatmul.mubr.msk.f32.gmra.mxu0 %vm12668_vm9, %v12667_v9  ;;  %6099 = vmatprep.mubr.msk.f32.mxu1 %vm12672_vm13, %v2046_v59  ;;  %v1364_v9 = vmul.f32 %v10680_v21, %v12673_v8  ;;  %v1374_v59 = vmul.f32 %v10557_v20, %v10683_v10  ;;  %vm12674_vm6 = vmmov %vm12671_vm0  ;;  %v1468_v42 = vadd.f32 %v1380_v7, %v820_v1  ;;  %v12677_v20 = vld [vmem:[#allocation111_spill] sm:$0xff]  ;;  %v12684_v1 = vld [vmem:[#allocation94_spill] sm:$0xff] }
 0x387   : > { %6009 = vmatprep.mubr.msk.f32.mxu0 %vm12671_vm0, %v12670_v30  ;;  %6139 = vmatpush3.msk.msra.mxu1 %vm6777_vm1, %v12430_v58  ;;  %vm12676_vm1 = vmmov %vm12671_vm0  ;;  %v1972_v38 = vadd.f32 %v1964_v19, %v1954_v35  ;;  %v1973_v17 = vadd.f32 %v1965_v31, %v1955_v33  ;;  %v822_v15 = vadd.f32 %v814_v60, %v804_v55  ;;  %v12680_v60 = vld [vmem:[#allocation55_spill] sm:$0xff]  ;;  %v12686_v7 = vld [vmem:[#allocation60_spill] sm:$0xff] }
 0x388   : > { %6100 = vmatmul.mubr.msk.f32.gmra.mxu1 %vm12674_vm6, %v2047_v22  ;;  %6140 = vmatprep.subr.msk.mxu1 %vm6803_vm4, %v12430_v58  ;;  %vm12678_vm9 = vmmov %vm12671_vm0  ;;  %v1469_v22 = vadd.f32 %v1381_v2, %v821_v14  ;;  %v1956_v23 = vmul.f32 %v10734_v39, %v12679_v52  ;;  %v1966_v41 = vmul.f32 %v10603_v5, %v10742_v50  ;;  %v12682_v5 = vld [vmem:[#allocation56_spill] sm:$0xff] }
 0x389   : > { %6141 = vmatpush3.msk.msra.mxu1 %vm6803_vm4, %v12430_v58  ;;  %6102 = vmatprep.mubr.msk.f32.mxu1 %vm12671_vm0, %v2048_v51  ;;  %v1382_v48 = vadd.f32 %v1374_v59, %v1364_v9  ;;  %v805_v54 = vmul.f32 %v10664_v24, %v12680_v60  ;;  %v815_v12 = vmul.f32 %v10588_v45, %v10677_v62  ;;  %vm12681_vm4 = vmmov %vm12671_vm0  ;;  %v12691_v14 = vld [vmem:[#allocation268_spill] sm:$0xff]  ;;  %v12695_v59 = vld [vmem:[#allocation61_spill] sm:$0xff] }
 0x38a   : > { %6010 = vmatmul.mubr.msk.f32.gmra.mxu0 %vm12676_vm1, %v12675_v46  ;;  %6142 = vmatprep.subr.msk.mxu1 %vm12607_vm7, %v12430_v58  ;;  %v1365_v34 = vmul.f32 %v10680_v21, %v12682_v5  ;;  %v806_v55 = vmul.f32 %v10664_v24, %v12683_v36  ;;  %v816_v45 = vmul.f32 %v10164_v18, %v10677_v62  ;;  %vm12688_vm13 = vmmov %vm12671_vm0  ;;  %v12707_v5 = vld [vmem:[#allocation64_spill] sm:$0xff]  ;;  %v12709_v36 = vld [vmem:[#allocation66_spill] sm:$0xff] }
 0x38b   : > { %6068 = vmatprep.mubr.msk.f32.mxu0 %vm12678_vm9, %v12677_v20  ;;  %6143 = vmatpush3.msk.msra.mxu1 %vm12607_vm7, %v12430_v58  ;;  %vm12685_vm7 = vmmov %vm12671_vm0  ;;  %v1366_v35 = vmul.f32 %v10680_v21, %v12686_v7  ;;  %v1376_v9 = vmul.f32 %v10169_v61, %v10683_v10  ;;  %v2051_v19 = vadd.f32 %v1923_v32, %v1459_v57  ;;  %v12694_v32 = vld [vmem:[#allocation63_spill] sm:$0xff]  ;;  %v12701_v20 = vld [vmem:[#allocation249_spill] sm:$0xff] }
 0x38c   : > { %6103 = vmatmul.mubr.msk.f32.gmra.mxu1 %vm12681_vm4, %v2049_v16  ;;  %6144 = vmatprep.subr.msk.mxu1 %vm12619_vm12, %v12430_v58  ;;  %v2059_v44 = vadd.f32 %v10626_v29, %v10623_v28  ;;  %v10847_v33 = vadd.f32 %v1972_v38, %v1468_v42  ;;  %v1470_v18 = vadd.f32 %v1382_v48, %v822_v15  ;;  %v12690_v29 = vld [vmem:[#allocation58_spill] sm:$0xff]  ;;  %v12700_v15 = vld [vmem:[#allocation235_spill] sm:$0xff]  ;;  %vm12720_vm1 = vmmov %vm12671_vm0 }
 0x38d   : > { %6145 = vmatpush3.msk.msra.mxu1 %vm12619_vm12, %v12430_v58  ;;  %v1974_v61 = vadd.f32 %v1966_v41, %v1956_v23  ;;  %v823_v31 = vadd.f32 %v815_v12, %v805_v54  ;;  %v1383_v6 = vadd.f32 %v1375_v53, %v1365_v34  ;;  %v1957_v28 = vmul.f32 %v10734_v39, %v12690_v29  ;;  %vm12692_vm12 = vmmov %vm12671_vm0  ;;  %v12704_v23 = vld [vmem:[#allocation237_spill] sm:$0xff]  ;;  %v12708_v34 = vld [vmem:[#allocation228_spill] sm:$0xff] }
 0x38e   : > { %6069 = vmatmul.mubr.msk.f32.vlgmr.msra.gmra.mxu0 %vm12685_vm7, %v12684_v1  ;;  %6146 = vmatprep.subr.msk.mxu1 %vm12632_vm14, %v12430_v58  ;;  %v1967_v51 = vmul.f32 %v10636_v49, %v10742_v50  ;;  %v2061_v2 = vadd.f32 %v1973_v17, %v1469_v22  ;;  %v824_v16 = vadd.f32 %v816_v45, %v806_v55  ;;  %v12711_v45 = vld [vmem:[#allocation44_spill] sm:$0xff]  ;;  %vm12725_vm4 = vmmov %vm12671_vm0 }
 0x38f   : > { %6071 = vmatprep.mubr.msk.f32.mxu0 %vm12688_vm13, %v12687_v40  ;;  %6109 = vmatpush3.msk.msra.mxu0 %vm6786_vm2, %v12430_v58  ;;  %vm12689_vm2 = vmmov %vm12671_vm0  ;;  %v1384_v43 = vadd.f32 %v1376_v9, %v1366_v35  ;;  %v1958_v49 = vmul.f32 %v10734_v39, %v12694_v32  ;;  %v1968_v8 = vmul.f32 %v10641_v25, %v10742_v50  ;;  %v12713_v35 = vld [vmem:[#allocation70_spill] sm:$0xff] }
 0x390   : > { %6110 = vmatprep.subr.msk.mxu0 %vm6798_vm3, %v12430_v58  ;;  %6105 = vmatprep.mubr.msk.f32.mxu1 %vm12689_vm2, %v2050_v3  ;;  %v807_v3 = vmul.f32 %v10664_v24, %v12695_v59  ;;  %v1377_v25 = vmul.f32 %v10189_v37, %v10683_v10  ;;  %v2062_v42 = vadd.f32 %v1974_v61, %v1470_v18  ;;  %v12714_v40 = vld [vmem:[#allocation226_spill] sm:$0xff]  ;;  %v12715_v18 = vld [vmem:[#allocation43_spill] sm:$0xff]  ;;  %vm12726_vm7 = vmmov %vm12671_vm0 }
 0x391   : > { %6111 = vmatpush3.msk.msra.mxu0 %vm6798_vm3, %v12430_v58  ;;  %vm12693_vm3 = vmmov %vm12671_vm0  ;;  %6147 = vmatpush3.msk.msra.mxu1 %vm12632_vm14, %v12430_v58  ;;  %v1471_v38 = vadd.f32 %v1383_v6, %v823_v31  ;;  %v1975_v17 = vadd.f32 %v1967_v51, %v1957_v28  ;;  %v1472_v63 = vadd.f32 %v1384_v43, %v824_v16  ;;  %v12718_v31 = vld [vmem:[#allocation115_spill] sm:$0xff]  ;;  %v12724_v43 = vld [vmem:[#allocation129_spill] sm:$0xff] }
 0x392   : > { %6072 = vmatmul.mubr.msk.f32.gmra.mxu0 %vm12692_vm12, %v12691_v14  ;;  %6112 = vmatprep.subr.msk.mxu0 %vm6834_vm5, %v12430_v58  ;;  %vm12698_vm14 = vmmov %vm12671_vm0  ;;  %v808_v37 = vmul.f32 %v10664_v24, %v12699_v47  ;;  %v818_v4 = vmul.f32 %v12700_v15, %v10677_v62  ;;  %v1976_v22 = vadd.f32 %v1968_v8, %v1958_v49  ;;  %v12723_v14 = vld [vmem:[#allocation72_spill] sm:$0xff] }
 0x393   : > { %6074 = vmatprep.mubr.msk.f32.mxu0 %vm12693_vm3, %v10494_v0  ;;  %6113 = vmatpush3.msk.msra.mxu0 %vm6834_vm5, %v12430_v58  ;;  %v12696_v0 = vld [vmem:[#allocation62_spill] sm:$0xff]  ;;  %vm12697_vm5 = vmmov %vm12671_vm0  ;;  %v1378_v41 = vmul.f32 %v12704_v23, %v10683_v10  ;;  %v825_v54 = vadd.f32 %v817_v13, %v807_v3  ;;  %v1959_v11 = vmul.f32 %v10734_v39, %v12707_v5 }
 0x394   : > { %6114 = vmatprep.subr.msk.mxu0 %vm6873_vm8, %v12430_v58  ;;  %v1367_v57 = vmul.f32 %v10680_v21, %v12696_v0  ;;  %6106 = vmatmul.mubr.msk.f32.gmra.mxu1 %vm12697_vm5, %v2051_v19  ;;  %v1969_v53 = vmul.f32 %v12708_v34, %v10742_v50  ;;  %v809_v55 = vmul.f32 %v10664_v24, %v12709_v36  ;;  %v12717_v24 = vld [vmem:[#allocation71_spill] sm:$0xff]  ;;  %vm12728_vm13 = vmmov %vm12671_vm0 }
 0x395   : > { %6115 = vmatpush3.msk.msra.mxu0 %vm6873_vm8, %v12430_v58  ;;  %vm12702_vm8 = vmmov %vm12671_vm0  ;;  %6148 = vmatprep.subr.msk.mxu1 %vm12643_vm10, %v12430_v58  ;;  %v819_v1 = vmul.f32 %v10727_v27, %v10677_v62  ;;  %vm12712_vm6 = vnez %v12711_v45  ;;  %v826_v7 = vadd.f32 %v818_v4, %v808_v37  ;;  %v1369_v9 = vmul.f32 %v10680_v21, %v12713_v35  ;;  %v12736_v0 = vld [vmem:[#allocation139_spill] sm:$0xff] }
 0x396   : > { %6075 = vmatmul.mubr.msk.f32.gmra.mxu0 %vm12698_vm14, %v10561_v26  ;;  %6116 = vmatprep.subr.msk.mxu0 %vm11945_vm15, %v12430_v58  ;;  %v12703_v26 = vld [vmem:[#allocation69_spill] sm:$0xff]  ;;  %v1385_v12 = vadd.f32 %v1377_v25, %v1367_v57  ;;  %v1379_v19 = vmul.f32 %v12714_v40, %v10683_v10  ;;  %v1960_v27 = vmul.f32 %v10734_v39, %v12717_v24  ;;  %v12721_v10 = vld [vmem:[#allocation46_spill] sm:$0xff]  ;;  %vm12729_vm2 = vmmov %vm12671_vm0 }
 0x397   : > { %6077 = vmatprep.mubr.msk.f32.mxu0 %vm12702_vm8, %v12701_v20  ;;  %6117 = vmatpush3.msk.msra.mxu0 %vm11945_vm15, %v12430_v58  ;;  %v1368_v52 = vmul.f32 %v10680_v21, %v12703_v26  ;;  %vm12710_vm15 = vmmov %vm12671_vm0  ;;  %v2063_v21 = vadd.f32 %v1975_v17, %v1471_v38  ;;  %vm12722_vm9 = vnez %v12721_v10  ;;  %v1977_v29 = vadd.f32 %v1969_v53, %v1959_v11  ;;  %v12739_v57 = vld [vmem:[#allocation135_spill] sm:$0xff]  ;;  %v12746_v38 = vld [vmem:[#allocation188_spill] sm:$0xff] }
 0x398   : > { %6118 = vmatprep.subr.msk.mxu0 %vm12523_vm11, %v12430_v58  ;;  %6149 = vmatpush3.msk.msra.mxu1 %vm12643_vm10, %v12430_v58  ;;  %vm12719_vm10 = vmmov %vm12671_vm0  ;;  %v1473_v6 = vadd.f32 %v1385_v12, %v825_v54  ;;  %v827_v28 = vadd.f32 %v819_v1, %v809_v55  ;;  %v1387_v51 = vadd.f32 %v1379_v19, %v1369_v9  ;;  %v12742_v25 = vld [vmem:[#allocation147_spill] sm:$0xff] }
 0x399   : > { %6119 = vmatpush3.msk.msra.mxu0 %vm12523_vm11, %v12430_v58  ;;  %vm12716_vm11 = vnez %v12715_v18  ;;  %v1386_v62 = vadd.f32 %v1378_v41, %v1368_v52  ;;  %6152 = vmatprep.mubr.msk.f32.mxu1 %vm12720_vm1, %v10847_v33  ;;  %v1961_v16 = vmul.f32 %v10734_v39, %v12723_v14  ;;  %v1971_v33 = vmul.f32 %v10785_v56, %v10742_v50  ;;  %v12730_v39 = vld [vmem:[#allocation162_spill] sm:$0xff]  ;;  %vm12731_vm12 = vmmov %vm12671_vm0  ;;  %v12733_v56 = vld [vmem:[#allocation144_spill] sm:$0xff] }
 0x39a   : > { %6078 = vmatmul.mubr.msk.f32.gmra.mxu0 %vm12710_vm15, %v2059_v44  ;;  %6120 = vmatprep.subr.msk.mxu0 %vm12712_vm6, %v12430_v58  ;;  %v6387_v44 = vld [vmem:[%s6684_s22 + $0xb0] sm:$0xff]  ;;  %v2064_v32 = vadd.f32 %v1976_v22, %v1472_v63  ;;  %v1475_v59 = vadd.f32 %v1387_v51, %v827_v28  ;;  %vm12732_vm3 = vmmov %vm12671_vm0  ;;  %s5199_s22 = sld [smem:[#allocation7 + $0x1]] }
 0x39b   : > { %6150 = vmatprep.subr.msk.mxu1 %vm12716_vm11, %v12430_v58  ;;  %6121 = vmatpush3.msk.msra.mxu0 %vm12712_vm6, %v12430_v58  ;;  %v1970_v61 = vmul.f32 %v6387_v44, %v10742_v50  ;;  %v1474_v49 = vadd.f32 %v1386_v62, %v826_v7  ;;  %v1979_v3 = vadd.f32 %v1971_v33, %v1961_v16  ;;  %vm12734_vm5 = vmmov %vm12671_vm0 }
 0x39c   : > { %6124 = vmatprep.mubr.msk.f32.mxu0 %vm12719_vm10, %v12718_v31  ;;  %6151 = vmatpush3.msk.msra.mxu1 %vm12716_vm11, %v12430_v58  ;;  %vm12735_vm14 = vmmov %vm12671_vm0 }
 0x39d   : > { %6122 = vmatprep.subr.msk.mxu0 %vm12722_vm9, %v12430_v58  ;;  %6153 = vmatmul.mubr.msk.f32.vlgmr.msra.gmra.mxu1 %vm12671_vm0, %v2061_v2  ;;  %v1978_v8 = vadd.f32 %v1970_v61, %v1960_v27  ;;  %v12727_v2 = vld [vmem:[#allocation149_spill] sm:$0xff]  ;;  %v2067_v13 = vadd.f32 %v1979_v3, %v1475_v59  ;;  %vm12737_vm8 = vmmov %vm12671_vm0 }
 0x39e   : > { %6123 = vmatpush3.msk.msra.mxu0 %vm12722_vm9, %v12430_v58  ;;  %6155 = vmatprep.mubr.msk.f32.mxu1 %vm12726_vm7, %v2062_v42  ;;  %v2065_v58 = vadd.f32 %v1977_v29, %v1473_v6  ;;  %vm12738_vm15 = vmmov %vm12671_vm0  ;;  %v12744_v42 = vld [vmem:[#allocation177_spill] sm:$0xff] }
 0x39f   : > { %6125 = vmatmul.mubr.msk.f32.vlgmr.msra.gmra.mxu0 %vm12725_vm4, %v12724_v43  ;;  %v2066_v50 = vadd.f32 %v1978_v8, %v1474_v49  ;;  %vm12740_vm6 = vmmov %vm12671_vm0 }
 0x3a0   : > { %6127 = vmatprep.mubr.msk.f32.mxu0 %vm12728_vm13, %v12727_v2  ;;  %vm12741_vm11 = vmmov %vm12671_vm0  ;;  %v10993_v52 = vstv %s5199_s22 }
 0x3a1   : > { %6156 = vmatmul.mubr.msk.f32.gmra.mxu1 %vm12729_vm2, %v2063_v21  ;;  %vm12743_vm10 = vmmov %vm12671_vm0 }
 0x3a2   : > { %6158 = vmatprep.mubr.msk.f32.mxu1 %vm12732_vm3, %v2064_v32  ;;  %vm12745_vm1 = vmmov %vm12671_vm0 }
 0x3a3   : > { %6128 = vmatmul.mubr.msk.f32.gmra.mxu0 %vm12731_vm12, %v12730_v39  ;;  %vm12747_vm9 = vmmov %vm12671_vm0 }
 0x3a4   : > { %6130 = vmatprep.mubr.msk.f32.mxu0 %vm12734_vm5, %v12733_v56  ;;  %vm12750_vm4 = vmmov %vm12671_vm0 }
 0x3a5   : > { %6159 = vmatmul.mubr.msk.f32.gmra.mxu1 %vm12735_vm14, %v2065_v58  ;;  %vm12752_vm7 = vmmov %vm12671_vm0 }
 0x3a6   : > { %6161 = vmatprep.mubr.msk.f32.mxu1 %vm12738_vm15, %v2066_v50  ;;  %vm12754_vm13 = vmmov %vm12671_vm0 }
 0x3a7   : > { %6131 = vmatmul.mubr.msk.f32.gmra.mxu0 %vm12737_vm8, %v12736_v0  ;;  %vm12756_vm2 = vmmov %vm12671_vm0 }
 0x3a8   : > { %6133 = vmatprep.mubr.msk.f32.mxu0 %vm12740_vm6, %v12739_v57  ;;  %vm12758_vm12 = vmmov %vm12671_vm0 }
 0x3a9   : > { %6162 = vmatmul.mubr.msk.f32.gmra.mxu1 %vm12741_vm11, %v2067_v13  ;;  %vm12760_vm3 = vmmov %vm12671_vm0 }
 0x3aa   : > { %6220 = vmatprep.mubr.msk.f32.mxu1 %vm12745_vm1, %v12744_v42  ;;  %vm12762_vm5 = vmmov %vm12671_vm0 }
 0x3ab   : > { %6134 = vmatmul.mubr.msk.f32.gmra.mxu0 %vm12743_vm10, %v12742_v25  ;;  %vm12764_vm14 = vmmov %vm12671_vm0 }
 0x3ac   : > { %6180 = vmatprep.mubr.msk.f32.mxu0 %vm12747_vm9, %v12746_v38  ;;  %vm12766_vm8 = vmmov %vm12671_vm0 }
 0x3ad   : > { %vm12768_vm15 = vmmov %vm12671_vm0 }
 0x3ae   : > { %vm12770_vm6 = vmmov %vm12671_vm0 }
 0x3af   : > { %vm12772_vm11 = vmmov %vm12671_vm0 }
 0x3b0   : > { %vm12774_vm10 = vmmov %vm12671_vm0 }
 0x3b1   : > { %vm12776_vm1 = vmmov %vm12671_vm0 }
 0x3b2   : > { %vm12778_vm9 = vmmov %vm12671_vm0 }
 0x41d   : > { %v6030_v17 = vpop.f32.mrf.mxu1 }
 0x41f   : > { %v3756_v63 = vpop.f32.mrf.mxu1 }
 0x421   : > { %v6033_v47 = vpop.f32.mrf.mxu1 }
 0x423   : > { %v3766_v37 = vpop.f32.mrf.mxu1 }
 0x425   : > { %v6036_v15 = vpop.f32.mrf.mxu1 }
 0x427   : > { %v3776_v4 = vpop.f32.mrf.mxu1 }
 0x429   : > { %v6039_v20 = vpop.f32.mrf.mxu1 }
 0x42b   : > { %v3786_v22 = vpop.f32.mrf.mxu1 }
 0x42d   : > { %v5990_v26 = vpop.f32.mrf.mxu0 }
 0x42e   : > { %v3762_v23 = vadd.f32 %v6030_v17, %v5990_v26 }
 0x42f   : > { %v3611_v41 = vpop.f32.mrf.mxu0  ;;  %v6042_v48 = vpop.f32.mrf.mxu1 }
 0x430   : > { %v3838_v60 = vadd.f32 %v10993_v52, %v3762_v23  ;;  %v3757_v54 = vadd.f32 %v3756_v63, %v3611_v41 }
 0x431   : > { %v5993_v12 = vpop.f32.mrf.mxu0  ;;  %v3796_v36 = vpop.f32.mrf.mxu1 }
 0x432   : > { %v3854_v5 = vmax.f32 %v3838_v60, 0.0  ;;  %v3837_v11 = vadd.f32 %v10993_v52, %v3757_v54  ;;  %v3772_v34 = vadd.f32 %v6033_v47, %v5993_v12 }
 0x433   : > { %v3621_v53 = vpop.f32.mrf.mxu0 }
 0x434   : > { %5201 = vst [vmem:[%s10317_s21 + $0x88] sm:$0xff] %v3854_v5  ;;  %v3853_v55 = vmax.f32 %v3837_v11, 0.0  ;;  %v3840_v1 = vadd.f32 %v10993_v52, %v3772_v34  ;;  %v3767_v45 = vadd.f32 %v3766_v37, %v3621_v53 }
 0x435   : > { %v5996_v7 = vpop.f32.mrf.mxu0 }
 0x436   : > { %5200 = vst [vmem:[%s10317_s21 + $0x80] sm:$0xff] %v3853_v55  ;;  %v3856_v35 = vmax.f32 %v3840_v1, 0.0  ;;  %v3839_v9 = vadd.f32 %v10993_v52, %v3767_v45  ;;  %v3782_v40 = vadd.f32 %v6036_v15, %v5996_v7 }
 0x437   : > { %v3631_v19 = vpop.f32.mrf.mxu0  ;;  %v6045_v18 = vpop.f32.mrf.mxu1 }
 0x438   : > { %5203 = vst [vmem:[%s10317_s21 + $0x98] sm:$0xff] %v3856_v35  ;;  %v3855_v62 = vmax.f32 %v3839_v9, 0.0  ;;  %v3842_v24 = vadd.f32 %v10993_v52, %v3782_v40  ;;  %v3777_v27 = vadd.f32 %v3776_v4, %v3631_v19 }
 0x439   : > { %v5999_v44 = vpop.f32.mrf.mxu0  ;;  %v3806_v61 = vpop.f32.mrf.mxu1 }
 0x43a   : > { %5202 = vst [vmem:[%s10317_s21 + $0x90] sm:$0xff] %v3855_v62  ;;  %v3858_v31 = vmax.f32 %v3842_v24, 0.0  ;;  %v3841_v21 = vadd.f32 %v10993_v52, %v3777_v27  ;;  %v3792_v10 = vadd.f32 %v6039_v20, %v5999_v44 }
 0x43b   : > { %v3641_v6 = vpop.f32.mrf.mxu0  ;;  %v6048_v29 = vpop.f32.mrf.mxu1 }
 0x43c   : > { %5205 = vst [vmem:[%s10317_s21 + $0xa8] sm:$0xff] %v3858_v31  ;;  %v3857_v28 = vmax.f32 %v3841_v21, 0.0  ;;  %v3844_v51 = vadd.f32 %v10993_v52, %v3792_v10  ;;  %v3787_v14 = vadd.f32 %v3786_v22, %v3641_v6 }
 0x43d   : > { %v6002_v16 = vpop.f32.mrf.mxu0  ;;  %v3816_v33 = vpop.f32.mrf.mxu1 }
 0x43e   : > { %5204 = vst [vmem:[%s10317_s21 + $0xa0] sm:$0xff] %v3857_v28  ;;  %v3860_v43 = vmax.f32 %v3844_v51, 0.0  ;;  %v3843_v32 = vadd.f32 %v10993_v52, %v3787_v14  ;;  %v3802_v49 = vadd.f32 %v6042_v48, %v6002_v16 }
 0x43f   : > { %v3651_v8 = vpop.f32.mrf.mxu0  ;;  %v6051_v2 = vpop.f32.mrf.mxu1 }
 0x440   : > { %5207 = vst [vmem:[%s10317_s21 + $0xb8] sm:$0xff] %v3860_v43  ;;  %v3859_v58 = vmax.f32 %v3843_v32, 0.0  ;;  %v3846_v59 = vadd.f32 %v10993_v52, %v3802_v49  ;;  %v3797_v3 = vadd.f32 %v3796_v36, %v3651_v8 }
 0x441   : > { %v3826_v50 = vpop.f32.mrf.mxu1 }
 0x442   : > { %v6005_v39 = vpop.f32.mrf.mxu0  ;;  %5206 = vst [vmem:[%s10317_s21 + $0xb0] sm:$0xff] %v3859_v58  ;;  %v3862_v56 = vmax.f32 %v3846_v59, 0.0  ;;  %v3845_v13 = vadd.f32 %v10993_v52, %v3797_v3 }
 0x443   : > { %v3812_v0 = vadd.f32 %v6045_v18, %v6005_v39  ;;  %v11013_v25 = vpop.f32.mrf.mxu1 }
 0x444   : > { %v3661_v57 = vpop.f32.mrf.mxu0  ;;  %5209 = vst [vmem:[%s10317_s21 + $0xc8] sm:$0xff] %v3862_v56  ;;  %v3861_v42 = vmax.f32 %v3845_v13, 0.0 }
 0x445   : > { %v3848_v38 = vadd.f32 %v10993_v52, %v3812_v0  ;;  %v3807_v17 = vadd.f32 %v3806_v61, %v3661_v57  ;;  %v11017_v47 = vpop.f32.mrf.mxu1 }
 0x446   : > { %v6008_v63 = vpop.f32.mrf.mxu0  ;;  %5208 = vst [vmem:[%s10317_s21 + $0xc0] sm:$0xff] %v3861_v42 }
 0x447   : > { %v3864_v37 = vmax.f32 %v3848_v38, 0.0  ;;  %v3847_v15 = vadd.f32 %v10993_v52, %v3807_v17  ;;  %v3822_v4 = vadd.f32 %v6048_v29, %v6008_v63  ;;  %v12748_v38 = vld [vmem:[#allocation212_spill] sm:$0xff]  ;;  %v12749_v17 = vld [vmem:[#allocation214_spill] sm:$0xff] }
 0x448   : > { %v3671_v20 = vpop.f32.mrf.mxu0  ;;  %v6101_v41 = vpop.f32.mrf.mxu1 }
 0x449   : > { %5211 = vst [vmem:[%s10317_s21 + $0xd8] sm:$0xff] %v3864_v37  ;;  %v3863_v22 = vmax.f32 %v3847_v15, 0.0  ;;  %v3850_v26 = vadd.f32 %v10993_v52, %v3822_v4  ;;  %v3817_v23 = vadd.f32 %v3816_v33, %v3671_v20  ;;  %v12753_v15 = vld [vmem:[#allocation227_spill] sm:$0xff]  ;;  %v12755_v20 = vld [vmem:[#allocation233_spill] sm:$0xff] }
 0x44a   : > { %v6011_v48 = vpop.f32.mrf.mxu0  ;;  %v4115_v5 = vpop.f32.mrf.mxu1 }
 0x44b   : > { %5210 = vst [vmem:[%s10317_s21 + $0xd0] sm:$0xff] %v3863_v22  ;;  %v3866_v60 = vmax.f32 %v3850_v26, 0.0  ;;  %v3849_v54 = vadd.f32 %v10993_v52, %v3817_v23  ;;  %v3832_v12 = vadd.f32 %v6051_v2, %v6011_v48  ;;  %v12757_v26 = vld [vmem:[#allocation218_spill] sm:$0xff] }
 0x44c   : > { %v3681_v11 = vpop.f32.mrf.mxu0  ;;  %v6104_v1 = vpop.f32.mrf.mxu1 }
 0x44d   : > { %5213 = vst [vmem:[%s10317_s21 + $0xe8] sm:$0xff] %v3866_v60  ;;  %v3865_v34 = vmax.f32 %v3849_v54, 0.0  ;;  %v3852_v53 = vadd.f32 %v10993_v52, %v3832_v12  ;;  %v3827_v36 = vadd.f32 %v3826_v50, %v3681_v11  ;;  %v12761_v60 = vld [vmem:[#allocation183_spill] sm:$0xff]  ;;  %v12765_v12 = vld [vmem:[#allocation153_spill] sm:$0xff] }
 0x44e   : > { %v6070_v55 = vpop.f32.mrf.mxu0  ;;  %v4125_v19 = vpop.f32.mrf.mxu1  ;;  %v12763_v54 = vld [vmem:[#allocation187_spill] sm:$0xff] }
 0x44f   : > { %5212 = vst [vmem:[%s10317_s21 + $0xe0] sm:$0xff] %v3865_v34  ;;  %v3868_v45 = vmax.f32 %v3852_v53, 0.0  ;;  %v3851_v7 = vadd.f32 %v10993_v52, %v3827_v36  ;;  %v4111_v58 = vadd.f32 %v11013_v25, %v6070_v55  ;;  %v12769_v11 = vld [vmem:[#allocation155_spill] sm:$0xff]  ;;  %v12771_v34 = vld [vmem:[#allocation213_spill] sm:$0xff]  ;;  %v12773_v53 = vld [vmem:[#allocation164_spill] sm:$0xff] }
 0x450   : > { %v3976_v35 = vpop.f32.mrf.mxu0  ;;  %v12775_v36 = vld [vmem:[#allocation136_spill] sm:$0xff] }
 0x451   : > { %5215 = vst [vmem:[%s10317_s21 + $0xf8] sm:$0xff] %v3868_v45  ;;  %v3867_v9 = vmax.f32 %v3851_v7, 0.0  ;;  %v4106_v39 = vadd.f32 %v11017_v47, %v3976_v35  ;;  %v12751_v47 = vld [vmem:[#allocation225_spill] sm:$0xff]  ;;  %v12777_v55 = vld [vmem:[#allocation172_spill] sm:$0xff]  ;;  %v12784_v35 = vld [vmem:[#allocation190_spill] sm:$0xff] }
 0x452   : > { %v6073_v40 = vpop.f32.mrf.mxu0  ;;  %v12780_v45 = vld [vmem:[#allocation204_spill] sm:$0xff]  ;;  %v12782_v7 = vld [vmem:[#allocation97_spill] sm:$0xff] }
 0x453   : > { %5214 = vst [vmem:[%s10317_s21 + $0xf0] sm:$0xff] %v3867_v9  ;;  %v4121_v33 = vadd.f32 %v6101_v41, %v6073_v40  ;;  %v12759_v41 = vld [vmem:[#allocation176_spill] sm:$0xff]  ;;  %v12786_v9 = vld [vmem:[#allocation102_spill] sm:$0xff] }
 0x454   : > { %v3986_v18 = vpop.f32.mrf.mxu0  ;;  %v6107_v24 = vpop.f32.mrf.mxu1  ;;  %v12788_v40 = vld [vmem:[#allocation198_spill] sm:$0xff] }
 0x455   : > { %v4116_v49 = vadd.f32 %v4115_v5, %v3986_v18  ;;  %v12767_v5 = vld [vmem:[#allocation211_spill] sm:$0xff] }
 0x456   : > { %v6076_v62 = vpop.f32.mrf.mxu0  ;;  %v4135_v61 = vpop.f32.mrf.mxu1  ;;  %v12792_v18 = vld [vmem:[#allocation67_spill] sm:$0xff] }
 0x457   : > { %v4131_v29 = vadd.f32 %v6104_v1, %v6076_v62  ;;  %v12779_v1 = vld [vmem:[#allocation203_spill] sm:$0xff] }
 0x458   : > { %v3996_v27 = vpop.f32.mrf.mxu0  ;;  %v12794_v62 = vld [vmem:[#allocation195_spill] sm:$0xff] }
 0x459   : > { %v4126_v51 = vadd.f32 %v4125_v19, %v3996_v27  ;;  %v12790_v19 = vld [vmem:[#allocation193_spill] sm:$0xff]  ;;  %v12798_v27 = vld [vmem:[#allocation215_spill] sm:$0xff] }
 0x45a   : > { %v6079_v44 = vpop.f32.mrf.mxu0 }
 0x45b   : > { %v4141_v31 = vadd.f32 %v6107_v24, %v6079_v44  ;;  %v12796_v24 = vld [vmem:[#allocation201_spill] sm:$0xff] }
 0x45c   : > { %v4006_v21 = vpop.f32.mrf.mxu0  ;;  %v12800_v44 = vld [vmem:[#allocation217_spill] sm:$0xff] }
 0x45d   : > { %v4136_v10 = vadd.f32 %v4135_v61, %v4006_v21  ;;  %6204 = vmatprep.subr.mxu1 %v4141_v31  ;;  %v6154_v6 = vpop.f32.mrf.mxu1 }
 0x45e   : > { %6205 = vmatpush3.msra.mxu1 %v4141_v31 }
 0x45f   : > { %v6126_v52 = vpop.f32.mrf.mxu0  ;;  %6206 = vmatprep.subr.mxu1 %v4136_v10  ;;  %v4363_v28 = vpop.f32.mrf.mxu1 }
 0x460   : > { %6207 = vmatpush3.msra.mxu1 %v4136_v10  ;;  %v4369_v23 = vadd.f32 %v6154_v6, %v6126_v52 }
 0x461   : > { %v4234_v14 = vpop.f32.mrf.mxu0  ;;  %6208 = vmatprep.subr.mxu1 %v4131_v29  ;;  %v6157_v16 = vpop.f32.mrf.mxu1 }
 0x462   : > { %6209 = vmatpush3.msra.mxu1 %v4131_v29  ;;  %v4364_v48 = vadd.f32 %v4363_v28, %v4234_v14  ;;  %v11093_v14 = vstv %s5312_s1 }
 0x463   : > { %v6129_v43 = vpop.f32.mrf.mxu0  ;;  %6210 = vmatprep.subr.mxu1 %v4126_v51  ;;  %v4373_v32 = vpop.f32.mrf.mxu1 }
 0x464   : > { %6211 = vmatpush3.msra.mxu1 %v4126_v51  ;;  %v4379_v4 = vadd.f32 %v6157_v16, %v6129_v43 }
 0x465   : > { %v4244_v8 = vpop.f32.mrf.mxu0  ;;  %6212 = vmatprep.subr.mxu1 %v4121_v33  ;;  %v6160_v2 = vpop.f32.mrf.mxu1 }
 0x466   : > { %6213 = vmatpush3.msra.mxu1 %v4121_v33  ;;  %v4374_v22 = vadd.f32 %v4373_v32, %v4244_v8 }
 0x467   : > { %v6132_v59 = vpop.f32.mrf.mxu0  ;;  %6214 = vmatprep.subr.mxu1 %v4116_v49  ;;  %v4383_v3 = vpop.f32.mrf.mxu1 }
 0x468   : > { %6215 = vmatpush3.msra.mxu1 %v4116_v49  ;;  %v4389_v63 = vadd.f32 %v6160_v2, %v6132_v59 }
 0x469   : > { %v4254_v50 = vpop.f32.mrf.mxu0  ;;  %6216 = vmatprep.subr.mxu1 %v4111_v58  ;;  %v6163_v56 = vpop.f32.mrf.mxu1 }
 0x46a   : > { %6217 = vmatpush3.msra.mxu1 %v4111_v58  ;;  %v4384_v37 = vadd.f32 %v4383_v3, %v4254_v50 }
 0x46b   : > { %v6135_v13 = vpop.f32.mrf.mxu0  ;;  %6218 = vmatprep.subr.mxu1 %v4106_v39  ;;  %v4393_v57 = vpop.f32.mrf.mxu1 }
 0x46c   : > { %v4399_v0 = vadd.f32 %v6163_v56, %v6135_v13  ;;  %6219 = vmatpush3.msra.mxu1 %v4106_v39 }
 0x46d   : > { %v4264_v42 = vpop.f32.mrf.mxu0  ;;  %6221 = vmatmul.mubr.msk.f32.vlgmr.msra.gmra.mxu1 %vm12671_vm0, %v12748_v38 }
 0x46e   : > { %v4394_v25 = vadd.f32 %v4393_v57, %v4264_v42  ;;  %6164 = vmatprep.subr.mxu0 %v4399_v0  ;;  %6223 = vmatprep.mubr.msk.f32.mxu1 %vm12750_vm4, %v12749_v17  ;;  %vm12781_vm4 = vmmov %vm12671_vm0 }
 0x46f   : > { %6165 = vmatpush3.msra.mxu0 %v4399_v0 }
 0x470   : > { %6166 = vmatprep.subr.mxu0 %v4394_v25 }
 0x471   : > { %6167 = vmatpush3.msra.mxu0 %v4394_v25  ;;  %6224 = vmatmul.mubr.msk.f32.gmra.mxu1 %vm12752_vm7, %v12751_v47  ;;  %vm12783_vm7 = vmmov %vm12671_vm0 }
 0x472   : > { %6168 = vmatprep.subr.mxu0 %v4389_v63  ;;  %6226 = vmatprep.mubr.msk.f32.mxu1 %vm12754_vm13, %v12753_v15  ;;  %vm12785_vm13 = vmmov %vm12671_vm0 }
 0x473   : > { %6169 = vmatpush3.msra.mxu0 %v4389_v63 }
 0x474   : > { %6170 = vmatprep.subr.mxu0 %v4384_v37 }
 0x475   : > { %6171 = vmatpush3.msra.mxu0 %v4384_v37  ;;  %6227 = vmatmul.mubr.msk.f32.gmra.mxu1 %vm12756_vm2, %v12755_v20  ;;  %vm12787_vm2 = vmmov %vm12671_vm0 }
 0x476   : > { %6172 = vmatprep.subr.mxu0 %v4379_v4  ;;  %6229 = vmatprep.mubr.msk.f32.mxu1 %vm12758_vm12, %v12757_v26  ;;  %vm12789_vm12 = vmmov %vm12671_vm0 }
 0x477   : > { %6173 = vmatpush3.msra.mxu0 %v4379_v4 }
 0x478   : > { %6174 = vmatprep.subr.mxu0 %v4374_v22 }
 0x479   : > { %6175 = vmatpush3.msra.mxu0 %v4374_v22  ;;  %6230 = vmatmul.mubr.msk.f32.gmra.mxu1 %vm12760_vm3, %v12759_v41  ;;  %vm12791_vm3 = vmmov %vm12671_vm0 }
 0x47a   : > { %6176 = vmatprep.subr.mxu0 %v4369_v23  ;;  %6232 = vmatprep.mubr.msk.f32.mxu1 %vm12762_vm5, %v12761_v60  ;;  %vm12793_vm5 = vmmov %vm12671_vm0 }
 0x47b   : > { %6177 = vmatpush3.msra.mxu0 %v4369_v23 }
 0x47c   : > { %6178 = vmatprep.subr.mxu0 %v4364_v48 }
 0x47d   : > { %6179 = vmatpush3.msra.mxu0 %v4364_v48  ;;  %6233 = vmatmul.mubr.msk.f32.gmra.mxu1 %vm12764_vm14, %v12763_v54  ;;  %vm12795_vm14 = vmmov %vm12671_vm0 }
 0x47e   : > { %6181 = vmatmul.mubr.msk.f32.vlgmr.msra.gmra.mxu0 %vm12766_vm8, %v12765_v12  ;;  %6235 = vmatprep.mubr.msk.f32.mxu1 %vm12768_vm15, %v12767_v5  ;;  %vm12797_vm8 = vmmov %vm12671_vm0 }
 0x47f   : > { %6183 = vmatprep.mubr.msk.f32.mxu0 %vm12770_vm6, %v12769_v11  ;;  %vm12799_vm15 = vmmov %vm12671_vm0 }
 0x480   : > { %vm12801_vm6 = vmmov %vm12671_vm0 }
 0x481   : > { %6236 = vmatmul.mubr.msk.f32.gmra.mxu1 %vm12772_vm11, %v12771_v34  ;;  %vm12802_vm11 = vmmov %vm12671_vm0 }
 0x482   : > { %6184 = vmatmul.mubr.msk.f32.gmra.mxu0 %vm12774_vm10, %v12773_v53  ;;  %6238 = vmatprep.mubr.msk.f32.mxu1 %vm12776_vm1, %v12775_v36  ;;  %vm12803_vm10 = vmmov %vm12671_vm0 }
 0x483   : > { %6186 = vmatprep.mubr.msk.f32.mxu0 %vm12778_vm9, %v12777_v55 }
 0x485   : > { %6239 = vmatmul.mubr.msk.f32.gmra.mxu1 %vm12671_vm0, %v12779_v1 }
 0x486   : > { %6187 = vmatmul.mubr.msk.f32.gmra.mxu0 %vm12781_vm4, %v12780_v45  ;;  %6241 = vmatprep.mubr.msk.f32.mxu1 %vm12783_vm7, %v12782_v7 }
 0x487   : > { %6189 = vmatprep.mubr.msk.f32.mxu0 %vm12785_vm13, %v12784_v35 }
 0x489   : > { %6242 = vmatmul.mubr.msk.f32.gmra.mxu1 %vm12787_vm2, %v12786_v9 }
 0x48a   : > { %6190 = vmatmul.mubr.msk.f32.gmra.mxu0 %vm12789_vm12, %v12788_v40 }
 0x48b   : > { %6192 = vmatprep.mubr.msk.f32.mxu0 %vm12791_vm3, %v12790_v19 }
 0x48e   : > { %6193 = vmatmul.mubr.msk.f32.gmra.mxu0 %vm12793_vm5, %v12792_v18 }
 0x48f   : > { %6195 = vmatprep.mubr.msk.f32.mxu0 %vm12795_vm14, %v12794_v62 }
 0x492   : > { %6196 = vmatmul.mubr.msk.f32.gmra.mxu0 %vm12797_vm8, %v12796_v24 }
 0x493   : > { %6198 = vmatprep.mubr.msk.f32.mxu0 %vm12799_vm15, %v12798_v27 }
 0x496   : > { %6199 = vmatmul.mubr.msk.f32.gmra.mxu0 %vm12801_vm6, %v12800_v44 }
 0x497   : > { %6201 = vmatprep.mubr.msk.f32.mxu0 %vm12802_vm11, %v12670_v30 }
 0x49a   : > { %6202 = vmatmul.mubr.msk.f32.gmra.mxu0 %vm12803_vm10, %v12675_v46 }
 0x52d   : > { %v6222_v61 = vpop.f32.mrf.mxu1 }
 0x52f   : > { %v4613_v31 = vpop.f32.mrf.mxu1 }
 0x531   : > { %v6225_v21 = vpop.f32.mrf.mxu1 }
 0x533   : > { %v4623_v10 = vpop.f32.mrf.mxu1 }
 0x535   : > { %v6228_v6 = vpop.f32.mrf.mxu1 }
 0x537   : > { %v4633_v29 = vpop.f32.mrf.mxu1 }
 0x539   : > { %v6231_v52 = vpop.f32.mrf.mxu1 }
 0x53b   : > { %v4643_v28 = vpop.f32.mrf.mxu1 }
 0x53d   : > { %v6234_v30 = vpop.f32.mrf.mxu1 }
 0x53e   : > { %v6182_v51 = vpop.f32.mrf.mxu0 }
 0x53f   : > { %v4619_v16 = vadd.f32 %v6222_v61, %v6182_v51  ;;  %v4653_v59 = vpop.f32.mrf.mxu1 }
 0x540   : > { %v4468_v33 = vpop.f32.mrf.mxu0 }
 0x541   : > { %v4695_v43 = vadd.f32 %v11093_v14, %v4619_v16  ;;  %v4614_v46 = vadd.f32 %v4613_v31, %v4468_v33  ;;  %v6237_v38 = vpop.f32.mrf.mxu1 }
 0x542   : > { %v6185_v32 = vpop.f32.mrf.mxu0 }
 0x543   : > { %v4711_v49 = vmax.f32 %v4695_v43, 0.0  ;;  %v4694_v8 = vadd.f32 %v11093_v14, %v4614_v46  ;;  %v4629_v2 = vadd.f32 %v6225_v21, %v6185_v32  ;;  %v4663_v22 = vpop.f32.mrf.mxu1 }
 0x544   : > { %v4478_v58 = vpop.f32.mrf.mxu0 }
 0x545   : > { %5314 = vst [vmem:[%s10317_s21 + $0x108] sm:$0xff] %v4711_v49  ;;  %v4710_v3 = vmax.f32 %v4694_v8, 0.0  ;;  %v4697_v39 = vadd.f32 %v11093_v14, %v4629_v2  ;;  %v4624_v50 = vadd.f32 %v4623_v10, %v4478_v58  ;;  %v6240_v11 = vpop.f32.mrf.mxu1 }
 0x546   : > { %v6188_v56 = vpop.f32.mrf.mxu0 }
 0x547   : > { %5313 = vst [vmem:[%s10317_s21 + $0x100] sm:$0xff] %v4710_v3  ;;  %v4713_v13 = vmax.f32 %v4697_v39, 0.0  ;;  %v4696_v0 = vadd.f32 %v11093_v14, %v4624_v50  ;;  %v4639_v57 = vadd.f32 %v6228_v6, %v6188_v56  ;;  %v4673_v9 = vpop.f32.mrf.mxu1 }
 0x548   : > { %v4488_v42 = vpop.f32.mrf.mxu0 }
 0x549   : > { %5316 = vst [vmem:[%s10317_s21 + $0x118] sm:$0xff] %v4713_v13  ;;  %v4712_v25 = vmax.f32 %v4696_v0, 0.0  ;;  %v4699_v17 = vadd.f32 %v11093_v14, %v4639_v57  ;;  %v4634_v63 = vadd.f32 %v4633_v29, %v4488_v42  ;;  %v6243_v31 = vpop.f32.mrf.mxu1 }
 0x54a   : > { %v6191_v47 = vpop.f32.mrf.mxu0 }
 0x54b   : > { %5315 = vst [vmem:[%s10317_s21 + $0x110] sm:$0xff] %v4712_v25  ;;  %v4715_v37 = vmax.f32 %v4699_v17, 0.0  ;;  %v4698_v15 = vadd.f32 %v11093_v14, %v4634_v63  ;;  %v4649_v4 = vadd.f32 %v6231_v52, %v6191_v47  ;;  %v4683_v16 = vpop.f32.mrf.mxu1 }
 0x54c   : > { %v4498_v20 = vpop.f32.mrf.mxu0 }
 0x54d   : > { %5318 = vst [vmem:[%s10317_s21 + $0x128] sm:$0xff] %v4715_v37  ;;  %v4714_v26 = vmax.f32 %v4698_v15, 0.0  ;;  %v4701_v23 = vadd.f32 %v11093_v14, %v4649_v4  ;;  %v4644_v41 = vadd.f32 %v4643_v28, %v4498_v20 }
 0x54e   : > { %v6194_v48 = vpop.f32.mrf.mxu0 }
 0x54f   : > { %5317 = vst [vmem:[%s10317_s21 + $0x120] sm:$0xff] %v4714_v26  ;;  %v4717_v60 = vmax.f32 %v4701_v23, 0.0  ;;  %v4700_v54 = vadd.f32 %v11093_v14, %v4644_v41  ;;  %v4659_v12 = vadd.f32 %v6234_v30, %v6194_v48 }
 0x550   : > { %v4508_v5 = vpop.f32.mrf.mxu0 }
 0x551   : > { %5320 = vst [vmem:[%s10317_s21 + $0x138] sm:$0xff] %v4717_v60  ;;  %v4716_v34 = vmax.f32 %v4700_v54, 0.0  ;;  %v4703_v53 = vadd.f32 %v11093_v14, %v4659_v12  ;;  %v4654_v36 = vadd.f32 %v4653_v59, %v4508_v5 }
 0x552   : > { %v6197_v55 = vpop.f32.mrf.mxu0 }
 0x553   : > { %5319 = vst [vmem:[%s10317_s21 + $0x130] sm:$0xff] %v4716_v34  ;;  %v4719_v1 = vmax.f32 %v4703_v53, 0.0  ;;  %v4702_v45 = vadd.f32 %v11093_v14, %v4654_v36  ;;  %v4669_v7 = vadd.f32 %v6237_v38, %v6197_v55 }
 0x554   : > { %v4518_v35 = vpop.f32.mrf.mxu0 }
 0x555   : > { %5322 = vst [vmem:[%s10317_s21 + $0x148] sm:$0xff] %v4719_v1  ;;  %v4718_v40 = vmax.f32 %v4702_v45, 0.0  ;;  %v4705_v19 = vadd.f32 %v11093_v14, %v4669_v7  ;;  %v4664_v18 = vadd.f32 %v4663_v22, %v4518_v35 }
 0x556   : > { %v6200_v62 = vpop.f32.mrf.mxu0 }
 0x557   : > { %5321 = vst [vmem:[%s10317_s21 + $0x140] sm:$0xff] %v4718_v40  ;;  %v4721_v24 = vmax.f32 %v4705_v19, 0.0  ;;  %v4704_v27 = vadd.f32 %v11093_v14, %v4664_v18  ;;  %v4679_v44 = vadd.f32 %v6240_v11, %v6200_v62 }
 0x558   : > { %v4528_v61 = vpop.f32.mrf.mxu0 }
 0x559   : > { %5324 = vst [vmem:[%s10317_s21 + $0x158] sm:$0xff] %v4721_v24  ;;  %v4720_v21 = vmax.f32 %v4704_v27, 0.0  ;;  %v4707_v10 = vadd.f32 %v11093_v14, %v4679_v44  ;;  %v4674_v6 = vadd.f32 %v4673_v9, %v4528_v61 }
 0x55a   : > { %v6203_v29 = vpop.f32.mrf.mxu0 }
 0x55b   : > { %5323 = vst [vmem:[%s10317_s21 + $0x150] sm:$0xff] %v4720_v21  ;;  %v4723_v52 = vmax.f32 %v4707_v10, 0.0  ;;  %v4706_v28 = vadd.f32 %v11093_v14, %v4674_v6  ;;  %v4689_v51 = vadd.f32 %v6243_v31, %v6203_v29 }
 0x55c   : > { %v4538_v33 = vpop.f32.mrf.mxu0 }
 0x55d   : > { %5326 = vst [vmem:[%s10317_s21 + $0x168] sm:$0xff] %v4723_v52  ;;  %v4722_v30 = vmax.f32 %v4706_v28, 0.0  ;;  %v4709_v43 = vadd.f32 %v11093_v14, %v4689_v51  ;;  %v4684_v46 = vadd.f32 %v4683_v16, %v4538_v33 }
 0x55f   : > { %5325 = vst [vmem:[%s10317_s21 + $0x160] sm:$0xff] %v4722_v30  ;;  %v4725_v32 = vmax.f32 %v4709_v43, 0.0  ;;  %v4708_v49 = vadd.f32 %v11093_v14, %v4684_v46 }
 0x561   : > { %5328 = vst [vmem:[%s10317_s21 + $0x178] sm:$0xff] %v4725_v32  ;;  %v4724_v8 = vmax.f32 %v4708_v49, 0.0 }
 0x563   : > { %5327 = vst [vmem:[%s10317_s21 + $0x170] sm:$0xff] %v4724_v8 }
 0x564   : > { %6455 = shalt.err (!%p6452_p8)
}
 0x565   : > { %s6456_s29 = scalar_lea.hbm %s11130_s27, 6144  ;;  %s6460_s14 = scalar_lea.hbm %s11180_s3, 12288 }
 0x566   : > { %p6457_p7 = scmp.ne.s32.totalorder %s11130_s27, %s6456_s29  ;;  %p6461_p6 = scmp.lt.s32.totalorder %s11130_s27, %s11180_s3 }
 0x567   : > { %p6462_p11 = scmp.lt.s32.totalorder %s6460_s14, %s6456_s29 }
 0x568   : > { %p6458_p12 = pnand %p6457_p7, %p12804_p10 }
 0x569   : > { %p6463_p13 = por %p6462_p11, %p6461_p6 }
 0x56a   : > { %p6459_p9 = pneg %p6458_p12 }
 0x56c   : > { %p6464_p3 = pnand %p6463_p13, %p6459_p9 }
 0x56e   : > { %6467 = shalt.err (!%p6464_p3)
}
 0x56f   : > { %s6525_s25 = smov 128   ;;  %s6526_s0 = smov 8  }
 0x570   : > { %6259 = dma.vmem_to_hbm [thread:$0]  (%p12804_p10), %s11133_s19, 6144, %s11130_s27, %s4744_s16, %s6525_s25, %s6525_s25, %s6526_s0  }
 0x571 PF: > { %s12805_s7 = sld [smem:[#allocation19_spill]]  ;;  %s4772_s8 = sand.u32 1, %s6502_s12  }
 0x572   : > { %s12806_s9 = sld [smem:[#allocation16_spill]]  ;;  %s4773_s10 = scalar_lea.sflag [#allocation4], %s4772_s8 }
 0x577   : > { %p12807_p2 = scmp.ne.s32.totalorder %s12805_s7, 0 }
 0x578   : > { %p12808_p0 = scmp.ge.s32.totalorder %s12806_s9, 2 }
 0x57a   : > { %p6273_p4 = pnand %p12808_p0, %p12807_p2 }
 0x57c   : > { %p6274_p5 = pneg %p6273_p4 }
 0x57e   : > { %6497 = dma.done.wait (%p6274_p5), %s4773_s10, 6144  }
 0x57f   : > { %6499 = vsyncadd (%p6274_p5), %s4773_s10, 4294961152  ;;  %s12809_s15 = sld [smem:[#allocation17_spill]] }
 0x580   : > { %s12810_s12 = sld [smem:[#allocation14_spill]] }
 0x581   : > { %s12811_s13 = sld [smem:[#allocation15_spill]] }
 0x582   : > { %s12812_s14 = sld [smem:[#allocation18_spill]] }
 0x585   : > { %p18_p1 = scmp.ge.s32.totalorder %s12809_s15, 4  }
 0x587   :  { %20 = sbr.rel (!%p18_p1) target bundleno = 11 (0xb), region = 91 }
 0x58c   :  { %4778 = vsyncpa [#allocation3], 1 }
 0x58d   :  { %4780 = vsyncpa [#allocation3 + $0x1], 1 }
 0x58e   :  { %4781 = vsyncpa [#allocation4], 1 }
 0x58f   :  { %4783 = vsyncpa [#allocation4 + $0x1], 1 }
 0x590   :  { %4784 = vsyncpa [#allocation5], 1 }
 0x591   :  { %4786 = vsyncpa [#allocation5 + $0x1], 1 }
 0x592   :  { %4787 = vsyncpa [#allocation6], 1 }
 0x593   :  { %4789 = vsyncpa [#allocation6 + $0x1], 1 }

</bundles_post_ra>
